<compile_context>
chip_gen: v5e
topology: v5e:2x2
jax: 0.10.0
libtpu: 0.0.40
codegen_flags: <defaults>
</compile_context>

<pallas_src>
import math

import jax
import jax.numpy as jnp
from jax.experimental import pallas as pl
from jax.experimental.pallas import tpu as pltpu

LANE = 128
BF16_ROWS = 16  # bf16 vreg packs [16, 128]


def _round_up(x, m):
    return (x + m - 1) // m * m


# --------------------------------------------------------------------------
# Pallas kernel: f32 state-norm -> fc1+relu -> fc2+relu -> out (unnorm folded)
# --------------------------------------------------------------------------
def pgactor_kernel(s_ref, mu_ref, sig_ref,
                   w1_ref, s1_ref, b1_ref,
                   w2_ref, s2_ref, b2_ref,
                   wo_ref, bo_ref, out_ref):
    # state_norm.normalize_pt in f32, then cast the normalized state to bf16
    # (matches the original module's rounding behaviour; NOT folded into W1).
    x = ((s_ref[...] - mu_ref[...]) / sig_ref[...]).astype(jnp.bfloat16)

    # fc1 + relu.  W1 is int8 (or bf16); int8 values are exactly representable
    # in bf16, so convert and apply the per-column scale on the f32 accumulator.
    w1 = w1_ref[...].astype(jnp.float32).astype(jnp.bfloat16)
    h = jnp.dot(x, w1, preferred_element_type=jnp.float32) * s1_ref[...] + b1_ref[...]
    h = jnp.maximum(h, 0.0)

    # fc2 + relu.
    w2 = w2_ref[...].astype(jnp.float32).astype(jnp.bfloat16)
    h = jnp.dot(h.astype(jnp.bfloat16), w2,
                preferred_element_type=jnp.float32) * s2_ref[...] + b2_ref[...]
    h = jnp.maximum(h, 0.0)

    # out_layer with the action unnormalizer folded into Wo/bo; action dim is
    # lane-padded to 128 so this store is a full, unmasked lane-dense slab.
    out_ref[...] = jnp.dot(h.astype(jnp.bfloat16), wo_ref[...],
                           preferred_element_type=jnp.float32) + bo_ref[...]


# --------------------------------------------------------------------------
# One-time parameter transform.
# --------------------------------------------------------------------------
def prepare_params(p, *, int8_hidden_weights=True):
    """Folds the action unnormalizer into (Wo, bo), lane-pads the action dim,
    and packs W1/W2 as int8 + per-column f32 scale (default) or bf16.
    The state normalizer is intentionally kept un-folded (see header)."""
    wo = p["wo"] * p["a_std"]
    bo = p["bo"] * p["a_std"] + p["a_mean"]
    A = wo.shape[1]
    A_pad = _round_up(A, LANE)
    wo = jnp.pad(wo, ((0, 0), (0, A_pad - A)))
    bo = jnp.pad(bo, ((0, 0), (0, A_pad - A)))

    def pack_weight(w):
        if int8_hidden_weights:
            scale = jnp.max(jnp.abs(w), axis=0, keepdims=True) / 127.0
            scale = jnp.maximum(scale, 1e-30)
            q = jnp.clip(jnp.round(w / scale), -127.0, 127.0).astype(jnp.int8)
            return q, scale.astype(jnp.float32)
        return w.astype(jnp.bfloat16), jnp.ones((1, w.shape[1]), jnp.float32)

    w1, s1 = pack_weight(p["w1"])
    w2, s2 = pack_weight(p["w2"])

    return {
        "s_mean": p["s_mean"].astype(jnp.float32),
        "s_std": p["s_std"].astype(jnp.float32),
        "w1": w1, "w1_scale": s1, "b1": p["b1"].astype(jnp.float32),
        "w2": w2, "w2_scale": s2, "b2": p["b2"].astype(jnp.float32),
        "wo": wo.astype(jnp.bfloat16), "bo": bo.astype(jnp.float32),
        "a_out": A,
    }


# --------------------------------------------------------------------------
# pallas_call wrapper
# --------------------------------------------------------------------------
_SINGLE_BUFFER_CONSTS = None  # lazily probed: pipeline_mode=pl.Buffered(1) support


def _pgactor_pallas_call(state, fp, tile_b, n_tiles, semantics, single_buffer_consts):
    Bp, S = state.shape
    H1 = fp["w1"].shape[1]
    H2 = fp["w2"].shape[1]
    A_pad = fp["wo"].shape[1]

    def const(shape):
        # Grid-constant block (same block index every step -> DMA'd once).
        # Single-buffer it when supported: it never changes, so the second
        # pipeline buffer is pure wasted VMEM.
        if single_buffer_consts:
            return pl.BlockSpec(shape, lambda i: (0, 0), pipeline_mode=pl.Buffered(1))
        return pl.BlockSpec(shape, lambda i: (0, 0))

    in_specs = [
        pl.BlockSpec((tile_b, S), lambda i: (i, 0)),   # state (tiled over batch)
        const((1, S)),          # state mean
        const((1, S)),          # state std
        const((S, H1)),         # W1 (int8 or bf16)
        const((1, H1)),         # W1 per-column scale
        const((1, H1)),         # b1
        const((H1, H2)),        # W2 (int8 or bf16)
        const((1, H2)),         # W2 per-column scale
        const((1, H2)),         # b2
        const((H2, A_pad)),     # Wo (bf16, action unnormalizer folded)
        const((1, A_pad)),      # bo
    ]
    out_specs = pl.BlockSpec((tile_b, A_pad), lambda i: (i, 0))

    return pl.pallas_call(
        pgactor_kernel,
        out_shape=jax.ShapeDtypeStruct((Bp, A_pad), jnp.float32),
        grid_spec=pltpu.PrefetchScalarGridSpec(
            num_scalar_prefetch=0,
            grid=(n_tiles,),
            in_specs=in_specs,
            out_specs=out_specs,
        ),
        compiler_params=pltpu.CompilerParams(
            dimension_semantics=semantics,
            vmem_limit_bytes=32 * 1024 * 1024,
        ),
    )(state, fp["s_mean"], fp["s_std"],
      fp["w1"], fp["w1_scale"], fp["b1"],
      fp["w2"], fp["w2_scale"], fp["b2"],
      fp["wo"], fp["bo"])


def pgactor_forward(state, fp, *, max_tile_b=512):
    """state: [B, inputdim] f32; fp: params from prepare_params()."""
    global _SINGLE_BUFFER_CONSTS
    B, S = state.shape

    max_tile_b = max(BF16_ROWS, (max_tile_b // BF16_ROWS) * BF16_ROWS)
    if B <= max_tile_b:
        # Single batch tile, rounded to the bf16 sublane pack (16 rows).
        # Padding only a <=15 row tail of a small array is negligible.
        tile_b = _round_up(max(B, BF16_ROWS), BF16_ROWS)
        if tile_b != B:
            state = jnp.pad(state, ((0, tile_b - B), (0, 0)))
    else:
        # Multi-tile: do NOT jnp.pad the whole array (that re-streams all of
        # `state` through HBM); Pallas masks the ragged last block.
        tile_b = max_tile_b

    Bp = state.shape[0]
    n_tiles = pl.cdiv(Bp, tile_b)

    # Megacore (v7x): shard batch tiles across TensorCores whenever there are
    # at least two of them; single-core chips treat "parallel" as a no-op.
    semantics = ("parallel",) if n_tiles >= 2 else ("arbitrary",)

    if _SINGLE_BUFFER_CONSTS is None:
        try:
            out = _pgactor_pallas_call(state, fp, tile_b, n_tiles, semantics, True)
            _SINGLE_BUFFER_CONSTS = True
        except Exception:
            # Running Pallas without pipeline_mode=pl.Buffered support on the
            # main pipeline: fall back to default double-buffered constants.
            _SINGLE_BUFFER_CONSTS = False
            out = _pgactor_pallas_call(state, fp, tile_b, n_tiles, semantics, False)
    else:
        out = _pgactor_pallas_call(state, fp, tile_b, n_tiles, semantics,
                                   _SINGLE_BUFFER_CONSTS)

    return out[:B, :fp["a_out"]]


# --------------------------------------------------------------------------
# Deterministic parameter init mirroring PGActor.__init__
#   fc1/fc2: xavier_uniform_ weights, zero bias
#   out_layer: uniform_(-init_output_scale, init_output_scale), zero bias
#   norm stats: synthetic deterministic mean/std (std strictly positive)
# Weights stored as [in, out] (transpose of torch's [out, in]).
# --------------------------------------------------------------------------
def init_pgactor_params(key, inputdim, action_size, init_output_scale=0.01):
    H1, H2 = 1024, 512  # self.layers = [1024, 512]
    k = jax.random.split(key, 6)

    def xavier(kk, fan_in, fan_out):
        bound = math.sqrt(6.0 / (fan_in + fan_out))
        return jax.random.uniform(kk, (fan_in, fan_out), jnp.float32, -bound, bound)

    return {
        "w1": xavier(k[0], inputdim, H1),
        "b1": jnp.zeros((1, H1), jnp.float32),
        "w2": xavier(k[1], H1, H2),
        "b2": jnp.zeros((1, H2), jnp.float32),
        "wo": jax.random.uniform(k[2], (H2, action_size), jnp.float32,
                                 -init_output_scale, init_output_scale),
        "bo": jnp.zeros((1, action_size), jnp.float32),
        "s_mean": jax.random.normal(k[3], (1, inputdim), jnp.float32) * 0.5,
        "s_std": jnp.abs(jax.random.normal(k[4], (1, inputdim), jnp.float32)) + 0.5,
        "a_mean": jnp.zeros((1, action_size), jnp.float32),
        "a_std": jnp.abs(jax.random.normal(k[5], (1, action_size), jnp.float32)) + 0.5,
    }


# --------------------------------------------------------------------------
# References
# --------------------------------------------------------------------------
def pgactor_reference_f32(state, p):
    """Pure-JAX f32 reference of the original (un-quantized) forward pass."""
    x = (state - p["s_mean"]) / p["s_std"]
    h = jnp.maximum(x @ p["w1"] + p["b1"], 0.0)
    h = jnp.maximum(h @ p["w2"] + p["b2"], 0.0)
    a = h @ p["wo"] + p["bo"]
    return a * p["a_std"] + p["a_mean"]


def pgactor_reference_prepared(state, fp):
    """Pure-JAX reference using exactly the kernel's math (int8/bf16 weights,
    bf16 MXU operands, f32 accumulation, per-column scale on the accumulator)."""
    x = ((state - fp["s_mean"]) / fp["s_std"]).astype(jnp.bfloat16)
    w1 = fp["w1"].astype(jnp.float32).astype(jnp.bfloat16)
    h = jnp.dot(x, w1, preferred_element_type=jnp.float32) * fp["w1_scale"] + fp["b1"]
    h = jnp.maximum(h, 0.0)
    w2 = fp["w2"].astype(jnp.float32).astype(jnp.bfloat16)
    h = jnp.dot(h.astype(jnp.bfloat16), w2,
                preferred_element_type=jnp.float32) * fp["w2_scale"] + fp["b2"]
    h = jnp.maximum(h, 0.0)
    a = jnp.dot(h.astype(jnp.bfloat16), fp["wo"],
                preferred_element_type=jnp.float32) + fp["bo"]
    return a[:, :fp["a_out"]]


if __name__ == "__main__":
    key = jax.random.PRNGKey(0)
    k_param, k_state = jax.random.split(key)

    INPUT_DIM = 256   # len(input_tensors) * input_tensors[0].shape[-1]
    ACTION_SIZE = 36  # deepmimic-style action dim

    raw = init_pgactor_params(k_param, INPUT_DIM, ACTION_SIZE, init_output_scale=0.01)
    prepared = prepare_params(raw)            # int8 hidden weights by default

    # ---- small rollout-style batch: single tile, no megacore ----
    B = 16
    state = jax.random.normal(k_state, (B, INPUT_DIM), jnp.float32)
    out = jax.block_until_ready(pgactor_forward(state, prepared))
    assert out.shape == (B, ACTION_SIZE)

    ref_tight = pgactor_reference_prepared(state, prepared)
    assert jnp.allclose(out, ref_tight, atol=2e-3, rtol=2e-3), \
        "mismatch vs kernel-exact (int8/bf16) reference"
    ref_f32 = pgactor_reference_f32(state, raw)
    assert jnp.allclose(out, ref_f32, atol=3e-2, rtol=3e-2), \
        "mismatch vs f32 reference (int8 + bf16 quantization tolerance)"

    # ---- larger batch: multi-tile grid, megacore-parallel on v7x ----
    B2 = 1024
    state2 = jax.random.normal(jax.random.PRNGKey(1), (B2, INPUT_DIM), jnp.float32)
    out2 = jax.block_until_ready(pgactor_forward(state2, prepared))
    assert out2.shape == (B2, ACTION_SIZE)

    ref2_tight = pgactor_reference_prepared(state2, prepared)
    assert jnp.allclose(out2, ref2_tight, atol=2e-3, rtol=2e-3), \
        "large-batch mismatch vs kernel-exact reference"
    ref2_f32 = pgactor_reference_f32(state2, raw)
    assert jnp.allclose(out2, ref2_f32, atol=3e-2, rtol=3e-2), \
        "large-batch mismatch vs f32 reference"

    print("KERNEL_OK")
</pallas_src>

<mosaic_0001>
module attributes {stable_mosaic.version = 11 : i64} {
  func.func @pgactor_kernel(%arg0: i32, %arg1: memref<16x256xf32, #tpu.memory_space<vmem>>, %arg2: memref<1x256xf32, #tpu.memory_space<vmem>>, %arg3: memref<1x256xf32, #tpu.memory_space<vmem>>, %arg4: memref<256x1024xi8, #tpu.memory_space<vmem>>, %arg5: memref<1x1024xf32, #tpu.memory_space<vmem>>, %arg6: memref<1x1024xf32, #tpu.memory_space<vmem>>, %arg7: memref<1024x512xi8, #tpu.memory_space<vmem>>, %arg8: memref<1x512xf32, #tpu.memory_space<vmem>>, %arg9: memref<1x512xf32, #tpu.memory_space<vmem>>, %arg10: memref<512x128xbf16, #tpu.memory_space<vmem>>, %arg11: memref<1x128xf32, #tpu.memory_space<vmem>>, %arg12: memref<16x128xf32, #tpu.memory_space<vmem>>) attributes {dimension_semantics = [#tpu.dimension_semantics<arbitrary>], iteration_bounds = array<i64: 1>, scalar_prefetch = 0 : i64, scratch_operands = 0 : i64, tpu.core_type = #tpu.core_type<tc>, window_params = [{transform_indices = @transform_0, window_bounds = array<i64: 16, 256>}, {pipeline_mode = #tpu.pipeline_mode<synchronous>, transform_indices = @transform_1, window_bounds = array<i64: 1, 256>}, {pipeline_mode = #tpu.pipeline_mode<synchronous>, transform_indices = @transform_2, window_bounds = array<i64: 1, 256>}, {pipeline_mode = #tpu.pipeline_mode<synchronous>, transform_indices = @transform_3, window_bounds = array<i64: 256, 1024>}, {pipeline_mode = #tpu.pipeline_mode<synchronous>, transform_indices = @transform_4, window_bounds = array<i64: 1, 1024>}, {pipeline_mode = #tpu.pipeline_mode<synchronous>, transform_indices = @transform_5, window_bounds = array<i64: 1, 1024>}, {pipeline_mode = #tpu.pipeline_mode<synchronous>, transform_indices = @transform_6, window_bounds = array<i64: 1024, 512>}, {pipeline_mode = #tpu.pipeline_mode<synchronous>, transform_indices = @transform_7, window_bounds = array<i64: 1, 512>}, {pipeline_mode = #tpu.pipeline_mode<synchronous>, transform_indices = @transform_8, window_bounds = array<i64: 1, 512>}, {pipeline_mode = #tpu.pipeline_mode<synchronous>, transform_indices = @transform_9, window_bounds = array<i64: 512, 128>}, {pipeline_mode = #tpu.pipeline_mode<synchronous>, transform_indices = @transform_10, window_bounds = array<i64: 1, 128>}, {transform_indices = @transform_11, window_bounds = array<i64: 16, 128>}]} {
    %c0 = arith.constant 0 : index
    %c0_0 = arith.constant 0 : index
    %0 = vector.load %arg1[%c0, %c0_0] : memref<16x256xf32, #tpu.memory_space<vmem>>, vector<16x256xf32>
    %c0_1 = arith.constant 0 : index
    %c0_2 = arith.constant 0 : index
    %1 = vector.load %arg2[%c0_1, %c0_2] : memref<1x256xf32, #tpu.memory_space<vmem>>, vector<1x256xf32>
    %2 = vector.broadcast %1 : vector<1x256xf32> to vector<16x256xf32>
    %3 = arith.subf %0, %2 : vector<16x256xf32>
    %c0_3 = arith.constant 0 : index
    %c0_4 = arith.constant 0 : index
    %4 = vector.load %arg3[%c0_3, %c0_4] : memref<1x256xf32, #tpu.memory_space<vmem>>, vector<1x256xf32>
    %5 = vector.broadcast %4 : vector<1x256xf32> to vector<16x256xf32>
    %6 = arith.divf %3, %5 : vector<16x256xf32>
    %7 = arith.truncf %6 : vector<16x256xf32> to vector<16x256xbf16>
    %c0_5 = arith.constant 0 : index
    %c0_6 = arith.constant 0 : index
    %8 = vector.load %arg4[%c0_5, %c0_6] : memref<256x1024xi8, #tpu.memory_space<vmem>>, vector<256x1024xi8>
    %9 = arith.sitofp %8 : vector<256x1024xi8> to vector<256x1024xf32>
    %10 = arith.truncf %9 : vector<256x1024xf32> to vector<256x1024xbf16>
    %cst = arith.constant dense<0.000000e+00> : vector<16x1024xf32>
    %11 = tpu.matmul %7, %10, %cst {dimension_numbers = #tpu.dot_dimension_numbers<[1], [0], [0], [1], [0, 0, 1, 1], [], []>} : vector<16x256xbf16>, vector<256x1024xbf16>, vector<16x1024xf32> -> vector<16x1024xf32>
    %c0_7 = arith.constant 0 : index
    %c0_8 = arith.constant 0 : index
    %12 = vector.load %arg5[%c0_7, %c0_8] : memref<1x1024xf32, #tpu.memory_space<vmem>>, vector<1x1024xf32>
    %13 = vector.broadcast %12 : vector<1x1024xf32> to vector<16x1024xf32>
    %14 = arith.mulf %11, %13 : vector<16x1024xf32>
    %c0_9 = arith.constant 0 : index
    %c0_10 = arith.constant 0 : index
    %15 = vector.load %arg6[%c0_9, %c0_10] : memref<1x1024xf32, #tpu.memory_space<vmem>>, vector<1x1024xf32>
    %16 = vector.broadcast %15 : vector<1x1024xf32> to vector<16x1024xf32>
    %17 = arith.addf %14, %16 : vector<16x1024xf32>
    %cst_11 = arith.constant 0.000000e+00 : f32
    %18 = vector.broadcast %cst_11 : f32 to vector<16x1024xf32>
    %19 = arith.maximumf %17, %18 : vector<16x1024xf32>
    %c0_12 = arith.constant 0 : index
    %c0_13 = arith.constant 0 : index
    %20 = vector.load %arg7[%c0_12, %c0_13] : memref<1024x512xi8, #tpu.memory_space<vmem>>, vector<1024x512xi8>
    %21 = arith.sitofp %20 : vector<1024x512xi8> to vector<1024x512xf32>
    %22 = arith.truncf %21 : vector<1024x512xf32> to vector<1024x512xbf16>
    %23 = arith.truncf %19 : vector<16x1024xf32> to vector<16x1024xbf16>
    %cst_14 = arith.constant dense<0.000000e+00> : vector<16x512xf32>
    %24 = tpu.matmul %23, %22, %cst_14 {dimension_numbers = #tpu.dot_dimension_numbers<[1], [0], [0], [1], [0, 0, 1, 1], [], []>} : vector<16x1024xbf16>, vector<1024x512xbf16>, vector<16x512xf32> -> vector<16x512xf32>
    %c0_15 = arith.constant 0 : index
    %c0_16 = arith.constant 0 : index
    %25 = vector.load %arg8[%c0_15, %c0_16] : memref<1x512xf32, #tpu.memory_space<vmem>>, vector<1x512xf32>
    %26 = vector.broadcast %25 : vector<1x512xf32> to vector<16x512xf32>
    %27 = arith.mulf %24, %26 : vector<16x512xf32>
    %c0_17 = arith.constant 0 : index
    %c0_18 = arith.constant 0 : index
    %28 = vector.load %arg9[%c0_17, %c0_18] : memref<1x512xf32, #tpu.memory_space<vmem>>, vector<1x512xf32>
    %29 = vector.broadcast %28 : vector<1x512xf32> to vector<16x512xf32>
    %30 = arith.addf %27, %29 : vector<16x512xf32>
    %cst_19 = arith.constant 0.000000e+00 : f32
    %31 = vector.broadcast %cst_19 : f32 to vector<16x512xf32>
    %32 = arith.maximumf %30, %31 : vector<16x512xf32>
    %33 = arith.truncf %32 : vector<16x512xf32> to vector<16x512xbf16>
    %c0_20 = arith.constant 0 : index
    %c0_21 = arith.constant 0 : index
    %34 = vector.load %arg10[%c0_20, %c0_21] : memref<512x128xbf16, #tpu.memory_space<vmem>>, vector<512x128xbf16>
    %cst_22 = arith.constant dense<0.000000e+00> : vector<16x128xf32>
    %35 = tpu.matmul %33, %34, %cst_22 {dimension_numbers = #tpu.dot_dimension_numbers<[1], [0], [0], [1], [0, 0, 1, 1], [], []>} : vector<16x512xbf16>, vector<512x128xbf16>, vector<16x128xf32> -> vector<16x128xf32>
    %c0_23 = arith.constant 0 : index
    %c0_24 = arith.constant 0 : index
    %36 = vector.load %arg11[%c0_23, %c0_24] : memref<1x128xf32, #tpu.memory_space<vmem>>, vector<1x128xf32>
    %37 = vector.broadcast %36 : vector<1x128xf32> to vector<16x128xf32>
    %38 = arith.addf %35, %37 : vector<16x128xf32>
    %c0_25 = arith.constant 0 : index
    %c0_26 = arith.constant 0 : index
    %39 = vector.load %arg12[%c0_25, %c0_26] : memref<16x128xf32, #tpu.memory_space<vmem>>, vector<16x128xf32>
    tpu.vector_store %arg12[%c0_25, %c0_26], %38 {strides = array<i32>} : memref<16x128xf32, #tpu.memory_space<vmem>>, vector<16x128xf32>,
    return
  }
  func.func @transform_0(%arg0: i32) -> (i32, i32) {
    %c0_i32 = arith.constant 0 : i32
    %c0_i32_0 = arith.constant 0 : i32
    return %arg0, %c0_i32 : i32, i32
  }
  func.func @transform_1(%arg0: i32) -> (i32, i32) {
    %c0_i32 = arith.constant 0 : i32
    %c0_i32_0 = arith.constant 0 : i32
    %c0_i32_1 = arith.constant 0 : i32
    return %c0_i32, %c0_i32_0 : i32, i32
  }
  func.func @transform_2(%arg0: i32) -> (i32, i32) {
    %c0_i32 = arith.constant 0 : i32
    %c0_i32_0 = arith.constant 0 : i32
    %c0_i32_1 = arith.constant 0 : i32
    return %c0_i32, %c0_i32_0 : i32, i32
  }
  func.func @transform_3(%arg0: i32) -> (i32, i32) {
    %c0_i32 = arith.constant 0 : i32
    %c0_i32_0 = arith.constant 0 : i32
    %c0_i32_1 = arith.constant 0 : i32
    return %c0_i32, %c0_i32_0 : i32, i32
  }
  func.func @transform_4(%arg0: i32) -> (i32, i32) {
    %c0_i32 = arith.constant 0 : i32
    %c0_i32_0 = arith.constant 0 : i32
    %c0_i32_1 = arith.constant 0 : i32
    return %c0_i32, %c0_i32_0 : i32, i32
  }
  func.func @transform_5(%arg0: i32) -> (i32, i32) {
    %c0_i32 = arith.constant 0 : i32
    %c0_i32_0 = arith.constant 0 : i32
    %c0_i32_1 = arith.constant 0 : i32
    return %c0_i32, %c0_i32_0 : i32, i32
  }
  func.func @transform_6(%arg0: i32) -> (i32, i32) {
    %c0_i32 = arith.constant 0 : i32
    %c0_i32_0 = arith.constant 0 : i32
    %c0_i32_1 = arith.constant 0 : i32
    return %c0_i32, %c0_i32_0 : i32, i32
  }
  func.func @transform_7(%arg0: i32) -> (i32, i32) {
    %c0_i32 = arith.constant 0 : i32
    %c0_i32_0 = arith.constant 0 : i32
    %c0_i32_1 = arith.constant 0 : i32
    return %c0_i32, %c0_i32_0 : i32, i32
  }
  func.func @transform_8(%arg0: i32) -> (i32, i32) {
    %c0_i32 = arith.constant 0 : i32
    %c0_i32_0 = arith.constant 0 : i32
    %c0_i32_1 = arith.constant 0 : i32
    return %c0_i32, %c0_i32_0 : i32, i32
  }
  func.func @transform_9(%arg0: i32) -> (i32, i32) {
    %c0_i32 = arith.constant 0 : i32
    %c0_i32_0 = arith.constant 0 : i32
    %c0_i32_1 = arith.constant 0 : i32
    return %c0_i32, %c0_i32_0 : i32, i32
  }
  func.func @transform_10(%arg0: i32) -> (i32, i32) {
    %c0_i32 = arith.constant 0 : i32
    %c0_i32_0 = arith.constant 0 : i32
    %c0_i32_1 = arith.constant 0 : i32
    return %c0_i32, %c0_i32_0 : i32, i32
  }
  func.func @transform_11(%arg0: i32) -> (i32, i32) {
    %c0_i32 = arith.constant 0 : i32
    %c0_i32_0 = arith.constant 0 : i32
    return %arg0, %c0_i32 : i32, i32
  }
}

module attributes {stable_mosaic.version = 11 : i64} {
  func.func @pgactor_kernel(%arg0: i32, %arg1: memref<16x256xf32, #tpu.memory_space<vmem>>, %arg2: memref<1x256xf32, #tpu.memory_space<vmem>>, %arg3: memref<1x256xf32, #tpu.memory_space<vmem>>, %arg4: memref<256x1024xi8, #tpu.memory_space<vmem>>, %arg5: memref<1x1024xf32, #tpu.memory_space<vmem>>, %arg6: memref<1x1024xf32, #tpu.memory_space<vmem>>, %arg7: memref<1024x512xi8, #tpu.memory_space<vmem>>, %arg8: memref<1x512xf32, #tpu.memory_space<vmem>>, %arg9: memref<1x512xf32, #tpu.memory_space<vmem>>, %arg10: memref<512x128xbf16, #tpu.memory_space<vmem>>, %arg11: memref<1x128xf32, #tpu.memory_space<vmem>>, %arg12: memref<16x128xf32, #tpu.memory_space<vmem>>) attributes {dimension_semantics = [#tpu.dimension_semantics<arbitrary>], iteration_bounds = array<i64: 1>, scalar_prefetch = 0 : i64, scratch_operands = 0 : i64, tpu.core_type = #tpu.core_type<tc>, window_params = [{transform_indices = @transform_0, window_bounds = array<i64: 16, 256>}, {pipeline_mode = #tpu.pipeline_mode<synchronous>, transform_indices = @transform_1, window_bounds = array<i64: 1, 256>}, {pipeline_mode = #tpu.pipeline_mode<synchronous>, transform_indices = @transform_2, window_bounds = array<i64: 1, 256>}, {pipeline_mode = #tpu.pipeline_mode<synchronous>, transform_indices = @transform_3, window_bounds = array<i64: 256, 1024>}, {pipeline_mode = #tpu.pipeline_mode<synchronous>, transform_indices = @transform_4, window_bounds = array<i64: 1, 1024>}, {pipeline_mode = #tpu.pipeline_mode<synchronous>, transform_indices = @transform_5, window_bounds = array<i64: 1, 1024>}, {pipeline_mode = #tpu.pipeline_mode<synchronous>, transform_indices = @transform_6, window_bounds = array<i64: 1024, 512>}, {pipeline_mode = #tpu.pipeline_mode<synchronous>, transform_indices = @transform_7, window_bounds = array<i64: 1, 512>}, {pipeline_mode = #tpu.pipeline_mode<synchronous>, transform_indices = @transform_8, window_bounds = array<i64: 1, 512>}, {pipeline_mode = #tpu.pipeline_mode<synchronous>, transform_indices = @transform_9, window_bounds = array<i64: 512, 128>}, {pipeline_mode = #tpu.pipeline_mode<synchronous>, transform_indices = @transform_10, window_bounds = array<i64: 1, 128>}, {transform_indices = @transform_11, window_bounds = array<i64: 16, 128>}]} {
    %c0 = arith.constant 0 : index
    %c0_0 = arith.constant 0 : index
    %0 = vector.load %arg1[%c0, %c0_0] : memref<16x256xf32, #tpu.memory_space<vmem>>, vector<16x256xf32>
    %c0_1 = arith.constant 0 : index
    %c0_2 = arith.constant 0 : index
    %1 = vector.load %arg2[%c0_1, %c0_2] : memref<1x256xf32, #tpu.memory_space<vmem>>, vector<1x256xf32>
    %2 = vector.broadcast %1 : vector<1x256xf32> to vector<16x256xf32>
    %3 = arith.subf %0, %2 : vector<16x256xf32>
    %c0_3 = arith.constant 0 : index
    %c0_4 = arith.constant 0 : index
    %4 = vector.load %arg3[%c0_3, %c0_4] : memref<1x256xf32, #tpu.memory_space<vmem>>, vector<1x256xf32>
    %5 = vector.broadcast %4 : vector<1x256xf32> to vector<16x256xf32>
    %6 = arith.divf %3, %5 : vector<16x256xf32>
    %7 = arith.truncf %6 : vector<16x256xf32> to vector<16x256xbf16>
    %c0_5 = arith.constant 0 : index
    %c0_6 = arith.constant 0 : index
    %8 = vector.load %arg4[%c0_5, %c0_6] : memref<256x1024xi8, #tpu.memory_space<vmem>>, vector<256x1024xi8>
    %9 = arith.sitofp %8 : vector<256x1024xi8> to vector<256x1024xf32>
    %10 = arith.truncf %9 : vector<256x1024xf32> to vector<256x1024xbf16>
    %cst = arith.constant dense<0.000000e+00> : vector<16x1024xf32>
    %11 = tpu.matmul %7, %10, %cst {dimension_numbers = #tpu.dot_dimension_numbers<[1], [0], [0], [1], [0, 0, 1, 1], [], []>} : vector<16x256xbf16>, vector<256x1024xbf16>, vector<16x1024xf32> -> vector<16x1024xf32>
    %c0_7 = arith.constant 0 : index
    %c0_8 = arith.constant 0 : index
    %12 = vector.load %arg5[%c0_7, %c0_8] : memref<1x1024xf32, #tpu.memory_space<vmem>>, vector<1x1024xf32>
    %13 = vector.broadcast %12 : vector<1x1024xf32> to vector<16x1024xf32>
    %14 = arith.mulf %11, %13 : vector<16x1024xf32>
    %c0_9 = arith.constant 0 : index
    %c0_10 = arith.constant 0 : index
    %15 = vector.load %arg6[%c0_9, %c0_10] : memref<1x1024xf32, #tpu.memory_space<vmem>>, vector<1x1024xf32>
    %16 = vector.broadcast %15 : vector<1x1024xf32> to vector<16x1024xf32>
    %17 = arith.addf %14, %16 : vector<16x1024xf32>
    %cst_11 = arith.constant 0.000000e+00 : f32
    %18 = vector.broadcast %cst_11 : f32 to vector<16x1024xf32>
    %19 = arith.maximumf %17, %18 : vector<16x1024xf32>
    %c0_12 = arith.constant 0 : index
    %c0_13 = arith.constant 0 : index
    %20 = vector.load %arg7[%c0_12, %c0_13] : memref<1024x512xi8, #tpu.memory_space<vmem>>, vector<1024x512xi8>
    %21 = arith.sitofp %20 : vector<1024x512xi8> to vector<1024x512xf32>
    %22 = arith.truncf %21 : vector<1024x512xf32> to vector<1024x512xbf16>
    %23 = arith.truncf %19 : vector<16x1024xf32> to vector<16x1024xbf16>
    %cst_14 = arith.constant dense<0.000000e+00> : vector<16x512xf32>
    %24 = tpu.matmul %23, %22, %cst_14 {dimension_numbers = #tpu.dot_dimension_numbers<[1], [0], [0], [1], [0, 0, 1, 1], [], []>} : vector<16x1024xbf16>, vector<1024x512xbf16>, vector<16x512xf32> -> vector<16x512xf32>
    %c0_15 = arith.constant 0 : index
    %c0_16 = arith.constant 0 : index
    %25 = vector.load %arg8[%c0_15, %c0_16] : memref<1x512xf32, #tpu.memory_space<vmem>>, vector<1x512xf32>
    %26 = vector.broadcast %25 : vector<1x512xf32> to vector<16x512xf32>
    %27 = arith.mulf %24, %26 : vector<16x512xf32>
    %c0_17 = arith.constant 0 : index
    %c0_18 = arith.constant 0 : index
    %28 = vector.load %arg9[%c0_17, %c0_18] : memref<1x512xf32, #tpu.memory_space<vmem>>, vector<1x512xf32>
    %29 = vector.broadcast %28 : vector<1x512xf32> to vector<16x512xf32>
    %30 = arith.addf %27, %29 : vector<16x512xf32>
    %cst_19 = arith.constant 0.000000e+00 : f32
    %31 = vector.broadcast %cst_19 : f32 to vector<16x512xf32>
    %32 = arith.maximumf %30, %31 : vector<16x512xf32>
    %33 = arith.truncf %32 : vector<16x512xf32> to vector<16x512xbf16>
    %c0_20 = arith.constant 0 : index
    %c0_21 = arith.constant 0 : index
    %34 = vector.load %arg10[%c0_20, %c0_21] : memref<512x128xbf16, #tpu.memory_space<vmem>>, vector<512x128xbf16>
    %cst_22 = arith.constant dense<0.000000e+00> : vector<16x128xf32>
    %35 = tpu.matmul %33, %34, %cst_22 {dimension_numbers = #tpu.dot_dimension_numbers<[1], [0], [0], [1], [0, 0, 1, 1], [], []>} : vector<16x512xbf16>, vector<512x128xbf16>, vector<16x128xf32> -> vector<16x128xf32>
    %c0_23 = arith.constant 0 : index
    %c0_24 = arith.constant 0 : index
    %36 = vector.load %arg11[%c0_23, %c0_24] : memref<1x128xf32, #tpu.memory_space<vmem>>, vector<1x128xf32>
    %37 = vector.broadcast %36 : vector<1x128xf32> to vector<16x128xf32>
    %38 = arith.addf %35, %37 : vector<16x128xf32>
    %c0_25 = arith.constant 0 : index
    %c0_26 = arith.constant 0 : index
    %39 = vector.load %arg12[%c0_25, %c0_26] : memref<16x128xf32, #tpu.memory_space<vmem>>, vector<16x128xf32>
    tpu.vector_store %arg12[%c0_25, %c0_26], %38 {strides = array<i32>} : memref<16x128xf32, #tpu.memory_space<vmem>>, vector<16x128xf32>,
    return
  }
  func.func @transform_0(%arg0: i32) -> (i32, i32) {
    %c0_i32 = arith.constant 0 : i32
    %c0_i32_0 = arith.constant 0 : i32
    return %arg0, %c0_i32 : i32, i32
  }
  func.func @transform_1(%arg0: i32) -> (i32, i32) {
    %c0_i32 = arith.constant 0 : i32
    %c0_i32_0 = arith.constant 0 : i32
    %c0_i32_1 = arith.constant 0 : i32
    return %c0_i32, %c0_i32_0 : i32, i32
  }
  func.func @transform_2(%arg0: i32) -> (i32, i32) {
    %c0_i32 = arith.constant 0 : i32
    %c0_i32_0 = arith.constant 0 : i32
    %c0_i32_1 = arith.constant 0 : i32
    return %c0_i32, %c0_i32_0 : i32, i32
  }
  func.func @transform_3(%arg0: i32) -> (i32, i32) {
    %c0_i32 = arith.constant 0 : i32
    %c0_i32_0 = arith.constant 0 : i32
    %c0_i32_1 = arith.constant 0 : i32
    return %c0_i32, %c0_i32_0 : i32, i32
  }
  func.func @transform_4(%arg0: i32) -> (i32, i32) {
    %c0_i32 = arith.constant 0 : i32
    %c0_i32_0 = arith.constant 0 : i32
    %c0_i32_1 = arith.constant 0 : i32
    return %c0_i32, %c0_i32_0 : i32, i32
  }
  func.func @transform_5(%arg0: i32) -> (i32, i32) {
    %c0_i32 = arith.constant 0 : i32
    %c0_i32_0 = arith.constant 0 : i32
    %c0_i32_1 = arith.constant 0 : i32
    return %c0_i32, %c0_i32_0 : i32, i32
  }
  func.func @transform_6(%arg0: i32) -> (i32, i32) {
    %c0_i32 = arith.constant 0 : i32
    %c0_i32_0 = arith.constant 0 : i32
    %c0_i32_1 = arith.constant 0 : i32
    return %c0_i32, %c0_i32_0 : i32, i32
  }
  func.func @transform_7(%arg0: i32) -> (i32, i32) {
    %c0_i32 = arith.constant 0 : i32
    %c0_i32_0 = arith.constant 0 : i32
    %c0_i32_1 = arith.constant 0 : i32
    return %c0_i32, %c0_i32_0 : i32, i32
  }
  func.func @transform_8(%arg0: i32) -> (i32, i32) {
    %c0_i32 = arith.constant 0 : i32
    %c0_i32_0 = arith.constant 0 : i32
    %c0_i32_1 = arith.constant 0 : i32
    return %c0_i32, %c0_i32_0 : i32, i32
  }
  func.func @transform_9(%arg0: i32) -> (i32, i32) {
    %c0_i32 = arith.constant 0 : i32
    %c0_i32_0 = arith.constant 0 : i32
    %c0_i32_1 = arith.constant 0 : i32
    return %c0_i32, %c0_i32_0 : i32, i32
  }
  func.func @transform_10(%arg0: i32) -> (i32, i32) {
    %c0_i32 = arith.constant 0 : i32
    %c0_i32_0 = arith.constant 0 : i32
    %c0_i32_1 = arith.constant 0 : i32
    return %c0_i32, %c0_i32_0 : i32, i32
  }
  func.func @transform_11(%arg0: i32) -> (i32, i32) {
    %c0_i32 = arith.constant 0 : i32
    %c0_i32_0 = arith.constant 0 : i32
    return %arg0, %c0_i32 : i32, i32
  }
}

</mosaic_0001>

<bundles_post_ra>
// kernel: tpu_custom_call.1
= control target key start
LH: loop header
LB: loop body
LE: loop exit
PB: predicated region body
PF: predicated region fallthrough
CT: control target
= control target key end

     0   :  { %16 = vsyncpa [#allocation3], 0  ;;  %s4529_s0 = inlined_call_operand.hbm [shape: f32[16,256], index: 0, kind: input, shape index: {}]   ;;  %s4530_s1 = inlined_call_operand.hbm [shape: f32[1,256], index: 1, kind: input, shape index: {}]   ;;  %s4531_s2 = inlined_call_operand.hbm [shape: f32[1,256], index: 2, kind: input, shape index: {}]   ;;  %s4532_s3 = inlined_call_operand.hbm [shape: s8[256,1024], index: 3, kind: input, shape index: {}]   ;;  %s4533_s4 = inlined_call_operand.hbm [shape: f32[1,1024], index: 4, kind: input, shape index: {}]   ;;  %s4534_s5 = inlined_call_operand.hbm [shape: f32[1,1024], index: 5, kind: input, shape index: {}]   ;;  %s4535_s6 = inlined_call_operand.hbm [shape: s8[1024,512], index: 6, kind: input, shape index: {}]   ;;  %s4536_s7 = inlined_call_operand.vmem [shape: f32[1,512], index: 7, kind: input, shape index: {}]   ;;  %s4537_s8 = inlined_call_operand.hbm [shape: f32[1,512], index: 8, kind: input, shape index: {}]   ;;  %s4538_s9 = inlined_call_operand.hbm [shape: bf16[512,128], index: 9, kind: input, shape index: {}]   ;;  %s4539_s10 = inlined_call_operand.vmem [shape: f32[1,128], index: 10, kind: input, shape index: {}]   ;;  %s4540_s11 = inlined_call_operand.hbm [shape: f32[16,128], index: 11, kind: output, shape index: {}]  }
   0x1   :  { %17 = vsyncpa [#allocation6], 0 }
   0x2   :  { %18 = vsyncpa [#allocation9], 0 }
   0x3   :  { %19 = vsyncpa [#allocation12], 0 }
   0x4   :  { %20 = vsyncpa [#allocation15], 0  ;;  %s40_s19 = sshll.u32 %s4530_s1, 4  ;;  %s41_s19 = int_to_ptr.hbm [resolvable:$true] %s40_s19 }
   0x5   :  { %21 = vsyncpa [#allocation4], 0  ;;  %s3926_s20 = smov [#allocation5]   ;;  %s61_s24 = sshll.u32 %s4532_s3, 4  ;;  %s62_s24 = int_to_ptr.hbm [resolvable:$true] %s61_s24 }
   0x6   :  { %s42_s21 = sshll.u32 %s3926_s20, 4  ;;  %s3927_s25 = smov [#allocation8]   ;;  %s43_s21 = int_to_ptr.vmem [resolvable:$true] %s42_s21 }
   0x7   :  { %45 = dma.hbm_to_vmem [thread:$0]  %s41_s19, 32, %s43_s21, [#allocation6]  }
   0x8   :  { %s63_s26 = sshll.u32 %s3927_s25, 4  ;;  %s3928_s27 = smov 1024   ;;  %s64_s26 = int_to_ptr.vmem [resolvable:$true] %s63_s26 }
   0x9   :  { %s3929_s28 = smov 64   ;;  %s86_s30 = sshll.u32 %s4534_s5, 4  ;;  %s87_s30 = int_to_ptr.hbm [resolvable:$true] %s86_s30 }
   0xa   :  { %69 = dma.hbm_to_vmem [thread:$0]  %s62_s24, 8192, %s64_s26, [#allocation9], %s3928_s27, %s3928_s27, %s3929_s28  }
   0xb   :  { %s3930_s12 = smov [#allocation11]   ;;  %s112_s3 = sshll.u32 %s4537_s8, 4  ;;  %s113_s3 = int_to_ptr.hbm [resolvable:$true] %s112_s3 }
   0xc   :  { %s88_s13 = sshll.u32 %s3930_s12, 4  ;;  %s3931_s16 = smov [#allocation14]   ;;  %s89_s13 = int_to_ptr.vmem [resolvable:$true] %s88_s13 }
   0xd   :  { %91 = dma.hbm_to_vmem [thread:$0]  %s87_s30, 128, %s89_s13, [#allocation12]  }
   0xe   :  { %s114_s17 = sshll.u32 %s3931_s16, 4  ;;  %s26_s20 = sshll.u32 %s4529_s0, 4  ;;  %s115_s17 = int_to_ptr.vmem [resolvable:$true] %s114_s17  ;;  %s27_s20 = int_to_ptr.hbm [resolvable:$true] %s26_s20 }
   0xf   :  { %117 = dma.hbm_to_vmem [thread:$0]  %s113_s3, 64, %s115_s17, [#allocation15]  }
  0x10   :  { %s3932_s5 = smov [#allocation2]   ;;  %s51_s24 = sshll.u32 %s4531_s2, 4  ;;  %s52_s24 = int_to_ptr.hbm [resolvable:$true] %s51_s24 }
  0x11   :  { %s28_s21 = sshll.u32 %s3932_s5, 4  ;;  %s3933_s25 = smov 256   ;;  %s29_s21 = int_to_ptr.vmem [resolvable:$true] %s28_s21 }
  0x12   :  { %s3934_s8 = smov 16   ;;  %s3935_s26 = smov [#allocation7]  }
  0x13   :  { %34 = dma.hbm_to_vmem [thread:$0]  %s27_s20, 512, %s29_s21, [#allocation3], %s3933_s25, %s3933_s25, %s3934_s8  }
  0x14   :  { %s53_s27 = sshll.u32 %s3935_s26, 4  ;;  %s75_s0 = sshll.u32 %s4533_s4, 4  ;;  %s54_s27 = int_to_ptr.vmem [resolvable:$true] %s53_s27  ;;  %s76_s0 = int_to_ptr.hbm [resolvable:$true] %s75_s0 }
  0x15   :  { %56 = dma.hbm_to_vmem [thread:$0]  %s52_s24, 32, %s54_s27, [#allocation6]  }
  0x16   :  { %s96_s13 = sshll.u32 %s4535_s6, 4  ;;  %s3936_s14 = smov [#allocation10]   ;;  %s97_s13 = int_to_ptr.hbm [resolvable:$true] %s96_s13 }
  0x17   :  { %s77_s15 = sshll.u32 %s3936_s14, 4  ;;  %s3937_s2 = smov [#allocation13]   ;;  %s78_s15 = int_to_ptr.vmem [resolvable:$true] %s77_s15 }
  0x18   :  { %80 = dma.hbm_to_vmem [thread:$0]  %s76_s0, 128, %s78_s15, [#allocation9]  }
  0x19   :  { %s98_s3 = sshll.u32 %s3937_s2, 4  ;;  %s3938_s16 = smov 512   ;;  %s99_s3 = int_to_ptr.vmem [resolvable:$true] %s98_s3 }
  0x1a   :  { %s3939_s17 = smov 32   ;;  %s122_s19 = sshll.u32 %s4538_s9, 4  ;;  %s123_s19 = int_to_ptr.hbm [resolvable:$true] %s122_s19 }
  0x1b   :  { %104 = dma.hbm_to_vmem [thread:$0]  %s97_s13, 16384, %s99_s3, [#allocation12], %s3938_s16, %s3938_s16, %s3939_s17  }
  0x1c   :  { %s3940_s20 = smov [#allocation16]   ;;  %s3941_s6 = smov 4  }
  0x1d   :  { %s124_s5 = sshll.u32 %s3940_s20, 4  ;;  %s125_s5 = int_to_ptr.vmem [resolvable:$true] %s124_s5 }
  0x1e   :  { %130 = dma.hbm_to_vmem [thread:$0]  %s123_s19, 4096, %s125_s5, [#allocation15], %s3929_s28, %s3929_s28, %s3941_s6  }
  0x1f   :  { %3914 = dma.done.wait [#allocation3], 512  }
  0x20   :  { %3915 = vsyncadd [#allocation3], 4294966784 }
  0x21   :  { %3916 = dma.done.wait [#allocation6], 64  }
  0x22   :  { %3917 = vsyncadd [#allocation6], 4294967232 }
  0x23   :  { %3918 = dma.done.wait [#allocation9], 8320  }
  0x24   :  { %3919 = vsyncadd [#allocation9], 4294958976 }
  0x25   :  { %3920 = dma.done.wait [#allocation12], 16512  }
  0x26   :  { %3921 = vsyncadd [#allocation12], 4294950784 }
  0x27   :  { %3922 = dma.done.wait [#allocation15], 4160  }
  0x28   :  { %3923 = vsyncadd [#allocation15], 4294963136  ;;  %v247_v0 = vld [vmem:[#allocation8 + $0xc0] sm:$0xff]  ;;  %v248_v2 = vld [vmem:[#allocation8 + $0xc8] sm:$0xff]  ;;  %s3942_s22 = smov [#allocation17]   ;;  %s3471_s8 = sshll.u32 %s4540_s11, 4  ;;  %s3472_s8 = int_to_ptr.hbm [resolvable:$true] %s3471_s8 }
  0x29   :  { %v279_v1 = vld [vmem:[#allocation8 + $0x1c0] sm:$0xff]  ;;  %v399_v3 = vunpack.c.2.s8 %v247_v0  ;;  %v407_v4 = vunpack.c.3.s8 %v247_v0  ;;  %v280_v7 = vld [vmem:[#allocation8 + $0x1c8] sm:$0xff]  ;;  %v400_v8 = vunpack.c.2.s8 %v248_v2  ;;  %v408_v9 = vunpack.c.3.s8 %v248_v2  ;;  %s3469_s23 = sshll.u32 %s3942_s22, 4  ;;  %s3944_s26 = smov 8   ;;  %s3470_s23 = int_to_ptr.vmem [resolvable:$true] %s3469_s23 }
  0x2a   :  { %v527_v5 = vunpack.c.2.s8 %v279_v1  ;;  %v535_v6 = vunpack.c.3.s8 %v279_v1  ;;  %v528_v10 = vunpack.c.2.s8 %v280_v7  ;;  %v536_v11 = vunpack.c.3.s8 %v280_v7  ;;  %v239_v28 = vld [vmem:[#allocation8 + $0x80] sm:$0xff]  ;;  %v240_v42 = vld [vmem:[#allocation8 + $0x88] sm:$0xff] }
  0x2b   :  { %v655_v12 = vcvt.s32.f32 %v399_v3  ;;  %v663_v13 = vcvt.s32.f32 %v407_v4  ;;  %v656_v16 = vcvt.s32.f32 %v400_v8  ;;  %v664_v17 = vcvt.s32.f32 %v408_v9  ;;  %v271_v37 = vld [vmem:[#allocation8 + $0x180] sm:$0xff]  ;;  %v272_v47 = vld [vmem:[#allocation8 + $0x188] sm:$0xff] }
  0x2c   :  { %v783_v14 = vcvt.s32.f32 %v527_v5  ;;  %v791_v15 = vcvt.s32.f32 %v535_v6  ;;  %v784_v18 = vcvt.s32.f32 %v528_v10  ;;  %v792_v19 = vcvt.s32.f32 %v536_v11  ;;  %v231_v8 = vld [vmem:[#allocation8 + $0x40] sm:$0xff] }
  0x2d   :  { %v855_v20 = vpack.c.bf16 %v663_v13, %v655_v12  ;;  %v383_v22 = vunpack.c.0.s8 %v247_v0  ;;  %v391_v23 = vunpack.c.1.s8 %v247_v0  ;;  %v856_v24 = vpack.c.bf16 %v664_v17, %v656_v16  ;;  %v263_v17 = vld [vmem:[#allocation8 + $0x140] sm:$0xff] }
  0x2e   :  { %v919_v21 = vpack.c.bf16 %v791_v15, %v783_v14  ;;  %v920_v25 = vpack.c.bf16 %v792_v19, %v784_v18  ;;  %v511_v26 = vunpack.c.0.s8 %v279_v1  ;;  %v519_v27 = vunpack.c.1.s8 %v279_v1 }
  0x2f   :  { %927 = vmatpush.bf16.msra.mxu0 %v855_v20  ;;  %v639_v29 = vcvt.s32.f32 %v383_v22  ;;  %v647_v30 = vcvt.s32.f32 %v391_v23  ;;  %v384_v31 = vunpack.c.0.s8 %v248_v2  ;;  %v392_v32 = vunpack.c.1.s8 %v248_v2  ;;  %955 = vmatpush.bf16.msra.mxu2 %v856_v24  ;;  %v232_v22 = vld [vmem:[#allocation8 + $0x48] sm:$0xff] }
  0x30   :  { %941 = vmatpush.bf16.msra.mxu1 %v919_v21  ;;  %969 = vmatpush.bf16.msra.mxu3 %v920_v25  ;;  %v767_v33 = vcvt.s32.f32 %v511_v26  ;;  %v775_v34 = vcvt.s32.f32 %v519_v27  ;;  %v512_v35 = vunpack.c.0.s8 %v280_v7  ;;  %v520_v36 = vunpack.c.1.s8 %v280_v7  ;;  %v264_v27 = vld [vmem:[#allocation8 + $0x148] sm:$0xff] }
  0x31   :  { %v847_v38 = vpack.c.bf16 %v647_v30, %v639_v29  ;;  %v640_v39 = vcvt.s32.f32 %v384_v31  ;;  %v648_v40 = vcvt.s32.f32 %v392_v32  ;;  %v367_v41 = vunpack.c.2.s8 %v239_v28 }
  0x32   :  { %v911_v43 = vpack.c.bf16 %v775_v34, %v767_v33  ;;  %v768_v44 = vcvt.s32.f32 %v512_v35  ;;  %v776_v45 = vcvt.s32.f32 %v520_v36  ;;  %v375_v46 = vunpack.c.3.s8 %v239_v28 }
  0x33   :  { %928 = vmatpush.bf16.msra.mxu0 %v847_v38  ;;  %v848_v48 = vpack.c.bf16 %v648_v40, %v640_v39  ;;  %v623_v49 = vcvt.s32.f32 %v367_v41  ;;  %v495_v50 = vunpack.c.2.s8 %v271_v37  ;;  %v503_v51 = vunpack.c.3.s8 %v271_v37 }
  0x34   :  { %942 = vmatpush.bf16.msra.mxu1 %v911_v43  ;;  %v912_v52 = vpack.c.bf16 %v776_v45, %v768_v44  ;;  %v631_v53 = vcvt.s32.f32 %v375_v46  ;;  %v368_v54 = vunpack.c.2.s8 %v240_v42  ;;  %v376_v55 = vunpack.c.3.s8 %v240_v42 }
  0x35   :  { %956 = vmatpush.bf16.msra.mxu2 %v848_v48  ;;  %v751_v56 = vcvt.s32.f32 %v495_v50  ;;  %v759_v57 = vcvt.s32.f32 %v503_v51  ;;  %v496_v58 = vunpack.c.2.s8 %v272_v47  ;;  %v504_v59 = vunpack.c.3.s8 %v272_v47 }
  0x36   :  { %970 = vmatpush.bf16.msra.mxu3 %v912_v52  ;;  %v839_v60 = vpack.c.bf16 %v631_v53, %v623_v49  ;;  %v624_v61 = vcvt.s32.f32 %v368_v54  ;;  %v632_v62 = vcvt.s32.f32 %v376_v55  ;;  %v351_v63 = vunpack.c.0.s8 %v239_v28  ;;  %v223_v52 = vld [vmem:[#allocation8] sm:$0xff] }
  0x37   :  { %v903_v0 = vpack.c.bf16 %v759_v57, %v751_v56  ;;  %v752_v1 = vcvt.s32.f32 %v496_v58  ;;  %v760_v2 = vcvt.s32.f32 %v504_v59  ;;  %v359_v3 = vunpack.c.1.s8 %v239_v28 }
  0x38   :  { %929 = vmatpush.bf16.msra.mxu0 %v839_v60  ;;  %v840_v4 = vpack.c.bf16 %v632_v62, %v624_v61  ;;  %v607_v5 = vcvt.s32.f32 %v351_v63  ;;  %v479_v6 = vunpack.c.0.s8 %v271_v37  ;;  %v487_v7 = vunpack.c.1.s8 %v271_v37  ;;  %v255_v61 = vld [vmem:[#allocation8 + $0x100] sm:$0xff] }
  0x39   :  { %943 = vmatpush.bf16.msra.mxu1 %v903_v0  ;;  %v904_v9 = vpack.c.bf16 %v760_v2, %v752_v1  ;;  %v615_v10 = vcvt.s32.f32 %v359_v3  ;;  %v352_v11 = vunpack.c.0.s8 %v240_v42  ;;  %v360_v12 = vunpack.c.1.s8 %v240_v42  ;;  %v224_v2 = vld [vmem:[#allocation8 + $0x8] sm:$0xff] }
  0x3a   :  { %957 = vmatpush.bf16.msra.mxu2 %v840_v4  ;;  %v735_v13 = vcvt.s32.f32 %v479_v6  ;;  %v743_v14 = vcvt.s32.f32 %v487_v7  ;;  %v480_v15 = vunpack.c.0.s8 %v272_v47  ;;  %v488_v16 = vunpack.c.1.s8 %v272_v47  ;;  %v256_v7 = vld [vmem:[#allocation8 + $0x108] sm:$0xff] }
  0x3b   :  { %971 = vmatpush.bf16.msra.mxu3 %v904_v9  ;;  %v831_v18 = vpack.c.bf16 %v615_v10, %v607_v5  ;;  %v608_v19 = vcvt.s32.f32 %v352_v11  ;;  %v616_v20 = vcvt.s32.f32 %v360_v12  ;;  %v335_v21 = vunpack.c.2.s8 %v231_v8 }
  0x3c   :  { %v895_v23 = vpack.c.bf16 %v743_v14, %v735_v13  ;;  %v736_v24 = vcvt.s32.f32 %v480_v15  ;;  %v744_v25 = vcvt.s32.f32 %v488_v16  ;;  %v343_v26 = vunpack.c.3.s8 %v231_v8 }
  0x3d   :  { %930 = vmatpush.bf16.msra.mxu0 %v831_v18  ;;  %v832_v28 = vpack.c.bf16 %v616_v20, %v608_v19  ;;  %v591_v29 = vcvt.s32.f32 %v335_v21  ;;  %v463_v30 = vunpack.c.2.s8 %v263_v17  ;;  %v471_v31 = vunpack.c.3.s8 %v263_v17 }
  0x3e   :  { %944 = vmatpush.bf16.msra.mxu1 %v895_v23  ;;  %v896_v32 = vpack.c.bf16 %v744_v25, %v736_v24  ;;  %v599_v33 = vcvt.s32.f32 %v343_v26  ;;  %v336_v34 = vunpack.c.2.s8 %v232_v22  ;;  %v344_v35 = vunpack.c.3.s8 %v232_v22 }
  0x3f   :  { %958 = vmatpush.bf16.msra.mxu2 %v832_v28  ;;  %v719_v36 = vcvt.s32.f32 %v463_v30  ;;  %v727_v37 = vcvt.s32.f32 %v471_v31  ;;  %v464_v38 = vunpack.c.2.s8 %v264_v27  ;;  %v472_v39 = vunpack.c.3.s8 %v264_v27 }
  0x40   :  { %972 = vmatpush.bf16.msra.mxu3 %v896_v32  ;;  %v823_v40 = vpack.c.bf16 %v599_v33, %v591_v29  ;;  %v592_v41 = vcvt.s32.f32 %v336_v34  ;;  %v600_v42 = vcvt.s32.f32 %v344_v35  ;;  %v319_v43 = vunpack.c.0.s8 %v231_v8  ;;  %v249_v32 = vld [vmem:[#allocation8 + $0xd0] sm:$0xff] }
  0x41   :  { %v887_v44 = vpack.c.bf16 %v727_v37, %v719_v36  ;;  %v720_v45 = vcvt.s32.f32 %v464_v38  ;;  %v728_v46 = vcvt.s32.f32 %v472_v39  ;;  %v327_v47 = vunpack.c.1.s8 %v231_v8 }
  0x42   :  { %931 = vmatpush.bf16.msra.mxu0 %v823_v40  ;;  %v824_v48 = vpack.c.bf16 %v600_v42, %v592_v41  ;;  %v575_v49 = vcvt.s32.f32 %v319_v43  ;;  %v447_v50 = vunpack.c.0.s8 %v263_v17  ;;  %v455_v51 = vunpack.c.1.s8 %v263_v17  ;;  %v281_v41 = vld [vmem:[#allocation8 + $0x1d0] sm:$0xff] }
  0x43   :  { %945 = vmatpush.bf16.msra.mxu1 %v887_v44  ;;  %v888_v53 = vpack.c.bf16 %v728_v46, %v720_v45  ;;  %v583_v54 = vcvt.s32.f32 %v327_v47  ;;  %v320_v55 = vunpack.c.0.s8 %v232_v22  ;;  %v328_v56 = vunpack.c.1.s8 %v232_v22  ;;  %v250_v46 = vld [vmem:[#allocation8 + $0xd8] sm:$0xff] }
  0x44   :  { %959 = vmatpush.bf16.msra.mxu2 %v824_v48  ;;  %v703_v57 = vcvt.s32.f32 %v447_v50  ;;  %v711_v58 = vcvt.s32.f32 %v455_v51  ;;  %v448_v59 = vunpack.c.0.s8 %v264_v27  ;;  %v456_v60 = vunpack.c.1.s8 %v264_v27  ;;  %v282_v51 = vld [vmem:[#allocation8 + $0x1d8] sm:$0xff] }
  0x45   :  { %973 = vmatpush.bf16.msra.mxu3 %v888_v53  ;;  %v815_v62 = vpack.c.bf16 %v583_v54, %v575_v49  ;;  %v576_v63 = vcvt.s32.f32 %v320_v55  ;;  %v584_v0 = vcvt.s32.f32 %v328_v56  ;;  %v303_v1 = vunpack.c.2.s8 %v223_v52 }
  0x46   :  { %v879_v3 = vpack.c.bf16 %v711_v58, %v703_v57  ;;  %v704_v4 = vcvt.s32.f32 %v448_v59  ;;  %v712_v5 = vcvt.s32.f32 %v456_v60  ;;  %v311_v6 = vunpack.c.3.s8 %v223_v52 }
  0x47   :  { %932 = vmatpush.bf16.msra.mxu0 %v815_v62  ;;  %v816_v8 = vpack.c.bf16 %v584_v0, %v576_v63  ;;  %v559_v9 = vcvt.s32.f32 %v303_v1  ;;  %v431_v10 = vunpack.c.2.s8 %v255_v61  ;;  %v439_v11 = vunpack.c.3.s8 %v255_v61 }
  0x48   :  { %946 = vmatpush.bf16.msra.mxu1 %v879_v3  ;;  %v880_v12 = vpack.c.bf16 %v712_v5, %v704_v4  ;;  %v567_v13 = vcvt.s32.f32 %v311_v6  ;;  %v304_v14 = vunpack.c.2.s8 %v224_v2  ;;  %v312_v15 = vunpack.c.3.s8 %v224_v2 }
  0x49   :  { %960 = vmatpush.bf16.msra.mxu2 %v816_v8  ;;  %v687_v16 = vcvt.s32.f32 %v431_v10  ;;  %v695_v17 = vcvt.s32.f32 %v439_v11  ;;  %v432_v18 = vunpack.c.2.s8 %v256_v7  ;;  %v440_v19 = vunpack.c.3.s8 %v256_v7 }
  0x4a   :  { %974 = vmatpush.bf16.msra.mxu3 %v880_v12  ;;  %v807_v20 = vpack.c.bf16 %v567_v13, %v559_v9  ;;  %v560_v21 = vcvt.s32.f32 %v304_v14  ;;  %v568_v22 = vcvt.s32.f32 %v312_v15  ;;  %v287_v23 = vunpack.c.0.s8 %v223_v52  ;;  %v4035_v12 = vld [vmem:[#allocation8 + $0x90] sm:$0xff] }
  0x4b   :  { %v871_v24 = vpack.c.bf16 %v695_v17, %v687_v16  ;;  %v688_v25 = vcvt.s32.f32 %v432_v18  ;;  %v696_v26 = vcvt.s32.f32 %v440_v19  ;;  %v295_v27 = vunpack.c.1.s8 %v223_v52 }
  0x4c   :  { %933 = vmatpush.bf16.msra.mxu0 %v807_v20  ;;  %v808_v28 = vpack.c.bf16 %v568_v22, %v560_v21  ;;  %v543_v29 = vcvt.s32.f32 %v287_v23  ;;  %v415_v30 = vunpack.c.0.s8 %v255_v61  ;;  %v423_v31 = vunpack.c.1.s8 %v255_v61  ;;  %v4037_v21 = vld [vmem:[#allocation8 + $0x190] sm:$0xff] }
  0x4d   :  { %947 = vmatpush.bf16.msra.mxu1 %v871_v24  ;;  %v872_v33 = vpack.c.bf16 %v696_v26, %v688_v25  ;;  %v551_v34 = vcvt.s32.f32 %v295_v27  ;;  %v288_v35 = vunpack.c.0.s8 %v224_v2  ;;  %v296_v36 = vunpack.c.1.s8 %v224_v2  ;;  %v4040_v26 = vld [vmem:[#allocation8 + $0x98] sm:$0xff] }
  0x4e   :  { %961 = vmatpush.bf16.msra.mxu2 %v808_v28  ;;  %v671_v37 = vcvt.s32.f32 %v415_v30  ;;  %v679_v38 = vcvt.s32.f32 %v423_v31  ;;  %v416_v39 = vunpack.c.0.s8 %v256_v7  ;;  %v424_v40 = vunpack.c.1.s8 %v256_v7  ;;  %v4043_v31 = vld [vmem:[#allocation8 + $0x198] sm:$0xff] }
  0x4f   :  { %975 = vmatpush.bf16.msra.mxu3 %v872_v33  ;;  %v799_v42 = vpack.c.bf16 %v551_v34, %v543_v29  ;;  %v544_v43 = vcvt.s32.f32 %v288_v35  ;;  %v552_v44 = vcvt.s32.f32 %v296_v36  ;;  %v401_v45 = vunpack.c.2.s8 %v249_v32  ;;  %v173_v36 = vld [vmem:[#allocation5] sm:$0x3] }
  0x50   :  { %v863_v47 = vpack.c.bf16 %v679_v38, %v671_v37  ;;  %v672_v48 = vcvt.s32.f32 %v416_v39  ;;  %v680_v49 = vcvt.s32.f32 %v424_v40  ;;  %v409_v50 = vunpack.c.3.s8 %v249_v32 }
  0x51   :  { %934 = vmatpush.bf16.msra.mxu0 %v799_v42  ;;  %v800_v52 = vpack.c.bf16 %v552_v44, %v544_v43  ;;  %v657_v53 = vcvt.s32.f32 %v401_v45  ;;  %v529_v54 = vunpack.c.2.s8 %v281_v41  ;;  %v537_v55 = vunpack.c.3.s8 %v281_v41 }
  0x52   :  { %948 = vmatpush.bf16.msra.mxu1 %v863_v47  ;;  %v864_v56 = vpack.c.bf16 %v680_v49, %v672_v48  ;;  %v665_v57 = vcvt.s32.f32 %v409_v50  ;;  %v402_v58 = vunpack.c.2.s8 %v250_v46  ;;  %v410_v59 = vunpack.c.3.s8 %v250_v46  ;;  %v169_v49 = vld [vmem:[#allocation2] sm:$0xff]  ;;  %v171_v50 = vld [vmem:[#allocation2 + $0x10] sm:$0xff] }
  0x53   :  { %962 = vmatpush.bf16.msra.mxu2 %v800_v52  ;;  %v785_v60 = vcvt.s32.f32 %v529_v54  ;;  %v793_v61 = vcvt.s32.f32 %v537_v55  ;;  %v530_v62 = vunpack.c.2.s8 %v282_v51  ;;  %v538_v63 = vunpack.c.3.s8 %v282_v51 }
  0x54   :  { %976 = vmatpush.bf16.msra.mxu3 %v864_v56  ;;  %v857_v0 = vpack.c.bf16 %v665_v57, %v657_v53  ;;  %v658_v1 = vcvt.s32.f32 %v402_v58  ;;  %v666_v2 = vcvt.s32.f32 %v410_v59  ;;  %v385_v3 = vunpack.c.0.s8 %v249_v32  ;;  %v170_v57 = vld [vmem:[#allocation2 + $0x8] sm:$0xff] }
  0x55   :  { %v921_v4 = vpack.c.bf16 %v793_v61, %v785_v60  ;;  %v786_v5 = vcvt.s32.f32 %v530_v62  ;;  %v794_v6 = vcvt.s32.f32 %v538_v63  ;;  %v393_v7 = vunpack.c.1.s8 %v249_v32  ;;  %v172_v62 = vld [vmem:[#allocation2 + $0x18] sm:$0xff] }
  0x56   :  { %983 = vmatpush.bf16.msrb.mxu0 %v857_v0  ;;  %v858_v8 = vpack.c.bf16 %v666_v2, %v658_v1  ;;  %v641_v9 = vcvt.s32.f32 %v385_v3  ;;  %v513_v10 = vunpack.c.0.s8 %v281_v41  ;;  %v521_v11 = vunpack.c.1.s8 %v281_v41  ;;  %v183_v41 = vld [vmem:[#allocation7] sm:$0x3] }
  0x57   :  { %997 = vmatpush.bf16.msrb.mxu1 %v921_v4  ;;  %v922_v13 = vpack.c.bf16 %v794_v6, %v786_v5  ;;  %v649_v14 = vcvt.s32.f32 %v393_v7  ;;  %v386_v15 = vunpack.c.0.s8 %v250_v46  ;;  %v394_v16 = vunpack.c.1.s8 %v250_v46 }
  0x58   :  { %1011 = vmatpush.bf16.msrb.mxu2 %v858_v8  ;;  %v769_v17 = vcvt.s32.f32 %v513_v10  ;;  %v777_v18 = vcvt.s32.f32 %v521_v11  ;;  %v514_v19 = vunpack.c.0.s8 %v282_v51  ;;  %v522_v20 = vunpack.c.1.s8 %v282_v51 }
  0x59   :  { %1025 = vmatpush.bf16.msrb.mxu3 %v922_v13  ;;  %v849_v22 = vpack.c.bf16 %v649_v14, %v641_v9  ;;  %v642_v23 = vcvt.s32.f32 %v386_v15  ;;  %v650_v24 = vcvt.s32.f32 %v394_v16  ;;  %v369_v25 = vunpack.c.2.s8 %v4035_v12 }
  0x5a   :  { %v913_v27 = vpack.c.bf16 %v777_v18, %v769_v17  ;;  %v770_v28 = vcvt.s32.f32 %v514_v19  ;;  %v778_v29 = vcvt.s32.f32 %v522_v20  ;;  %v377_v30 = vunpack.c.3.s8 %v4035_v12  ;;  %v4083_v17 = vld [vmem:[#allocation8 + $0x50] sm:$0xff] }
  0x5b   :  { %984 = vmatpush.bf16.msrb.mxu0 %v849_v22  ;;  %v850_v32 = vpack.c.bf16 %v650_v24, %v642_v23  ;;  %v625_v33 = vcvt.s32.f32 %v369_v25  ;;  %v497_v34 = vunpack.c.2.s8 %v4037_v21  ;;  %v505_v35 = vunpack.c.3.s8 %v4037_v21  ;;  %v4088_v23 = vld [vmem:[#allocation8 + $0x150] sm:$0xff] }
  0x5c   :  { %998 = vmatpush.bf16.msrb.mxu1 %v913_v27  ;;  %v914_v37 = vpack.c.bf16 %v778_v29, %v770_v28  ;;  %v633_v38 = vcvt.s32.f32 %v377_v30  ;;  %v370_v39 = vunpack.c.2.s8 %v4040_v26  ;;  %v378_v40 = vunpack.c.3.s8 %v4040_v26 }
  0x5d   :  { %1012 = vmatpush.bf16.msrb.mxu2 %v850_v32  ;;  %v753_v42 = vcvt.s32.f32 %v497_v34  ;;  %v761_v43 = vcvt.s32.f32 %v505_v35  ;;  %v498_v44 = vunpack.c.2.s8 %v4043_v31  ;;  %v506_v45 = vunpack.c.3.s8 %v4043_v31 }
  0x5e   :  { %1026 = vmatpush.bf16.msrb.mxu3 %v914_v37  ;;  %v841_v46 = vpack.c.bf16 %v633_v38, %v625_v33  ;;  %v626_v47 = vcvt.s32.f32 %v370_v39  ;;  %v634_v48 = vcvt.s32.f32 %v378_v40  ;;  %v175_v51 = vperm.slane %v173_v36, 0  ;;  %v4099_v38 = vld [vmem:[#allocation8 + $0x58] sm:$0xff] }
  0x5f   :  { %v905_v52 = vpack.c.bf16 %v761_v43, %v753_v42  ;;  %v754_v53 = vcvt.s32.f32 %v498_v44  ;;  %v762_v54 = vcvt.s32.f32 %v506_v45  ;;  %v4051_v55 = vperm.slane %v183_v41, 0  ;;  %v4102_v42 = vld [vmem:[#allocation8 + $0x158] sm:$0xff] }
  0x60   :  { %985 = vmatpush.bf16.msrb.mxu0 %v841_v46  ;;  %v842_v56 = vpack.c.bf16 %v634_v48, %v626_v47  ;;  %v176_v58 = vperm.slane %v173_v36, 1  ;;  %v4053_v60 = vsub.f32 %v169_v49, %v175_v51  ;;  %v4055_v61 = vsub.f32 %v171_v50, %v175_v51 }
  0x61   :  { %999 = vmatpush.bf16.msrb.mxu1 %v905_v52  ;;  %v906_v59 = vpack.c.bf16 %v762_v54, %v754_v53  ;;  %3668 = vrcp.f32 %v4051_v55  ;;  %vm194_vm0 = vweird.f32 %v4051_v55  ;;  %v198_v63 = vand.u32 2147483647, %v4051_v55 }
  0x62   :  { %1013 = vmatpush.bf16.msrb.mxu2 %v842_v56  ;;  %v200_v0 = vand.u32 2147483648, %v4051_v55  ;;  %v4061_v1 = vperm.slane %v183_v41, 1  ;;  %v4063_v2 = vsub.f32 %v170_v57, %v176_v58  ;;  %v353_v3 = vunpack.c.0.s8 %v4035_v12 }
  0x63   :  { %1027 = vmatpush.bf16.msrb.mxu3 %v906_v59  ;;  %v361_v4 = vunpack.c.1.s8 %v4035_v12  ;;  %v481_v5 = vunpack.c.0.s8 %v4037_v21  ;;  %v4070_v7 = vsub.f32 %v172_v62, %v176_v58  ;;  %v489_v13 = vunpack.c.1.s8 %v4037_v21  ;;  %v251_v62 = vld [vmem:[#allocation8 + $0xe0] sm:$0xff] }
  0x64   :  { %v4068_v6 = vor.u32 1.1754944e-38, %v200_v0  ;;  %3670 = vrcp.f32 %v4061_v1  ;;  %v213_v8 = vand.u32 2147483647, %v4061_v1  ;;  %v215_v9 = vand.u32 2147483648, %v4061_v1 }
  0x65   :  { %v609_v10 = vcvt.s32.f32 %v353_v3  ;;  %v617_v11 = vcvt.s32.f32 %v361_v4  ;;  %vm4076_vm1 = vcmp.eq.f32.partialorder %v198_v63, 8.507059e+37  ;;  %vm209_vm2 = vweird.f32 %v4061_v1 }
  0x66   :  { %v737_v12 = vcvt.s32.f32 %v481_v5  ;;  %v354_v15 = vunpack.c.0.s8 %v4040_v26  ;;  %v362_v16 = vunpack.c.1.s8 %v4040_v26  ;;  %v4085_v19 = vor.u32 1.1754944e-38, %v215_v9 }
  0x67   :  { %v3669_v18 = vpop.eup %3668  ;;  %v833_v20 = vpack.c.bf16 %v617_v11, %v609_v10  ;;  %v745_v22 = vcvt.s32.f32 %v489_v13  ;;  %v482_v21 = vunpack.c.0.s8 %v4043_v31  ;;  %vm4091_vm4 = vcmp.eq.f32.partialorder %v213_v8, 8.507059e+37 }
  0x68   :  { %v190_v24 = vmul.f32 %v3669_v18, %v4051_v55  ;;  %vm195_vm3 = vweird.f32 %v3669_v18  ;;  %v610_v25 = vcvt.s32.f32 %v354_v15  ;;  %v618_v27 = vcvt.s32.f32 %v362_v16 }
  0x69   :  { %986 = vmatpush.bf16.msrb.mxu0 %v833_v20  ;;  %v897_v26 = vpack.c.bf16 %v745_v22, %v737_v12  ;;  %v490_v29 = vunpack.c.1.s8 %v4043_v31  ;;  %v738_v30 = vcvt.s32.f32 %v482_v21  ;;  %v337_v32 = vunpack.c.2.s8 %v4083_v17  ;;  %vm4108_vm6 = vmor %vm194_vm0, %vm195_vm3 }
  0x6a   :  { %v3671_v33 = vpop.eup %3670  ;;  %v191_v34 = vsub.f32 1.0, %v190_v24  ;;  %v834_v35 = vpack.c.bf16 %v618_v27, %v610_v25  ;;  %v345_v36 = vunpack.c.3.s8 %v4083_v17  ;;  %v465_v37 = vunpack.c.2.s8 %v4088_v23  ;;  %v257_v25 = vld [vmem:[#allocation8 + $0x110] sm:$0xff] }
  0x6b   :  { %v205_v39 = vmul.f32 %v3671_v33, %v4061_v1  ;;  %vm210_vm5 = vweird.f32 %v3671_v33  ;;  %1000 = vmatpush.bf16.msrb.mxu1 %v897_v26  ;;  %v746_v40 = vcvt.s32.f32 %v490_v29  ;;  %v593_v41 = vcvt.s32.f32 %v337_v32  ;;  %v226_v26 = vld [vmem:[#allocation8 + $0x18] sm:$0xff] }
  0x6c   :  { %v192_v31 = vmul.f32 %v3669_v18, %v191_v34  ;;  %1014 = vmatpush.bf16.msrb.mxu2 %v834_v35  ;;  %v601_v43 = vcvt.s32.f32 %v345_v36  ;;  %v473_v44 = vunpack.c.3.s8 %v4088_v23  ;;  %v721_v45 = vcvt.s32.f32 %v465_v37  ;;  %vm4121_vm7 = vmor %vm209_vm2, %vm210_vm5  ;;  %v258_v36 = vld [vmem:[#allocation8 + $0x118] sm:$0xff] }
  0x6d   :  { %v206_v47 = vsub.f32 1.0, %v205_v39  ;;  %v898_v48 = vpack.c.bf16 %v746_v40, %v738_v30  ;;  %v338_v49 = vunpack.c.2.s8 %v4099_v38  ;;  %v346_v50 = vunpack.c.3.s8 %v4099_v38 }
  0x6e   :  { %v193_v51 = vadd.f32 %v3669_v18, %v192_v31  ;;  %v825_v52 = vpack.c.bf16 %v601_v43, %v593_v41  ;;  %v729_v53 = vcvt.s32.f32 %v473_v44  ;;  %v466_v54 = vunpack.c.2.s8 %v4102_v42 }
  0x6f   :  { %v207_v56 = vmul.f32 %v3671_v33, %v206_v47  ;;  %1028 = vmatpush.bf16.msrb.mxu3 %v898_v48  ;;  %v594_v57 = vcvt.s32.f32 %v338_v49  ;;  %v602_v58 = vcvt.s32.f32 %v346_v50  ;;  %v474_v55 = vunpack.c.3.s8 %v4102_v42 }
  0x70   :  { %v197_v59 = vsel %vm4108_vm6, %v3669_v18, %v193_v51  ;;  %987 = vmatpush.bf16.msrb.mxu0 %v825_v52  ;;  %v889_v63 = vpack.c.bf16 %v729_v53, %v721_v45  ;;  %v722_v0 = vcvt.s32.f32 %v466_v54  ;;  %v321_v3 = vunpack.c.0.s8 %v4083_v17 }
  0x71   :  { %v202_v4 = vsel %vm4076_vm1, %v4068_v6, %v197_v59  ;;  %v208_v5 = vadd.f32 %v3671_v33, %v207_v56  ;;  %v826_v8 = vpack.c.bf16 %v602_v58, %v594_v57  ;;  %v730_v9 = vcvt.s32.f32 %v474_v55 }
  0x72   :  { %v203_v10 = vmul.f32 %v202_v4, %v4053_v60  ;;  %v219_v1 = vmul.f32 %v202_v4, %v4055_v61  ;;  %1001 = vmatpush.bf16.msrb.mxu1 %v889_v63  ;;  %v329_v11 = vunpack.c.1.s8 %v4083_v17  ;;  %v577_v13 = vcvt.s32.f32 %v321_v3  ;;  %v225_v17 = vld [vmem:[#allocation8 + $0x10] sm:$0xff] }
  0x73   :  { %v212_v12 = vsel %vm4121_vm7, %v3671_v33, %v208_v5  ;;  %1015 = vmatpush.bf16.msrb.mxu2 %v826_v8  ;;  %v890_v15 = vpack.c.bf16 %v730_v9, %v722_v0  ;;  %v449_v16 = vunpack.c.0.s8 %v4088_v23  ;;  %v457_v6 = vunpack.c.1.s8 %v4088_v23 }
  0x74   :  { %v4136_v14 = vpack.c.bf16 %v219_v1, %v203_v10  ;;  %v217_v60 = vsel %vm4091_vm4, %v4085_v19, %v212_v12  ;;  %v585_v61 = vcvt.s32.f32 %v329_v11  ;;  %v322_v18 = vunpack.c.0.s8 %v4099_v38  ;;  %v283_v1 = vld [vmem:[#allocation8 + $0x1e0] sm:$0xff] }
  0x75   :  { %v218_v20 = vmul.f32 %v217_v60, %v4063_v2  ;;  %v220_v22 = vmul.f32 %v217_v60, %v4070_v7  ;;  %1029 = vmatpush.bf16.msrb.mxu3 %v890_v15  ;;  %v705_v21 = vcvt.s32.f32 %v449_v16  ;;  %v713_v24 = vcvt.s32.f32 %v457_v6  ;;  %v252_v16 = vld [vmem:[#allocation8 + $0xe8] sm:$0xff] }
  0x76   :  { %963 = vmatmul.bf16.vlgmr.msra.gmra.mxu2 %v4136_v14  ;;  %935 = vmatmul.bf16.vlgmr.msra.gmra.mxu0 %v4136_v14  ;;  %v817_v23 = vpack.c.bf16 %v585_v61, %v577_v13  ;;  %v330_v27 = vunpack.c.1.s8 %v4099_v38  ;;  %v578_v19 = vcvt.s32.f32 %v322_v18  ;;  %v450_v28 = vunpack.c.0.s8 %v4102_v42 }
  0x77   :  { %v4148_v29 = vpack.c.bf16 %v220_v22, %v218_v20  ;;  %v881_v2 = vpack.c.bf16 %v713_v24, %v705_v21  ;;  %v458_v7 = vunpack.c.1.s8 %v4102_v42  ;;  %v305_v30 = vunpack.c.2.s8 %v225_v17 }
  0x78   :  { %988 = vmatpush.bf16.msrb.mxu0 %v817_v23  ;;  %v586_v32 = vcvt.s32.f32 %v330_v27  ;;  %v706_v33 = vcvt.s32.f32 %v450_v28  ;;  %v313_v34 = vunpack.c.3.s8 %v225_v17  ;;  %v433_v35 = vunpack.c.2.s8 %v257_v25 }
  0x79   :  { %977 = vmatmul.bf16.vlgmr.msra.gmra.mxu3 %v4148_v29  ;;  %949 = vmatmul.bf16.vlgmr.msra.gmra.mxu1 %v4148_v29  ;;  %v714_v37 = vcvt.s32.f32 %v458_v7  ;;  %v561_v38 = vcvt.s32.f32 %v305_v30  ;;  %v441_v39 = vunpack.c.3.s8 %v257_v25  ;;  %v306_v40 = vunpack.c.2.s8 %v226_v26 }
  0x7a   :  { %1002 = vmatpush.bf16.msrb.mxu1 %v881_v2  ;;  %v818_v41 = vpack.c.bf16 %v586_v32, %v578_v19  ;;  %v569_v31 = vcvt.s32.f32 %v313_v34  ;;  %v689_v43 = vcvt.s32.f32 %v433_v35  ;;  %v314_v42 = vunpack.c.3.s8 %v226_v26 }
  0x7b   :  { %v882_v44 = vpack.c.bf16 %v714_v37, %v706_v33  ;;  %v697_v45 = vcvt.s32.f32 %v441_v39  ;;  %v562_v46 = vcvt.s32.f32 %v306_v40  ;;  %v434_v47 = vunpack.c.2.s8 %v258_v36 }
  0x7c   :  { %1016 = vmatpush.bf16.msrb.mxu2 %v818_v41  ;;  %v809_v48 = vpack.c.bf16 %v569_v31, %v561_v38  ;;  %v570_v49 = vcvt.s32.f32 %v314_v42  ;;  %v442_v50 = vunpack.c.3.s8 %v258_v36  ;;  %v289_v51 = vunpack.c.0.s8 %v225_v17 }
  0x7d   :  { %1030 = vmatpush.bf16.msrb.mxu3 %v882_v44  ;;  %v873_v52 = vpack.c.bf16 %v697_v45, %v689_v43  ;;  %v690_v53 = vcvt.s32.f32 %v434_v47  ;;  %v297_v54 = vunpack.c.1.s8 %v225_v17  ;;  %v417_v56 = vunpack.c.0.s8 %v257_v25  ;;  %v284_v17 = vld [vmem:[#allocation8 + $0x1e8] sm:$0xff]  ;;  %v243_v43 = vld [vmem:[#allocation8 + $0xa0] sm:$0xff] }
  0x7e   :  { %989 = vmatpush.bf16.msrb.mxu0 %v809_v48  ;;  %v810_v57 = vpack.c.bf16 %v570_v49, %v562_v46  ;;  %v698_v58 = vcvt.s32.f32 %v442_v50  ;;  %v545_v55 = vcvt.s32.f32 %v289_v51  ;;  %v425_v59 = vunpack.c.1.s8 %v257_v25  ;;  %v275_v51 = vld [vmem:[#allocation8 + $0x1a0] sm:$0xff] }
  0x7f   :  { %1003 = vmatpush.bf16.msrb.mxu1 %v873_v52  ;;  %v553_v63 = vcvt.s32.f32 %v297_v54  ;;  %v673_v0 = vcvt.s32.f32 %v417_v56  ;;  %v290_v3 = vunpack.c.0.s8 %v226_v26  ;;  %v298_v4 = vunpack.c.1.s8 %v226_v26 }
  0x80   :  { %1017 = vmatpush.bf16.msrb.mxu2 %v810_v57  ;;  %v874_v5 = vpack.c.bf16 %v698_v58, %v690_v53  ;;  %v681_v8 = vcvt.s32.f32 %v425_v59  ;;  %v418_v9 = vunpack.c.0.s8 %v258_v36  ;;  %v426_v10 = vunpack.c.1.s8 %v258_v36  ;;  %v244_v57 = vld [vmem:[#allocation8 + $0xa8] sm:$0xff] }
  0x81   :  { %v801_v11 = vpack.c.bf16 %v553_v63, %v545_v55  ;;  %v546_v13 = vcvt.s32.f32 %v290_v3  ;;  %v554_v12 = vcvt.s32.f32 %v298_v4  ;;  %v403_v15 = vunpack.c.2.s8 %v251_v62  ;;  %v276_v63 = vld [vmem:[#allocation8 + $0x1a8] sm:$0xff] }
  0x82   :  { %1031 = vmatpush.bf16.msrb.mxu3 %v874_v5  ;;  %v865_v6 = vpack.c.bf16 %v681_v8, %v673_v0  ;;  %v674_v60 = vcvt.s32.f32 %v418_v9  ;;  %v682_v61 = vcvt.s32.f32 %v426_v10  ;;  %v411_v18 = vunpack.c.3.s8 %v251_v62 }
  0x83   :  { %990 = vmatpush.bf16.msrb.mxu0 %v801_v11  ;;  %v802_v20 = vpack.c.bf16 %v554_v12, %v546_v13  ;;  %v659_v22 = vcvt.s32.f32 %v403_v15  ;;  %v531_v21 = vunpack.c.2.s8 %v283_v1  ;;  %v539_v24 = vunpack.c.3.s8 %v283_v1 }
  0x84   :  { %1004 = vmatpush.bf16.msrb.mxu1 %v865_v6  ;;  %v866_v25 = vpack.c.bf16 %v682_v61, %v674_v60  ;;  %v667_v23 = vcvt.s32.f32 %v411_v18  ;;  %v404_v27 = vunpack.c.2.s8 %v252_v16  ;;  %v412_v19 = vunpack.c.3.s8 %v252_v16 }
  0x85   :  { %1018 = vmatpush.bf16.msrb.mxu2 %v802_v20  ;;  %v787_v28 = vcvt.s32.f32 %v531_v21  ;;  %v795_v26 = vcvt.s32.f32 %v539_v24  ;;  %v532_v2 = vunpack.c.2.s8 %v284_v17  ;;  %v540_v7 = vunpack.c.3.s8 %v284_v17 }
  0x86   :  { %1032 = vmatpush.bf16.msrb.mxu3 %v866_v25  ;;  %v859_v30 = vpack.c.bf16 %v667_v23, %v659_v22  ;;  %v660_v32 = vcvt.s32.f32 %v404_v27  ;;  %v668_v33 = vcvt.s32.f32 %v412_v19  ;;  %991 = vmatmul.bf16.vlgmr.msrb.gmra.mxu0 %v4136_v14  ;;  %v387_v34 = vunpack.c.0.s8 %v251_v62  ;;  %v235_v27 = vld [vmem:[#allocation8 + $0x60] sm:$0xff] }
  0x87   :  { %v923_v35 = vpack.c.bf16 %v795_v26, %v787_v28  ;;  %v788_v36 = vcvt.s32.f32 %v532_v2  ;;  %v796_v37 = vcvt.s32.f32 %v540_v7  ;;  %v395_v38 = vunpack.c.1.s8 %v251_v62 }
  0x88   :  { %1039 = vmatpush.bf16.msra.mxu0 %v859_v30  ;;  %v860_v39 = vpack.c.bf16 %v668_v33, %v660_v32  ;;  %1019 = vmatmul.bf16.vlgmr.msrb.gmra.mxu2 %v4136_v14  ;;  %v643_v40 = vcvt.s32.f32 %v387_v34  ;;  %v515_v41 = vunpack.c.0.s8 %v283_v1  ;;  %v523_v31 = vunpack.c.1.s8 %v283_v1  ;;  %v267_v34 = vld [vmem:[#allocation8 + $0x160] sm:$0xff] }
  0x89   :  { %1053 = vmatpush.bf16.msra.mxu1 %v923_v35  ;;  %v924_v42 = vpack.c.bf16 %v796_v37, %v788_v36  ;;  %1033 = vmatmul.bf16.vlgmr.msrb.gmra.mxu3 %v4148_v29  ;;  %v651_v44 = vcvt.s32.f32 %v395_v38  ;;  %v388_v45 = vunpack.c.0.s8 %v252_v16  ;;  %v396_v46 = vunpack.c.1.s8 %v252_v16 }
  0x8a   :  { %1067 = vmatpush.bf16.msra.mxu2 %v860_v39  ;;  %1005 = vmatmul.bf16.vlgmr.msrb.gmra.mxu1 %v4148_v29  ;;  %v771_v47 = vcvt.s32.f32 %v515_v41  ;;  %v779_v48 = vcvt.s32.f32 %v523_v31  ;;  %v516_v49 = vunpack.c.0.s8 %v284_v17  ;;  %v524_v50 = vunpack.c.1.s8 %v284_v17  ;;  %v236_v39 = vld [vmem:[#allocation8 + $0x68] sm:$0xff] }
  0x8b   :  { %1081 = vmatpush.bf16.msra.mxu3 %v924_v42  ;;  %v851_v52 = vpack.c.bf16 %v651_v44, %v643_v40  ;;  %v644_v53 = vcvt.s32.f32 %v388_v45  ;;  %v652_v54 = vcvt.s32.f32 %v396_v46  ;;  %v371_v56 = vunpack.c.2.s8 %v243_v43  ;;  %v268_v42 = vld [vmem:[#allocation8 + $0x168] sm:$0xff] }
  0x8c   :  { %v915_v58 = vpack.c.bf16 %v779_v48, %v771_v47  ;;  %v772_v55 = vcvt.s32.f32 %v516_v49  ;;  %v780_v59 = vcvt.s32.f32 %v524_v50  ;;  %v379_v62 = vunpack.c.3.s8 %v243_v43 }
  0x8d   :  { %1040 = vmatpush.bf16.msra.mxu0 %v851_v52  ;;  %v852_v0 = vpack.c.bf16 %v652_v54, %v644_v53  ;;  %v627_v3 = vcvt.s32.f32 %v371_v56  ;;  %v499_v4 = vunpack.c.2.s8 %v275_v51  ;;  %v507_v5 = vunpack.c.3.s8 %v275_v51 }
  0x8e   :  { %1054 = vmatpush.bf16.msra.mxu1 %v915_v58  ;;  %v916_v8 = vpack.c.bf16 %v780_v59, %v772_v55  ;;  %v635_v9 = vcvt.s32.f32 %v379_v62  ;;  %v372_v10 = vunpack.c.2.s8 %v244_v57  ;;  %v380_v1 = vunpack.c.3.s8 %v244_v57 }
  0x8f   :  { %1068 = vmatpush.bf16.msra.mxu2 %v852_v0  ;;  %v755_v11 = vcvt.s32.f32 %v499_v4  ;;  %v763_v13 = vcvt.s32.f32 %v507_v5  ;;  %v500_v12 = vunpack.c.2.s8 %v276_v63  ;;  %v508_v15 = vunpack.c.3.s8 %v276_v63 }
  0x90   :  { %1082 = vmatpush.bf16.msra.mxu3 %v916_v8  ;;  %v843_v16 = vpack.c.bf16 %v635_v9, %v627_v3  ;;  %v628_v6 = vcvt.s32.f32 %v372_v10  ;;  %v636_v60 = vcvt.s32.f32 %v380_v1  ;;  %v355_v61 = vunpack.c.0.s8 %v243_v43  ;;  %v227_v10 = vld [vmem:[#allocation8 + $0x20] sm:$0xff] }
  0x91   :  { %v907_v18 = vpack.c.bf16 %v763_v13, %v755_v11  ;;  %v756_v17 = vcvt.s32.f32 %v500_v12  ;;  %v764_v20 = vcvt.s32.f32 %v508_v15  ;;  %v363_v22 = vunpack.c.1.s8 %v243_v43 }
  0x92   :  { %1041 = vmatpush.bf16.msra.mxu0 %v843_v16  ;;  %v844_v21 = vpack.c.bf16 %v636_v60, %v628_v6  ;;  %v611_v24 = vcvt.s32.f32 %v355_v61  ;;  %v483_v25 = vunpack.c.0.s8 %v275_v51  ;;  %v491_v23 = vunpack.c.1.s8 %v275_v51  ;;  %v259_v61 = vld [vmem:[#allocation8 + $0x120] sm:$0xff] }
  0x93   :  { %1055 = vmatpush.bf16.msra.mxu1 %v907_v18  ;;  %v908_v19 = vpack.c.bf16 %v764_v20, %v756_v17  ;;  %v619_v28 = vcvt.s32.f32 %v363_v22  ;;  %v356_v26 = vunpack.c.0.s8 %v244_v57  ;;  %v364_v2 = vunpack.c.1.s8 %v244_v57 }
  0x94   :  { %1069 = vmatpush.bf16.msra.mxu2 %v844_v21  ;;  %v739_v7 = vcvt.s32.f32 %v483_v25  ;;  %v747_v30 = vcvt.s32.f32 %v491_v23  ;;  %v484_v32 = vunpack.c.0.s8 %v276_v63  ;;  %v492_v33 = vunpack.c.1.s8 %v276_v63  ;;  %v228_v21 = vld [vmem:[#allocation8 + $0x28] sm:$0xff] }
  0x95   :  { %1083 = vmatpush.bf16.msra.mxu3 %v908_v19  ;;  %v835_v35 = vpack.c.bf16 %v619_v28, %v611_v24  ;;  %v612_v36 = vcvt.s32.f32 %v356_v26  ;;  %v620_v37 = vcvt.s32.f32 %v364_v2  ;;  %v339_v38 = vunpack.c.2.s8 %v235_v27  ;;  %v260_v19 = vld [vmem:[#allocation8 + $0x128] sm:$0xff] }
  0x96   :  { %v899_v40 = vpack.c.bf16 %v747_v30, %v739_v7  ;;  %v740_v41 = vcvt.s32.f32 %v484_v32  ;;  %v748_v31 = vcvt.s32.f32 %v492_v33  ;;  %v347_v43 = vunpack.c.3.s8 %v235_v27 }
  0x97   :  { %1042 = vmatpush.bf16.msra.mxu0 %v835_v35  ;;  %v836_v44 = vpack.c.bf16 %v620_v37, %v612_v36  ;;  %v595_v45 = vcvt.s32.f32 %v339_v38  ;;  %v467_v46 = vunpack.c.2.s8 %v267_v34  ;;  %v475_v47 = vunpack.c.3.s8 %v267_v34 }
  0x98   :  { %1056 = vmatpush.bf16.msra.mxu1 %v899_v40  ;;  %v900_v48 = vpack.c.bf16 %v748_v31, %v740_v41  ;;  %v603_v49 = vcvt.s32.f32 %v347_v43  ;;  %v340_v50 = vunpack.c.2.s8 %v236_v39  ;;  %v348_v51 = vunpack.c.3.s8 %v236_v39 }
  0x99   :  { %1070 = vmatpush.bf16.msra.mxu2 %v836_v44  ;;  %v723_v52 = vcvt.s32.f32 %v467_v46  ;;  %v731_v53 = vcvt.s32.f32 %v475_v47  ;;  %v468_v54 = vunpack.c.2.s8 %v268_v42  ;;  %v476_v56 = vunpack.c.3.s8 %v268_v42 }
  0x9a   :  { %1084 = vmatpush.bf16.msra.mxu3 %v900_v48  ;;  %v827_v57 = vpack.c.bf16 %v603_v49, %v595_v45  ;;  %v596_v58 = vcvt.s32.f32 %v340_v50  ;;  %v604_v55 = vcvt.s32.f32 %v348_v51  ;;  %v323_v59 = vunpack.c.0.s8 %v235_v27  ;;  %v253_v50 = vld [vmem:[#allocation8 + $0xf0] sm:$0xff] }
  0x9b   :  { %v891_v62 = vpack.c.bf16 %v731_v53, %v723_v52  ;;  %v724_v63 = vcvt.s32.f32 %v468_v54  ;;  %v732_v0 = vcvt.s32.f32 %v476_v56  ;;  %v331_v3 = vunpack.c.1.s8 %v235_v27 }
  0x9c   :  { %1043 = vmatpush.bf16.msra.mxu0 %v827_v57  ;;  %v828_v4 = vpack.c.bf16 %v604_v55, %v596_v58  ;;  %v579_v5 = vcvt.s32.f32 %v323_v59  ;;  %v451_v8 = vunpack.c.0.s8 %v267_v34  ;;  %v459_v9 = vunpack.c.1.s8 %v267_v34  ;;  %v285_v59 = vld [vmem:[#allocation8 + $0x1f0] sm:$0xff] }
  0x9d   :  { %1057 = vmatpush.bf16.msra.mxu1 %v891_v62  ;;  %v892_v1 = vpack.c.bf16 %v732_v0, %v724_v63  ;;  %v587_v11 = vcvt.s32.f32 %v331_v3  ;;  %v324_v13 = vunpack.c.0.s8 %v236_v39  ;;  %v332_v12 = vunpack.c.1.s8 %v236_v39 }
  0x9e   :  { %1071 = vmatpush.bf16.msra.mxu2 %v828_v4  ;;  %v707_v15 = vcvt.s32.f32 %v451_v8  ;;  %v715_v16 = vcvt.s32.f32 %v459_v9  ;;  %v452_v6 = vunpack.c.0.s8 %v268_v42  ;;  %v460_v60 = vunpack.c.1.s8 %v268_v42  ;;  %v254_v4 = vld [vmem:[#allocation8 + $0xf8] sm:$0xff] }
  0x9f   :  { %1085 = vmatpush.bf16.msra.mxu3 %v892_v1  ;;  %v819_v18 = vpack.c.bf16 %v587_v11, %v579_v5  ;;  %v580_v17 = vcvt.s32.f32 %v324_v13  ;;  %v588_v20 = vcvt.s32.f32 %v332_v12  ;;  %v307_v22 = vunpack.c.2.s8 %v227_v10  ;;  %v286_v1 = vld [vmem:[#allocation8 + $0x1f8] sm:$0xff] }
  0xa0   :  { %v883_v24 = vpack.c.bf16 %v715_v16, %v707_v15  ;;  %v708_v25 = vcvt.s32.f32 %v452_v6  ;;  %v716_v23 = vcvt.s32.f32 %v460_v60  ;;  %v315_v27 = vunpack.c.3.s8 %v227_v10 }
  0xa1   :  { %1044 = vmatpush.bf16.msra.mxu0 %v819_v18  ;;  %v820_v28 = vpack.c.bf16 %v588_v20, %v580_v17  ;;  %v563_v26 = vcvt.s32.f32 %v307_v22  ;;  %v435_v2 = vunpack.c.2.s8 %v259_v61  ;;  %v443_v7 = vunpack.c.3.s8 %v259_v61 }
  0xa2   :  { %1058 = vmatpush.bf16.msra.mxu1 %v883_v24  ;;  %v884_v30 = vpack.c.bf16 %v716_v23, %v708_v25  ;;  %v571_v32 = vcvt.s32.f32 %v315_v27  ;;  %v308_v33 = vunpack.c.2.s8 %v228_v21  ;;  %v316_v34 = vunpack.c.3.s8 %v228_v21 }
  0xa3   :  { %1072 = vmatpush.bf16.msra.mxu2 %v820_v28  ;;  %v691_v35 = vcvt.s32.f32 %v435_v2  ;;  %v699_v36 = vcvt.s32.f32 %v443_v7  ;;  %v436_v37 = vunpack.c.2.s8 %v260_v19  ;;  %v444_v38 = vunpack.c.3.s8 %v260_v19 }
  0xa4   :  { %1086 = vmatpush.bf16.msra.mxu3 %v884_v30  ;;  %v811_v39 = vpack.c.bf16 %v571_v32, %v563_v26  ;;  %v564_v40 = vcvt.s32.f32 %v308_v33  ;;  %v572_v41 = vcvt.s32.f32 %v316_v34  ;;  %v291_v31 = vunpack.c.0.s8 %v227_v10  ;;  %v245_v33 = vld [vmem:[#allocation8 + $0xb0] sm:$0xff] }
  0xa5   :  { %v875_v43 = vpack.c.bf16 %v699_v36, %v691_v35  ;;  %v692_v42 = vcvt.s32.f32 %v436_v37  ;;  %v700_v44 = vcvt.s32.f32 %v444_v38  ;;  %v299_v45 = vunpack.c.1.s8 %v227_v10 }
  0xa6   :  { %1045 = vmatpush.bf16.msra.mxu0 %v811_v39  ;;  %v812_v46 = vpack.c.bf16 %v572_v41, %v564_v40  ;;  %v547_v47 = vcvt.s32.f32 %v291_v31  ;;  %v419_v48 = vunpack.c.0.s8 %v259_v61  ;;  %v427_v49 = vunpack.c.1.s8 %v259_v61  ;;  %v277_v31 = vld [vmem:[#allocation8 + $0x1b0] sm:$0xff] }
  0xa7   :  { %1059 = vmatpush.bf16.msra.mxu1 %v875_v43  ;;  %v876_v51 = vpack.c.bf16 %v700_v44, %v692_v42  ;;  %v555_v52 = vcvt.s32.f32 %v299_v45  ;;  %v292_v53 = vunpack.c.0.s8 %v228_v21  ;;  %v300_v54 = vunpack.c.1.s8 %v228_v21 }
  0xa8   :  { %1073 = vmatpush.bf16.msra.mxu2 %v812_v46  ;;  %v675_v56 = vcvt.s32.f32 %v419_v48  ;;  %v683_v57 = vcvt.s32.f32 %v427_v49  ;;  %v420_v58 = vunpack.c.0.s8 %v260_v19  ;;  %v428_v55 = vunpack.c.1.s8 %v260_v19  ;;  %v246_v46 = vld [vmem:[#allocation8 + $0xb8] sm:$0xff] }
  0xa9   :  { %1087 = vmatpush.bf16.msra.mxu3 %v876_v51  ;;  %v803_v62 = vpack.c.bf16 %v555_v52, %v547_v47  ;;  %v548_v63 = vcvt.s32.f32 %v292_v53  ;;  %v556_v0 = vcvt.s32.f32 %v300_v54  ;;  %v405_v3 = vunpack.c.2.s8 %v253_v50  ;;  %v278_v51 = vld [vmem:[#allocation8 + $0x1b8] sm:$0xff] }
  0xaa   :  { %v867_v5 = vpack.c.bf16 %v683_v57, %v675_v56  ;;  %v676_v8 = vcvt.s32.f32 %v420_v58  ;;  %v684_v9 = vcvt.s32.f32 %v428_v55  ;;  %v413_v10 = vunpack.c.3.s8 %v253_v50 }
  0xab   :  { %1046 = vmatpush.bf16.msra.mxu0 %v803_v62  ;;  %v804_v11 = vpack.c.bf16 %v556_v0, %v548_v63  ;;  %v661_v13 = vcvt.s32.f32 %v405_v3  ;;  %v533_v12 = vunpack.c.2.s8 %v285_v59  ;;  %v541_v15 = vunpack.c.3.s8 %v285_v59 }
  0xac   :  { %1060 = vmatpush.bf16.msra.mxu1 %v867_v5  ;;  %v868_v16 = vpack.c.bf16 %v684_v9, %v676_v8  ;;  %v669_v6 = vcvt.s32.f32 %v413_v10  ;;  %v406_v60 = vunpack.c.2.s8 %v254_v4  ;;  %v414_v61 = vunpack.c.3.s8 %v254_v4 }
  0xad   :  { %1074 = vmatpush.bf16.msra.mxu2 %v804_v11  ;;  %v789_v18 = vcvt.s32.f32 %v533_v12  ;;  %v797_v17 = vcvt.s32.f32 %v541_v15  ;;  %v534_v20 = vunpack.c.2.s8 %v286_v1  ;;  %v542_v22 = vunpack.c.3.s8 %v286_v1 }
  0xae   :  { %1088 = vmatpush.bf16.msra.mxu3 %v868_v16  ;;  %v861_v21 = vpack.c.bf16 %v669_v6, %v661_v13  ;;  %v662_v24 = vcvt.s32.f32 %v406_v60  ;;  %v670_v25 = vcvt.s32.f32 %v414_v61  ;;  %1047 = vmatmul.bf16.vlgmr.msra.gmra.mxu0 %v4136_v14  ;;  %v389_v23 = vunpack.c.0.s8 %v253_v50  ;;  %v237_v60 = vld [vmem:[#allocation8 + $0x70] sm:$0xff] }
  0xaf   :  { %v925_v27 = vpack.c.bf16 %v797_v17, %v789_v18  ;;  %v790_v19 = vcvt.s32.f32 %v534_v20  ;;  %v798_v28 = vcvt.s32.f32 %v542_v22  ;;  %1061 = vmatmul.bf16.vlgmr.msra.gmra.mxu1 %v4148_v29  ;;  %v397_v26 = vunpack.c.1.s8 %v253_v50 }
  0xb0   :  { %1095 = vmatpush.bf16.msrb.mxu0 %v861_v21  ;;  %v862_v2 = vpack.c.bf16 %v670_v25, %v662_v24  ;;  %1075 = vmatmul.bf16.vlgmr.msra.gmra.mxu2 %v4136_v14  ;;  %v645_v7 = vcvt.s32.f32 %v389_v23  ;;  %v517_v30 = vunpack.c.0.s8 %v285_v59  ;;  %v525_v32 = vunpack.c.1.s8 %v285_v59  ;;  %v269_v23 = vld [vmem:[#allocation8 + $0x170] sm:$0xff] }
  0xb1   :  { %1109 = vmatpush.bf16.msrb.mxu1 %v925_v27  ;;  %v926_v34 = vpack.c.bf16 %v798_v28, %v790_v19  ;;  %1089 = vmatmul.bf16.vlgmr.msra.gmra.mxu3 %v4148_v29  ;;  %v653_v35 = vcvt.s32.f32 %v397_v26  ;;  %v390_v36 = vunpack.c.0.s8 %v254_v4  ;;  %v398_v37 = vunpack.c.1.s8 %v254_v4 }
  0xb2   :  { %1123 = vmatpush.bf16.msrb.mxu2 %v862_v2  ;;  %v773_v38 = vcvt.s32.f32 %v517_v30  ;;  %v781_v39 = vcvt.s32.f32 %v525_v32  ;;  %v518_v40 = vunpack.c.0.s8 %v286_v1  ;;  %v526_v41 = vunpack.c.1.s8 %v286_v1  ;;  %v238_v2 = vld [vmem:[#allocation8 + $0x78] sm:$0xff] }
  0xb3   :  { %1137 = vmatpush.bf16.msrb.mxu3 %v926_v34  ;;  %v853_v43 = vpack.c.bf16 %v653_v35, %v645_v7  ;;  %v646_v42 = vcvt.s32.f32 %v390_v36  ;;  %v654_v44 = vcvt.s32.f32 %v398_v37  ;;  %v373_v45 = vunpack.c.2.s8 %v245_v33  ;;  %v270_v34 = vld [vmem:[#allocation8 + $0x178] sm:$0xff] }
  0xb4   :  { %v917_v47 = vpack.c.bf16 %v781_v39, %v773_v38  ;;  %v774_v48 = vcvt.s32.f32 %v518_v40  ;;  %v782_v49 = vcvt.s32.f32 %v526_v41  ;;  %v381_v50 = vunpack.c.3.s8 %v245_v33 }
  0xb5   :  { %1096 = vmatpush.bf16.msrb.mxu0 %v853_v43  ;;  %v854_v52 = vpack.c.bf16 %v654_v44, %v646_v42  ;;  %v629_v53 = vcvt.s32.f32 %v373_v45  ;;  %v501_v54 = vunpack.c.2.s8 %v277_v31  ;;  %v509_v56 = vunpack.c.3.s8 %v277_v31 }
  0xb6   :  { %1110 = vmatpush.bf16.msrb.mxu1 %v917_v47  ;;  %v918_v57 = vpack.c.bf16 %v782_v49, %v774_v48  ;;  %v637_v58 = vcvt.s32.f32 %v381_v50  ;;  %v374_v55 = vunpack.c.2.s8 %v246_v46  ;;  %v382_v59 = vunpack.c.3.s8 %v246_v46 }
  0xb7   :  { %1124 = vmatpush.bf16.msrb.mxu2 %v854_v52  ;;  %v757_v62 = vcvt.s32.f32 %v501_v54  ;;  %v765_v63 = vcvt.s32.f32 %v509_v56  ;;  %v502_v0 = vunpack.c.2.s8 %v278_v51  ;;  %v510_v3 = vunpack.c.3.s8 %v278_v51 }
  0xb8   :  { %1138 = vmatpush.bf16.msrb.mxu3 %v918_v57  ;;  %v845_v4 = vpack.c.bf16 %v637_v58, %v629_v53  ;;  %v630_v5 = vcvt.s32.f32 %v374_v55  ;;  %v638_v8 = vcvt.s32.f32 %v382_v59  ;;  %v357_v9 = vunpack.c.0.s8 %v245_v33  ;;  %v229_v55 = vld [vmem:[#allocation8 + $0x30] sm:$0xff] }
  0xb9   :  { %v909_v10 = vpack.c.bf16 %v765_v63, %v757_v62  ;;  %v758_v1 = vcvt.s32.f32 %v502_v0  ;;  %v766_v11 = vcvt.s32.f32 %v510_v3  ;;  %v365_v13 = vunpack.c.1.s8 %v245_v33 }
  0xba   :  { %1097 = vmatpush.bf16.msrb.mxu0 %v845_v4  ;;  %v846_v12 = vpack.c.bf16 %v638_v8, %v630_v5  ;;  %v613_v15 = vcvt.s32.f32 %v357_v9  ;;  %v485_v16 = vunpack.c.0.s8 %v277_v31  ;;  %v493_v6 = vunpack.c.1.s8 %v277_v31  ;;  %v261_v9 = vld [vmem:[#allocation8 + $0x130] sm:$0xff] }
  0xbb   :  { %1111 = vmatpush.bf16.msrb.mxu1 %v909_v10  ;;  %v910_v61 = vpack.c.bf16 %v766_v11, %v758_v1  ;;  %v621_v18 = vcvt.s32.f32 %v365_v13  ;;  %v358_v17 = vunpack.c.0.s8 %v246_v46  ;;  %v366_v20 = vunpack.c.1.s8 %v246_v46 }
  0xbc   :  { %1125 = vmatpush.bf16.msrb.mxu2 %v846_v12  ;;  %v741_v22 = vcvt.s32.f32 %v485_v16  ;;  %v749_v21 = vcvt.s32.f32 %v493_v6  ;;  %v486_v24 = vunpack.c.0.s8 %v278_v51  ;;  %v494_v25 = vunpack.c.1.s8 %v278_v51  ;;  %v230_v12 = vld [vmem:[#allocation8 + $0x38] sm:$0xff] }
  0xbd   :  { %1139 = vmatpush.bf16.msrb.mxu3 %v910_v61  ;;  %v837_v27 = vpack.c.bf16 %v621_v18, %v613_v15  ;;  %v614_v19 = vcvt.s32.f32 %v358_v17  ;;  %v622_v28 = vcvt.s32.f32 %v366_v20  ;;  %v341_v26 = vunpack.c.2.s8 %v237_v60  ;;  %v262_v61 = vld [vmem:[#allocation8 + $0x138] sm:$0xff] }
  0xbe   :  { %v901_v7 = vpack.c.bf16 %v749_v21, %v741_v22  ;;  %v742_v30 = vcvt.s32.f32 %v486_v24  ;;  %v750_v32 = vcvt.s32.f32 %v494_v25  ;;  %v349_v33 = vunpack.c.3.s8 %v237_v60 }
  0xbf   :  { %1098 = vmatpush.bf16.msrb.mxu0 %v837_v27  ;;  %v838_v35 = vpack.c.bf16 %v622_v28, %v614_v19  ;;  %v597_v36 = vcvt.s32.f32 %v341_v26  ;;  %v469_v37 = vunpack.c.2.s8 %v269_v23  ;;  %v477_v38 = vunpack.c.3.s8 %v269_v23 }
  0xc0   :  { %1112 = vmatpush.bf16.msrb.mxu1 %v901_v7  ;;  %v902_v39 = vpack.c.bf16 %v750_v32, %v742_v30  ;;  %v605_v40 = vcvt.s32.f32 %v349_v33  ;;  %v342_v41 = vunpack.c.2.s8 %v238_v2  ;;  %v350_v31 = vunpack.c.3.s8 %v238_v2 }
  0xc1   :  { %1126 = vmatpush.bf16.msrb.mxu2 %v838_v35  ;;  %v725_v43 = vcvt.s32.f32 %v469_v37  ;;  %v733_v42 = vcvt.s32.f32 %v477_v38  ;;  %v470_v44 = vunpack.c.2.s8 %v270_v34  ;;  %v478_v45 = vunpack.c.3.s8 %v270_v34 }
  0xc2   :  { %1140 = vmatpush.bf16.msrb.mxu3 %v902_v39  ;;  %v829_v46 = vpack.c.bf16 %v605_v40, %v597_v36  ;;  %v598_v47 = vcvt.s32.f32 %v342_v41  ;;  %v606_v48 = vcvt.s32.f32 %v350_v31  ;;  %v325_v49 = vunpack.c.0.s8 %v237_v60  ;;  %v1247_v41 = vld [vmem:[#allocation13 + $0x60] sm:$0xff] }
  0xc3   :  { %v893_v50 = vpack.c.bf16 %v733_v42, %v725_v43  ;;  %v726_v51 = vcvt.s32.f32 %v470_v44  ;;  %v734_v52 = vcvt.s32.f32 %v478_v45  ;;  %v333_v53 = vunpack.c.1.s8 %v237_v60 }
  0xc4   :  { %1099 = vmatpush.bf16.msrb.mxu0 %v829_v46  ;;  %v830_v54 = vpack.c.bf16 %v606_v48, %v598_v47  ;;  %v581_v56 = vcvt.s32.f32 %v325_v49  ;;  %v453_v57 = vunpack.c.0.s8 %v269_v23  ;;  %v461_v58 = vunpack.c.1.s8 %v269_v23 }
  0xc5   :  { %1113 = vmatpush.bf16.msrb.mxu1 %v893_v50  ;;  %v894_v59 = vpack.c.bf16 %v734_v52, %v726_v51  ;;  %v589_v62 = vcvt.s32.f32 %v333_v53  ;;  %v326_v63 = vunpack.c.0.s8 %v238_v2  ;;  %v334_v0 = vunpack.c.1.s8 %v238_v2  ;;  %v1263_v53 = vld [vmem:[#allocation13 + $0xe0] sm:$0xff] }
  0xc6   :  { %1127 = vmatpush.bf16.msrb.mxu2 %v830_v54  ;;  %v709_v3 = vcvt.s32.f32 %v453_v57  ;;  %v717_v4 = vcvt.s32.f32 %v461_v58  ;;  %v454_v5 = vunpack.c.0.s8 %v270_v34  ;;  %v462_v8 = vunpack.c.1.s8 %v270_v34 }
  0xc7   :  { %1141 = vmatpush.bf16.msrb.mxu3 %v894_v59  ;;  %v821_v10 = vpack.c.bf16 %v589_v62, %v581_v56  ;;  %v582_v1 = vcvt.s32.f32 %v326_v63  ;;  %v590_v11 = vcvt.s32.f32 %v334_v0  ;;  %v309_v13 = vunpack.c.2.s8 %v229_v55 }
  0xc8   :  { %v885_v15 = vpack.c.bf16 %v717_v4, %v709_v3  ;;  %v710_v16 = vcvt.s32.f32 %v454_v5  ;;  %v718_v6 = vcvt.s32.f32 %v462_v8  ;;  %v317_v60 = vunpack.c.3.s8 %v229_v55 }
  0xc9   :  { %1100 = vmatpush.bf16.msrb.mxu0 %v821_v10  ;;  %v822_v18 = vpack.c.bf16 %v590_v11, %v582_v1  ;;  %v565_v17 = vcvt.s32.f32 %v309_v13  ;;  %v437_v20 = vunpack.c.2.s8 %v261_v9  ;;  %v445_v22 = vunpack.c.3.s8 %v261_v9 }
  0xca   :  { %1114 = vmatpush.bf16.msrb.mxu1 %v885_v15  ;;  %v886_v21 = vpack.c.bf16 %v718_v6, %v710_v16  ;;  %v573_v24 = vcvt.s32.f32 %v317_v60  ;;  %v310_v25 = vunpack.c.2.s8 %v230_v12  ;;  %v318_v23 = vunpack.c.3.s8 %v230_v12  ;;  %v1259_v6 = vld [vmem:[#allocation13 + $0xc0] sm:$0xff] }
  0xcb   :  { %1128 = vmatpush.bf16.msrb.mxu2 %v822_v18  ;;  %v693_v27 = vcvt.s32.f32 %v437_v20  ;;  %v701_v19 = vcvt.s32.f32 %v445_v22  ;;  %v438_v28 = vunpack.c.2.s8 %v262_v61  ;;  %v446_v26 = vunpack.c.3.s8 %v262_v61  ;;  %v1239_v20 = vld [vmem:[#allocation13 + $0x20] sm:$0xff] }
  0xcc   :  { %1142 = vmatpush.bf16.msrb.mxu3 %v886_v21  ;;  %v813_v2 = vpack.c.bf16 %v573_v24, %v565_v17  ;;  %v566_v7 = vcvt.s32.f32 %v310_v25  ;;  %v574_v30 = vcvt.s32.f32 %v318_v23  ;;  %v293_v32 = vunpack.c.0.s8 %v229_v55 }
  0xcd   :  { %v877_v33 = vpack.c.bf16 %v701_v19, %v693_v27  ;;  %v694_v34 = vcvt.s32.f32 %v438_v28  ;;  %v702_v35 = vcvt.s32.f32 %v446_v26  ;;  %v301_v36 = vunpack.c.1.s8 %v229_v55  ;;  %v1243_v55 = vld [vmem:[#allocation13 + $0x40] sm:$0xff] }
  0xce   :  { %1101 = vmatpush.bf16.msrb.mxu0 %v813_v2  ;;  %v814_v37 = vpack.c.bf16 %v574_v30, %v566_v7  ;;  %v549_v38 = vcvt.s32.f32 %v293_v32  ;;  %v421_v39 = vunpack.c.0.s8 %v261_v9  ;;  %v429_v40 = vunpack.c.1.s8 %v261_v9 }
  0xcf   :  { %1115 = vmatpush.bf16.msrb.mxu1 %v877_v33  ;;  %v878_v31 = vpack.c.bf16 %v702_v35, %v694_v34  ;;  %v557_v43 = vcvt.s32.f32 %v301_v36  ;;  %v294_v42 = vunpack.c.0.s8 %v230_v12  ;;  %v302_v44 = vunpack.c.1.s8 %v230_v12  ;;  %v1255_v34 = vld [vmem:[#allocation13 + $0xa0] sm:$0xff] }
  0xd0   :  { %1129 = vmatpush.bf16.msrb.mxu2 %v814_v37  ;;  %v677_v45 = vcvt.s32.f32 %v421_v39  ;;  %v685_v46 = vcvt.s32.f32 %v429_v40  ;;  %v422_v47 = vunpack.c.0.s8 %v262_v61  ;;  %v430_v48 = vunpack.c.1.s8 %v262_v61 }
  0xd1   :  { %1143 = vmatpush.bf16.msrb.mxu3 %v878_v31  ;;  %v805_v49 = vpack.c.bf16 %v557_v43, %v549_v38  ;;  %v550_v50 = vcvt.s32.f32 %v294_v42  ;;  %v558_v51 = vcvt.s32.f32 %v302_v44  ;;  %v1419_v52 = vunpack.c.2.s8 %v1247_v41 }
  0xd2   :  { %v869_v54 = vpack.c.bf16 %v685_v46, %v677_v45  ;;  %v678_v56 = vcvt.s32.f32 %v422_v47  ;;  %v686_v57 = vcvt.s32.f32 %v430_v48  ;;  %v1423_v58 = vunpack.c.3.s8 %v1247_v41  ;;  %v4165_v45 = vld [vmem:[#allocation10] sm:$0xff]  ;;  %v4167_v48 = vld [vmem:[#allocation11] sm:$0xff] }
  0xd3   :  { %1102 = vmatpush.bf16.msrb.mxu0 %v805_v49  ;;  %v806_v59 = vpack.c.bf16 %v558_v51, %v550_v50  ;;  %v1931_v62 = vcvt.s32.f32 %v1419_v52  ;;  %v1411_v63 = vunpack.c.0.s8 %v1247_v41  ;;  %v1415_v0 = vunpack.c.1.s8 %v1247_v41  ;;  %v1235_v41 = vld [vmem:[#allocation13] sm:$0xff] }
  0xd4   :  { %1116 = vmatpush.bf16.msrb.mxu1 %v869_v54  ;;  %v870_v3 = vpack.c.bf16 %v686_v57, %v678_v56  ;;  %v1935_v4 = vcvt.s32.f32 %v1423_v58  ;;  %v1483_v5 = vunpack.c.2.s8 %v1263_v53  ;;  %v1487_v8 = vunpack.c.3.s8 %v1263_v53 }
  0xd5   :  { %1130 = vmatpush.bf16.msrb.mxu2 %v806_v59  ;;  %v1923_v9 = vcvt.s32.f32 %v1411_v63  ;;  %v1927_v10 = vcvt.s32.f32 %v1415_v0  ;;  %v1403_v1 = vunpack.c.2.s8 %v1243_v55  ;;  %v1407_v11 = vunpack.c.3.s8 %v1243_v55 }
  0xd6   :  { %1144 = vmatpush.bf16.msrb.mxu3 %v870_v3  ;;  %1103 = vmatmul.bf16.vlgmr.msrb.gmra.mxu0 %v4136_v14  ;;  %v2415_v13 = vpack.c.bf16 %v1935_v4, %v1931_v62  ;;  %v1995_v12 = vcvt.s32.f32 %v1483_v5  ;;  %v1999_v15 = vcvt.s32.f32 %v1487_v8  ;;  %v1475_v16 = vunpack.c.0.s8 %v1263_v53  ;;  %v1279_v3 = vld [vmem:[#allocation13 + $0x160] sm:$0xff] }
  0xd7   :  { %1117 = vmatmul.bf16.vlgmr.msrb.gmra.mxu1 %v4148_v29  ;;  %v2411_v60 = vpack.c.bf16 %v1927_v10, %v1923_v9  ;;  %v1915_v61 = vcvt.s32.f32 %v1403_v1  ;;  %v1919_v18 = vcvt.s32.f32 %v1407_v11  ;;  %v1479_v17 = vunpack.c.1.s8 %v1263_v53  ;;  %v1311_v5 = vld [vmem:[#allocation13 + $0x260] sm:$0xff] }
  0xd8   :  { %1131 = vmatmul.bf16.vlgmr.msrb.gmra.mxu2 %v4136_v14  ;;  %2651 = vmatpush.bf16.msra.mxu0 %v2415_v13  ;;  %v2447_v22 = vpack.c.bf16 %v1999_v15, %v1995_v12  ;;  %v1987_v21 = vcvt.s32.f32 %v1475_v16  ;;  %v1395_v24 = vunpack.c.0.s8 %v1243_v55  ;;  %v1399_v25 = vunpack.c.1.s8 %v1243_v55  ;;  %v1251_v11 = vld [vmem:[#allocation13 + $0x80] sm:$0xff] }
  0xd9   :  { %1145 = vmatmul.bf16.vlgmr.msrb.gmra.mxu3 %v4148_v29  ;;  %v1991_v23 = vcvt.s32.f32 %v1479_v17  ;;  %v1467_v27 = vunpack.c.2.s8 %v1259_v6  ;;  %v1471_v19 = vunpack.c.3.s8 %v1259_v6  ;;  %v2407_v28 = vpack.c.bf16 %v1919_v18, %v1915_v61 }
  0xda   :  { %2665 = vmatpush.bf16.msra.mxu1 %v2447_v22  ;;  %v1387_v26 = vunpack.c.2.s8 %v1239_v20  ;;  %v1391_v2 = vunpack.c.3.s8 %v1239_v20  ;;  %v1459_v33 = vunpack.c.0.s8 %v1259_v6  ;;  %v1907_v14 = vcvt.s32.f32 %v1395_v24 }
  0xdb   :  { %v2443_v7 = vpack.c.bf16 %v1991_v23, %v1987_v21  ;;  %v1979_v30 = vcvt.s32.f32 %v1467_v27  ;;  %v1983_v32 = vcvt.s32.f32 %v1471_v19  ;;  %v1911_v35 = vcvt.s32.f32 %v1399_v25 }
  0xdc   :  { %2652 = vmatpush.bf16.msra.mxu0 %v2411_v60  ;;  %v1899_v36 = vcvt.s32.f32 %v1387_v26  ;;  %v1463_v37 = vunpack.c.1.s8 %v1259_v6  ;;  %v1903_v39 = vcvt.s32.f32 %v1391_v2  ;;  %v1379_v29 = vunpack.c.0.s8 %v1239_v20 }
  0xdd   :  { %v2439_v38 = vpack.c.bf16 %v1983_v32, %v1979_v30  ;;  %v1383_v40 = vunpack.c.1.s8 %v1239_v20  ;;  %v1971_v31 = vcvt.s32.f32 %v1459_v33  ;;  %v1451_v42 = vunpack.c.2.s8 %v1255_v34 }
  0xde   :  { %2666 = vmatpush.bf16.msra.mxu1 %v2443_v7  ;;  %v1975_v43 = vcvt.s32.f32 %v1463_v37  ;;  %v1455_v44 = vunpack.c.3.s8 %v1255_v34  ;;  %v1891_v46 = vcvt.s32.f32 %v1379_v29  ;;  %v2403_v49 = vpack.c.bf16 %v1911_v35, %v1907_v14  ;;  %v1295_v35 = vld [vmem:[#allocation13 + $0x1e0] sm:$0xff] }
  0xdf   :  { %v1895_v47 = vcvt.s32.f32 %v1383_v40  ;;  %v1963_v50 = vcvt.s32.f32 %v1451_v42  ;;  %v1371_v52 = vunpack.c.2.s8 %v1235_v41  ;;  %v2399_v53 = vpack.c.bf16 %v1903_v39, %v1899_v36 }
  0xe0   :  { %2653 = vmatpush.bf16.msra.mxu0 %v2407_v28  ;;  %v1967_v51 = vcvt.s32.f32 %v1455_v44  ;;  %v1153_v54 = vperm.slane %v4165_v45, 0  ;;  %v1375_v56 = vunpack.c.3.s8 %v1235_v41  ;;  %v2435_v57 = vpack.c.bf16 %v1975_v43, %v1971_v31  ;;  %v1327_v31 = vld [vmem:[#allocation13 + $0x2e0] sm:$0xff] }
  0xe1   :  { %v2395_v58 = vpack.c.bf16 %v1895_v47, %v1891_v46  ;;  %v1187_v59 = vperm.slane %v4167_v48, 0  ;;  %v4171_v62 = vcvt.s32.f32 %v1371_v52  ;;  %v1443_v63 = vunpack.c.0.s8 %v1255_v34  ;;  %v4192_v52 = vld [vmem:[#allocation13 + $0x240] sm:$0xff] }
  0xe2   :  { %2667 = vmatpush.bf16.msra.mxu1 %v2439_v38  ;;  %v2431_v55 = vpack.c.bf16 %v1967_v51, %v1963_v50  ;;  %v1447_v0 = vunpack.c.1.s8 %v1255_v34  ;;  %v1363_v4 = vunpack.c.0.s8 %v1235_v41  ;;  %v1547_v8 = vunpack.c.2.s8 %v1279_v3  ;;  %v1275_v38 = vld [vmem:[#allocation13 + $0x140] sm:$0xff] }
  0xe3   :  { %v1551_v9 = vunpack.c.3.s8 %v1279_v3  ;;  %v1367_v10 = vunpack.c.1.s8 %v1235_v41  ;;  %v1675_v1 = vunpack.c.2.s8 %v1311_v5  ;;  %v1887_v13 = vcvt.s32.f32 %v1375_v56 }
  0xe4   :  { %2654 = vmatpush.bf16.msra.mxu0 %v2403_v49  ;;  %v1955_v12 = vcvt.s32.f32 %v1443_v63  ;;  %v1959_v15 = vcvt.s32.f32 %v1447_v0  ;;  %v4173_v16 = vcvt.s32.f32 %v1363_v4  ;;  %v2059_v6 = vcvt.s32.f32 %v1547_v8 }
  0xe5   :  { %v2063_v60 = vcvt.s32.f32 %v1551_v9  ;;  %v4175_v61 = vcvt.s32.f32 %v1367_v10  ;;  %v1679_v18 = vunpack.c.3.s8 %v1311_v5  ;;  %v1154_v17 = vperm.slane %v4165_v45, 1 }
  0xe6   :  { %2668 = vmatpush.bf16.msra.mxu1 %v2435_v57  ;;  %v4178_v20 = vcvt.s32.f32 %v1675_v1  ;;  %v1435_v22 = vunpack.c.2.s8 %v1251_v11  ;;  %v1439_v21 = vunpack.c.3.s8 %v1251_v11  ;;  %v1188_v24 = vperm.slane %v4167_v48, 1 }
  0xe7   :  { %v2479_v25 = vpack.c.bf16 %v2063_v60, %v2059_v6  ;;  %v4181_v23 = vcvt.s32.f32 %v1679_v18  ;;  %v1539_v27 = vunpack.c.0.s8 %v1279_v3  ;;  %v2391_v19 = vpack.c.bf16 %v1887_v13, %v4171_v62  ;;  %v4199_v13 = vld [vmem:[#allocation13 + $0x1c0] sm:$0xff] }
  0xe8   :  { %2655 = vmatpush.bf16.msra.mxu0 %v2399_v53  ;;  %v1947_v28 = vcvt.s32.f32 %v1435_v22  ;;  %v1951_v26 = vcvt.s32.f32 %v1439_v21  ;;  %v1543_v2 = vunpack.c.1.s8 %v1279_v3  ;;  %v2427_v7 = vpack.c.bf16 %v1959_v15, %v1955_v12 }
  0xe9   :  { %2679 = vmatpush.bf16.msra.mxu2 %v2479_v25  ;;  %v2387_v30 = vpack.c.bf16 %v4175_v61, %v4173_v16  ;;  %v2543_v32 = vpack.c.bf16 %v4181_v23, %v4178_v20  ;;  %v2051_v33 = vcvt.s32.f32 %v1539_v27  ;;  %v1667_v36 = vunpack.c.0.s8 %v1311_v5 }
  0xea   :  { %2669 = vmatpush.bf16.msra.mxu1 %v2431_v55  ;;  %v2423_v34 = vpack.c.bf16 %v1951_v26, %v1947_v28  ;;  %v2055_v14 = vcvt.s32.f32 %v1543_v2  ;;  %v1671_v37 = vunpack.c.1.s8 %v1311_v5  ;;  %v1611_v39 = vunpack.c.2.s8 %v1295_v35 }
  0xeb   :  { %v1615_v29 = vunpack.c.3.s8 %v1295_v35  ;;  %v1427_v40 = vunpack.c.0.s8 %v1251_v11  ;;  %v1431_v41 = vunpack.c.1.s8 %v1251_v11  ;;  %v4188_v42 = vcvt.s32.f32 %v1667_v36 }
  0xec   :  { %2656 = vmatpush.bf16.msra.mxu0 %v2395_v58  ;;  %v2475_v43 = vpack.c.bf16 %v2055_v14, %v2051_v33  ;;  %v4190_v44 = vcvt.s32.f32 %v1671_v37  ;;  %v1531_v46 = vunpack.c.2.s8 %v1275_v38  ;;  %v2123_v47 = vcvt.s32.f32 %v1611_v39  ;;  %v4204_v33 = vld [vmem:[#allocation13 + $0x120] sm:$0xff] }
  0xed   :  { %v2127_v49 = vcvt.s32.f32 %v1615_v29  ;;  %v1939_v50 = vcvt.s32.f32 %v1427_v40  ;;  %v1943_v51 = vcvt.s32.f32 %v1431_v41  ;;  %v1535_v56 = vunpack.c.3.s8 %v1275_v38 }
  0xee   :  { %2670 = vmatpush.bf16.msra.mxu1 %v2427_v7  ;;  %2680 = vmatpush.bf16.msra.mxu2 %v2475_v43  ;;  %v2539_v53 = vpack.c.bf16 %v4190_v44, %v4188_v42  ;;  %v2043_v57 = vcvt.s32.f32 %v1531_v46  ;;  %v1739_v58 = vunpack.c.2.s8 %v1327_v31  ;;  %v1743_v63 = vunpack.c.3.s8 %v1327_v31 }
  0xef   :  { %v2511_v55 = vpack.c.bf16 %v2127_v49, %v2123_v47  ;;  %v2419_v62 = vpack.c.bf16 %v1943_v51, %v1939_v50  ;;  %v1603_v0 = vunpack.c.0.s8 %v1295_v35  ;;  %v2047_v3 = vcvt.s32.f32 %v1535_v56  ;;  %v4220_v56 = vld [vmem:[#allocation13 + $0x220] sm:$0xff] }
  0xf0   :  { %2657 = vmatpush.bf16.msra.mxu0 %v2391_v19  ;;  %v2251_v4 = vcvt.s32.f32 %v1739_v58  ;;  %v1607_v5 = vunpack.c.1.s8 %v1295_v35  ;;  %v1659_v8 = vunpack.c.2.s8 %v4192_v52  ;;  %v2255_v9 = vcvt.s32.f32 %v1743_v63  ;;  %v4206_v35 = vld [vmem:[#allocation13 + $0x2c0] sm:$0xff] }
  0xf1   :  { %2693 = vmatpush.bf16.msra.mxu3 %v2511_v55  ;;  %v2115_v10 = vcvt.s32.f32 %v1603_v0  ;;  %v1663_v1 = vunpack.c.3.s8 %v4192_v52  ;;  %v1155_v11 = vperm.slane %v4165_v45, 2  ;;  %v2471_v15 = vpack.c.bf16 %v2047_v3, %v2043_v57 }
  0xf2   :  { %2671 = vmatpush.bf16.msra.mxu1 %v2423_v34  ;;  %v2119_v16 = vcvt.s32.f32 %v1607_v5  ;;  %v2171_v6 = vcvt.s32.f32 %v1659_v8  ;;  %v1189_v60 = vperm.slane %v4167_v48, 2  ;;  %v2575_v61 = vpack.c.bf16 %v2255_v9, %v2251_v4 }
  0xf3   :  { %v936_v12 = vpop.f32.mrf.mxu0  ;;  %v2175_v18 = vcvt.s32.f32 %v1663_v1  ;;  %v1523_v20 = vunpack.c.0.s8 %v1275_v38  ;;  %v1527_v22 = vunpack.c.1.s8 %v1275_v38  ;;  %2681 = vmatpush.bf16.msra.mxu2 %v2471_v15  ;;  %v1731_v25 = vunpack.c.0.s8 %v1327_v31 }
  0xf4   :  { %2658 = vmatpush.bf16.msra.mxu0 %v2387_v30  ;;  %v2507_v21 = vpack.c.bf16 %v2119_v16, %v2115_v10  ;;  %v1735_v23 = vunpack.c.1.s8 %v1327_v31  ;;  %v1595_v27 = vunpack.c.2.s8 %v4199_v13  ;;  %v1599_v7 = vunpack.c.3.s8 %v4199_v13 }
  0xf5   :  { %v2535_v28 = vpack.c.bf16 %v2175_v18, %v2171_v6  ;;  %v2035_v26 = vcvt.s32.f32 %v1523_v20  ;;  %v2039_v2 = vcvt.s32.f32 %v1527_v22  ;;  %v2243_v34 = vcvt.s32.f32 %v1731_v25  ;;  %v4232_v25 = vld [vmem:[#allocation13 + $0x1a0] sm:$0xff] }
  0xf6   :  { %v950_v19 = vpop.f32.mrf.mxu1  ;;  %2672 = vmatpush.bf16.msra.mxu1 %v2419_v62  ;;  %2694 = vmatpush.bf16.msra.mxu3 %v2507_v21  ;;  %v2107_v14 = vcvt.s32.f32 %v1595_v27  ;;  %v2111_v37 = vcvt.s32.f32 %v1599_v7  ;;  %v1651_v38 = vunpack.c.0.s8 %v4192_v52  ;;  %v1655_v39 = vunpack.c.1.s8 %v4192_v52 }
  0xf7   :  { %v951_v30 = vadd.f32 %v950_v19, %v936_v12  ;;  %v2467_v36 = vpack.c.bf16 %v2039_v2, %v2035_v26  ;;  %v1515_v31 = vunpack.c.2.s8 %v4204_v33  ;;  %v1519_v43 = vunpack.c.3.s8 %v4204_v33 }
  0xf8   :  { %2707 = vmatpush.bf16.msrb.mxu0 %v2543_v32  ;;  %v2247_v32 = vcvt.s32.f32 %v1735_v23  ;;  %v2503_v42 = vpack.c.bf16 %v2111_v37, %v2107_v14  ;;  %v2163_v44 = vcvt.s32.f32 %v1651_v38  ;;  %v2167_v46 = vcvt.s32.f32 %v1655_v39 }
  0xf9   :  { %v1169_v29 = vmul.f32 %v1153_v54, %v951_v30  ;;  %v964_v40 = vpop.f32.mrf.mxu2  ;;  %2682 = vmatpush.bf16.msra.mxu2 %v2467_v36  ;;  %v1723_v47 = vunpack.c.2.s8 %v4206_v35  ;;  %v2027_v51 = vcvt.s32.f32 %v1515_v31  ;;  %v2031_v52 = vcvt.s32.f32 %v1519_v43 }
  0xfa   :  { %2721 = vmatpush.bf16.msrb.mxu1 %v2575_v61  ;;  %v2571_v41 = vpack.c.bf16 %v2247_v32, %v2243_v34  ;;  %2695 = vmatpush.bf16.msra.mxu3 %v2503_v42  ;;  %v2531_v58 = vpack.c.bf16 %v2167_v46, %v2163_v44  ;;  %v1156_v62 = vperm.slane %v4165_v45, 3  ;;  %v1190_v63 = vperm.slane %v4167_v48, 3 }
  0xfb   :  { %v4217_v49 = vadd.f32 %v1187_v59, %v1169_v29  ;;  %v938_v50 = vpop.f32.mrf.mxu0  ;;  %v2235_v55 = vcvt.s32.f32 %v1723_v47  ;;  %v2463_v4 = vpack.c.bf16 %v2031_v52, %v2027_v51  ;;  %v1587_v9 = vunpack.c.0.s8 %v4199_v13 }
  0xfc   :  { %2708 = vmatpush.bf16.msrb.mxu0 %v2539_v53  ;;  %v1727_v53 = vunpack.c.3.s8 %v4206_v35  ;;  %v978_v57 = vpop.f32.mrf.mxu3  ;;  %v1591_v10 = vunpack.c.1.s8 %v4199_v13  ;;  %v1643_v1 = vunpack.c.2.s8 %v4220_v56  ;;  %v1647_v12 = vunpack.c.3.s8 %v4220_v56 }
  0xfd   :  { %v1219_v0 = vmax.f32 %v4217_v49, 0.0  ;;  %v979_v3 = vadd.f32 %v978_v57, %v964_v40  ;;  %2683 = vmatpush.bf16.msra.mxu2 %v2463_v4  ;;  %v1507_v61 = vunpack.c.0.s8 %v4204_v33  ;;  %v2099_v18 = vcvt.s32.f32 %v1587_v9  ;;  %v4249_v40 = vld [vmem:[#allocation13 + $0x100] sm:$0xff] }
  0xfe   :  { %2722 = vmatpush.bf16.msrb.mxu1 %v2571_v41  ;;  %v2239_v5 = vcvt.s32.f32 %v1727_v53  ;;  %v952_v8 = vpop.f32.mrf.mxu1  ;;  %v2103_v20 = vcvt.s32.f32 %v1591_v10  ;;  %v2155_v22 = vcvt.s32.f32 %v1643_v1  ;;  %v2159_v21 = vcvt.s32.f32 %v1647_v12 }
  0xff   :  { %v1170_v15 = vmul.f32 %v1154_v17, %v979_v3  ;;  %v953_v16 = vadd.f32 %v952_v8, %v938_v50  ;;  %v1511_v27 = vunpack.c.1.s8 %v4204_v33  ;;  %v2019_v19 = vcvt.s32.f32 %v1507_v61 }
 0x100   :  { %2709 = vmatpush.bf16.msrb.mxu0 %v2535_v28  ;;  %v2567_v6 = vpack.c.bf16 %v2239_v5, %v2235_v55  ;;  %v2499_v26 = vpack.c.bf16 %v2103_v20, %v2099_v18  ;;  %v2527_v2 = vpack.c.bf16 %v2159_v21, %v2155_v22  ;;  %v1715_v7 = vunpack.c.0.s8 %v4206_v35  ;;  %v4265_v5 = vld [vmem:[#allocation13 + $0x200] sm:$0xff] }
 0x101   :  { %v4236_v13 = vadd.f32 %v1188_v24, %v1170_v15  ;;  %v1177_v23 = vmul.f32 %v1153_v54, %v953_v16  ;;  %v966_v28 = vpop.f32.mrf.mxu2  ;;  %v1719_v30 = vunpack.c.1.s8 %v4206_v35  ;;  %v2023_v36 = vcvt.s32.f32 %v1511_v27 }
 0x102   :  { %2723 = vmatpush.bf16.msrb.mxu1 %v2567_v6  ;;  %v1579_v54 = vunpack.c.2.s8 %v4232_v25  ;;  %2696 = vmatpush.bf16.msra.mxu3 %v2499_v26  ;;  %v2227_v33 = vcvt.s32.f32 %v1715_v7  ;;  %v1583_v39 = vunpack.c.3.s8 %v4232_v25  ;;  %v1635_v29 = vunpack.c.0.s8 %v4220_v56 }
 0x103   :  { %v1220_v34 = vmax.f32 %v4236_v13, 0.0  ;;  %v1211_v32 = vadd.f32 %v1187_v59, %v1177_v23  ;;  %v992_v14 = vpop.f32.mrf.mxu0  ;;  %v2231_v38 = vcvt.s32.f32 %v1719_v30  ;;  %v2459_v31 = vpack.c.bf16 %v2023_v36, %v2019_v19  ;;  %v4251_v59 = vld [vmem:[#allocation13 + $0x2a0] sm:$0xff] }
 0x104   :  { %2710 = vmatpush.bf16.msrb.mxu0 %v2531_v58  ;;  %v980_v37 = vpop.f32.mrf.mxu3  ;;  %v2091_v43 = vcvt.s32.f32 %v1579_v54  ;;  %v2095_v44 = vcvt.s32.f32 %v1583_v39  ;;  %v1639_v46 = vunpack.c.1.s8 %v4220_v56  ;;  %v2147_v47 = vcvt.s32.f32 %v1635_v29  ;;  %v4281_v30 = vld [vmem:[#allocation13 + $0x180] sm:$0xff] }
 0x105   :  { %v1227_v35 = vmax.f32 %v1211_v32, 0.0  ;;  %v981_v41 = vadd.f32 %v980_v37, %v966_v28  ;;  %v2563_v42 = vpack.c.bf16 %v2231_v38, %v2227_v33  ;;  %2684 = vmatpush.bf16.msra.mxu2 %v2459_v31  ;;  %v1499_v52 = vunpack.c.2.s8 %v4249_v40 }
 0x106   :  { %v1503_v53 = vunpack.c.3.s8 %v4249_v40  ;;  %v2495_v58 = vpack.c.bf16 %v2095_v44, %v2091_v43  ;;  %v2151_v55 = vcvt.s32.f32 %v1639_v46  ;;  %v1707_v3 = vunpack.c.2.s8 %v4251_v59  ;;  %v1343_v46 = vld [vmem:[#allocation13 + $0x360] sm:$0xff] }
 0x107   :  { %v1178_v49 = vmul.f32 %v1154_v17, %v981_v41  ;;  %v1006_v50 = vpop.f32.mrf.mxu1  ;;  %v4256_v51 = vpack.c.bf16 %v1227_v35, %v1219_v0  ;;  %2724 = vmatpush.bf16.msrb.mxu1 %v2563_v42  ;;  %v2011_v17 = vcvt.s32.f32 %v1499_v52  ;;  %v1711_v0 = vunpack.c.3.s8 %v4251_v59 }
 0x108   :  { %2711 = vmatpush.bf16.msrb.mxu0 %v2527_v2  ;;  %v1007_v57 = vadd.f32 %v1006_v50, %v992_v14  ;;  %v2015_v4 = vcvt.s32.f32 %v1503_v53  ;;  %2697 = vmatpush.bf16.msra.mxu3 %v2495_v58  ;;  %v2523_v9 = vpack.c.bf16 %v2151_v55, %v2147_v47  ;;  %v2219_v10 = vcvt.s32.f32 %v1707_v3  ;;  %v1248_v53 = vld [vmem:[#allocation13 + $0x68] sm:$0xff] }
 0x109   :  { %v1212_v56 = vadd.f32 %v1188_v24, %v1178_v49  ;;  %2659 = vmatmul.bf16.vlgmr.msra.gmra.mxu0 %v4256_v51  ;;  %v1571_v1 = vunpack.c.0.s8 %v4232_v25  ;;  %v2223_v24 = vcvt.s32.f32 %v1711_v0  ;;  %v1575_v6 = vunpack.c.1.s8 %v4232_v25 }
 0x10a   :  { %v1171_v8 = vmul.f32 %v1155_v11, %v1007_v57  ;;  %v2455_v16 = vpack.c.bf16 %v2015_v4, %v2011_v17  ;;  %v1627_v22 = vunpack.c.2.s8 %v4265_v5  ;;  %v1631_v21 = vunpack.c.3.s8 %v4265_v5 }
 0x10b   :  { %v1228_v12 = vmax.f32 %v1212_v56, 0.0  ;;  %v1020_v15 = vpop.f32.mrf.mxu2  ;;  %v2083_v20 = vcvt.s32.f32 %v1571_v1  ;;  %v994_v27 = vpop.f32.mrf.mxu0  ;;  %v2559_v19 = vpack.c.bf16 %v2223_v24, %v2219_v10  ;;  %v2087_v28 = vcvt.s32.f32 %v1575_v6 }
 0x10c   :  { %v4273_v61 = vadd.f32 %v1189_v60, %v1171_v8  ;;  %v1034_v18 = vpop.f32.mrf.mxu3  ;;  %2712 = vmatpush.bf16.msrb.mxu0 %v2523_v9  ;;  %2685 = vmatpush.bf16.msra.mxu2 %v2455_v16  ;;  %v2139_v26 = vcvt.s32.f32 %v1627_v22  ;;  %v2143_v2 = vcvt.s32.f32 %v1631_v21  ;;  %v1491_v7 = vunpack.c.0.s8 %v4249_v40  ;;  %v1315_v8 = vld [vmem:[#allocation13 + $0x280] sm:$0xff] }
 0x10d   :  { %v4277_v13 = vpack.c.bf16 %v1228_v12, %v1220_v34  ;;  %v1035_v23 = vadd.f32 %v1034_v18, %v1020_v15  ;;  %v2491_v14 = vpack.c.bf16 %v2087_v28, %v2083_v20  ;;  %v1495_v36 = vunpack.c.1.s8 %v4249_v40  ;;  %2725 = vmatpush.bf16.msrb.mxu1 %v2559_v19 }
 0x10e   :  { %v1221_v25 = vmax.f32 %v4273_v61, 0.0  ;;  %v1699_v54 = vunpack.c.0.s8 %v4251_v59  ;;  %v2519_v33 = vpack.c.bf16 %v2143_v2, %v2139_v26  ;;  %v2003_v38 = vcvt.s32.f32 %v1491_v7 }
 0x10f   :  { %2673 = vmatmul.bf16.vlgmr.msra.gmra.mxu1 %v4277_v13  ;;  %v1172_v32 = vmul.f32 %v1156_v62, %v1035_v23  ;;  %v1008_v34 = vpop.f32.mrf.mxu1  ;;  %v1703_v39 = vunpack.c.1.s8 %v4251_v59  ;;  %2698 = vmatpush.bf16.msra.mxu3 %v2491_v14  ;;  %v2007_v35 = vcvt.s32.f32 %v1495_v36  ;;  %v1563_v31 = vunpack.c.2.s8 %v4281_v30  ;;  %v1359_v36 = vld [vmem:[#allocation13 + $0x3e0] sm:$0xff] }
 0x110   :  { %v1009_v37 = vadd.f32 %v1008_v34, %v994_v27  ;;  %v2211_v41 = vcvt.s32.f32 %v1699_v54  ;;  %2713 = vmatpush.bf16.msrb.mxu0 %v2519_v33  ;;  %v1567_v42 = vunpack.c.3.s8 %v4281_v30  ;;  %v1619_v44 = vunpack.c.0.s8 %v4265_v5 }
 0x111   :  { %v4291_v29 = vadd.f32 %v1190_v63, %v1172_v32  ;;  %v2215_v43 = vcvt.s32.f32 %v1703_v39  ;;  %v2451_v49 = vpack.c.bf16 %v2007_v35, %v2003_v38  ;;  %v2075_v50 = vcvt.s32.f32 %v1563_v31  ;;  %v1264_v39 = vld [vmem:[#allocation13 + $0xe8] sm:$0xff]  ;;  %v1339_v31 = vld [vmem:[#allocation13 + $0x340] sm:$0xff] }
 0x112   :  { %v1179_v40 = vmul.f32 %v1155_v11, %v1009_v37  ;;  %v1623_v52 = vunpack.c.1.s8 %v4265_v5  ;;  %v2079_v55 = vcvt.s32.f32 %v1567_v42  ;;  %v2131_v3 = vcvt.s32.f32 %v1619_v44 }
 0x113   :  { %v1222_v59 = vmax.f32 %v4291_v29, 0.0  ;;  %v1022_v47 = vpop.f32.mrf.mxu2  ;;  %v2555_v11 = vpack.c.bf16 %v2215_v43, %v2211_v41  ;;  %2686 = vmatpush.bf16.msra.mxu2 %v2451_v49  ;;  %v1803_v4 = vunpack.c.2.s8 %v1343_v46  ;;  %v1807_v0 = vunpack.c.3.s8 %v1343_v46 }
 0x114   :  { %v1213_v57 = vadd.f32 %v1189_v60, %v1179_v40  ;;  %v1036_v58 = vpop.f32.mrf.mxu3  ;;  %v2135_v17 = vcvt.s32.f32 %v1623_v52  ;;  %v2487_v10 = vpack.c.bf16 %v2079_v55, %v2075_v50  ;;  %v1420_v1 = vunpack.c.2.s8 %v1248_v53 }
 0x115   :  { %v1037_v56 = vadd.f32 %v1036_v58, %v1022_v47  ;;  %2726 = vmatpush.bf16.msrb.mxu1 %v2555_v11  ;;  %v1424_v12 = vunpack.c.3.s8 %v1248_v53  ;;  %v2315_v60 = vcvt.s32.f32 %v1803_v4  ;;  %v2319_v16 = vcvt.s32.f32 %v1807_v0 }
 0x116   :  { %v1229_v9 = vmax.f32 %v1213_v57, 0.0  ;;  %v2515_v15 = vpack.c.bf16 %v2135_v17, %v2131_v3  ;;  %2699 = vmatpush.bf16.msra.mxu3 %v2487_v10  ;;  %v1932_v6 = vcvt.s32.f32 %v1420_v1  ;;  %v1691_v18 = vunpack.c.2.s8 %v1315_v8 }
 0x117   :  { %v1180_v5 = vmul.f32 %v1156_v62, %v1037_v56  ;;  %v1936_v61 = vcvt.s32.f32 %v1424_v12  ;;  %v2607_v22 = vpack.c.bf16 %v2319_v16, %v2315_v60  ;;  %v1695_v21 = vunpack.c.3.s8 %v1315_v8 }
 0x118   :  { %v4304_v24 = vpack.c.bf16 %v1229_v9, %v1221_v25  ;;  %2714 = vmatpush.bf16.msrb.mxu0 %v2515_v15  ;;  %v1555_v23 = vunpack.c.0.s8 %v4281_v30  ;;  %v2203_v27 = vcvt.s32.f32 %v1691_v18  ;;  %v1559_v19 = vunpack.c.1.s8 %v4281_v30 }
 0x119   :  { %v1214_v20 = vadd.f32 %v1190_v63, %v1180_v5  ;;  %v2416_v62 = vpack.c.bf16 %v1936_v61, %v1932_v6  ;;  %v1795_v28 = vunpack.c.0.s8 %v1343_v46  ;;  %2735 = vmatpush.bf16.msrb.mxu2 %v2607_v22  ;;  %v2207_v26 = vcvt.s32.f32 %v1695_v21  ;;  %v1355_v22 = vld [vmem:[#allocation13 + $0x3c0] sm:$0xff] }
 0x11a   :  { %2687 = vmatmul.bf16.vlgmr.msra.gmra.mxu2 %v4304_v24  ;;  %v2067_v2 = vcvt.s32.f32 %v1555_v23  ;;  %v1799_v7 = vunpack.c.1.s8 %v1343_v46  ;;  %v2071_v32 = vcvt.s32.f32 %v1559_v19  ;;  %v1412_v34 = vunpack.c.0.s8 %v1248_v53  ;;  %v1244_v46 = vld [vmem:[#allocation13 + $0x48] sm:$0xff] }
 0x11b   :  { %v1230_v25 = vmax.f32 %v1214_v20, 0.0  ;;  %v2307_v63 = vcvt.s32.f32 %v1795_v28  ;;  %v1416_v14 = vunpack.c.1.s8 %v1248_v53  ;;  %v2551_v37 = vpack.c.bf16 %v2207_v26, %v2203_v27  ;;  %v1260_v19 = vld [vmem:[#allocation13 + $0xc8] sm:$0xff] }
 0x11c   :  { %2763 = vmatpush.bf16.msra.mxu0 %v2416_v62  ;;  %v2311_v33 = vcvt.s32.f32 %v1799_v7  ;;  %v1683_v38 = vunpack.c.0.s8 %v1315_v8  ;;  %v2483_v29 = vpack.c.bf16 %v2071_v32, %v2067_v2  ;;  %v1924_v30 = vcvt.s32.f32 %v1412_v34 }
 0x11d   :  { %v4311_v54 = vpack.c.bf16 %v1230_v25, %v1222_v59  ;;  %v1928_v35 = vcvt.s32.f32 %v1416_v14  ;;  %v1687_v41 = vunpack.c.1.s8 %v1315_v8  ;;  %2727 = vmatpush.bf16.msrb.mxu1 %v2551_v37  ;;  %v1867_v42 = vunpack.c.2.s8 %v1359_v36  ;;  %v4316_v14 = vld [vmem:[#allocation13 + $0x320] sm:$0xff] }
 0x11e   :  { %v2603_v40 = vpack.c.bf16 %v2311_v33, %v2307_v63  ;;  %v2195_v43 = vcvt.s32.f32 %v1683_v38  ;;  %v1871_v44 = vunpack.c.3.s8 %v1359_v36  ;;  %2700 = vmatpush.bf16.msra.mxu3 %v2483_v29  ;;  %v1484_v59 = vunpack.c.2.s8 %v1264_v39 }
 0x11f   :  { %v2412_v47 = vpack.c.bf16 %v1928_v35, %v1924_v30  ;;  %v2199_v49 = vcvt.s32.f32 %v1687_v41  ;;  %v1488_v50 = vunpack.c.3.s8 %v1264_v39  ;;  %v2379_v52 = vcvt.s32.f32 %v1867_v42 }
 0x120   :  { %2736 = vmatpush.bf16.msrb.mxu2 %v2603_v40  ;;  %v2383_v53 = vcvt.s32.f32 %v1871_v44  ;;  %v1787_v57 = vunpack.c.2.s8 %v1339_v31  ;;  %v1791_v58 = vunpack.c.3.s8 %v1339_v31  ;;  %v1996_v55 = vcvt.s32.f32 %v1484_v59 }
 0x121   :  { %2764 = vmatpush.bf16.msra.mxu0 %v2412_v47  ;;  %v2547_v11 = vpack.c.bf16 %v2199_v49, %v2195_v43  ;;  %v2000_v3 = vcvt.s32.f32 %v1488_v50  ;;  %v1404_v56 = vunpack.c.2.s8 %v1244_v46  ;;  %2701 = vmatmul.bf16.vlgmr.msra.gmra.mxu3 %v4311_v54  ;;  %v1408_v8 = vunpack.c.3.s8 %v1244_v46 }
 0x122   :  { %v2639_v17 = vpack.c.bf16 %v2383_v53, %v2379_v52  ;;  %v2299_v4 = vcvt.s32.f32 %v1787_v57  ;;  %v2303_v0 = vcvt.s32.f32 %v1791_v58  ;;  %v1157_v1 = vperm.slane %v4165_v45, 4 }
 0x123   :  { %2728 = vmatpush.bf16.msrb.mxu1 %v2547_v11  ;;  %v2448_v9 = vpack.c.bf16 %v2000_v3, %v1996_v55  ;;  %v1916_v10 = vcvt.s32.f32 %v1404_v56  ;;  %v1191_v12 = vperm.slane %v4167_v48, 4  ;;  %v1920_v15 = vcvt.s32.f32 %v1408_v8 }
 0x124   :  { %2749 = vmatpush.bf16.msrb.mxu3 %v2639_v17  ;;  %v2599_v5 = vpack.c.bf16 %v2303_v0, %v2299_v4  ;;  %v1859_v60 = vunpack.c.0.s8 %v1359_v36  ;;  %v1863_v16 = vunpack.c.1.s8 %v1359_v36  ;;  %v1476_v6 = vunpack.c.0.s8 %v1264_v39 }
 0x125   :  { %v1480_v61 = vunpack.c.1.s8 %v1264_v39  ;;  %v1779_v18 = vunpack.c.0.s8 %v1339_v31  ;;  %v1783_v20 = vunpack.c.1.s8 %v1339_v31  ;;  %v2408_v21 = vpack.c.bf16 %v1920_v15, %v1916_v10  ;;  %v1240_v31 = vld [vmem:[#allocation13 + $0x28] sm:$0xff] }
 0x126   :  { %2737 = vmatpush.bf16.msrb.mxu2 %v2599_v5  ;;  %v2371_v23 = vcvt.s32.f32 %v1859_v60  ;;  %v2375_v62 = vcvt.s32.f32 %v1863_v16  ;;  %v1396_v27 = vunpack.c.0.s8 %v1244_v46  ;;  %v1988_v28 = vcvt.s32.f32 %v1476_v6  ;;  %v4328_v60 = vld [vmem:[#allocation13 + $0x3a0] sm:$0xff] }
 0x127   :  { %2777 = vmatpush.bf16.msra.mxu1 %v2448_v9  ;;  %v1992_v25 = vcvt.s32.f32 %v1480_v61  ;;  %v2291_v26 = vcvt.s32.f32 %v1779_v18  ;;  %v2295_v2 = vcvt.s32.f32 %v1783_v20  ;;  %2765 = vmatpush.bf16.msra.mxu0 %v2408_v21  ;;  %v1400_v32 = vunpack.c.1.s8 %v1244_v46 }
 0x128   :  { %v2635_v7 = vpack.c.bf16 %v2375_v62, %v2371_v23  ;;  %v1908_v63 = vcvt.s32.f32 %v1396_v27  ;;  %v1851_v34 = vunpack.c.2.s8 %v1355_v22  ;;  %v1855_v33 = vunpack.c.3.s8 %v1355_v22 }
 0x129   :  { %v2444_v36 = vpack.c.bf16 %v1992_v25, %v1988_v28  ;;  %v2595_v37 = vpack.c.bf16 %v2295_v2, %v2291_v26  ;;  %v1468_v38 = vunpack.c.2.s8 %v1260_v19  ;;  %v1912_v29 = vcvt.s32.f32 %v1400_v32  ;;  %v1256_v32 = vld [vmem:[#allocation13 + $0xa8] sm:$0xff] }
 0x12a   :  { %2750 = vmatpush.bf16.msrb.mxu3 %v2635_v7  ;;  %v2363_v30 = vcvt.s32.f32 %v1851_v34  ;;  %v1472_v35 = vunpack.c.3.s8 %v1260_v19  ;;  %v1158_v41 = vperm.slane %v4165_v45, 5  ;;  %v2367_v43 = vcvt.s32.f32 %v1855_v33  ;;  %v1331_v33 = vld [vmem:[#allocation13 + $0x300] sm:$0xff] }
 0x12b   :  { %v1048_v39 = vpop.f32.mrf.mxu0  ;;  %2778 = vmatpush.bf16.msra.mxu1 %v2444_v36  ;;  %2738 = vmatpush.bf16.msrb.mxu2 %v2595_v37  ;;  %v1980_v42 = vcvt.s32.f32 %v1468_v38  ;;  %v1192_v44 = vperm.slane %v4167_v48, 5  ;;  %v1771_v46 = vunpack.c.2.s8 %v4316_v14  ;;  %v2404_v49 = vpack.c.bf16 %v1912_v29, %v1908_v63 }
 0x12c   :  { %v1062_v40 = vpop.f32.mrf.mxu1  ;;  %v1984_v59 = vcvt.s32.f32 %v1472_v35  ;;  %v1775_v50 = vunpack.c.3.s8 %v4316_v14  ;;  %v2631_v52 = vpack.c.bf16 %v2367_v43, %v2363_v30  ;;  %v1388_v57 = vunpack.c.2.s8 %v1240_v31  ;;  %v1236_v43 = vld [vmem:[#allocation13 + $0x8] sm:$0xff] }
 0x12d   :  { %v1063_v47 = vadd.f32 %v1062_v40, %v1048_v39  ;;  %v2283_v53 = vcvt.s32.f32 %v1771_v46  ;;  %v1392_v58 = vunpack.c.3.s8 %v1240_v31  ;;  %2766 = vmatpush.bf16.msra.mxu0 %v2404_v49  ;;  %v1843_v56 = vunpack.c.0.s8 %v1355_v22 }
 0x12e   :  { %v2440_v55 = vpack.c.bf16 %v1984_v59, %v1980_v42  ;;  %v2287_v3 = vcvt.s32.f32 %v1775_v50  ;;  %2751 = vmatpush.bf16.msrb.mxu3 %v2631_v52  ;;  %v1900_v17 = vcvt.s32.f32 %v1388_v57  ;;  %v1847_v0 = vunpack.c.1.s8 %v1355_v22 }
 0x12f   :  { %v1173_v11 = vmul.f32 %v1157_v1, %v1063_v47  ;;  %v1904_v4 = vcvt.s32.f32 %v1392_v58  ;;  %v1460_v8 = vunpack.c.0.s8 %v1260_v19  ;;  %v2355_v5 = vcvt.s32.f32 %v1843_v56 }
 0x130   :  { %2779 = vmatpush.bf16.msra.mxu1 %v2440_v55  ;;  %v2591_v10 = vpack.c.bf16 %v2287_v3, %v2283_v53  ;;  %v1464_v15 = vunpack.c.1.s8 %v1260_v19  ;;  %v2359_v6 = vcvt.s32.f32 %v1847_v0  ;;  %v1763_v18 = vunpack.c.0.s8 %v4316_v14 }
 0x131   :  { %v4326_v9 = vadd.f32 %v1191_v12, %v1173_v11  ;;  %v2400_v16 = vpack.c.bf16 %v1904_v4, %v1900_v17  ;;  %v1972_v61 = vcvt.s32.f32 %v1460_v8  ;;  %v1767_v62 = vunpack.c.1.s8 %v4316_v14 }
 0x132   :  { %2739 = vmatpush.bf16.msrb.mxu2 %v2591_v10  ;;  %v1976_v23 = vcvt.s32.f32 %v1464_v15  ;;  %v1380_v27 = vunpack.c.0.s8 %v1240_v31  ;;  %v2627_v19 = vpack.c.bf16 %v2359_v6, %v2355_v5  ;;  %v2275_v26 = vcvt.s32.f32 %v1763_v18 }
 0x133   :  { %v1223_v20 = vmax.f32 %v4326_v9, 0.0  ;;  %v1076_v21 = vpop.f32.mrf.mxu2  ;;  %v1050_v22 = vpop.f32.mrf.mxu0  ;;  %2767 = vmatpush.bf16.msra.mxu0 %v2400_v16  ;;  %v1384_v2 = vunpack.c.1.s8 %v1240_v31  ;;  %v1835_v7 = vunpack.c.2.s8 %v4328_v60  ;;  %v2279_v37 = vcvt.s32.f32 %v1767_v62 }
 0x134   :  { %v1090_v28 = vpop.f32.mrf.mxu3  ;;  %v1064_v25 = vpop.f32.mrf.mxu1  ;;  %v2436_v36 = vpack.c.bf16 %v1976_v23, %v1972_v61  ;;  %2752 = vmatpush.bf16.msrb.mxu3 %v2627_v19  ;;  %v1892_v38 = vcvt.s32.f32 %v1380_v27  ;;  %v1839_v14 = vunpack.c.3.s8 %v4328_v60  ;;  %v1452_v40 = vunpack.c.2.s8 %v1256_v32 }
 0x135   :  { %v1091_v63 = vadd.f32 %v1090_v28, %v1076_v21  ;;  %v1065_v34 = vadd.f32 %v1064_v25, %v1050_v22  ;;  %v1896_v39 = vcvt.s32.f32 %v1384_v2  ;;  %v2347_v29 = vcvt.s32.f32 %v1835_v7  ;;  %v1312_v2 = vld [vmem:[#allocation13 + $0x268] sm:$0xff] }
 0x136   :  { %2780 = vmatpush.bf16.msra.mxu1 %v2436_v36  ;;  %v2587_v31 = vpack.c.bf16 %v2279_v37, %v2275_v26  ;;  %v2351_v46 = vcvt.s32.f32 %v1839_v14  ;;  %v1456_v47 = vunpack.c.3.s8 %v1256_v32  ;;  %v1755_v49 = vunpack.c.2.s8 %v1331_v33 }
 0x137   :  { %v1174_v30 = vmul.f32 %v1158_v41, %v1091_v63  ;;  %v1181_v35 = vmul.f32 %v1157_v1, %v1065_v34  ;;  %v2396_v42 = vpack.c.bf16 %v1896_v39, %v1892_v38  ;;  %v1964_v52 = vcvt.s32.f32 %v1452_v40 }
 0x138   :  { %2740 = vmatpush.bf16.msrb.mxu2 %v2587_v31  ;;  %v1759_v53 = vunpack.c.3.s8 %v1331_v33  ;;  %v2623_v1 = vpack.c.bf16 %v2351_v46, %v2347_v29  ;;  %v1968_v57 = vcvt.s32.f32 %v1456_v47  ;;  %v2267_v58 = vcvt.s32.f32 %v1755_v49 }
 0x139   :  { %v4341_v59 = vadd.f32 %v1192_v44, %v1174_v30  ;;  %v1215_v50 = vadd.f32 %v1191_v12, %v1181_v35  ;;  %2768 = vmatpush.bf16.msra.mxu0 %v2396_v42  ;;  %v1372_v11 = vunpack.c.2.s8 %v1236_v43  ;;  %v1376_v4 = vunpack.c.3.s8 %v1236_v43  ;;  %v1252_v30 = vld [vmem:[#allocation13 + $0x88] sm:$0xff] }
 0x13a   :  { %v2271_v17 = vcvt.s32.f32 %v1759_v53  ;;  %2753 = vmatpush.bf16.msrb.mxu3 %v2623_v1  ;;  %v2432_v0 = vpack.c.bf16 %v1968_v57, %v1964_v52  ;;  %v1827_v12 = vunpack.c.0.s8 %v4328_v60  ;;  %v1831_v10 = vunpack.c.1.s8 %v4328_v60  ;;  %v1280_v60 = vld [vmem:[#allocation13 + $0x168] sm:$0xff] }
 0x13b   :  { %v1224_v55 = vmax.f32 %v4341_v59, 0.0  ;;  %v1231_v3 = vmax.f32 %v1215_v50, 0.0  ;;  %v1078_v56 = vpop.f32.mrf.mxu2  ;;  %v1884_v9 = vcvt.s32.f32 %v1372_v11  ;;  %v1888_v6 = vcvt.s32.f32 %v1376_v4 }
 0x13c   :  { %v1092_v8 = vpop.f32.mrf.mxu3  ;;  %v2583_v16 = vpack.c.bf16 %v2271_v17, %v2267_v58  ;;  %2781 = vmatpush.bf16.msra.mxu1 %v2432_v0  ;;  %v2339_v61 = vcvt.s32.f32 %v1827_v12  ;;  %v2343_v18 = vcvt.s32.f32 %v1831_v10  ;;  %v1444_v21 = vunpack.c.0.s8 %v1256_v32 }
 0x13d   :  { %v4348_v5 = vpack.c.bf16 %v1231_v3, %v1223_v20  ;;  %v1093_v15 = vadd.f32 %v1092_v8, %v1078_v56  ;;  %v1448_v22 = vunpack.c.1.s8 %v1256_v32  ;;  %v2392_v62 = vpack.c.bf16 %v1888_v6, %v1884_v9  ;;  %v4358_v8 = vld [vmem:[#allocation13 + $0x1e8] sm:$0xff] }
 0x13e   :  { %2741 = vmatpush.bf16.msrb.mxu2 %v2583_v16  ;;  %v1747_v27 = vunpack.c.0.s8 %v1331_v33  ;;  %v1751_v28 = vunpack.c.1.s8 %v1331_v33  ;;  %v2619_v20 = vpack.c.bf16 %v2343_v18, %v2339_v61  ;;  %v1956_v25 = vcvt.s32.f32 %v1444_v21  ;;  %v1328_v16 = vld [vmem:[#allocation13 + $0x2e8] sm:$0xff] }
 0x13f   :  { %v1182_v23 = vmul.f32 %v1158_v41, %v1093_v15  ;;  %2715 = vmatmul.bf16.vlgmr.msrb.gmra.mxu0 %v4348_v5  ;;  %v1960_v19 = vcvt.s32.f32 %v1448_v22  ;;  %v1364_v26 = vunpack.c.0.s8 %v1236_v43  ;;  %v1368_v45 = vunpack.c.1.s8 %v1236_v43  ;;  %v1347_v41 = vld [vmem:[#allocation13 + $0x380] sm:$0xff]  ;;  %v1276_v22 = vld [vmem:[#allocation13 + $0x148] sm:$0xff] }
 0x140   :  { %2769 = vmatpush.bf16.msra.mxu0 %v2392_v62  ;;  %v2259_v32 = vcvt.s32.f32 %v1747_v27  ;;  %v2263_v63 = vcvt.s32.f32 %v1751_v28  ;;  %2754 = vmatpush.bf16.msrb.mxu3 %v2619_v20  ;;  %v1548_v37 = vunpack.c.2.s8 %v1280_v60  ;;  %v1552_v33 = vunpack.c.3.s8 %v1280_v60 }
 0x141   :  { %v1216_v7 = vadd.f32 %v1192_v44, %v1182_v23  ;;  %v2428_v34 = vpack.c.bf16 %v1960_v19, %v1956_v25  ;;  %v1876_v36 = vcvt.s32.f32 %v1364_v26  ;;  %v1880_v14 = vcvt.s32.f32 %v1368_v45  ;;  %v1308_v26 = vld [vmem:[#allocation13 + $0x248] sm:$0xff] }
 0x142   :  { %v2579_v39 = vpack.c.bf16 %v2263_v63, %v2259_v32  ;;  %v1676_v29 = vunpack.c.2.s8 %v1312_v2  ;;  %v2060_v35 = vcvt.s32.f32 %v1548_v37  ;;  %v2064_v31 = vcvt.s32.f32 %v1552_v33 }
 0x143   :  { %v1232_v38 = vmax.f32 %v1216_v7, 0.0  ;;  %2782 = vmatpush.bf16.msra.mxu1 %v2428_v34  ;;  %v1680_v48 = vunpack.c.3.s8 %v1312_v2  ;;  %v1819_v44 = vunpack.c.2.s8 %v1347_v41  ;;  %v2388_v43 = vpack.c.bf16 %v1880_v14, %v1876_v36 }
 0x144   :  { %2742 = vmatpush.bf16.msrb.mxu2 %v2579_v39  ;;  %v2188_v42 = vcvt.s32.f32 %v1676_v29  ;;  %v1823_v46 = vunpack.c.3.s8 %v1347_v41  ;;  %v2480_v47 = vpack.c.bf16 %v2064_v31, %v2060_v35  ;;  %v1436_v50 = vunpack.c.2.s8 %v1252_v30  ;;  %v4366_v31 = vld [vmem:[#allocation11] sm:$0xff] }
 0x145   :  { %v4355_v40 = vpack.c.bf16 %v1232_v38, %v1224_v55  ;;  %v2192_v49 = vcvt.s32.f32 %v1680_v48  ;;  %v2331_v59 = vcvt.s32.f32 %v1819_v44  ;;  %2770 = vmatpush.bf16.msra.mxu0 %v2388_v43  ;;  %v1440_v53 = vunpack.c.3.s8 %v1252_v30 }
 0x146   :  { %v2335_v52 = vcvt.s32.f32 %v1823_v46  ;;  %v1540_v1 = vunpack.c.0.s8 %v1280_v60  ;;  %v1544_v57 = vunpack.c.1.s8 %v1280_v60  ;;  %v1948_v11 = vcvt.s32.f32 %v1436_v50 }
 0x147   :  { %2729 = vmatmul.bf16.vlgmr.msrb.gmra.mxu1 %v4355_v40  ;;  %v2544_v58 = vpack.c.bf16 %v2192_v49, %v2188_v42  ;;  %v1668_v55 = vunpack.c.0.s8 %v1312_v2  ;;  %v1672_v3 = vunpack.c.1.s8 %v1312_v2  ;;  %v1952_v17 = vcvt.s32.f32 %v1440_v53 }
 0x148   :  { %2791 = vmatpush.bf16.msra.mxu2 %v2480_v47  ;;  %v2615_v56 = vpack.c.bf16 %v2335_v52, %v2331_v59  ;;  %v2052_v4 = vcvt.s32.f32 %v1540_v1  ;;  %v2056_v0 = vcvt.s32.f32 %v1544_v57  ;;  %v1811_v10 = vunpack.c.0.s8 %v1347_v41 }
 0x149   :  { %2819 = vmatpush.bf16.msrb.mxu0 %v2544_v58  ;;  %v2180_v9 = vcvt.s32.f32 %v1668_v55  ;;  %v2184_v12 = vcvt.s32.f32 %v1672_v3  ;;  %v1815_v15 = vunpack.c.1.s8 %v1347_v41  ;;  %v2424_v6 = vpack.c.bf16 %v1952_v17, %v1948_v11  ;;  %v4371_v55 = vld [vmem:[#allocation13 + $0x1c8] sm:$0xff] }
 0x14a   :  { %2755 = vmatpush.bf16.msrb.mxu3 %v2615_v56  ;;  %v2476_v61 = vpack.c.bf16 %v2056_v0, %v2052_v4  ;;  %v1428_v18 = vunpack.c.0.s8 %v1252_v30  ;;  %v1432_v21 = vunpack.c.1.s8 %v1252_v30  ;;  %v2323_v62 = vcvt.s32.f32 %v1811_v10  ;;  %v4363_v30 = vld [vmem:[#allocation10] sm:$0xff]  ;;  %v1324_v10 = vld [vmem:[#allocation13 + $0x2c8] sm:$0xff] }
 0x14b   :  { %v2540_v23 = vpack.c.bf16 %v2184_v12, %v2180_v9  ;;  %v2327_v27 = vcvt.s32.f32 %v1815_v15  ;;  %v1612_v28 = vunpack.c.2.s8 %v4358_v8  ;;  %2783 = vmatpush.bf16.msra.mxu1 %v2424_v6  ;;  %v1616_v25 = vunpack.c.3.s8 %v4358_v8 }
 0x14c   :  { %2792 = vmatpush.bf16.msra.mxu2 %v2476_v61  ;;  %v1940_v60 = vcvt.s32.f32 %v1428_v18  ;;  %v1944_v20 = vcvt.s32.f32 %v1432_v21  ;;  %v1740_v19 = vunpack.c.2.s8 %v1328_v16  ;;  %v1744_v32 = vunpack.c.3.s8 %v1328_v16 }
 0x14d   :  { %2820 = vmatpush.bf16.msrb.mxu0 %v2540_v23  ;;  %v2611_v2 = vpack.c.bf16 %v2327_v27, %v2323_v62  ;;  %v2124_v7 = vcvt.s32.f32 %v1612_v28  ;;  %v1532_v63 = vunpack.c.2.s8 %v1276_v22  ;;  %v2128_v41 = vcvt.s32.f32 %v1616_v25  ;;  %v4378_v62 = vld [vmem:[#allocation13 + $0x128] sm:$0xff] }
 0x14e   :  { %v2420_v45 = vpack.c.bf16 %v1944_v20, %v1940_v60  ;;  %v2252_v34 = vcvt.s32.f32 %v1740_v19  ;;  %v1536_v36 = vunpack.c.3.s8 %v1276_v22  ;;  %v2256_v37 = vcvt.s32.f32 %v1744_v32  ;;  %v1304_v25 = vld [vmem:[#allocation13 + $0x228] sm:$0xff] }
 0x14f   :  { %2771 = vmatmul.bf16.vlgmr.msra.gmra.mxu0 %v4256_v51  ;;  %2756 = vmatpush.bf16.msrb.mxu3 %v2611_v2  ;;  %v2044_v33 = vcvt.s32.f32 %v1532_v63  ;;  %v1660_v38 = vunpack.c.2.s8 %v1308_v26  ;;  %v1664_v39 = vunpack.c.3.s8 %v1308_v26  ;;  %v2512_v14 = vpack.c.bf16 %v2128_v41, %v2124_v7 }
 0x150   :  { %2784 = vmatpush.bf16.msra.mxu1 %v2420_v45  ;;  %v2048_v29 = vcvt.s32.f32 %v1536_v36  ;;  %v1159_v35 = vperm.slane %v4363_v30, 6  ;;  %v1193_v48 = vperm.slane %v4366_v31, 6  ;;  %v2576_v44 = vpack.c.bf16 %v2256_v37, %v2252_v34 }
 0x151   :  { %v2172_v43 = vcvt.s32.f32 %v1660_v38  ;;  %v2176_v42 = vcvt.s32.f32 %v1664_v39  ;;  %v1604_v46 = vunpack.c.0.s8 %v4358_v8  ;;  %v1608_v59 = vunpack.c.1.s8 %v4358_v8 }
 0x152   :  { %v2472_v47 = vpack.c.bf16 %v2048_v29, %v2044_v33  ;;  %v1732_v50 = vunpack.c.0.s8 %v1328_v16  ;;  %v1736_v52 = vunpack.c.1.s8 %v1328_v16  ;;  %v1524_v58 = vunpack.c.0.s8 %v1276_v22 }
 0x153   :  { %2805 = vmatpush.bf16.msra.mxu3 %v2512_v14  ;;  %v1104_v49 = vpop.f32.mrf.mxu0  ;;  %v2536_v53 = vpack.c.bf16 %v2176_v42, %v2172_v43  ;;  %v2116_v57 = vcvt.s32.f32 %v1604_v46  ;;  %v1528_v11 = vunpack.c.1.s8 %v1276_v22  ;;  %v2120_v56 = vcvt.s32.f32 %v1608_v59 }
 0x154   :  { %2833 = vmatpush.bf16.msrb.mxu1 %v2576_v44  ;;  %v1118_v1 = vpop.f32.mrf.mxu1  ;;  %2793 = vmatpush.bf16.msra.mxu2 %v2472_v47  ;;  %v2244_v17 = vcvt.s32.f32 %v1732_v50  ;;  %v2248_v4 = vcvt.s32.f32 %v1736_v52  ;;  %v2036_v0 = vcvt.s32.f32 %v1524_v58  ;;  %v1652_v12 = vunpack.c.0.s8 %v1308_v26 }
 0x155   :  { %v1119_v3 = vadd.f32 %v1118_v1, %v1104_v49  ;;  %2821 = vmatpush.bf16.msrb.mxu0 %v2536_v53  ;;  %v2040_v9 = vcvt.s32.f32 %v1528_v11  ;;  %v1656_v8 = vunpack.c.1.s8 %v1308_v26  ;;  %v2508_v16 = vpack.c.bf16 %v2120_v56, %v2116_v57 }
 0x156   :  { %v2572_v6 = vpack.c.bf16 %v2248_v4, %v2244_v17  ;;  %v1596_v61 = vunpack.c.2.s8 %v4371_v55  ;;  %v2164_v21 = vcvt.s32.f32 %v1652_v12  ;;  %v1600_v23 = vunpack.c.3.s8 %v4371_v55 }
 0x157   :  { %v1175_v15 = vmul.f32 %v1159_v35, %v1119_v3  ;;  %2785 = vmatmul.bf16.vlgmr.msra.gmra.mxu1 %v4277_v13  ;;  %v2468_v18 = vpack.c.bf16 %v2040_v9, %v2036_v0  ;;  %v2168_v22 = vcvt.s32.f32 %v1656_v8  ;;  %2806 = vmatpush.bf16.msra.mxu3 %v2508_v16  ;;  %v1724_v60 = vunpack.c.2.s8 %v1324_v10 }
 0x158   :  { %2834 = vmatpush.bf16.msrb.mxu1 %v2572_v6  ;;  %v2108_v28 = vcvt.s32.f32 %v1596_v61  ;;  %v1728_v20 = vunpack.c.3.s8 %v1324_v10  ;;  %v2112_v26 = vcvt.s32.f32 %v1600_v23  ;;  %v1160_v2 = vperm.slane %v4363_v30, 7 }
 0x159   :  { %v4382_v27 = vadd.f32 %v1193_v48, %v1175_v15  ;;  %2794 = vmatpush.bf16.msra.mxu2 %v2468_v18  ;;  %v2532_v19 = vpack.c.bf16 %v2168_v22, %v2164_v21  ;;  %v1194_v7 = vperm.slane %v4366_v31, 7  ;;  %v2236_v63 = vcvt.s32.f32 %v1724_v60  ;;  %v1288_v15 = vld [vmem:[#allocation13 + $0x1a8] sm:$0xff] }
 0x15a   :  { %v2240_v45 = vcvt.s32.f32 %v1728_v20  ;;  %v1516_v34 = vunpack.c.2.s8 %v4378_v62  ;;  %v2504_v37 = vpack.c.bf16 %v2112_v26, %v2108_v28  ;;  %v1520_v38 = vunpack.c.3.s8 %v4378_v62  ;;  %v1320_v18 = vld [vmem:[#allocation13 + $0x2a8] sm:$0xff] }
 0x15b   :  { %v1225_v32 = vmax.f32 %v4382_v27, 0.0  ;;  %v1132_v41 = vpop.f32.mrf.mxu2  ;;  %v1106_v36 = vpop.f32.mrf.mxu0  ;;  %2822 = vmatpush.bf16.msrb.mxu0 %v2532_v19  ;;  %v1644_v39 = vunpack.c.2.s8 %v1304_v25  ;;  %v1648_v14 = vunpack.c.3.s8 %v1304_v25  ;;  %v1588_v50 = vunpack.c.0.s8 %v4371_v55  ;;  %v1268_v60 = vld [vmem:[#allocation13 + $0x108] sm:$0xff] }
 0x15c   :  { %v1146_v33 = vpop.f32.mrf.mxu3  ;;  %v1120_v29 = vpop.f32.mrf.mxu1  ;;  %v2568_v44 = vpack.c.bf16 %v2240_v45, %v2236_v63  ;;  %v2028_v42 = vcvt.s32.f32 %v1516_v34  ;;  %2807 = vmatpush.bf16.msra.mxu3 %v2504_v37  ;;  %v2032_v47 = vcvt.s32.f32 %v1520_v38  ;;  %v1592_v1 = vunpack.c.1.s8 %v4371_v55 }
 0x15d   :  { %v1147_v43 = vadd.f32 %v1146_v33, %v1132_v41  ;;  %v1121_v46 = vadd.f32 %v1120_v29, %v1106_v36  ;;  %v2156_v49 = vcvt.s32.f32 %v1644_v39  ;;  %v2160_v59 = vcvt.s32.f32 %v1648_v14 }
 0x15e   :  { %2835 = vmatpush.bf16.msrb.mxu1 %v2568_v44  ;;  %v1716_v57 = vunpack.c.0.s8 %v1324_v10  ;;  %v2464_v58 = vpack.c.bf16 %v2032_v47, %v2028_v42  ;;  %v2100_v3 = vcvt.s32.f32 %v1588_v50  ;;  %v1720_v56 = vunpack.c.1.s8 %v1324_v10 }
 0x15f   :  { %v1176_v52 = vmul.f32 %v1160_v2, %v1147_v43  ;;  %v1183_v53 = vmul.f32 %v1159_v35, %v1121_v46  ;;  %v2528_v11 = vpack.c.bf16 %v2160_v59, %v2156_v49  ;;  %v2104_v0 = vcvt.s32.f32 %v1592_v1 }
 0x160   :  { %v2228_v9 = vcvt.s32.f32 %v1716_v57  ;;  %2795 = vmatpush.bf16.msra.mxu2 %v2464_v58  ;;  %v2232_v12 = vcvt.s32.f32 %v1720_v56  ;;  %v1508_v35 = vunpack.c.0.s8 %v4378_v62  ;;  %v1512_v55 = vunpack.c.1.s8 %v4378_v62 }
 0x161   :  { %v4397_v17 = vadd.f32 %v1194_v7, %v1176_v52  ;;  %v1217_v4 = vadd.f32 %v1193_v48, %v1183_v53  ;;  %2823 = vmatpush.bf16.msrb.mxu0 %v2528_v11  ;;  %v1636_v8 = vunpack.c.0.s8 %v1304_v25  ;;  %v2500_v6 = vpack.c.bf16 %v2104_v0, %v2100_v3  ;;  %v1344_v3 = vld [vmem:[#allocation13 + $0x368] sm:$0xff] }
 0x162   :  { %v1640_v61 = vunpack.c.1.s8 %v1304_v25  ;;  %v2564_v22 = vpack.c.bf16 %v2232_v12, %v2228_v9  ;;  %v2020_v48 = vcvt.s32.f32 %v1508_v35  ;;  %v2024_v23 = vcvt.s32.f32 %v1512_v55  ;;  %v1300_v25 = vld [vmem:[#allocation13 + $0x208] sm:$0xff]  ;;  %v1249_v35 = vld [vmem:[#allocation13 + $0x70] sm:$0xff] }
 0x163   :  { %v1226_v10 = vmax.f32 %v4397_v17, 0.0  ;;  %v1233_v16 = vmax.f32 %v1217_v4, 0.0  ;;  %v1134_v21 = vpop.f32.mrf.mxu2  ;;  %v2148_v27 = vcvt.s32.f32 %v1636_v8  ;;  %2808 = vmatpush.bf16.msra.mxu3 %v2500_v6  ;;  %v1580_v62 = vunpack.c.2.s8 %v1288_v15  ;;  %v1284_v6 = vld [vmem:[#allocation13 + $0x188] sm:$0xff] }
 0x164   :  { %v1148_v28 = vpop.f32.mrf.mxu3  ;;  %v2152_v19 = vcvt.s32.f32 %v1640_v61  ;;  %v1584_v26 = vunpack.c.3.s8 %v1288_v15  ;;  %2836 = vmatpush.bf16.msrb.mxu1 %v2564_v22  ;;  %v2460_v63 = vpack.c.bf16 %v2024_v23, %v2020_v48  ;;  %v1708_v45 = vunpack.c.2.s8 %v1320_v18  ;;  %v1316_v48 = vld [vmem:[#allocation13 + $0x288] sm:$0xff] }
 0x165   :  { %v4404_v20 = vpack.c.bf16 %v1233_v16, %v1225_v32  ;;  %v1712_v41 = vunpack.c.3.s8 %v1320_v18  ;;  %v1149_v34 = vadd.f32 %v1148_v28, %v1134_v21  ;;  %v2092_v37 = vcvt.s32.f32 %v1580_v62 }
 0x166   :  { %v2524_v36 = vpack.c.bf16 %v2152_v19, %v2148_v27  ;;  %v2096_v33 = vcvt.s32.f32 %v1584_v26  ;;  %v1500_v38 = vunpack.c.2.s8 %v1268_v60  ;;  %2796 = vmatpush.bf16.msra.mxu2 %v2460_v63  ;;  %v2220_v39 = vcvt.s32.f32 %v1708_v45 }
 0x167   :  { %2743 = vmatmul.bf16.vlgmr.msrb.gmra.mxu2 %v4404_v20  ;;  %v2224_v32 = vcvt.s32.f32 %v1712_v41  ;;  %v1184_v14 = vmul.f32 %v1160_v2, %v1149_v34  ;;  %v1504_v29 = vunpack.c.3.s8 %v1268_v60  ;;  %v1628_v42 = vunpack.c.2.s8 %v1300_v25 }
 0x168   :  { %2824 = vmatpush.bf16.msrb.mxu0 %v2524_v36  ;;  %v2496_v44 = vpack.c.bf16 %v2096_v33, %v2092_v37  ;;  %v2012_v43 = vcvt.s32.f32 %v1500_v38  ;;  %v1632_v46 = vunpack.c.3.s8 %v1300_v25  ;;  %v1572_v50 = vunpack.c.0.s8 %v1288_v15 }
 0x169   :  { %v2560_v47 = vpack.c.bf16 %v2224_v32, %v2220_v39  ;;  %v1218_v49 = vadd.f32 %v1194_v7, %v1184_v14  ;;  %v2016_v59 = vcvt.s32.f32 %v1504_v29  ;;  %v2140_v52 = vcvt.s32.f32 %v1628_v42 }
 0x16a   :  { %2809 = vmatpush.bf16.msra.mxu3 %v2496_v44  ;;  %v2144_v53 = vcvt.s32.f32 %v1632_v46  ;;  %v1576_v1 = vunpack.c.1.s8 %v1288_v15  ;;  %v1700_v57 = vunpack.c.0.s8 %v1320_v18  ;;  %v2084_v58 = vcvt.s32.f32 %v1572_v50  ;;  %v1360_v50 = vld [vmem:[#allocation13 + $0x3e8] sm:$0xff] }
 0x16b   :  { %2837 = vmatpush.bf16.msrb.mxu1 %v2560_v47  ;;  %v1234_v30 = vmax.f32 %v1218_v49, 0.0  ;;  %v2456_v2 = vpack.c.bf16 %v2016_v59, %v2012_v43  ;;  %v1704_v11 = vunpack.c.1.s8 %v1320_v18  ;;  %v1492_v0 = vunpack.c.0.s8 %v1268_v60 }
 0x16c   :  { %v2520_v56 = vpack.c.bf16 %v2144_v53, %v2140_v52  ;;  %v2088_v17 = vcvt.s32.f32 %v1576_v1  ;;  %v2212_v4 = vcvt.s32.f32 %v1700_v57  ;;  %v1496_v7 = vunpack.c.1.s8 %v1268_v60 }
 0x16d   :  { %v4411_v9 = vpack.c.bf16 %v1234_v30, %v1226_v10  ;;  %2797 = vmatpush.bf16.msra.mxu2 %v2456_v2  ;;  %v2216_v31 = vcvt.s32.f32 %v1704_v11  ;;  %v1620_v12 = vunpack.c.0.s8 %v1300_v25  ;;  %v2004_v8 = vcvt.s32.f32 %v1492_v0  ;;  %v1265_v30 = vld [vmem:[#allocation13 + $0xf0] sm:$0xff] }
 0x16e   :  { %2825 = vmatpush.bf16.msrb.mxu0 %v2520_v56  ;;  %v2492_v55 = vpack.c.bf16 %v2088_v17, %v2084_v58  ;;  %v1624_v15 = vunpack.c.1.s8 %v1300_v25  ;;  %v1804_v16 = vunpack.c.2.s8 %v1344_v3  ;;  %v2008_v18 = vcvt.s32.f32 %v1496_v7  ;;  %v1340_v56 = vld [vmem:[#allocation13 + $0x348] sm:$0xff]  ;;  %v1245_v7 = vld [vmem:[#allocation13 + $0x50] sm:$0xff] }
 0x16f   :  { %v2556_v61 = vpack.c.bf16 %v2216_v31, %v2212_v4  ;;  %v2132_v21 = vcvt.s32.f32 %v1620_v12  ;;  %v1808_v22 = vunpack.c.3.s8 %v1344_v3  ;;  %2757 = vmatmul.bf16.vlgmr.msrb.gmra.mxu3 %v4411_v9  ;;  %v1421_v27 = vunpack.c.2.s8 %v1249_v35 }
 0x170   :  { %2810 = vmatpush.bf16.msra.mxu3 %v2492_v55  ;;  %v2136_v10 = vcvt.s32.f32 %v1624_v15  ;;  %v2316_v23 = vcvt.s32.f32 %v1804_v16  ;;  %v1425_v28 = vunpack.c.3.s8 %v1249_v35  ;;  %v2452_v60 = vpack.c.bf16 %v2008_v18, %v2004_v8 }
 0x171   :  { %2838 = vmatpush.bf16.msrb.mxu1 %v2556_v61  ;;  %v2320_v19 = vcvt.s32.f32 %v1808_v22  ;;  %v1564_v62 = vunpack.c.2.s8 %v1284_v6  ;;  %v1568_v26 = vunpack.c.3.s8 %v1284_v6  ;;  %v1933_v45 = vcvt.s32.f32 %v1421_v27 }
 0x172   :  { %v2516_v63 = vpack.c.bf16 %v2136_v10, %v2132_v21  ;;  %v1937_v41 = vcvt.s32.f32 %v1425_v28  ;;  %v1692_v34 = vunpack.c.2.s8 %v1316_v48  ;;  %2798 = vmatpush.bf16.msra.mxu2 %v2452_v60  ;;  %v1696_v33 = vunpack.c.3.s8 %v1316_v48 }
 0x173   :  { %v2608_v25 = vpack.c.bf16 %v2320_v19, %v2316_v23  ;;  %v2076_v36 = vcvt.s32.f32 %v1564_v62  ;;  %v2080_v37 = vcvt.s32.f32 %v1568_v26  ;;  %v1796_v32 = vunpack.c.0.s8 %v1344_v3 }
 0x174   :  { %2826 = vmatpush.bf16.msrb.mxu0 %v2516_v63  ;;  %v2417_v38 = vpack.c.bf16 %v1937_v41, %v1933_v45  ;;  %v2204_v39 = vcvt.s32.f32 %v1692_v34  ;;  %v1800_v14 = vunpack.c.1.s8 %v1344_v3  ;;  %v2208_v44 = vcvt.s32.f32 %v1696_v33 }
 0x175   :  { %v2488_v29 = vpack.c.bf16 %v2080_v37, %v2076_v36  ;;  %v1413_v43 = vunpack.c.0.s8 %v1249_v35  ;;  %v1417_v42 = vunpack.c.1.s8 %v1249_v35  ;;  %v2308_v46 = vcvt.s32.f32 %v1796_v32 }
 0x176   :  { %2847 = vmatpush.bf16.msrb.mxu2 %v2608_v25  ;;  %v2312_v47 = vcvt.s32.f32 %v1800_v14  ;;  %v1556_v49 = vunpack.c.0.s8 %v1284_v6  ;;  %v1560_v59 = vunpack.c.1.s8 %v1284_v6  ;;  %v2552_v52 = vpack.c.bf16 %v2208_v44, %v2204_v39  ;;  %v1261_v44 = vld [vmem:[#allocation13 + $0xd0] sm:$0xff] }
 0x177   :  { %2799 = vmatmul.bf16.vlgmr.msra.gmra.mxu2 %v4304_v24  ;;  %2811 = vmatpush.bf16.msra.mxu3 %v2488_v29  ;;  %v1925_v53 = vcvt.s32.f32 %v1413_v43  ;;  %v1929_v1 = vcvt.s32.f32 %v1417_v42  ;;  %v1684_v57 = vunpack.c.0.s8 %v1316_v48  ;;  %v1688_v3 = vunpack.c.1.s8 %v1316_v48 }
 0x178   :  { %2875 = vmatpush.bf16.msra.mxu0 %v2417_v38  ;;  %v2604_v2 = vpack.c.bf16 %v2312_v47, %v2308_v46  ;;  %v2068_v58 = vcvt.s32.f32 %v1556_v49  ;;  %v2072_v11 = vcvt.s32.f32 %v1560_v59  ;;  %2839 = vmatpush.bf16.msrb.mxu1 %v2552_v52  ;;  %v1868_v0 = vunpack.c.2.s8 %v1360_v50  ;;  %v1356_v38 = vld [vmem:[#allocation13 + $0x3c8] sm:$0xff] }
 0x179   :  { %2827 = vmatmul.bf16.vlgmr.msrb.gmra.mxu0 %v4348_v5  ;;  %v2413_v17 = vpack.c.bf16 %v1929_v1, %v1925_v53  ;;  %v2196_v4 = vcvt.s32.f32 %v1684_v57  ;;  %v1872_v31 = vunpack.c.3.s8 %v1360_v50  ;;  %v2200_v35 = vcvt.s32.f32 %v1688_v3  ;;  %v1336_v49 = vld [vmem:[#allocation13 + $0x328] sm:$0xff]  ;;  %v1241_v1 = vld [vmem:[#allocation13 + $0x30] sm:$0xff] }
 0x17a   :  { %2848 = vmatpush.bf16.msrb.mxu2 %v2604_v2  ;;  %v2484_v12 = vpack.c.bf16 %v2072_v11, %v2068_v58  ;;  %v1485_v55 = vunpack.c.2.s8 %v1265_v30  ;;  %v1489_v8 = vunpack.c.3.s8 %v1265_v30  ;;  %v2380_v15 = vcvt.s32.f32 %v1868_v0 }
 0x17b   :  { %v2384_v16 = vcvt.s32.f32 %v1872_v31  ;;  %v1788_v6 = vunpack.c.2.s8 %v1340_v56  ;;  %v1792_v61 = vunpack.c.3.s8 %v1340_v56  ;;  %v2548_v18 = vpack.c.bf16 %v2200_v35, %v2196_v4 }
 0x17c   :  { %2876 = vmatpush.bf16.msra.mxu0 %v2413_v17  ;;  %2812 = vmatpush.bf16.msra.mxu3 %v2484_v12  ;;  %v1997_v21 = vcvt.s32.f32 %v1485_v55  ;;  %v2001_v22 = vcvt.s32.f32 %v1489_v8  ;;  %v1405_v48 = vunpack.c.2.s8 %v1245_v7  ;;  %v1409_v28 = vunpack.c.3.s8 %v1245_v7 }
 0x17d   :  { %v2640_v10 = vpack.c.bf16 %v2384_v16, %v2380_v15  ;;  %v2300_v23 = vcvt.s32.f32 %v1788_v6  ;;  %v2304_v27 = vcvt.s32.f32 %v1792_v61  ;;  %2840 = vmatpush.bf16.msrb.mxu1 %v2548_v18  ;;  %v1860_v62 = vunpack.c.0.s8 %v1360_v50 }
 0x17e   :  { %v2449_v60 = vpack.c.bf16 %v2001_v22, %v1997_v21  ;;  %v1917_v19 = vcvt.s32.f32 %v1405_v48  ;;  %v1864_v26 = vunpack.c.1.s8 %v1360_v50  ;;  %v1921_v45 = vcvt.s32.f32 %v1409_v28 }
 0x17f   :  { %v2600_v63 = vpack.c.bf16 %v2304_v27, %v2300_v23  ;;  %v1477_v41 = vunpack.c.0.s8 %v1265_v30  ;;  %v1481_v34 = vunpack.c.1.s8 %v1265_v30  ;;  %v2372_v25 = vcvt.s32.f32 %v1860_v62  ;;  %2813 = vmatmul.bf16.vlgmr.msra.gmra.mxu3 %v4311_v54 }
 0x180   :  { %2861 = vmatpush.bf16.msrb.mxu3 %v2640_v10  ;;  %v2376_v36 = vcvt.s32.f32 %v1864_v26  ;;  %v1780_v37 = vunpack.c.0.s8 %v1340_v56  ;;  %v1784_v33 = vunpack.c.1.s8 %v1340_v56  ;;  %v2409_v39 = vpack.c.bf16 %v1921_v45, %v1917_v19  ;;  %2841 = vmatmul.bf16.vlgmr.msrb.gmra.mxu1 %v4355_v40  ;;  %v1257_v45 = vld [vmem:[#allocation13 + $0xb0] sm:$0xff] }
 0x181   :  { %2889 = vmatpush.bf16.msra.mxu1 %v2449_v60  ;;  %2849 = vmatpush.bf16.msrb.mxu2 %v2600_v63  ;;  %v1989_v32 = vcvt.s32.f32 %v1477_v41  ;;  %v1993_v14 = vcvt.s32.f32 %v1481_v34  ;;  %v1397_v29 = vunpack.c.0.s8 %v1245_v7  ;;  %v1401_v47 = vunpack.c.1.s8 %v1245_v7  ;;  %v1352_v60 = vld [vmem:[#allocation13 + $0x3a8] sm:$0xff] }
 0x182   :  { %v2636_v43 = vpack.c.bf16 %v2376_v36, %v2372_v25  ;;  %v2292_v42 = vcvt.s32.f32 %v1780_v37  ;;  %v2296_v46 = vcvt.s32.f32 %v1784_v33  ;;  %2877 = vmatpush.bf16.msra.mxu0 %v2409_v39  ;;  %v1852_v52 = vunpack.c.2.s8 %v1356_v38  ;;  %v1332_v37 = vld [vmem:[#allocation13 + $0x308] sm:$0xff] }
 0x183   :  { %v2445_v59 = vpack.c.bf16 %v1993_v14, %v1989_v32  ;;  %v1909_v50 = vcvt.s32.f32 %v1397_v29  ;;  %v1856_v53 = vunpack.c.3.s8 %v1356_v38  ;;  %v1913_v30 = vcvt.s32.f32 %v1401_v47  ;;  %v1237_v14 = vld [vmem:[#allocation13 + $0x10] sm:$0xff] }
 0x184   :  { %2862 = vmatpush.bf16.msrb.mxu3 %v2636_v43  ;;  %v2596_v57 = vpack.c.bf16 %v2296_v46, %v2292_v42  ;;  %v1469_v2 = vunpack.c.2.s8 %v1261_v44  ;;  %v1473_v58 = vunpack.c.3.s8 %v1261_v44  ;;  %v2364_v11 = vcvt.s32.f32 %v1852_v52 }
 0x185   :  { %2890 = vmatpush.bf16.msra.mxu1 %v2445_v59  ;;  %v2368_v3 = vcvt.s32.f32 %v1856_v53  ;;  %v1772_v56 = vunpack.c.2.s8 %v1336_v49  ;;  %v1776_v17 = vunpack.c.3.s8 %v1336_v49  ;;  %v2405_v4 = vpack.c.bf16 %v1913_v30, %v1909_v50 }
 0x186   :  { %2850 = vmatpush.bf16.msrb.mxu2 %v2596_v57  ;;  %v1981_v0 = vcvt.s32.f32 %v1469_v2  ;;  %v1985_v31 = vcvt.s32.f32 %v1473_v58  ;;  %v1389_v7 = vunpack.c.2.s8 %v1241_v1  ;;  %v1393_v8 = vunpack.c.3.s8 %v1241_v1 }
 0x187   :  { %v2632_v12 = vpack.c.bf16 %v2368_v3, %v2364_v11  ;;  %v2284_v35 = vcvt.s32.f32 %v1772_v56  ;;  %v2288_v55 = vcvt.s32.f32 %v1776_v17  ;;  %2878 = vmatpush.bf16.msra.mxu0 %v2405_v4  ;;  %v1844_v6 = vunpack.c.0.s8 %v1356_v38 }
 0x188   :  { %v2441_v15 = vpack.c.bf16 %v1985_v31, %v1981_v0  ;;  %v1901_v16 = vcvt.s32.f32 %v1389_v7  ;;  %v1848_v61 = vunpack.c.1.s8 %v1356_v38  ;;  %v1905_v21 = vcvt.s32.f32 %v1393_v8 }
 0x189   :  { %2863 = vmatpush.bf16.msrb.mxu3 %v2632_v12  ;;  %v2592_v18 = vpack.c.bf16 %v2288_v55, %v2284_v35  ;;  %v1461_v22 = vunpack.c.0.s8 %v1261_v44  ;;  %v1465_v48 = vunpack.c.1.s8 %v1261_v44  ;;  %v2356_v10 = vcvt.s32.f32 %v1844_v6 }
 0x18a   :  { %2891 = vmatpush.bf16.msra.mxu1 %v2441_v15  ;;  %v2360_v23 = vcvt.s32.f32 %v1848_v61  ;;  %v1764_v27 = vunpack.c.0.s8 %v1336_v49  ;;  %v1768_v28 = vunpack.c.1.s8 %v1336_v49  ;;  %v2401_v19 = vpack.c.bf16 %v1905_v21, %v1901_v16  ;;  %v1281_v15 = vld [vmem:[#allocation13 + $0x170] sm:$0xff] }
 0x18b   :  { %2851 = vmatpush.bf16.msrb.mxu2 %v2592_v18  ;;  %v1973_v62 = vcvt.s32.f32 %v1461_v22  ;;  %v1977_v26 = vcvt.s32.f32 %v1465_v48  ;;  %v1381_v63 = vunpack.c.0.s8 %v1241_v1  ;;  %v1385_v36 = vunpack.c.1.s8 %v1241_v1  ;;  %v1313_v21 = vld [vmem:[#allocation13 + $0x270] sm:$0xff] }
 0x18c   :  { %v2628_v41 = vpack.c.bf16 %v2360_v23, %v2356_v10  ;;  %v2276_v34 = vcvt.s32.f32 %v1764_v27  ;;  %v2280_v25 = vcvt.s32.f32 %v1768_v28  ;;  %2879 = vmatpush.bf16.msra.mxu0 %v2401_v19  ;;  %v1836_v39 = vunpack.c.2.s8 %v1352_v60  ;;  %v1348_v27 = vld [vmem:[#allocation13 + $0x388] sm:$0xff] }
 0x18d   :  { %v2437_v33 = vpack.c.bf16 %v1977_v26, %v1973_v62  ;;  %v1893_v38 = vcvt.s32.f32 %v1381_v63  ;;  %v1840_v32 = vunpack.c.3.s8 %v1352_v60  ;;  %v1897_v44 = vcvt.s32.f32 %v1385_v36  ;;  %v1253_v26 = vld [vmem:[#allocation13 + $0x90] sm:$0xff] }
 0x18e   :  { %2864 = vmatpush.bf16.msrb.mxu3 %v2628_v41  ;;  %v2588_v29 = vpack.c.bf16 %v2280_v25, %v2276_v34  ;;  %v1453_v43 = vunpack.c.2.s8 %v1257_v45  ;;  %v1457_v42 = vunpack.c.3.s8 %v1257_v45  ;;  %v2348_v46 = vcvt.s32.f32 %v1836_v39 }
 0x18f   :  { %2892 = vmatpush.bf16.msra.mxu1 %v2437_v33  ;;  %v2352_v47 = vcvt.s32.f32 %v1840_v32  ;;  %v1756_v49 = vunpack.c.2.s8 %v1332_v37  ;;  %v1760_v59 = vunpack.c.3.s8 %v1332_v37  ;;  %v2397_v50 = vpack.c.bf16 %v1897_v44, %v1893_v38 }
 0x190   :  { %2852 = vmatpush.bf16.msrb.mxu2 %v2588_v29  ;;  %v1965_v52 = vcvt.s32.f32 %v1453_v43  ;;  %v1969_v53 = vcvt.s32.f32 %v1457_v42  ;;  %v1373_v1 = vunpack.c.2.s8 %v1237_v14  ;;  %v1377_v58 = vunpack.c.3.s8 %v1237_v14 }
 0x191   :  { %v2624_v57 = vpack.c.bf16 %v2352_v47, %v2348_v46  ;;  %v2268_v30 = vcvt.s32.f32 %v1756_v49  ;;  %v2272_v2 = vcvt.s32.f32 %v1760_v59  ;;  %2880 = vmatpush.bf16.msra.mxu0 %v2397_v50  ;;  %v1828_v56 = vunpack.c.0.s8 %v1352_v60 }
 0x192   :  { %v2433_v11 = vpack.c.bf16 %v1969_v53, %v1965_v52  ;;  %v1885_v3 = vcvt.s32.f32 %v1373_v1  ;;  %v1832_v17 = vunpack.c.1.s8 %v1352_v60  ;;  %v1889_v0 = vcvt.s32.f32 %v1377_v58 }
 0x193   :  { %2865 = vmatpush.bf16.msrb.mxu3 %v2624_v57  ;;  %v2584_v4 = vpack.c.bf16 %v2272_v2, %v2268_v30  ;;  %v1445_v31 = vunpack.c.0.s8 %v1257_v45  ;;  %v1449_v7 = vunpack.c.1.s8 %v1257_v45  ;;  %v2340_v12 = vcvt.s32.f32 %v1828_v56 }
 0x194   :  { %2893 = vmatpush.bf16.msra.mxu1 %v2433_v11  ;;  %v2344_v35 = vcvt.s32.f32 %v1832_v17  ;;  %v1748_v55 = vunpack.c.0.s8 %v1332_v37  ;;  %v1752_v8 = vunpack.c.1.s8 %v1332_v37  ;;  %v2393_v16 = vpack.c.bf16 %v1889_v0, %v1885_v3  ;;  %v1297_v11 = vld [vmem:[#allocation13 + $0x1f0] sm:$0xff] }
 0x195   :  { %2853 = vmatpush.bf16.msrb.mxu2 %v2584_v4  ;;  %v1957_v6 = vcvt.s32.f32 %v1445_v31  ;;  %v1961_v61 = vcvt.s32.f32 %v1449_v7  ;;  %v1365_v18 = vunpack.c.0.s8 %v1237_v14  ;;  %v1369_v23 = vunpack.c.1.s8 %v1237_v14  ;;  %v1329_v0 = vld [vmem:[#allocation13 + $0x2f0] sm:$0xff] }
 0x196   :  { %v2620_v22 = vpack.c.bf16 %v2344_v35, %v2340_v12  ;;  %v2260_v48 = vcvt.s32.f32 %v1748_v55  ;;  %v2264_v10 = vcvt.s32.f32 %v1752_v8  ;;  %2881 = vmatpush.bf16.msra.mxu0 %v2393_v16  ;;  %v1549_v19 = vunpack.c.2.s8 %v1281_v15  ;;  %v1277_v55 = vld [vmem:[#allocation13 + $0x150] sm:$0xff] }
 0x197   :  { %v2429_v28 = vpack.c.bf16 %v1961_v61, %v1957_v6  ;;  %v1877_v60 = vcvt.s32.f32 %v1365_v18  ;;  %v1553_v62 = vunpack.c.3.s8 %v1281_v15  ;;  %v1881_v45 = vcvt.s32.f32 %v1369_v23  ;;  %v1309_v61 = vld [vmem:[#allocation13 + $0x250] sm:$0xff] }
 0x198   :  { %2866 = vmatpush.bf16.msrb.mxu3 %v2620_v22  ;;  %v2580_v63 = vpack.c.bf16 %v2264_v10, %v2260_v48  ;;  %v1677_v41 = vunpack.c.2.s8 %v1313_v21  ;;  %v1681_v34 = vunpack.c.3.s8 %v1313_v21  ;;  %v2061_v25 = vcvt.s32.f32 %v1549_v19 }
 0x199   :  { %2894 = vmatpush.bf16.msra.mxu1 %v2429_v28  ;;  %v2065_v36 = vcvt.s32.f32 %v1553_v62  ;;  %v1820_v37 = vunpack.c.2.s8 %v1348_v27  ;;  %v1824_v33 = vunpack.c.3.s8 %v1348_v27  ;;  %v2389_v38 = vpack.c.bf16 %v1881_v45, %v1877_v60 }
 0x19a   :  { %2854 = vmatpush.bf16.msrb.mxu2 %v2580_v63  ;;  %v2189_v39 = vcvt.s32.f32 %v1677_v41  ;;  %v2193_v32 = vcvt.s32.f32 %v1681_v34  ;;  %v1437_v14 = vunpack.c.2.s8 %v1253_v26  ;;  %v1441_v42 = vunpack.c.3.s8 %v1253_v26 }
 0x19b   :  { %v2481_v29 = vpack.c.bf16 %v2065_v36, %v2061_v25  ;;  %v2332_v44 = vcvt.s32.f32 %v1820_v37  ;;  %v2336_v43 = vcvt.s32.f32 %v1824_v33  ;;  %2882 = vmatpush.bf16.msra.mxu0 %v2389_v38  ;;  %v1541_v49 = vunpack.c.0.s8 %v1281_v15 }
 0x19c   :  { %v2545_v46 = vpack.c.bf16 %v2193_v32, %v2189_v39  ;;  %v1949_v47 = vcvt.s32.f32 %v1437_v14  ;;  %v1545_v59 = vunpack.c.1.s8 %v1281_v15  ;;  %v1953_v52 = vcvt.s32.f32 %v1441_v42 }
 0x19d   :  { %v2616_v50 = vpack.c.bf16 %v2336_v43, %v2332_v44  ;;  %v1669_v53 = vunpack.c.0.s8 %v1313_v21  ;;  %v1673_v1 = vunpack.c.1.s8 %v1313_v21  ;;  %2855 = vmatmul.bf16.vlgmr.msrb.gmra.mxu2 %v4404_v20  ;;  %v2053_v57 = vcvt.s32.f32 %v1541_v49 }
 0x19e   :  { %2903 = vmatpush.bf16.msra.mxu2 %v2481_v29  ;;  %v2057_v30 = vcvt.s32.f32 %v1545_v59  ;;  %v1812_v2 = vunpack.c.0.s8 %v1348_v27  ;;  %v1816_v58 = vunpack.c.1.s8 %v1348_v27  ;;  %v2425_v3 = vpack.c.bf16 %v1953_v52, %v1949_v47  ;;  %2883 = vmatmul.bf16.vlgmr.msra.gmra.mxu0 %v4256_v51  ;;  %v1325_v52 = vld [vmem:[#allocation13 + $0x2d0] sm:$0xff] }
 0x19f   :  { %2931 = vmatpush.bf16.msrb.mxu0 %v2545_v46  ;;  %2867 = vmatpush.bf16.msrb.mxu3 %v2616_v50  ;;  %v2181_v56 = vcvt.s32.f32 %v1669_v53  ;;  %v2185_v17 = vcvt.s32.f32 %v1673_v1  ;;  %v1429_v4 = vunpack.c.0.s8 %v1253_v26  ;;  %v1433_v35 = vunpack.c.1.s8 %v1253_v26  ;;  %v1293_v46 = vld [vmem:[#allocation13 + $0x1d0] sm:$0xff] }
 0x1a0   :  { %v2477_v31 = vpack.c.bf16 %v2057_v30, %v2053_v57  ;;  %v2324_v7 = vcvt.s32.f32 %v1812_v2  ;;  %v2328_v12 = vcvt.s32.f32 %v1816_v58  ;;  %2895 = vmatpush.bf16.msra.mxu1 %v2425_v3  ;;  %v1613_v16 = vunpack.c.2.s8 %v1297_v11  ;;  %v1273_v2 = vld [vmem:[#allocation13 + $0x130] sm:$0xff] }
 0x1a1   :  { %v2541_v8 = vpack.c.bf16 %v2185_v17, %v2181_v56  ;;  %v1941_v15 = vcvt.s32.f32 %v1429_v4  ;;  %v1617_v6 = vunpack.c.3.s8 %v1297_v11  ;;  %v1945_v21 = vcvt.s32.f32 %v1433_v35  ;;  %v1305_v17 = vld [vmem:[#allocation13 + $0x230] sm:$0xff] }
 0x1a2   :  { %2904 = vmatpush.bf16.msra.mxu2 %v2477_v31  ;;  %v2612_v18 = vpack.c.bf16 %v2328_v12, %v2324_v7  ;;  %v1741_v22 = vunpack.c.2.s8 %v1329_v0  ;;  %v1745_v48 = vunpack.c.3.s8 %v1329_v0  ;;  %v2125_v10 = vcvt.s32.f32 %v1613_v16 }
 0x1a3   :  { %2932 = vmatpush.bf16.msrb.mxu0 %v2541_v8  ;;  %v2129_v23 = vcvt.s32.f32 %v1617_v6  ;;  %v1533_v27 = vunpack.c.2.s8 %v1277_v55  ;;  %v1537_v28 = vunpack.c.3.s8 %v1277_v55  ;;  %v2421_v60 = vpack.c.bf16 %v1945_v21, %v1941_v15 }
 0x1a4   :  { %2868 = vmatpush.bf16.msrb.mxu3 %v2612_v18  ;;  %v2253_v19 = vcvt.s32.f32 %v1741_v22  ;;  %v2257_v62 = vcvt.s32.f32 %v1745_v48  ;;  %v1661_v26 = vunpack.c.2.s8 %v1309_v61  ;;  %v1665_v34 = vunpack.c.3.s8 %v1309_v61 }
 0x1a5   :  { %v2513_v63 = vpack.c.bf16 %v2129_v23, %v2125_v10  ;;  %v2045_v45 = vcvt.s32.f32 %v1533_v27  ;;  %v2049_v41 = vcvt.s32.f32 %v1537_v28  ;;  %2896 = vmatpush.bf16.msra.mxu1 %v2421_v60  ;;  %v1605_v37 = vunpack.c.0.s8 %v1297_v11 }
 0x1a6   :  { %v2577_v25 = vpack.c.bf16 %v2257_v62, %v2253_v19  ;;  %v2173_v36 = vcvt.s32.f32 %v1661_v26  ;;  %v1609_v33 = vunpack.c.1.s8 %v1297_v11  ;;  %v2177_v39 = vcvt.s32.f32 %v1665_v34 }
 0x1a7   :  { %v2473_v38 = vpack.c.bf16 %v2049_v41, %v2045_v45  ;;  %v1733_v32 = vunpack.c.0.s8 %v1329_v0  ;;  %v1737_v14 = vunpack.c.1.s8 %v1329_v0  ;;  %2869 = vmatmul.bf16.vlgmr.msrb.gmra.mxu3 %v4411_v9  ;;  %v2117_v29 = vcvt.s32.f32 %v1605_v37 }
 0x1a8   :  { %2917 = vmatpush.bf16.msra.mxu3 %v2513_v63  ;;  %v2121_v44 = vcvt.s32.f32 %v1609_v33  ;;  %v1525_v43 = vunpack.c.0.s8 %v1277_v55  ;;  %v1529_v42 = vunpack.c.1.s8 %v1277_v55  ;;  %2897 = vmatmul.bf16.vlgmr.msra.gmra.mxu1 %v4277_v13  ;;  %v2537_v47 = vpack.c.bf16 %v2177_v39, %v2173_v36  ;;  %v1321_v39 = vld [vmem:[#allocation13 + $0x2b0] sm:$0xff] }
 0x1a9   :  { %2945 = vmatpush.bf16.msrb.mxu1 %v2577_v25  ;;  %2905 = vmatpush.bf16.msra.mxu2 %v2473_v38  ;;  %v2245_v49 = vcvt.s32.f32 %v1733_v32  ;;  %v2249_v59 = vcvt.s32.f32 %v1737_v14  ;;  %v1653_v50 = vunpack.c.0.s8 %v1309_v61  ;;  %v1657_v30 = vunpack.c.1.s8 %v1309_v61  ;;  %v1289_v25 = vld [vmem:[#allocation13 + $0x1b0] sm:$0xff] }
 0x1aa   :  { %v2509_v53 = vpack.c.bf16 %v2121_v44, %v2117_v29  ;;  %v2037_v1 = vcvt.s32.f32 %v1525_v43  ;;  %v2041_v57 = vcvt.s32.f32 %v1529_v42  ;;  %2933 = vmatpush.bf16.msrb.mxu0 %v2537_v47  ;;  %v1597_v3 = vunpack.c.2.s8 %v1293_v46  ;;  %v1269_v43 = vld [vmem:[#allocation13 + $0x110] sm:$0xff] }
 0x1ab   :  { %v2573_v58 = vpack.c.bf16 %v2249_v59, %v2245_v49  ;;  %v2165_v11 = vcvt.s32.f32 %v1653_v50  ;;  %v1601_v56 = vunpack.c.3.s8 %v1293_v46  ;;  %v2169_v0 = vcvt.s32.f32 %v1657_v30 }
 0x1ac   :  { %2918 = vmatpush.bf16.msra.mxu3 %v2509_v53  ;;  %v2469_v4 = vpack.c.bf16 %v2041_v57, %v2037_v1  ;;  %v1725_v31 = vunpack.c.2.s8 %v1325_v52  ;;  %v1729_v7 = vunpack.c.3.s8 %v1325_v52  ;;  %v2109_v12 = vcvt.s32.f32 %v1597_v3  ;;  %v1301_v1 = vld [vmem:[#allocation13 + $0x210] sm:$0xff] }
 0x1ad   :  { %2946 = vmatpush.bf16.msrb.mxu1 %v2573_v58  ;;  %v2113_v35 = vcvt.s32.f32 %v1601_v56  ;;  %v1517_v55 = vunpack.c.2.s8 %v1273_v2  ;;  %v1521_v8 = vunpack.c.3.s8 %v1273_v2  ;;  %v2533_v15 = vpack.c.bf16 %v2169_v0, %v2165_v11 }
 0x1ae   :  { %2906 = vmatpush.bf16.msra.mxu2 %v2469_v4  ;;  %v2237_v16 = vcvt.s32.f32 %v1725_v31  ;;  %v2241_v6 = vcvt.s32.f32 %v1729_v7  ;;  %v1645_v61 = vunpack.c.2.s8 %v1305_v17  ;;  %v1649_v48 = vunpack.c.3.s8 %v1305_v17 }
 0x1af   :  { %v2505_v18 = vpack.c.bf16 %v2113_v35, %v2109_v12  ;;  %v2029_v21 = vcvt.s32.f32 %v1517_v55  ;;  %v2033_v22 = vcvt.s32.f32 %v1521_v8  ;;  %2934 = vmatpush.bf16.msrb.mxu0 %v2533_v15  ;;  %v1589_v27 = vunpack.c.0.s8 %v1293_v46 }
 0x1b0   :  { %v2569_v10 = vpack.c.bf16 %v2241_v6, %v2237_v16  ;;  %v2157_v23 = vcvt.s32.f32 %v1645_v61  ;;  %v1593_v28 = vunpack.c.1.s8 %v1293_v46  ;;  %v2161_v19 = vcvt.s32.f32 %v1649_v48  ;;  %v1345_v48 = vld [vmem:[#allocation13 + $0x370] sm:$0xff] }
 0x1b1   :  { %2919 = vmatpush.bf16.msra.mxu3 %v2505_v18  ;;  %v2465_v60 = vpack.c.bf16 %v2033_v22, %v2029_v21  ;;  %v1717_v62 = vunpack.c.0.s8 %v1325_v52  ;;  %v1721_v26 = vunpack.c.1.s8 %v1325_v52  ;;  %v2101_v63 = vcvt.s32.f32 %v1589_v27 }
 0x1b2   :  { %2947 = vmatpush.bf16.msrb.mxu1 %v2569_v10  ;;  %v2105_v45 = vcvt.s32.f32 %v1593_v28  ;;  %v1509_v41 = vunpack.c.0.s8 %v1273_v2  ;;  %v1513_v34 = vunpack.c.1.s8 %v1273_v2  ;;  %v2529_v36 = vpack.c.bf16 %v2161_v19, %v2157_v23 }
 0x1b3   :  { %2907 = vmatpush.bf16.msra.mxu2 %v2465_v60  ;;  %v2229_v37 = vcvt.s32.f32 %v1717_v62  ;;  %v2233_v33 = vcvt.s32.f32 %v1721_v26  ;;  %v1637_v38 = vunpack.c.0.s8 %v1305_v17  ;;  %v1641_v44 = vunpack.c.1.s8 %v1305_v17  ;;  %v1250_v60 = vld [vmem:[#allocation13 + $0x78] sm:$0xff] }
 0x1b4   :  { %v2501_v32 = vpack.c.bf16 %v2105_v45, %v2101_v63  ;;  %v2021_v14 = vcvt.s32.f32 %v1509_v41  ;;  %v2025_v29 = vcvt.s32.f32 %v1513_v34  ;;  %2935 = vmatpush.bf16.msrb.mxu0 %v2529_v36  ;;  %v1581_v47 = vunpack.c.2.s8 %v1289_v25  ;;  %v1285_v45 = vld [vmem:[#allocation13 + $0x190] sm:$0xff] }
 0x1b5   :  { %v2565_v42 = vpack.c.bf16 %v2233_v33, %v2229_v37  ;;  %v2149_v46 = vcvt.s32.f32 %v1637_v38  ;;  %v1585_v49 = vunpack.c.3.s8 %v1289_v25  ;;  %v2153_v50 = vcvt.s32.f32 %v1641_v44 }
 0x1b6   :  { %2920 = vmatpush.bf16.msra.mxu3 %v2501_v32  ;;  %v2461_v59 = vpack.c.bf16 %v2025_v29, %v2021_v14  ;;  %v1709_v52 = vunpack.c.2.s8 %v1321_v39  ;;  %v1713_v53 = vunpack.c.3.s8 %v1321_v39  ;;  %v2093_v57 = vcvt.s32.f32 %v1581_v47  ;;  %v1317_v32 = vld [vmem:[#allocation13 + $0x290] sm:$0xff] }
 0x1b7   :  { %2948 = vmatpush.bf16.msrb.mxu1 %v2565_v42  ;;  %v2097_v30 = vcvt.s32.f32 %v1585_v49  ;;  %v1501_v2 = vunpack.c.2.s8 %v1269_v43  ;;  %v2525_v58 = vpack.c.bf16 %v2153_v50, %v2149_v46  ;;  %v1505_v56 = vunpack.c.3.s8 %v1269_v43 }
 0x1b8   :  { %2908 = vmatpush.bf16.msra.mxu2 %v2461_v59  ;;  %v2221_v11 = vcvt.s32.f32 %v1709_v52  ;;  %v2225_v3 = vcvt.s32.f32 %v1713_v53  ;;  %v1629_v0 = vunpack.c.2.s8 %v1301_v1  ;;  %v1633_v31 = vunpack.c.3.s8 %v1301_v1 }
 0x1b9   :  { %v2497_v17 = vpack.c.bf16 %v2097_v30, %v2093_v57  ;;  %v2013_v4 = vcvt.s32.f32 %v1501_v2  ;;  %2936 = vmatpush.bf16.msrb.mxu0 %v2525_v58  ;;  %v2017_v12 = vcvt.s32.f32 %v1505_v56  ;;  %v1573_v35 = vunpack.c.0.s8 %v1289_v25 }
 0x1ba   :  { %v2561_v7 = vpack.c.bf16 %v2225_v3, %v2221_v11  ;;  %v1577_v55 = vunpack.c.1.s8 %v1289_v25  ;;  %v2141_v8 = vcvt.s32.f32 %v1629_v0  ;;  %v2145_v15 = vcvt.s32.f32 %v1633_v31  ;;  %v1361_v31 = vld [vmem:[#allocation13 + $0x3f0] sm:$0xff] }
 0x1bb   :  { %2921 = vmatpush.bf16.msra.mxu3 %v2497_v17  ;;  %v1701_v16 = vunpack.c.0.s8 %v1321_v39  ;;  %v1705_v6 = vunpack.c.1.s8 %v1321_v39  ;;  %v2457_v61 = vpack.c.bf16 %v2017_v12, %v2013_v4  ;;  %v2085_v18 = vcvt.s32.f32 %v1573_v35 }
 0x1bc   :  { %2949 = vmatpush.bf16.msrb.mxu1 %v2561_v7  ;;  %v2089_v21 = vcvt.s32.f32 %v1577_v55  ;;  %v1493_v22 = vunpack.c.0.s8 %v1269_v43  ;;  %v2521_v10 = vpack.c.bf16 %v2145_v15, %v2141_v8  ;;  %v1497_v28 = vunpack.c.1.s8 %v1269_v43  ;;  %v1266_v8 = vld [vmem:[#allocation13 + $0xf8] sm:$0xff] }
 0x1bd   :  { %v2213_v23 = vcvt.s32.f32 %v1701_v16  ;;  %v2217_v27 = vcvt.s32.f32 %v1705_v6  ;;  %2909 = vmatpush.bf16.msra.mxu2 %v2457_v61  ;;  %v1621_v26 = vunpack.c.0.s8 %v1301_v1  ;;  %v1625_v63 = vunpack.c.1.s8 %v1301_v1 }
 0x1be   :  { %v2493_v19 = vpack.c.bf16 %v2089_v21, %v2085_v18  ;;  %v2005_v62 = vcvt.s32.f32 %v1493_v22  ;;  %2937 = vmatpush.bf16.msrb.mxu0 %v2521_v10  ;;  %v2009_v34 = vcvt.s32.f32 %v1497_v28  ;;  %v1805_v25 = vunpack.c.2.s8 %v1345_v48  ;;  %v1341_v10 = vld [vmem:[#allocation13 + $0x350] sm:$0xff] }
 0x1bf   :  { %v2557_v41 = vpack.c.bf16 %v2217_v27, %v2213_v23  ;;  %v1809_v36 = vunpack.c.3.s8 %v1345_v48  ;;  %v2133_v37 = vcvt.s32.f32 %v1621_v26  ;;  %v2137_v33 = vcvt.s32.f32 %v1625_v63 }
 0x1c0   :  { %2922 = vmatpush.bf16.msra.mxu3 %v2493_v19  ;;  %v1422_v38 = vunpack.c.2.s8 %v1250_v60  ;;  %v1426_v39 = vunpack.c.3.s8 %v1250_v60  ;;  %v2453_v14 = vpack.c.bf16 %v2009_v34, %v2005_v62  ;;  %v2317_v29 = vcvt.s32.f32 %v1805_v25  ;;  %v1246_v19 = vld [vmem:[#allocation13 + $0x58] sm:$0xff] }
 0x1c1   :  { %2950 = vmatpush.bf16.msrb.mxu1 %v2557_v41  ;;  %v2321_v44 = vcvt.s32.f32 %v1809_v36  ;;  %v1565_v43 = vunpack.c.2.s8 %v1285_v45  ;;  %v2517_v42 = vpack.c.bf16 %v2137_v33, %v2133_v37  ;;  %v1569_v49 = vunpack.c.3.s8 %v1285_v45 }
 0x1c2   :  { %v1934_v46 = vcvt.s32.f32 %v1422_v38  ;;  %v1938_v47 = vcvt.s32.f32 %v1426_v39  ;;  %2910 = vmatpush.bf16.msra.mxu2 %v2453_v14  ;;  %v1693_v52 = vunpack.c.2.s8 %v1317_v32  ;;  %v1697_v53 = vunpack.c.3.s8 %v1317_v32 }
 0x1c3   :  { %v2609_v59 = vpack.c.bf16 %v2321_v44, %v2317_v29  ;;  %v2077_v50 = vcvt.s32.f32 %v1565_v43  ;;  %2938 = vmatpush.bf16.msrb.mxu0 %v2517_v42  ;;  %v2081_v57 = vcvt.s32.f32 %v1569_v49  ;;  %v1797_v30 = vunpack.c.0.s8 %v1345_v48 }
 0x1c4   :  { %v2418_v1 = vpack.c.bf16 %v1938_v47, %v1934_v46  ;;  %v2205_v2 = vcvt.s32.f32 %v1693_v52  ;;  %v2209_v58 = vcvt.s32.f32 %v1697_v53  ;;  %v1801_v11 = vunpack.c.1.s8 %v1345_v48  ;;  %v1357_v53 = vld [vmem:[#allocation13 + $0x3d0] sm:$0xff] }
 0x1c5   :  { %v1414_v3 = vunpack.c.0.s8 %v1250_v60  ;;  %v2489_v56 = vpack.c.bf16 %v2081_v57, %v2077_v50  ;;  %2911 = vmatmul.bf16.vlgmr.msra.gmra.mxu2 %v4304_v24  ;;  %v2309_v17 = vcvt.s32.f32 %v1797_v30  ;;  %v1418_v4 = vunpack.c.1.s8 %v1250_v60 }
 0x1c6   :  { %2959 = vmatpush.bf16.msrb.mxu2 %v2609_v59  ;;  %v1557_v0 = vunpack.c.0.s8 %v1285_v45  ;;  %v2553_v7 = vpack.c.bf16 %v2209_v58, %v2205_v2  ;;  %2939 = vmatmul.bf16.vlgmr.msrb.gmra.mxu0 %v4348_v5  ;;  %v2313_v12 = vcvt.s32.f32 %v1801_v11  ;;  %v1561_v55 = vunpack.c.1.s8 %v1285_v45  ;;  %v1262_v58 = vld [vmem:[#allocation13 + $0xd8] sm:$0xff] }
 0x1c7   :  { %2987 = vmatpush.bf16.msra.mxu0 %v2418_v1  ;;  %v1926_v35 = vcvt.s32.f32 %v1414_v3  ;;  %2923 = vmatpush.bf16.msra.mxu3 %v2489_v56  ;;  %v1930_v15 = vcvt.s32.f32 %v1418_v4  ;;  %v1685_v6 = vunpack.c.0.s8 %v1317_v32  ;;  %v1689_v61 = vunpack.c.1.s8 %v1317_v32  ;;  %v2660_v4 = vpop.f32.mrf.mxu0 }
 0x1c8   :  { %v2069_v16 = vcvt.s32.f32 %v1557_v0  ;;  %2951 = vmatpush.bf16.msrb.mxu1 %v2553_v7  ;;  %v2605_v18 = vpack.c.bf16 %v2313_v12, %v2309_v17  ;;  %v2073_v21 = vcvt.s32.f32 %v1561_v55  ;;  %v1869_v22 = vunpack.c.2.s8 %v1361_v31  ;;  %v2674_v0 = vpop.f32.mrf.mxu1  ;;  %v1337_v55 = vld [vmem:[#allocation13 + $0x330] sm:$0xff] }
 0x1c9   :  { %v1873_v48 = vunpack.c.3.s8 %v1361_v31  ;;  %v2414_v23 = vpack.c.bf16 %v1930_v15, %v1926_v35  ;;  %v2197_v27 = vcvt.s32.f32 %v1685_v6  ;;  %v2201_v28 = vcvt.s32.f32 %v1689_v61  ;;  %v1242_v61 = vld [vmem:[#allocation13 + $0x38] sm:$0xff] }
 0x1ca   :  { %v1486_v60 = vunpack.c.2.s8 %v1266_v8  ;;  %2960 = vmatpush.bf16.msrb.mxu2 %v2605_v18  ;;  %v2485_v62 = vpack.c.bf16 %v2073_v21, %v2069_v16  ;;  %v2381_v26 = vcvt.s32.f32 %v1869_v22  ;;  %v1490_v45 = vunpack.c.3.s8 %v1266_v8 }
 0x1cb   :  { %v2385_v63 = vcvt.s32.f32 %v1873_v48  ;;  %2988 = vmatpush.bf16.msra.mxu0 %v2414_v23  ;;  %v2549_v41 = vpack.c.bf16 %v2201_v28, %v2197_v27  ;;  %v1789_v25 = vunpack.c.2.s8 %v1341_v10  ;;  %v1793_v36 = vunpack.c.3.s8 %v1341_v10 }
 0x1cc   :  { %v1998_v34 = vcvt.s32.f32 %v1486_v60  ;;  %2924 = vmatpush.bf16.msra.mxu3 %v2485_v62  ;;  %v2002_v33 = vcvt.s32.f32 %v1490_v45  ;;  %v1406_v38 = vunpack.c.2.s8 %v1246_v19  ;;  %v1410_v39 = vunpack.c.3.s8 %v1246_v19 }
 0x1cd   :  { %v2641_v37 = vpack.c.bf16 %v2385_v63, %v2381_v26  ;;  %2952 = vmatpush.bf16.msrb.mxu1 %v2549_v41  ;;  %v2301_v32 = vcvt.s32.f32 %v1789_v25  ;;  %v2305_v14 = vcvt.s32.f32 %v1793_v36  ;;  %v1861_v29 = vunpack.c.0.s8 %v1361_v31 }
 0x1ce   :  { %v1865_v44 = vunpack.c.1.s8 %v1361_v31  ;;  %v2450_v43 = vpack.c.bf16 %v2002_v33, %v1998_v34  ;;  %v1918_v42 = vcvt.s32.f32 %v1406_v38  ;;  %v1922_v46 = vcvt.s32.f32 %v1410_v39 }
 0x1cf   :  { %v1478_v47 = vunpack.c.0.s8 %v1266_v8  ;;  %2925 = vmatmul.bf16.vlgmr.msra.gmra.mxu3 %v4311_v54  ;;  %v2601_v49 = vpack.c.bf16 %v2305_v14, %v2301_v32  ;;  %v2373_v59 = vcvt.s32.f32 %v1861_v29  ;;  %v1482_v52 = vunpack.c.1.s8 %v1266_v8 }
 0x1d0   :  { %2973 = vmatpush.bf16.msrb.mxu3 %v2641_v37  ;;  %v2377_v50 = vcvt.s32.f32 %v1865_v44  ;;  %v2410_v1 = vpack.c.bf16 %v1922_v46, %v1918_v42  ;;  %v1781_v30 = vunpack.c.0.s8 %v1341_v10  ;;  %v1785_v2 = vunpack.c.1.s8 %v1341_v10  ;;  %2953 = vmatmul.bf16.vlgmr.msrb.gmra.mxu1 %v4355_v40  ;;  %v1353_v42 = vld [vmem:[#allocation13 + $0x3b0] sm:$0xff] }
 0x1d1   :  { %3001 = vmatpush.bf16.msra.mxu1 %v2450_v43  ;;  %v1990_v57 = vcvt.s32.f32 %v1478_v47  ;;  %2961 = vmatpush.bf16.msrb.mxu2 %v2601_v49  ;;  %v1994_v3 = vcvt.s32.f32 %v1482_v52  ;;  %v1398_v56 = vunpack.c.0.s8 %v1246_v19  ;;  %v1402_v17 = vunpack.c.1.s8 %v1246_v19 }
 0x1d2   :  { %v2637_v11 = vpack.c.bf16 %v2377_v50, %v2373_v59  ;;  %2989 = vmatpush.bf16.msra.mxu0 %v2410_v1  ;;  %v2293_v31 = vcvt.s32.f32 %v1781_v30  ;;  %v2297_v7 = vcvt.s32.f32 %v1785_v2  ;;  %v1853_v12 = vunpack.c.2.s8 %v1357_v53  ;;  %v1258_v50 = vld [vmem:[#allocation13 + $0xb8] sm:$0xff]  ;;  %v2676_v1 = vpop.f32.mrf.mxu1 }
 0x1d3   :  { %v1857_v35 = vunpack.c.3.s8 %v1357_v53  ;;  %v2446_v8 = vpack.c.bf16 %v1994_v3, %v1990_v57  ;;  %v1910_v15 = vcvt.s32.f32 %v1398_v56  ;;  %v1914_v16 = vcvt.s32.f32 %v1402_v17 }
 0x1d4   :  { %2974 = vmatpush.bf16.msrb.mxu3 %v2637_v11  ;;  %v1470_v6 = vunpack.c.2.s8 %v1262_v58  ;;  %v2597_v18 = vpack.c.bf16 %v2297_v7, %v2293_v31  ;;  %v2365_v21 = vcvt.s32.f32 %v1853_v12  ;;  %v1474_v48 = vunpack.c.3.s8 %v1262_v58  ;;  %v1333_v11 = vld [vmem:[#allocation13 + $0x310] sm:$0xff] }
 0x1d5   :  { %v2369_v22 = vcvt.s32.f32 %v1857_v35  ;;  %3002 = vmatpush.bf16.msra.mxu1 %v2446_v8  ;;  %v2406_v10 = vpack.c.bf16 %v1914_v16, %v1910_v15  ;;  %v1773_v27 = vunpack.c.2.s8 %v1337_v55  ;;  %v1777_v19 = vunpack.c.3.s8 %v1337_v55 }
 0x1d6   :  { %v1982_v23 = vcvt.s32.f32 %v1470_v6  ;;  %2962 = vmatpush.bf16.msrb.mxu2 %v2597_v18  ;;  %v1986_v60 = vcvt.s32.f32 %v1474_v48  ;;  %v1390_v62 = vunpack.c.2.s8 %v1242_v61  ;;  %v1394_v63 = vunpack.c.3.s8 %v1242_v61 }
 0x1d7   :  { %v2633_v28 = vpack.c.bf16 %v2369_v22, %v2365_v21  ;;  %2990 = vmatpush.bf16.msra.mxu0 %v2406_v10  ;;  %v2285_v26 = vcvt.s32.f32 %v1773_v27  ;;  %v1845_v45 = vunpack.c.0.s8 %v1357_v53  ;;  %v1849_v41 = vunpack.c.1.s8 %v1357_v53  ;;  %v2662_v53 = vpop.f32.mrf.mxu0 }
 0x1d8   :  { %v2442_v34 = vpack.c.bf16 %v1986_v60, %v1982_v23  ;;  %v2289_v25 = vcvt.s32.f32 %v1777_v19  ;;  %v1902_v36 = vcvt.s32.f32 %v1390_v62  ;;  %v1462_v37 = vunpack.c.0.s8 %v1262_v58 }
 0x1d9   :  { %2975 = vmatpush.bf16.msrb.mxu3 %v2633_v28  ;;  %v1906_v33 = vcvt.s32.f32 %v1394_v63  ;;  %v2357_v38 = vcvt.s32.f32 %v1845_v45  ;;  %v2361_v39 = vcvt.s32.f32 %v1849_v41  ;;  %v1466_v32 = vunpack.c.1.s8 %v1262_v58  ;;  %v2688_v45 = vpop.f32.mrf.mxu2 }
 0x1da   :  { %3003 = vmatpush.bf16.msra.mxu1 %v2442_v34  ;;  %v2593_v14 = vpack.c.bf16 %v2289_v25, %v2285_v26  ;;  %v1974_v29 = vcvt.s32.f32 %v1462_v37  ;;  %v1765_v44 = vunpack.c.0.s8 %v1337_v55  ;;  %v1769_v43 = vunpack.c.1.s8 %v1337_v55  ;;  %v1238_v55 = vld [vmem:[#allocation13 + $0x18] sm:$0xff] }
 0x1db   :  { %v2402_v46 = vpack.c.bf16 %v1906_v33, %v1902_v36  ;;  %v2629_v47 = vpack.c.bf16 %v2361_v39, %v2357_v38  ;;  %v1978_v49 = vcvt.s32.f32 %v1466_v32  ;;  %v1382_v59 = vunpack.c.0.s8 %v1242_v61  ;;  %v1282_v37 = vld [vmem:[#allocation13 + $0x178] sm:$0xff] }
 0x1dc   :  { %v2675_v52 = vadd.f32 %v2674_v0, %v2660_v4  ;;  %2963 = vmatpush.bf16.msrb.mxu2 %v2593_v14  ;;  %v2277_v57 = vcvt.s32.f32 %v1765_v44  ;;  %v2281_v30 = vcvt.s32.f32 %v1769_v43  ;;  %v1386_v2 = vunpack.c.1.s8 %v1242_v61  ;;  %v1314_v14 = vld [vmem:[#allocation13 + $0x278] sm:$0xff] }
 0x1dd   :  { %2991 = vmatpush.bf16.msra.mxu0 %v2402_v46  ;;  %2976 = vmatpush.bf16.msrb.mxu3 %v2629_v47  ;;  %v2438_v58 = vpack.c.bf16 %v1978_v49, %v1974_v29  ;;  %v1894_v3 = vcvt.s32.f32 %v1382_v59  ;;  %v1837_v56 = vunpack.c.2.s8 %v1353_v42  ;;  %v1841_v17 = vunpack.c.3.s8 %v1353_v42  ;;  %v1349_v46 = vld [vmem:[#allocation13 + $0x390] sm:$0xff] }
 0x1de   :  { %v2589_v31 = vpack.c.bf16 %v2281_v30, %v2277_v57  ;;  %v1898_v7 = vcvt.s32.f32 %v1386_v2  ;;  %v1454_v12 = vunpack.c.2.s8 %v1258_v50  ;;  %v1458_v35 = vunpack.c.3.s8 %v1258_v50  ;;  %v1254_v2 = vld [vmem:[#allocation13 + $0x98] sm:$0xff] }
 0x1df   :  { %v4426_v8 = vadd.f32 %v2676_v1, %v2662_v53  ;;  %3004 = vmatpush.bf16.msra.mxu1 %v2438_v58  ;;  %v2349_v4 = vcvt.s32.f32 %v1837_v56  ;;  %v2353_v0 = vcvt.s32.f32 %v1841_v17  ;;  %v1757_v15 = vunpack.c.2.s8 %v1333_v11 }
 0x1e0   :  { %2964 = vmatpush.bf16.msrb.mxu2 %v2589_v31  ;;  %v2398_v16 = vpack.c.bf16 %v1898_v7, %v1894_v3  ;;  %v1966_v6 = vcvt.s32.f32 %v1454_v12  ;;  %v1970_v61 = vcvt.s32.f32 %v1458_v35  ;;  %v1761_v18 = vunpack.c.3.s8 %v1333_v11 }
 0x1e1   :  { %v2625_v21 = vpack.c.bf16 %v2353_v0, %v2349_v4  ;;  %v2269_v22 = vcvt.s32.f32 %v1757_v15  ;;  %v1374_v48 = vunpack.c.2.s8 %v1238_v55  ;;  %v1378_v10 = vunpack.c.3.s8 %v1238_v55 }
 0x1e2   :  { %2992 = vmatpush.bf16.msra.mxu0 %v2398_v16  ;;  %v2434_v23 = vpack.c.bf16 %v1970_v61, %v1966_v6  ;;  %v2273_v27 = vcvt.s32.f32 %v1761_v18  ;;  %v1829_v28 = vunpack.c.0.s8 %v1353_v42  ;;  %v1833_v60 = vunpack.c.1.s8 %v1353_v42 }
 0x1e3   :  { %2977 = vmatpush.bf16.msrb.mxu3 %v2625_v21  ;;  %v1886_v19 = vcvt.s32.f32 %v1374_v48  ;;  %v1890_v62 = vcvt.s32.f32 %v1378_v10  ;;  %v1446_v26 = vunpack.c.0.s8 %v1258_v50  ;;  %v1450_v63 = vunpack.c.1.s8 %v1258_v50 }
 0x1e4   :  { %3005 = vmatpush.bf16.msra.mxu1 %v2434_v23  ;;  %v2585_v41 = vpack.c.bf16 %v2273_v27, %v2269_v22  ;;  %v2341_v34 = vcvt.s32.f32 %v1829_v28  ;;  %v2345_v25 = vcvt.s32.f32 %v1833_v60  ;;  %v1749_v36 = vunpack.c.0.s8 %v1333_v11  ;;  %v1298_v28 = vld [vmem:[#allocation13 + $0x1f8] sm:$0xff] }
 0x1e5   :  { %v2394_v33 = vpack.c.bf16 %v1890_v62, %v1886_v19  ;;  %v1958_v38 = vcvt.s32.f32 %v1446_v26  ;;  %v1962_v39 = vcvt.s32.f32 %v1450_v63  ;;  %v1753_v32 = vunpack.c.1.s8 %v1333_v11  ;;  %v1330_v63 = vld [vmem:[#allocation13 + $0x2f8] sm:$0xff] }
 0x1e6   :  { %2965 = vmatpush.bf16.msrb.mxu2 %v2585_v41  ;;  %v2621_v29 = vpack.c.bf16 %v2345_v25, %v2341_v34  ;;  %v2261_v44 = vcvt.s32.f32 %v1749_v36  ;;  %v1366_v43 = vunpack.c.0.s8 %v1238_v55  ;;  %v1370_v42 = vunpack.c.1.s8 %v1238_v55 }
 0x1e7   :  { %v4428_v47 = vadd.f32 %v2688_v45, %v2675_v52  ;;  %2993 = vmatpush.bf16.msra.mxu0 %v2394_v33  ;;  %v2430_v49 = vpack.c.bf16 %v1962_v39, %v1958_v38  ;;  %v2265_v59 = vcvt.s32.f32 %v1753_v32  ;;  %v1550_v50 = vunpack.c.2.s8 %v1282_v37  ;;  %v1278_v39 = vld [vmem:[#allocation13 + $0x158] sm:$0xff] }
 0x1e8   :  { %2978 = vmatpush.bf16.msrb.mxu3 %v2621_v29  ;;  %v1878_v53 = vcvt.s32.f32 %v1366_v43  ;;  %v1882_v1 = vcvt.s32.f32 %v1370_v42  ;;  %v1554_v57 = vunpack.c.3.s8 %v1282_v37  ;;  %v1678_v30 = vunpack.c.2.s8 %v1314_v14  ;;  %v1310_v43 = vld [vmem:[#allocation13 + $0x258] sm:$0xff]  ;;  %v2702_v42 = vpop.f32.mrf.mxu3 }
 0x1e9   :  { %3006 = vmatpush.bf16.msra.mxu1 %v2430_v49  ;;  %v2581_v11 = vpack.c.bf16 %v2265_v59, %v2261_v44  ;;  %v2062_v58 = vcvt.s32.f32 %v1550_v50  ;;  %v1682_v3 = vunpack.c.3.s8 %v1314_v14  ;;  %v1821_v56 = vunpack.c.2.s8 %v1349_v46 }
 0x1ea   :  { %v2390_v17 = vpack.c.bf16 %v1882_v1, %v1878_v53  ;;  %v2066_v31 = vcvt.s32.f32 %v1554_v57  ;;  %v2190_v7 = vcvt.s32.f32 %v1678_v30  ;;  %v1825_v52 = vunpack.c.3.s8 %v1349_v46 }
 0x1eb   :  { %2966 = vmatpush.bf16.msrb.mxu2 %v2581_v11  ;;  %v2194_v12 = vcvt.s32.f32 %v1682_v3  ;;  %v2333_v35 = vcvt.s32.f32 %v1821_v56  ;;  %v1438_v55 = vunpack.c.2.s8 %v1254_v2  ;;  %v1442_v4 = vunpack.c.3.s8 %v1254_v2 }
 0x1ec   :  { %2994 = vmatpush.bf16.msra.mxu0 %v2390_v17  ;;  %v2482_v0 = vpack.c.bf16 %v2066_v31, %v2062_v58  ;;  %v2337_v15 = vcvt.s32.f32 %v1825_v52  ;;  %v1542_v16 = vunpack.c.0.s8 %v1282_v37  ;;  %v1546_v6 = vunpack.c.1.s8 %v1282_v37 }
 0x1ed   :  { %v2546_v61 = vpack.c.bf16 %v2194_v12, %v2190_v7  ;;  %v1950_v18 = vcvt.s32.f32 %v1438_v55  ;;  %v1954_v21 = vcvt.s32.f32 %v1442_v4  ;;  %v1670_v22 = vunpack.c.0.s8 %v1314_v14 }
 0x1ee   :  { %v2617_v48 = vpack.c.bf16 %v2337_v15, %v2333_v35  ;;  %v2054_v10 = vcvt.s32.f32 %v1542_v16  ;;  %v2058_v23 = vcvt.s32.f32 %v1546_v6  ;;  %v1674_v27 = vunpack.c.1.s8 %v1314_v14  ;;  %2967 = vmatmul.bf16.vlgmr.msrb.gmra.mxu2 %v4404_v20  ;;  %v4436_v16 = vld [vmem:[#allocation13 + $0x1d8] sm:$0xff] }
 0x1ef   :  { %3015 = vmatpush.bf16.msra.mxu2 %v2482_v0  ;;  %v2426_v60 = vpack.c.bf16 %v1954_v21, %v1950_v18  ;;  %v2182_v19 = vcvt.s32.f32 %v1670_v22  ;;  %v1813_v62 = vunpack.c.0.s8 %v1349_v46  ;;  %v1817_v26 = vunpack.c.1.s8 %v1349_v46  ;;  %2995 = vmatmul.bf16.vlgmr.msra.gmra.mxu0 %v4256_v51 }
 0x1f0   :  { %3043 = vmatpush.bf16.msrb.mxu0 %v2546_v61  ;;  %2979 = vmatpush.bf16.msrb.mxu3 %v2617_v48  ;;  %v2478_v45 = vpack.c.bf16 %v2058_v23, %v2054_v10  ;;  %v2186_v41 = vcvt.s32.f32 %v1674_v27  ;;  %v1430_v34 = vunpack.c.0.s8 %v1254_v2  ;;  %v1434_v25 = vunpack.c.1.s8 %v1254_v2  ;;  %v1326_v23 = vld [vmem:[#allocation13 + $0x2d8] sm:$0xff]  ;;  %v2690_v27 = vpop.f32.mrf.mxu2 }
 0x1f1   :  { %3007 = vmatpush.bf16.msra.mxu1 %v2426_v60  ;;  %v2325_v36 = vcvt.s32.f32 %v1813_v62  ;;  %v2329_v37 = vcvt.s32.f32 %v1817_v26  ;;  %v1614_v33 = vunpack.c.2.s8 %v1298_v28  ;;  %v1618_v38 = vunpack.c.3.s8 %v1298_v28  ;;  %v1274_v26 = vld [vmem:[#allocation13 + $0x138] sm:$0xff] }
 0x1f2   :  { %v2542_v32 = vpack.c.bf16 %v2186_v41, %v2182_v19  ;;  %v1942_v14 = vcvt.s32.f32 %v1430_v34  ;;  %v1946_v29 = vcvt.s32.f32 %v1434_v25  ;;  %v1742_v44 = vunpack.c.2.s8 %v1330_v63  ;;  %v2704_v25 = vpop.f32.mrf.mxu3 }
 0x1f3   :  { %3016 = vmatpush.bf16.msra.mxu2 %v2478_v45  ;;  %v2613_v46 = vpack.c.bf16 %v2329_v37, %v2325_v36  ;;  %v2126_v49 = vcvt.s32.f32 %v1614_v33  ;;  %v2130_v51 = vcvt.s32.f32 %v1618_v38  ;;  %v1746_v59 = vunpack.c.3.s8 %v1330_v63 }
 0x1f4   :  { %3044 = vmatpush.bf16.msrb.mxu0 %v2542_v32  ;;  %v2422_v50 = vpack.c.bf16 %v1946_v29, %v1942_v14  ;;  %v2254_v53 = vcvt.s32.f32 %v1742_v44  ;;  %v1534_v1 = vunpack.c.2.s8 %v1278_v39  ;;  %v1538_v57 = vunpack.c.3.s8 %v1278_v39  ;;  %v2716_v32 = vpop.f32.mrf.mxu0 }
 0x1f5   :  { %2980 = vmatpush.bf16.msrb.mxu3 %v2613_v46  ;;  %v2514_v30 = vpack.c.bf16 %v2130_v51, %v2126_v49  ;;  %v2258_v2 = vcvt.s32.f32 %v1746_v59  ;;  %v1662_v11 = vunpack.c.2.s8 %v1310_v43  ;;  %v1666_v58 = vunpack.c.3.s8 %v1310_v43 }
 0x1f6   :  { %v4433_v3 = vadd.f32 %v2702_v42, %v4428_v47  ;;  %3008 = vmatpush.bf16.msra.mxu1 %v2422_v50  ;;  %v2046_v56 = vcvt.s32.f32 %v1534_v1  ;;  %v2050_v17 = vcvt.s32.f32 %v1538_v57  ;;  %v1606_v31 = vunpack.c.0.s8 %v1298_v28  ;;  %v4444_v50 = vpop.f32.mrf.mxu1 }
 0x1f7   :  { %v2578_v7 = vpack.c.bf16 %v2258_v2, %v2254_v53  ;;  %v2174_v52 = vcvt.s32.f32 %v1662_v11  ;;  %v2178_v12 = vcvt.s32.f32 %v1666_v58  ;;  %v1610_v35 = vunpack.c.1.s8 %v1298_v28 }
 0x1f8   :  { %2981 = vmatmul.bf16.vlgmr.msrb.gmra.mxu3 %v4411_v9  ;;  %v2474_v55 = vpack.c.bf16 %v2050_v17, %v2046_v56  ;;  %v2118_v4 = vcvt.s32.f32 %v1606_v31  ;;  %v1734_v0 = vunpack.c.0.s8 %v1330_v63  ;;  %v1738_v15 = vunpack.c.1.s8 %v1330_v63 }
 0x1f9   :  { %3029 = vmatpush.bf16.msra.mxu3 %v2514_v30  ;;  %v2538_v47 = vpack.c.bf16 %v2178_v12, %v2174_v52  ;;  %v2122_v6 = vcvt.s32.f32 %v1610_v35  ;;  %v1526_v61 = vunpack.c.0.s8 %v1278_v39  ;;  %v1530_v18 = vunpack.c.1.s8 %v1278_v39  ;;  %3009 = vmatmul.bf16.vlgmr.msra.gmra.mxu1 %v4277_v13  ;;  %v1306_v13 = vld [vmem:[#allocation13 + $0x238] sm:$0xff] }
 0x1fa   :  { %3057 = vmatpush.bf16.msrb.mxu1 %v2578_v7  ;;  %3017 = vmatpush.bf16.msra.mxu2 %v2474_v55  ;;  %v2246_v21 = vcvt.s32.f32 %v1734_v0  ;;  %v2250_v22 = vcvt.s32.f32 %v1738_v15  ;;  %v1654_v48 = vunpack.c.0.s8 %v1310_v43  ;;  %v1658_v10 = vunpack.c.1.s8 %v1310_v43  ;;  %v1290_v35 = vld [vmem:[#allocation13 + $0x1b8] sm:$0xff] }
 0x1fb   :  { %3045 = vmatpush.bf16.msrb.mxu0 %v2538_v47  ;;  %v2510_v28 = vpack.c.bf16 %v2122_v6, %v2118_v4  ;;  %v2038_v60 = vcvt.s32.f32 %v1526_v61  ;;  %v2042_v19 = vcvt.s32.f32 %v1530_v18  ;;  %v1598_v62 = vunpack.c.2.s8 %v4436_v16  ;;  %v1322_v47 = vld [vmem:[#allocation13 + $0x2b8] sm:$0xff] }
 0x1fc   :  { %v2574_v63 = vpack.c.bf16 %v2250_v22, %v2246_v21  ;;  %v2166_v45 = vcvt.s32.f32 %v1654_v48  ;;  %v2170_v41 = vcvt.s32.f32 %v1658_v10  ;;  %v1602_v34 = vunpack.c.3.s8 %v4436_v16 }
 0x1fd   :  { %3030 = vmatpush.bf16.msra.mxu3 %v2510_v28  ;;  %v2470_v36 = vpack.c.bf16 %v2042_v19, %v2038_v60  ;;  %v2110_v37 = vcvt.s32.f32 %v1598_v62  ;;  %v1726_v33 = vunpack.c.2.s8 %v1326_v23  ;;  %v1730_v38 = vunpack.c.3.s8 %v1326_v23 }
 0x1fe   :  { %v2691_v39 = vadd.f32 %v2690_v27, %v4426_v8  ;;  %3058 = vmatpush.bf16.msrb.mxu1 %v2574_v63  ;;  %v2534_v14 = vpack.c.bf16 %v2170_v41, %v2166_v45  ;;  %v2114_v29 = vcvt.s32.f32 %v1602_v34  ;;  %v1518_v44 = vunpack.c.2.s8 %v1274_v26  ;;  %v4448_v27 = vpop.f32.mrf.mxu2  ;;  %v4453_v45 = vpop.f32.mrf.mxu0 }
 0x1ff   :  { %3018 = vmatpush.bf16.msra.mxu2 %v2470_v36  ;;  %v2238_v43 = vcvt.s32.f32 %v1726_v33  ;;  %v2242_v42 = vcvt.s32.f32 %v1730_v38  ;;  %v1522_v46 = vunpack.c.3.s8 %v1274_v26  ;;  %v1646_v49 = vunpack.c.2.s8 %v1306_v13 }
 0x200   :  { %v4442_v51 = vadd.f32 %v2704_v25, %v2691_v39  ;;  %3046 = vmatpush.bf16.msrb.mxu0 %v2534_v14  ;;  %v2506_v59 = vpack.c.bf16 %v2114_v29, %v2110_v37  ;;  %v2030_v53 = vcvt.s32.f32 %v1518_v44  ;;  %v1650_v1 = vunpack.c.3.s8 %v1306_v13  ;;  %v4455_v14 = vpop.f32.mrf.mxu1 }
 0x201   :  { %v2570_v57 = vpack.c.bf16 %v2242_v42, %v2238_v43  ;;  %v2034_v8 = vcvt.s32.f32 %v1522_v46  ;;  %v2158_v30 = vcvt.s32.f32 %v1646_v49  ;;  %v1590_v2 = vunpack.c.0.s8 %v4436_v16  ;;  %v4457_v46 = vpop.f32.mrf.mxu3 }
 0x202   :  { %3031 = vmatpush.bf16.msra.mxu3 %v2506_v59  ;;  %v2162_v11 = vcvt.s32.f32 %v1650_v1  ;;  %v1594_v58 = vunpack.c.1.s8 %v4436_v16  ;;  %v1718_v56 = vunpack.c.0.s8 %v1326_v23  ;;  %v1722_v17 = vunpack.c.1.s8 %v1326_v23  ;;  %v1270_v23 = vld [vmem:[#allocation13 + $0x118] sm:$0xff] }
 0x203   :  { %3059 = vmatpush.bf16.msrb.mxu1 %v2570_v57  ;;  %v2466_v31 = vpack.c.bf16 %v2034_v8, %v2030_v53  ;;  %v2102_v7 = vcvt.s32.f32 %v1590_v2  ;;  %v1510_v52 = vunpack.c.0.s8 %v1274_v26  ;;  %v1514_v12 = vunpack.c.1.s8 %v1274_v26  ;;  %v1302_v26 = vld [vmem:[#allocation13 + $0x218] sm:$0xff] }
 0x204   :  { %v2530_v55 = vpack.c.bf16 %v2162_v11, %v2158_v30  ;;  %v2106_v4 = vcvt.s32.f32 %v1594_v58  ;;  %v2230_v0 = vcvt.s32.f32 %v1718_v56  ;;  %v2234_v15 = vcvt.s32.f32 %v1722_v17  ;;  %v1346_v11 = vld [vmem:[#allocation13 + $0x378] sm:$0xff] }
 0x205   :  { %3019 = vmatpush.bf16.msra.mxu2 %v2466_v31  ;;  %v2022_v6 = vcvt.s32.f32 %v1510_v52  ;;  %v2026_v61 = vcvt.s32.f32 %v1514_v12  ;;  %v1638_v18 = vunpack.c.0.s8 %v1306_v13  ;;  %v1642_v21 = vunpack.c.1.s8 %v1306_v13 }
 0x206   :  { %3047 = vmatpush.bf16.msrb.mxu0 %v2530_v55  ;;  %v2502_v16 = vpack.c.bf16 %v2106_v4, %v2102_v7  ;;  %v2566_v22 = vpack.c.bf16 %v2234_v15, %v2230_v0  ;;  %v1582_v48 = vunpack.c.2.s8 %v1290_v35  ;;  %v1586_v10 = vunpack.c.3.s8 %v1290_v35  ;;  %v1286_v7 = vld [vmem:[#allocation13 + $0x198] sm:$0xff]  ;;  %v4459_v52 = vpop.f32.mrf.mxu2 }
 0x207   :  { %v2462_v28 = vpack.c.bf16 %v2026_v61, %v2022_v6  ;;  %v2150_v60 = vcvt.s32.f32 %v1638_v18  ;;  %v2154_v19 = vcvt.s32.f32 %v1642_v21  ;;  %v1710_v62 = vunpack.c.2.s8 %v1322_v47 }
 0x208   :  { %v4451_v63 = vadd.f32 %v2716_v32, %v4433_v3  ;;  %3032 = vmatpush.bf16.msra.mxu3 %v2502_v16  ;;  %3060 = vmatpush.bf16.msrb.mxu1 %v2566_v22  ;;  %v2094_v41 = vcvt.s32.f32 %v1582_v48  ;;  %v2098_v34 = vcvt.s32.f32 %v1586_v10  ;;  %v1714_v13 = vunpack.c.3.s8 %v1322_v47  ;;  %v4461_v48 = vpop.f32.mrf.mxu0 }
 0x209   :  { %3020 = vmatpush.bf16.msra.mxu2 %v2462_v28  ;;  %v2526_v25 = vpack.c.bf16 %v2154_v19, %v2150_v60  ;;  %v2222_v36 = vcvt.s32.f32 %v1710_v62  ;;  %v1502_v37 = vunpack.c.2.s8 %v1270_v23  ;;  %v1506_v33 = vunpack.c.3.s8 %v1270_v23  ;;  %v3623_v19 = vld [vmem:[#allocation16 + $0x38] sm:$0xff] }
 0x20a   :  { %v2498_v38 = vpack.c.bf16 %v2098_v34, %v2094_v41  ;;  %v2226_v39 = vcvt.s32.f32 %v1714_v13  ;;  %v1630_v29 = vunpack.c.2.s8 %v1302_v26  ;;  %v1634_v44 = vunpack.c.3.s8 %v1302_v26  ;;  %v4463_v13 = vpop.f32.mrf.mxu3 }
 0x20b   :  { %3048 = vmatpush.bf16.msrb.mxu0 %v2526_v25  ;;  %v2014_v3 = vcvt.s32.f32 %v1502_v37  ;;  %v2018_v32 = vcvt.s32.f32 %v1506_v33  ;;  %v1574_v43 = vunpack.c.0.s8 %v1290_v35  ;;  %v1578_v42 = vunpack.c.1.s8 %v1290_v35  ;;  %v4469_v33 = vpop.f32.mrf.mxu1 }
 0x20c   :  { %3033 = vmatpush.bf16.msra.mxu3 %v2498_v38  ;;  %v2562_v49 = vpack.c.bf16 %v2226_v39, %v2222_v36  ;;  %v2142_v59 = vcvt.s32.f32 %v1630_v29  ;;  %v2146_v53 = vcvt.s32.f32 %v1634_v44  ;;  %v1702_v1 = vunpack.c.0.s8 %v1322_v47 }
 0x20d   :  { %v2458_v57 = vpack.c.bf16 %v2018_v32, %v2014_v3  ;;  %v2086_v8 = vcvt.s32.f32 %v1574_v43  ;;  %v2090_v30 = vcvt.s32.f32 %v1578_v42  ;;  %v1706_v2 = vunpack.c.1.s8 %v1322_v47  ;;  %v1318_v47 = vld [vmem:[#allocation13 + $0x298] sm:$0xff] }
 0x20e   :  { %3061 = vmatpush.bf16.msrb.mxu1 %v2562_v49  ;;  %v2522_v58 = vpack.c.bf16 %v2146_v53, %v2142_v59  ;;  %v2214_v56 = vcvt.s32.f32 %v1702_v1  ;;  %v1494_v17 = vunpack.c.0.s8 %v1270_v23  ;;  %v1498_v31 = vunpack.c.1.s8 %v1270_v23  ;;  %v1362_v32 = vld [vmem:[#allocation13 + $0x3f8] sm:$0xff] }
 0x20f   :  { %3021 = vmatpush.bf16.msra.mxu2 %v2458_v57  ;;  %v2494_v12 = vpack.c.bf16 %v2090_v30, %v2086_v8  ;;  %v2218_v35 = vcvt.s32.f32 %v1706_v2  ;;  %v1622_v55 = vunpack.c.0.s8 %v1302_v26  ;;  %v1626_v4 = vunpack.c.1.s8 %v1302_v26  ;;  %v1342_v53 = vld [vmem:[#allocation13 + $0x358] sm:$0xff] }
 0x210   :  { %3049 = vmatpush.bf16.msrb.mxu0 %v2522_v58  ;;  %v2006_v0 = vcvt.s32.f32 %v1494_v17  ;;  %v2010_v15 = vcvt.s32.f32 %v1498_v31  ;;  %v1806_v6 = vunpack.c.2.s8 %v1346_v11  ;;  %v1810_v61 = vunpack.c.3.s8 %v1346_v11 }
 0x211   :  { %3034 = vmatpush.bf16.msra.mxu3 %v2494_v12  ;;  %v2558_v18 = vpack.c.bf16 %v2218_v35, %v2214_v56  ;;  %v2134_v21 = vcvt.s32.f32 %v1622_v55  ;;  %v2138_v16 = vcvt.s32.f32 %v1626_v4  ;;  %v1566_v22 = vunpack.c.2.s8 %v1286_v7 }
 0x212   :  { %v2454_v10 = vpack.c.bf16 %v2010_v15, %v2006_v0  ;;  %v2318_v23 = vcvt.s32.f32 %v1806_v6  ;;  %v2322_v28 = vcvt.s32.f32 %v1810_v61  ;;  %v1570_v60 = vunpack.c.3.s8 %v1286_v7  ;;  %v1358_v0 = vld [vmem:[#allocation13 + $0x3d8] sm:$0xff]  ;;  %v3621_v15 = vld [vmem:[#allocation16 + $0x28] sm:$0xff] }
 0x213   :  { %3062 = vmatpush.bf16.msrb.mxu1 %v2558_v18  ;;  %v2518_v62 = vpack.c.bf16 %v2138_v16, %v2134_v21  ;;  %v2078_v26 = vcvt.s32.f32 %v1566_v22  ;;  %v1694_v41 = vunpack.c.2.s8 %v1318_v47  ;;  %v1698_v34 = vunpack.c.3.s8 %v1318_v47  ;;  %v4479_v18 = vpop.f32.mrf.mxu3  ;;  %v4481_v21 = vpop.f32.mrf.mxu0 }
 0x214   :  { %v4467_v25 = vadd.f32 %v4444_v50, %v4451_v63  ;;  %3022 = vmatpush.bf16.msra.mxu2 %v2454_v10  ;;  %v2610_v36 = vpack.c.bf16 %v2322_v28, %v2318_v23  ;;  %v2082_v37 = vcvt.s32.f32 %v1570_v60  ;;  %v1798_v38 = vunpack.c.0.s8 %v1346_v11  ;;  %v3622_v50 = vld [vmem:[#allocation16 + $0x30] sm:$0xff]  ;;  %v4471_v63 = vpop.f32.mrf.mxu2 }
 0x215   :  { %3050 = vmatpush.bf16.msrb.mxu0 %v2518_v62  ;;  %v2206_v39 = vcvt.s32.f32 %v1694_v41  ;;  %v2210_v29 = vcvt.s32.f32 %v1698_v34  ;;  %v1802_v44 = vunpack.c.1.s8 %v1346_v11  ;;  %v1558_v3 = vunpack.c.0.s8 %v1286_v7  ;;  %v1338_v10 = vld [vmem:[#allocation13 + $0x338] sm:$0xff] }
 0x216   :  { %v2490_v43 = vpack.c.bf16 %v2082_v37, %v2078_v26  ;;  %v2310_v42 = vcvt.s32.f32 %v1798_v38  ;;  %v1562_v49 = vunpack.c.1.s8 %v1286_v7  ;;  %v1686_v59 = vunpack.c.0.s8 %v1318_v47  ;;  %v3631_v62 = vld [vmem:[#allocation16 + $0x78] sm:$0xff]  ;;  %v4483_v26 = vpop.f32.mrf.mxu1  ;;  %v3620_v38 = vld [vmem:[#allocation16 + $0x20] sm:$0xff] }
 0x217   :  { %v2554_v1 = vpack.c.bf16 %v2210_v29, %v2206_v39  ;;  %3023 = vmatmul.bf16.vlgmr.msra.gmra.mxu2 %v4304_v24  ;;  %v2314_v57 = vcvt.s32.f32 %v1802_v44  ;;  %v2070_v8 = vcvt.s32.f32 %v1558_v3  ;;  %v1690_v30 = vunpack.c.1.s8 %v1318_v47 }
 0x218   :  { %3071 = vmatpush.bf16.msrb.mxu2 %v2610_v36  ;;  %3035 = vmatpush.bf16.msra.mxu3 %v2490_v43  ;;  %v2074_v2 = vcvt.s32.f32 %v1562_v49  ;;  %v2198_v11 = vcvt.s32.f32 %v1686_v59  ;;  %v1870_v58 = vunpack.c.2.s8 %v1362_v32  ;;  %v1874_v56 = vunpack.c.3.s8 %v1362_v32 }
 0x219   :  { %3407 = vmatpush.bf16.msra.mxu0 %v3623_v19  ;;  %3063 = vmatpush.bf16.msrb.mxu1 %v2554_v1  ;;  %v2606_v17 = vpack.c.bf16 %v2314_v57, %v2310_v42  ;;  %v2202_v31 = vcvt.s32.f32 %v1690_v30  ;;  %v1790_v7 = vunpack.c.2.s8 %v1342_v53  ;;  %v1794_v12 = vunpack.c.3.s8 %v1342_v53  ;;  %v4496_v1 = vld [vmem:[#allocation14] sm:$0xf]  ;;  %v1354_v57 = vld [vmem:[#allocation13 + $0x3b8] sm:$0xff] }
 0x21a   :  { %3051 = vmatmul.bf16.vlgmr.msrb.gmra.mxu0 %v4348_v5  ;;  %v4477_v35 = vadd.f32 %v4453_v45, %v4442_v51  ;;  %v2486_v24 = vpack.c.bf16 %v2074_v2, %v2070_v8  ;;  %v2382_v55 = vcvt.s32.f32 %v1870_v58  ;;  %v2386_v4 = vcvt.s32.f32 %v1874_v56  ;;  %v3630_v8 = vld [vmem:[#allocation16 + $0x70] sm:$0xff]  ;;  %v3619_v56 = vld [vmem:[#allocation16 + $0x18] sm:$0xff] }
 0x21b   :  { %v2550_v5 = vpack.c.bf16 %v2202_v31, %v2198_v11  ;;  %v2302_v6 = vcvt.s32.f32 %v1790_v7  ;;  %v2306_v61 = vcvt.s32.f32 %v1794_v12  ;;  %v1862_v47 = vunpack.c.0.s8 %v1362_v32  ;;  %v1334_v58 = vld [vmem:[#allocation13 + $0x318] sm:$0xff] }
 0x21c   :  { %3072 = vmatpush.bf16.msrb.mxu2 %v2606_v17  ;;  %3036 = vmatpush.bf16.msra.mxu3 %v2486_v24  ;;  %v2642_v16 = vpack.c.bf16 %v2386_v4, %v2382_v55  ;;  %v1866_v22 = vunpack.c.1.s8 %v1362_v32  ;;  %v1782_v51 = vunpack.c.0.s8 %v1342_v53  ;;  %v1786_v45 = vunpack.c.1.s8 %v1342_v53  ;;  %v4487_v39 = vpop.f32.mrf.mxu2  ;;  %v4502_v24 = vpop.f32.mrf.mxu3 }
 0x21d   :  { %3408 = vmatpush.bf16.msra.mxu0 %v3622_v50  ;;  %3064 = vmatpush.bf16.msrb.mxu1 %v2550_v5  ;;  %v2602_v23 = vpack.c.bf16 %v2306_v61, %v2302_v6  ;;  %v2374_v28 = vcvt.s32.f32 %v1862_v47  ;;  %v1854_v60 = vunpack.c.2.s8 %v1358_v0  ;;  %v1858_v19 = vunpack.c.3.s8 %v1358_v0  ;;  %v3629_v47 = vld [vmem:[#allocation16 + $0x68] sm:$0xff] }
 0x21e   :  { %v2378_v41 = vcvt.s32.f32 %v1866_v22  ;;  %v2294_v34 = vcvt.s32.f32 %v1782_v51  ;;  %v2298_v36 = vcvt.s32.f32 %v1786_v45  ;;  %v2745_v37 = vadd.f32 %v4448_v27, %v4467_v25  ;;  %v4494_v27 = vld [vmem:[%s4536_s7] sm:$0xf]  ;;  %v3618_v45 = vld [vmem:[#allocation16 + $0x10] sm:$0xff] }
 0x21f   :  { %3037 = vmatmul.bf16.vlgmr.msra.gmra.mxu3 %v4311_v54  ;;  %v2366_v29 = vcvt.s32.f32 %v1854_v60  ;;  %v2370_v44 = vcvt.s32.f32 %v1858_v19  ;;  %v1774_v3 = vunpack.c.2.s8 %v1338_v10  ;;  %v1778_v32 = vunpack.c.3.s8 %v1338_v10  ;;  %v1350_v19 = vld [vmem:[#allocation13 + $0x398] sm:$0xff] }
 0x220   :  { %3085 = vmatpush.bf16.msrb.mxu3 %v2642_v16  ;;  %3073 = vmatpush.bf16.msrb.mxu2 %v2602_v23  ;;  %v2638_v43 = vpack.c.bf16 %v2378_v41, %v2374_v28  ;;  %v2598_v42 = vpack.c.bf16 %v2298_v36, %v2294_v34  ;;  %v1846_v49 = vunpack.c.0.s8 %v1358_v0  ;;  %v1850_v59 = vunpack.c.1.s8 %v1358_v0  ;;  %v2828_v16 = vpop.f32.mrf.mxu0  ;;  %v2842_v41 = vpop.f32.mrf.mxu1 }
 0x221   :  { %3409 = vmatpush.bf16.msra.mxu0 %v3621_v15  ;;  %3065 = vmatmul.bf16.vlgmr.msrb.gmra.mxu1 %v4355_v40  ;;  %v2634_v25 = vpack.c.bf16 %v2370_v44, %v2366_v29  ;;  %v2286_v53 = vcvt.s32.f32 %v1774_v3  ;;  %v2290_v50 = vcvt.s32.f32 %v1778_v32  ;;  %v1766_v54 = vunpack.c.0.s8 %v1338_v10  ;;  %v3628_v32 = vld [vmem:[#allocation16 + $0x60] sm:$0xff] }
 0x222   :  { %3421 = vmatpush.bf16.msra.mxu1 %v3631_v62  ;;  %v2358_v40 = vcvt.s32.f32 %v1846_v49  ;;  %v2362_v30 = vcvt.s32.f32 %v1850_v59  ;;  %v1770_v2 = vunpack.c.1.s8 %v1338_v10  ;;  %v2759_v11 = vadd.f32 %v4457_v46, %v2745_v37 }
 0x223   :  { %v2733_v17 = vadd.f32 %v4455_v14, %v4477_v35  ;;  %v2594_v31 = vpack.c.bf16 %v2290_v50, %v2286_v53  ;;  %v2278_v7 = vcvt.s32.f32 %v1766_v54  ;;  %v3101_v12 = vperm.slane %v4494_v27, 0 }
 0x224   :  { %3086 = vmatpush.bf16.msrb.mxu3 %v2638_v43  ;;  %3074 = vmatpush.bf16.msrb.mxu2 %v2598_v42  ;;  %v2282_v55 = vcvt.s32.f32 %v1770_v2  ;;  %v3119_v4 = vperm.slane %v4496_v1, 0  ;;  %v1838_v0 = vunpack.c.2.s8 %v1354_v57  ;;  %v1842_v15 = vunpack.c.3.s8 %v1354_v57 }
 0x225   :  { %3410 = vmatpush.bf16.msra.mxu0 %v3620_v38  ;;  %v2630_v5 = vpack.c.bf16 %v2362_v30, %v2358_v40  ;;  %v3109_v46 = vmul.f32 %v3101_v12, %v2759_v11  ;;  %v1758_v6 = vunpack.c.2.s8 %v1334_v58  ;;  %v1762_v61 = vunpack.c.3.s8 %v1334_v58  ;;  %v2856_v38 = vpop.f32.mrf.mxu2  ;;  %v3627_v40 = vld [vmem:[#allocation16 + $0x58] sm:$0xff] }
 0x226   :  { %3422 = vmatpush.bf16.msra.mxu1 %v3630_v8  ;;  %v2350_v14 = vcvt.s32.f32 %v1838_v0  ;;  %v2354_v35 = vcvt.s32.f32 %v1842_v15  ;;  %v2747_v22 = vadd.f32 %v4459_v52, %v2733_v17  ;;  %v1830_v51 = vunpack.c.0.s8 %v1354_v57 }
 0x227   :  { %v2590_v10 = vpack.c.bf16 %v2282_v55, %v2278_v7  ;;  %v2270_v23 = vcvt.s32.f32 %v1758_v6  ;;  %v2274_v28 = vcvt.s32.f32 %v1762_v61  ;;  %v1834_v60 = vunpack.c.1.s8 %v1354_v57 }
 0x228   :  { %3087 = vmatpush.bf16.msrb.mxu3 %v2634_v25  ;;  %3075 = vmatpush.bf16.msrb.mxu2 %v2594_v31  ;;  %v2787_v62 = vadd.f32 %v4469_v33, %v4461_v48  ;;  %v3127_v34 = vadd.f32 %v3119_v4, %v3109_v46  ;;  %v1750_v36 = vunpack.c.0.s8 %v1334_v58  ;;  %v1754_v37 = vunpack.c.1.s8 %v1334_v58  ;;  %v3617_v33 = vld [vmem:[#allocation16 + $0x8] sm:$0xff]  ;;  %v2844_v0 = vpop.f32.mrf.mxu1 }
 0x229   :  { %3411 = vmatpush.bf16.msra.mxu0 %v3619_v56  ;;  %v2789_v52 = vadd.f32 %v4483_v26, %v4481_v21  ;;  %v2342_v29 = vcvt.s32.f32 %v1830_v51  ;;  %v2346_v44 = vcvt.s32.f32 %v1834_v60  ;;  %v2761_v3 = vadd.f32 %v4463_v13, %v2747_v22  ;;  %v3616_v56 = vld [vmem:[#allocation16] sm:$0xff]  ;;  %v3625_v51 = vld [vmem:[#allocation16 + $0x48] sm:$0xff] }
 0x22a   :  { %3423 = vmatpush.bf16.msra.mxu1 %v3629_v47  ;;  %v2626_v43 = vpack.c.bf16 %v2354_v35, %v2350_v14  ;;  %v2586_v42 = vpack.c.bf16 %v2274_v28, %v2270_v23  ;;  %v1822_v49 = vunpack.c.2.s8 %v1350_v19  ;;  %v1826_v48 = vunpack.c.3.s8 %v1350_v19  ;;  %v2870_v21 = vpop.f32.mrf.mxu3 }
 0x22b   :  { %v2262_v59 = vcvt.s32.f32 %v1750_v36  ;;  %v2266_v25 = vcvt.s32.f32 %v1754_v37  ;;  %v3113_v53 = vmul.f32 %v3101_v12, %v2761_v3  ;;  %v2801_v50 = vadd.f32 %v4471_v63, %v2787_v62  ;;  %v2830_v12 = vpop.f32.mrf.mxu0  ;;  %v3639_v37 = vld [vmem:[#allocation16 + $0xb8] sm:$0xff] }
 0x22c   :  { %3088 = vmatpush.bf16.msrb.mxu3 %v2630_v5  ;;  %3076 = vmatpush.bf16.msrb.mxu2 %v2590_v10  ;;  %v3135_v26 = vmax.f32 %v3127_v34, 0.0  ;;  %v2622_v54 = vpack.c.bf16 %v2346_v44, %v2342_v29  ;;  %v2803_v8 = vadd.f32 %v4487_v39, %v2789_v52  ;;  %v2334_v30 = vcvt.s32.f32 %v1822_v49  ;;  %v3626_v39 = vld [vmem:[#allocation16 + $0x50] sm:$0xff]  ;;  %v3636_v29 = vld [vmem:[#allocation16 + $0xa0] sm:$0xff] }
 0x22d   :  { %3412 = vmatpush.bf16.msra.mxu0 %v3618_v45  ;;  %v3131_v57 = vadd.f32 %v3119_v4, %v3113_v53  ;;  %v2815_v13 = vadd.f32 %v4479_v18, %v2801_v50  ;;  %v2338_v2 = vcvt.s32.f32 %v1826_v48  ;;  %v1814_v11 = vunpack.c.0.s8 %v1350_v19  ;;  %v2858_v6 = vpop.f32.mrf.mxu2 }
 0x22e   :  { %3424 = vmatpush.bf16.msra.mxu1 %v3628_v32  ;;  %v1818_v58 = vunpack.c.1.s8 %v1350_v19  ;;  %v2582_v17 = vpack.c.bf16 %v2266_v25, %v2262_v59  ;;  %v2817_v7 = vadd.f32 %v4502_v24, %v2803_v8  ;;  %v3102_v47 = vperm.slane %v4494_v27, 1  ;;  %v3624_v19 = vld [vmem:[#allocation16 + $0x40] sm:$0xff]  ;;  %v3635_v32 = vld [vmem:[#allocation16 + $0x98] sm:$0xff]  ;;  %v3633_v59 = vld [vmem:[#allocation16 + $0x88] sm:$0xff] }
 0x22f   :  { %v3139_v63 = vmax.f32 %v3131_v57, 0.0  ;;  %v2829_v31 = vadd.f32 %v2828_v16, %v2815_v13  ;;  %v2618_v15 = vpack.c.bf16 %v2338_v2, %v2334_v30  ;;  %v2326_v5 = vcvt.s32.f32 %v1814_v11 }
 0x230   :  { %3089 = vmatpush.bf16.msrb.mxu3 %v2626_v43  ;;  %3077 = vmatpush.bf16.msrb.mxu2 %v2586_v42  ;;  %v2831_v18 = vadd.f32 %v2830_v12, %v2817_v7  ;;  %v2330_v46 = vcvt.s32.f32 %v1818_v58  ;;  %v3120_v35 = vperm.slane %v4496_v1, 1  ;;  %v2898_v44 = vpop.f32.mrf.mxu1  ;;  %v3634_v42 = vld [vmem:[#allocation16 + $0x90] sm:$0xff] }
 0x231   :  { %3413 = vmatpush.bf16.msra.mxu0 %v3617_v33  ;;  %v3143_v55 = vpack.c.bf16 %v3139_v63, %v3135_v26  ;;  %v2843_v4 = vadd.f32 %v2842_v41, %v2829_v31  ;;  %v3103_v31 = vperm.slane %v4494_v27, 2 }
 0x232   :  { %3425 = vmatpush.bf16.msra.mxu1 %v3627_v40  ;;  %v2845_v16 = vadd.f32 %v2844_v0, %v2831_v18  ;;  %v2872_v14 = vpop.f32.mrf.mxu3  ;;  %v2614_v45 = vpack.c.bf16 %v2330_v46, %v2326_v5 }
 0x233   :  { %v2857_v61 = vadd.f32 %v2856_v38, %v2843_v4  ;;  %v3638_v38 = vld [vmem:[#allocation16 + $0xb0] sm:$0xff]  ;;  %v2884_v52 = vpop.f32.mrf.mxu0  ;;  %v3121_v4 = vperm.slane %v4496_v1, 2 }
 0x234   :  { %3090 = vmatpush.bf16.msrb.mxu3 %v2622_v54  ;;  %3078 = vmatpush.bf16.msrb.mxu2 %v2582_v17  ;;  %v2859_v22 = vadd.f32 %v2858_v6, %v2845_v16  ;;  %v2899_v33 = vadd.f32 %v2898_v44, %v2884_v52 }
 0x235   :  { %3414 = vmatpush.bf16.msra.mxu0 %v3616_v56  ;;  %v2871_v24 = vadd.f32 %v2870_v21, %v2857_v61  ;;  %v3632_v21 = vld [vmem:[#allocation16 + $0x80] sm:$0xff] }
 0x236   :  { %3426 = vmatpush.bf16.msra.mxu1 %v3626_v39  ;;  %v2873_v23 = vadd.f32 %v2872_v14, %v2859_v22  ;;  %v3647_v14 = vld [vmem:[#allocation16 + $0xf8] sm:$0xff]  ;;  %v3644_v22 = vld [vmem:[#allocation16 + $0xe0] sm:$0xff] }
 0x237   :  { %3079 = vmatmul.bf16.vlgmr.msrb.gmra.mxu2 %v4404_v20  ;;  %v3110_v10 = vmul.f32 %v3102_v47, %v2871_v24  ;;  %v3637_v20 = vld [vmem:[#allocation16 + $0xa8] sm:$0xff]  ;;  %v3646_v24 = vld [vmem:[#allocation16 + $0xf0] sm:$0xff] }
 0x238   :  { %3415 = vmatmul.bf16.vlgmr.msra.gmra.mxu0 %v3143_v55  ;;  %3091 = vmatpush.bf16.msrb.mxu3 %v2618_v15  ;;  %v3114_v60 = vmul.f32 %v3102_v47, %v2873_v23  ;;  %v2900_v49 = vpop.f32.mrf.mxu1 }
 0x239   :  { %v3128_v28 = vadd.f32 %v3120_v35, %v3110_v10  ;;  %3435 = vmatpush.bf16.msra.mxu2 %v3639_v37  ;;  %v3642_v10 = vld [vmem:[#allocation16 + $0xd0] sm:$0xff] }
 0x23a   :  { %3427 = vmatpush.bf16.msra.mxu1 %v3625_v51  ;;  %v3132_v62 = vadd.f32 %v3120_v35, %v3114_v60  ;;  %v3645_v35 = vld [vmem:[#allocation16 + $0xe8] sm:$0xff]  ;;  %v3643_v51 = vld [vmem:[#allocation16 + $0xd8] sm:$0xff] }
 0x23b   :  { %v3136_v41 = vmax.f32 %v3128_v28, 0.0  ;;  %v2886_v43 = vpop.f32.mrf.mxu0  ;;  %v3641_v60 = vld [vmem:[#allocation16 + $0xc8] sm:$0xff] }
 0x23c   :  { %3092 = vmatpush.bf16.msrb.mxu3 %v2614_v45  ;;  %v3140_v34 = vmax.f32 %v3132_v62, 0.0  ;;  %v2901_v54 = vadd.f32 %v2900_v49, %v2886_v43 }
 0x23d   :  { %3436 = vmatpush.bf16.msra.mxu2 %v3638_v38 }
 0x23e   :  { %3428 = vmatpush.bf16.msra.mxu1 %v3624_v19  ;;  %v3144_v36 = vpack.c.bf16 %v3140_v34, %v3136_v41  ;;  %v3640_v41 = vld [vmem:[#allocation16 + $0xc0] sm:$0xff] }
 0x23f   :  { %3093 = vmatmul.bf16.vlgmr.msrb.gmra.mxu3 %v4411_v9 }
 0x240   :  { %3449 = vmatpush.bf16.msra.mxu3 %v3647_v14 }
 0x241   :  { %3429 = vmatmul.bf16.vlgmr.msra.gmra.mxu1 %v3144_v36  ;;  %3437 = vmatpush.bf16.msra.mxu2 %v3637_v20 }
 0x243   :  { %v2940_v53 = vpop.f32.mrf.mxu0 }
 0x244   :  { %3450 = vmatpush.bf16.msra.mxu3 %v3646_v24 }
 0x245   :  { %3438 = vmatpush.bf16.msra.mxu2 %v3636_v29 }
 0x248   :  { %v2912_v3 = vpop.f32.mrf.mxu2  ;;  %3451 = vmatpush.bf16.msra.mxu3 %v3645_v35 }
 0x249   :  { %3439 = vmatpush.bf16.msra.mxu2 %v3635_v32  ;;  %v2913_v25 = vadd.f32 %v2912_v3, %v2899_v33 }
 0x24b   :  { %v2942_v11 = vpop.f32.mrf.mxu0 }
 0x24c   :  { %3452 = vmatpush.bf16.msra.mxu3 %v3644_v22 }
 0x24d   :  { %3440 = vmatpush.bf16.msra.mxu2 %v3634_v42  ;;  %v2954_v57 = vpop.f32.mrf.mxu1 }
 0x250   :  { %v2914_v48 = vpop.f32.mrf.mxu2  ;;  %3453 = vmatpush.bf16.msra.mxu3 %v3643_v51 }
 0x251   :  { %3441 = vmatpush.bf16.msra.mxu2 %v3633_v59  ;;  %v2915_v40 = vadd.f32 %v2914_v48, %v2901_v54 }
 0x252   :  { %v2926_v9 = vpop.f32.mrf.mxu3 }
 0x253   :  { %v2927_v50 = vadd.f32 %v2926_v9, %v2913_v25 }
 0x254   :  { %3454 = vmatpush.bf16.msra.mxu3 %v3642_v10 }
 0x255   :  { %v2941_v8 = vadd.f32 %v2940_v53, %v2927_v50  ;;  %3442 = vmatpush.bf16.msra.mxu2 %v3632_v21  ;;  %v2956_v7 = vpop.f32.mrf.mxu1  ;;  %v3104_v50 = vperm.slane %v4494_v27, 3  ;;  %v3667_v27 = vld [vmem:[%s4539_s10] ss:$0 sm:$0xff]  ;;  %s3943_s10 = smov 128  }
 0x257   :  { %v2955_v2 = vadd.f32 %v2954_v57, %v2941_v8 }
 0x258   :  { %3455 = vmatpush.bf16.msra.mxu3 %v3641_v60 }
 0x25a   :  { %v2928_v26 = vpop.f32.mrf.mxu3 }
 0x25b   :  { %v2929_v30 = vadd.f32 %v2928_v26, %v2915_v40 }
 0x25c   :  { %3456 = vmatpush.bf16.msra.mxu3 %v3640_v41 }
 0x25d   :  { %v2943_v56 = vadd.f32 %v2942_v11, %v2929_v30 }
 0x25f   :  { %v2957_v55 = vadd.f32 %v2956_v7, %v2943_v56 }
 0x26c   :  { %v2996_v45 = vpop.f32.mrf.mxu0 }
 0x271   :  { %v2968_v13 = vpop.f32.mrf.mxu2 }
 0x272   :  { %v2969_v17 = vadd.f32 %v2968_v13, %v2955_v2  ;;  %v3122_v13 = vperm.slane %v4496_v1, 3 }
 0x274   :  { %v2998_v19 = vpop.f32.mrf.mxu0 }
 0x276   :  { %v3010_v23 = vpop.f32.mrf.mxu1 }
 0x277   :  { %v3011_v37 = vadd.f32 %v3010_v23, %v2996_v45 }
 0x279   :  { %v2970_v12 = vpop.f32.mrf.mxu2 }
 0x27a   :  { %v2971_v39 = vadd.f32 %v2970_v12, %v2957_v55 }
 0x27b   :  { %v2982_v58 = vpop.f32.mrf.mxu3 }
 0x27c   :  { %v2983_v63 = vadd.f32 %v2982_v58, %v2969_v17 }
 0x27e   :  { %v3111_v18 = vmul.f32 %v3103_v31, %v2983_v63  ;;  %v3012_v34 = vpop.f32.mrf.mxu1 }
 0x27f   :  { %v3013_v44 = vadd.f32 %v3012_v34, %v2998_v19 }
 0x280   :  { %v3129_v5 = vadd.f32 %v3121_v4, %v3111_v18 }
 0x282   :  { %v3137_v61 = vmax.f32 %v3129_v5, 0.0 }
 0x283   :  { %v2984_v0 = vpop.f32.mrf.mxu3 }
 0x284   :  { %v2985_v15 = vadd.f32 %v2984_v0, %v2971_v39 }
 0x286   :  { %v3115_v46 = vmul.f32 %v3103_v31, %v2985_v15 }
 0x288   :  { %v3133_v6 = vadd.f32 %v3121_v4, %v3115_v46 }
 0x28a   :  { %v3141_v47 = vmax.f32 %v3133_v6, 0.0 }
 0x28c   :  { %v3145_v16 = vpack.c.bf16 %v3141_v47, %v3137_v61 }
 0x28e   :  { %3443 = vmatmul.bf16.vlgmr.msra.gmra.mxu2 %v3145_v16 }
 0x297   :  { %v3052_v20 = vpop.f32.mrf.mxu0 }
 0x29a   :  { %v3024_v28 = vpop.f32.mrf.mxu2 }
 0x29b   :  { %v3025_v38 = vadd.f32 %v3024_v28, %v3011_v37 }
 0x29e   :  { %v3066_v3 = vpop.f32.mrf.mxu1 }
 0x29f   :  { %v3054_v48 = vpop.f32.mrf.mxu0 }
 0x2a2   :  { %v3038_v62 = vpop.f32.mrf.mxu3  ;;  %v3026_v36 = vpop.f32.mrf.mxu2 }
 0x2a3   :  { %v3039_v52 = vadd.f32 %v3038_v62, %v3025_v38  ;;  %v3027_v9 = vadd.f32 %v3026_v36, %v3013_v44 }
 0x2a5   :  { %v3053_v43 = vadd.f32 %v3052_v20, %v3039_v52 }
 0x2a6   :  { %v3068_v21 = vpop.f32.mrf.mxu1 }
 0x2a7   :  { %v3067_v49 = vadd.f32 %v3066_v3, %v3053_v43 }
 0x2aa   :  { %v3040_v29 = vpop.f32.mrf.mxu3 }
 0x2ab   :  { %v3041_v42 = vadd.f32 %v3040_v29, %v3027_v9 }
 0x2ad   :  { %v3055_v59 = vadd.f32 %v3054_v48, %v3041_v42 }
 0x2af   :  { %v3069_v54 = vadd.f32 %v3068_v21, %v3055_v59 }
 0x2b5   :  { %v3416_v31 = vpop.f32.mrf.mxu0 }
 0x2b6   :  { %v3417_v55 = vadd.f32 %v3667_v27, %v3416_v31 }
 0x2ba   :  { %v3080_v32 = vpop.f32.mrf.mxu2 }
 0x2bb   :  { %v3081_v25 = vadd.f32 %v3080_v32, %v3067_v49 }
 0x2bd   :  { %v3418_v4 = vpop.f32.mrf.mxu0 }
 0x2be   :  { %v3430_v7 = vpop.f32.mrf.mxu1  ;;  %v3419_v5 = vadd.f32 %v3667_v27, %v3418_v4 }
 0x2bf   :  { %v3431_v18 = vadd.f32 %v3430_v7, %v3417_v55 }
 0x2c2   :  { %v3094_v33 = vpop.f32.mrf.mxu3  ;;  %v3082_v26 = vpop.f32.mrf.mxu2 }
 0x2c3   :  { %v3095_v53 = vadd.f32 %v3094_v33, %v3081_v25  ;;  %v3083_v8 = vadd.f32 %v3082_v26, %v3069_v54 }
 0x2c5   :  { %v3112_v57 = vmul.f32 %v3104_v50, %v3095_v53 }
 0x2c6   :  { %v3432_v15 = vpop.f32.mrf.mxu1 }
 0x2c7   :  { %v3130_v2 = vadd.f32 %v3122_v13, %v3112_v57  ;;  %v3433_v6 = vadd.f32 %v3432_v15, %v3419_v5 }
 0x2c9   :  { %v3138_v56 = vmax.f32 %v3130_v2, 0.0 }
 0x2ca   :  { %v3096_v40 = vpop.f32.mrf.mxu3 }
 0x2cb   :  { %v3097_v30 = vadd.f32 %v3096_v40, %v3083_v8 }
 0x2cd   :  { %v3116_v11 = vmul.f32 %v3104_v50, %v3097_v30 }
 0x2cf   :  { %v3134_v58 = vadd.f32 %v3122_v13, %v3116_v11 }
 0x2d1   :  { %v3142_v17 = vmax.f32 %v3134_v58, 0.0 }
 0x2d3   :  { %v3146_v63 = vpack.c.bf16 %v3142_v17, %v3138_v56 }
 0x2d5   :  { %3457 = vmatmul.bf16.vlgmr.msra.gmra.mxu3 %v3146_v63 }
 0x311   :  { %v3444_v12 = vpop.f32.mrf.mxu2 }
 0x312   :  { %v3445_v1 = vadd.f32 %v3444_v12, %v3431_v18 }
 0x319   :  { %v3446_v46 = vpop.f32.mrf.mxu2 }
 0x31a   :  { %v3447_v61 = vadd.f32 %v3446_v46, %v3433_v6 }
 0x358   :  { %v3458_v39 = vpop.f32.mrf.mxu3 }
 0x359   :  { %v3459_v0 = vadd.f32 %v3458_v39, %v3445_v1 }
 0x35b   :  { %3463 = vst [vmem:[#allocation17] sm:$0xff] %v3459_v0 }
 0x360   :  { %v3460_v47 = vpop.f32.mrf.mxu3 }
 0x361   :  { %v3461_v16 = vadd.f32 %v3460_v47, %v3447_v61 }
 0x363   :  { %3464 = vst [vmem:[#allocation17 + $0x8] sm:$0xff] %v3461_v16 }
 0x364   :  { %3477 = dma.vmem_to_hbm [thread:$0]  %s3470_s23, 256, %s3472_s8, [#allocation4], %s3943_s10, %s3943_s10, %s3944_s26  }
 0x365   :  { %3924 = dma.done.wait [#allocation4], 256  }
 0x366   :  { %3925 = vsyncadd [#allocation4], 4294967040 }
 0x367   :  { %3482 = vsyncpa [#allocation3], 1 }
 0x368   :  { %3483 = vsyncpa [#allocation6], 1 }
 0x369   :  { %3484 = vsyncpa [#allocation9], 1 }
 0x36a   :  { %3485 = vsyncpa [#allocation12], 1 }
 0x36b   :  { %3486 = vsyncpa [#allocation15], 1 }
 0x36c   :  { %3487 = vsyncpa [#allocation4], 1 }

// kernel: tpu_custom_call.1
= control target key start
LH: loop header
LB: loop body
LE: loop exit
PB: predicated region body
PF: predicated region fallthrough
CT: control target
= control target key end

     0   :  { %16 = vsyncpa [#allocation3], 0  ;;  %s4529_s0 = inlined_call_operand.hbm [shape: f32[16,256], index: 0, kind: input, shape index: {}]   ;;  %s4530_s1 = inlined_call_operand.hbm [shape: f32[1,256], index: 1, kind: input, shape index: {}]   ;;  %s4531_s2 = inlined_call_operand.hbm [shape: f32[1,256], index: 2, kind: input, shape index: {}]   ;;  %s4532_s3 = inlined_call_operand.hbm [shape: s8[256,1024], index: 3, kind: input, shape index: {}]   ;;  %s4533_s4 = inlined_call_operand.hbm [shape: f32[1,1024], index: 4, kind: input, shape index: {}]   ;;  %s4534_s5 = inlined_call_operand.hbm [shape: f32[1,1024], index: 5, kind: input, shape index: {}]   ;;  %s4535_s6 = inlined_call_operand.hbm [shape: s8[1024,512], index: 6, kind: input, shape index: {}]   ;;  %s4536_s7 = inlined_call_operand.vmem [shape: f32[1,512], index: 7, kind: input, shape index: {}]   ;;  %s4537_s8 = inlined_call_operand.hbm [shape: f32[1,512], index: 8, kind: input, shape index: {}]   ;;  %s4538_s9 = inlined_call_operand.hbm [shape: bf16[512,128], index: 9, kind: input, shape index: {}]   ;;  %s4539_s10 = inlined_call_operand.vmem [shape: f32[1,128], index: 10, kind: input, shape index: {}]   ;;  %s4540_s11 = inlined_call_operand.hbm [shape: f32[16,128], index: 11, kind: output, shape index: {}]  }
   0x1   :  { %17 = vsyncpa [#allocation6], 0 }
   0x2   :  { %18 = vsyncpa [#allocation9], 0 }
   0x3   :  { %19 = vsyncpa [#allocation12], 0 }
   0x4   :  { %20 = vsyncpa [#allocation15], 0  ;;  %s40_s19 = sshll.u32 %s4530_s1, 4  ;;  %s41_s19 = int_to_ptr.hbm [resolvable:$true] %s40_s19 }
   0x5   :  { %21 = vsyncpa [#allocation4], 0  ;;  %s3926_s20 = smov [#allocation5]   ;;  %s61_s24 = sshll.u32 %s4532_s3, 4  ;;  %s62_s24 = int_to_ptr.hbm [resolvable:$true] %s61_s24 }
   0x6   :  { %s42_s21 = sshll.u32 %s3926_s20, 4  ;;  %s3927_s25 = smov [#allocation8]   ;;  %s43_s21 = int_to_ptr.vmem [resolvable:$true] %s42_s21 }
   0x7   :  { %45 = dma.hbm_to_vmem [thread:$0]  %s41_s19, 32, %s43_s21, [#allocation6]  }
   0x8   :  { %s63_s26 = sshll.u32 %s3927_s25, 4  ;;  %s3928_s27 = smov 1024   ;;  %s64_s26 = int_to_ptr.vmem [resolvable:$true] %s63_s26 }
   0x9   :  { %s3929_s28 = smov 64   ;;  %s86_s30 = sshll.u32 %s4534_s5, 4  ;;  %s87_s30 = int_to_ptr.hbm [resolvable:$true] %s86_s30 }
   0xa   :  { %69 = dma.hbm_to_vmem [thread:$0]  %s62_s24, 8192, %s64_s26, [#allocation9], %s3928_s27, %s3928_s27, %s3929_s28  }
   0xb   :  { %s3930_s12 = smov [#allocation11]   ;;  %s112_s3 = sshll.u32 %s4537_s8, 4  ;;  %s113_s3 = int_to_ptr.hbm [resolvable:$true] %s112_s3 }
   0xc   :  { %s88_s13 = sshll.u32 %s3930_s12, 4  ;;  %s3931_s16 = smov [#allocation14]   ;;  %s89_s13 = int_to_ptr.vmem [resolvable:$true] %s88_s13 }
   0xd   :  { %91 = dma.hbm_to_vmem [thread:$0]  %s87_s30, 128, %s89_s13, [#allocation12]  }
   0xe   :  { %s114_s17 = sshll.u32 %s3931_s16, 4  ;;  %s26_s20 = sshll.u32 %s4529_s0, 4  ;;  %s115_s17 = int_to_ptr.vmem [resolvable:$true] %s114_s17  ;;  %s27_s20 = int_to_ptr.hbm [resolvable:$true] %s26_s20 }
   0xf   :  { %117 = dma.hbm_to_vmem [thread:$0]  %s113_s3, 64, %s115_s17, [#allocation15]  }
  0x10   :  { %s3932_s5 = smov [#allocation2]   ;;  %s51_s24 = sshll.u32 %s4531_s2, 4  ;;  %s52_s24 = int_to_ptr.hbm [resolvable:$true] %s51_s24 }
  0x11   :  { %s28_s21 = sshll.u32 %s3932_s5, 4  ;;  %s3933_s25 = smov 256   ;;  %s29_s21 = int_to_ptr.vmem [resolvable:$true] %s28_s21 }
  0x12   :  { %s3934_s8 = smov 16   ;;  %s3935_s26 = smov [#allocation7]  }
  0x13   :  { %34 = dma.hbm_to_vmem [thread:$0]  %s27_s20, 512, %s29_s21, [#allocation3], %s3933_s25, %s3933_s25, %s3934_s8  }
  0x14   :  { %s53_s27 = sshll.u32 %s3935_s26, 4  ;;  %s75_s0 = sshll.u32 %s4533_s4, 4  ;;  %s54_s27 = int_to_ptr.vmem [resolvable:$true] %s53_s27  ;;  %s76_s0 = int_to_ptr.hbm [resolvable:$true] %s75_s0 }
  0x15   :  { %56 = dma.hbm_to_vmem [thread:$0]  %s52_s24, 32, %s54_s27, [#allocation6]  }
  0x16   :  { %s96_s13 = sshll.u32 %s4535_s6, 4  ;;  %s3936_s14 = smov [#allocation10]   ;;  %s97_s13 = int_to_ptr.hbm [resolvable:$true] %s96_s13 }
  0x17   :  { %s77_s15 = sshll.u32 %s3936_s14, 4  ;;  %s3937_s2 = smov [#allocation13]   ;;  %s78_s15 = int_to_ptr.vmem [resolvable:$true] %s77_s15 }
  0x18   :  { %80 = dma.hbm_to_vmem [thread:$0]  %s76_s0, 128, %s78_s15, [#allocation9]  }
  0x19   :  { %s98_s3 = sshll.u32 %s3937_s2, 4  ;;  %s3938_s16 = smov 512   ;;  %s99_s3 = int_to_ptr.vmem [resolvable:$true] %s98_s3 }
  0x1a   :  { %s3939_s17 = smov 32   ;;  %s122_s19 = sshll.u32 %s4538_s9, 4  ;;  %s123_s19 = int_to_ptr.hbm [resolvable:$true] %s122_s19 }
  0x1b   :  { %104 = dma.hbm_to_vmem [thread:$0]  %s97_s13, 16384, %s99_s3, [#allocation12], %s3938_s16, %s3938_s16, %s3939_s17  }
  0x1c   :  { %s3940_s20 = smov [#allocation16]   ;;  %s3941_s6 = smov 4  }
  0x1d   :  { %s124_s5 = sshll.u32 %s3940_s20, 4  ;;  %s125_s5 = int_to_ptr.vmem [resolvable:$true] %s124_s5 }
  0x1e   :  { %130 = dma.hbm_to_vmem [thread:$0]  %s123_s19, 4096, %s125_s5, [#allocation15], %s3929_s28, %s3929_s28, %s3941_s6  }
  0x1f   :  { %3914 = dma.done.wait [#allocation3], 512  }
  0x20   :  { %3915 = vsyncadd [#allocation3], 4294966784 }
  0x21   :  { %3916 = dma.done.wait [#allocation6], 64  }
  0x22   :  { %3917 = vsyncadd [#allocation6], 4294967232 }
  0x23   :  { %3918 = dma.done.wait [#allocation9], 8320  }
  0x24   :  { %3919 = vsyncadd [#allocation9], 4294958976 }
  0x25   :  { %3920 = dma.done.wait [#allocation12], 16512  }
  0x26   :  { %3921 = vsyncadd [#allocation12], 4294950784 }
  0x27   :  { %3922 = dma.done.wait [#allocation15], 4160  }
  0x28   :  { %3923 = vsyncadd [#allocation15], 4294963136  ;;  %v247_v0 = vld [vmem:[#allocation8 + $0xc0] sm:$0xff]  ;;  %v248_v2 = vld [vmem:[#allocation8 + $0xc8] sm:$0xff]  ;;  %s3942_s22 = smov [#allocation17]   ;;  %s3471_s8 = sshll.u32 %s4540_s11, 4  ;;  %s3472_s8 = int_to_ptr.hbm [resolvable:$true] %s3471_s8 }
  0x29   :  { %v279_v1 = vld [vmem:[#allocation8 + $0x1c0] sm:$0xff]  ;;  %v399_v3 = vunpack.c.2.s8 %v247_v0  ;;  %v407_v4 = vunpack.c.3.s8 %v247_v0  ;;  %v280_v7 = vld [vmem:[#allocation8 + $0x1c8] sm:$0xff]  ;;  %v400_v8 = vunpack.c.2.s8 %v248_v2  ;;  %v408_v9 = vunpack.c.3.s8 %v248_v2  ;;  %s3469_s23 = sshll.u32 %s3942_s22, 4  ;;  %s3944_s26 = smov 8   ;;  %s3470_s23 = int_to_ptr.vmem [resolvable:$true] %s3469_s23 }
  0x2a   :  { %v527_v5 = vunpack.c.2.s8 %v279_v1  ;;  %v535_v6 = vunpack.c.3.s8 %v279_v1  ;;  %v528_v10 = vunpack.c.2.s8 %v280_v7  ;;  %v536_v11 = vunpack.c.3.s8 %v280_v7  ;;  %v239_v28 = vld [vmem:[#allocation8 + $0x80] sm:$0xff]  ;;  %v240_v42 = vld [vmem:[#allocation8 + $0x88] sm:$0xff] }
  0x2b   :  { %v655_v12 = vcvt.s32.f32 %v399_v3  ;;  %v663_v13 = vcvt.s32.f32 %v407_v4  ;;  %v656_v16 = vcvt.s32.f32 %v400_v8  ;;  %v664_v17 = vcvt.s32.f32 %v408_v9  ;;  %v271_v37 = vld [vmem:[#allocation8 + $0x180] sm:$0xff]  ;;  %v272_v47 = vld [vmem:[#allocation8 + $0x188] sm:$0xff] }
  0x2c   :  { %v783_v14 = vcvt.s32.f32 %v527_v5  ;;  %v791_v15 = vcvt.s32.f32 %v535_v6  ;;  %v784_v18 = vcvt.s32.f32 %v528_v10  ;;  %v792_v19 = vcvt.s32.f32 %v536_v11  ;;  %v231_v8 = vld [vmem:[#allocation8 + $0x40] sm:$0xff] }
  0x2d   :  { %v855_v20 = vpack.c.bf16 %v663_v13, %v655_v12  ;;  %v383_v22 = vunpack.c.0.s8 %v247_v0  ;;  %v391_v23 = vunpack.c.1.s8 %v247_v0  ;;  %v856_v24 = vpack.c.bf16 %v664_v17, %v656_v16  ;;  %v263_v17 = vld [vmem:[#allocation8 + $0x140] sm:$0xff] }
  0x2e   :  { %v919_v21 = vpack.c.bf16 %v791_v15, %v783_v14  ;;  %v920_v25 = vpack.c.bf16 %v792_v19, %v784_v18  ;;  %v511_v26 = vunpack.c.0.s8 %v279_v1  ;;  %v519_v27 = vunpack.c.1.s8 %v279_v1 }
  0x2f   :  { %927 = vmatpush.bf16.msra.mxu0 %v855_v20  ;;  %v639_v29 = vcvt.s32.f32 %v383_v22  ;;  %v647_v30 = vcvt.s32.f32 %v391_v23  ;;  %v384_v31 = vunpack.c.0.s8 %v248_v2  ;;  %v392_v32 = vunpack.c.1.s8 %v248_v2  ;;  %955 = vmatpush.bf16.msra.mxu2 %v856_v24  ;;  %v232_v22 = vld [vmem:[#allocation8 + $0x48] sm:$0xff] }
  0x30   :  { %941 = vmatpush.bf16.msra.mxu1 %v919_v21  ;;  %969 = vmatpush.bf16.msra.mxu3 %v920_v25  ;;  %v767_v33 = vcvt.s32.f32 %v511_v26  ;;  %v775_v34 = vcvt.s32.f32 %v519_v27  ;;  %v512_v35 = vunpack.c.0.s8 %v280_v7  ;;  %v520_v36 = vunpack.c.1.s8 %v280_v7  ;;  %v264_v27 = vld [vmem:[#allocation8 + $0x148] sm:$0xff] }
  0x31   :  { %v847_v38 = vpack.c.bf16 %v647_v30, %v639_v29  ;;  %v640_v39 = vcvt.s32.f32 %v384_v31  ;;  %v648_v40 = vcvt.s32.f32 %v392_v32  ;;  %v367_v41 = vunpack.c.2.s8 %v239_v28 }
  0x32   :  { %v911_v43 = vpack.c.bf16 %v775_v34, %v767_v33  ;;  %v768_v44 = vcvt.s32.f32 %v512_v35  ;;  %v776_v45 = vcvt.s32.f32 %v520_v36  ;;  %v375_v46 = vunpack.c.3.s8 %v239_v28 }
  0x33   :  { %928 = vmatpush.bf16.msra.mxu0 %v847_v38  ;;  %v848_v48 = vpack.c.bf16 %v648_v40, %v640_v39  ;;  %v623_v49 = vcvt.s32.f32 %v367_v41  ;;  %v495_v50 = vunpack.c.2.s8 %v271_v37  ;;  %v503_v51 = vunpack.c.3.s8 %v271_v37 }
  0x34   :  { %942 = vmatpush.bf16.msra.mxu1 %v911_v43  ;;  %v912_v52 = vpack.c.bf16 %v776_v45, %v768_v44  ;;  %v631_v53 = vcvt.s32.f32 %v375_v46  ;;  %v368_v54 = vunpack.c.2.s8 %v240_v42  ;;  %v376_v55 = vunpack.c.3.s8 %v240_v42 }
  0x35   :  { %956 = vmatpush.bf16.msra.mxu2 %v848_v48  ;;  %v751_v56 = vcvt.s32.f32 %v495_v50  ;;  %v759_v57 = vcvt.s32.f32 %v503_v51  ;;  %v496_v58 = vunpack.c.2.s8 %v272_v47  ;;  %v504_v59 = vunpack.c.3.s8 %v272_v47 }
  0x36   :  { %970 = vmatpush.bf16.msra.mxu3 %v912_v52  ;;  %v839_v60 = vpack.c.bf16 %v631_v53, %v623_v49  ;;  %v624_v61 = vcvt.s32.f32 %v368_v54  ;;  %v632_v62 = vcvt.s32.f32 %v376_v55  ;;  %v351_v63 = vunpack.c.0.s8 %v239_v28  ;;  %v223_v52 = vld [vmem:[#allocation8] sm:$0xff] }
  0x37   :  { %v903_v0 = vpack.c.bf16 %v759_v57, %v751_v56  ;;  %v752_v1 = vcvt.s32.f32 %v496_v58  ;;  %v760_v2 = vcvt.s32.f32 %v504_v59  ;;  %v359_v3 = vunpack.c.1.s8 %v239_v28 }
  0x38   :  { %929 = vmatpush.bf16.msra.mxu0 %v839_v60  ;;  %v840_v4 = vpack.c.bf16 %v632_v62, %v624_v61  ;;  %v607_v5 = vcvt.s32.f32 %v351_v63  ;;  %v479_v6 = vunpack.c.0.s8 %v271_v37  ;;  %v487_v7 = vunpack.c.1.s8 %v271_v37  ;;  %v255_v61 = vld [vmem:[#allocation8 + $0x100] sm:$0xff] }
  0x39   :  { %943 = vmatpush.bf16.msra.mxu1 %v903_v0  ;;  %v904_v9 = vpack.c.bf16 %v760_v2, %v752_v1  ;;  %v615_v10 = vcvt.s32.f32 %v359_v3  ;;  %v352_v11 = vunpack.c.0.s8 %v240_v42  ;;  %v360_v12 = vunpack.c.1.s8 %v240_v42  ;;  %v224_v2 = vld [vmem:[#allocation8 + $0x8] sm:$0xff] }
  0x3a   :  { %957 = vmatpush.bf16.msra.mxu2 %v840_v4  ;;  %v735_v13 = vcvt.s32.f32 %v479_v6  ;;  %v743_v14 = vcvt.s32.f32 %v487_v7  ;;  %v480_v15 = vunpack.c.0.s8 %v272_v47  ;;  %v488_v16 = vunpack.c.1.s8 %v272_v47  ;;  %v256_v7 = vld [vmem:[#allocation8 + $0x108] sm:$0xff] }
  0x3b   :  { %971 = vmatpush.bf16.msra.mxu3 %v904_v9  ;;  %v831_v18 = vpack.c.bf16 %v615_v10, %v607_v5  ;;  %v608_v19 = vcvt.s32.f32 %v352_v11  ;;  %v616_v20 = vcvt.s32.f32 %v360_v12  ;;  %v335_v21 = vunpack.c.2.s8 %v231_v8 }
  0x3c   :  { %v895_v23 = vpack.c.bf16 %v743_v14, %v735_v13  ;;  %v736_v24 = vcvt.s32.f32 %v480_v15  ;;  %v744_v25 = vcvt.s32.f32 %v488_v16  ;;  %v343_v26 = vunpack.c.3.s8 %v231_v8 }
  0x3d   :  { %930 = vmatpush.bf16.msra.mxu0 %v831_v18  ;;  %v832_v28 = vpack.c.bf16 %v616_v20, %v608_v19  ;;  %v591_v29 = vcvt.s32.f32 %v335_v21  ;;  %v463_v30 = vunpack.c.2.s8 %v263_v17  ;;  %v471_v31 = vunpack.c.3.s8 %v263_v17 }
  0x3e   :  { %944 = vmatpush.bf16.msra.mxu1 %v895_v23  ;;  %v896_v32 = vpack.c.bf16 %v744_v25, %v736_v24  ;;  %v599_v33 = vcvt.s32.f32 %v343_v26  ;;  %v336_v34 = vunpack.c.2.s8 %v232_v22  ;;  %v344_v35 = vunpack.c.3.s8 %v232_v22 }
  0x3f   :  { %958 = vmatpush.bf16.msra.mxu2 %v832_v28  ;;  %v719_v36 = vcvt.s32.f32 %v463_v30  ;;  %v727_v37 = vcvt.s32.f32 %v471_v31  ;;  %v464_v38 = vunpack.c.2.s8 %v264_v27  ;;  %v472_v39 = vunpack.c.3.s8 %v264_v27 }
  0x40   :  { %972 = vmatpush.bf16.msra.mxu3 %v896_v32  ;;  %v823_v40 = vpack.c.bf16 %v599_v33, %v591_v29  ;;  %v592_v41 = vcvt.s32.f32 %v336_v34  ;;  %v600_v42 = vcvt.s32.f32 %v344_v35  ;;  %v319_v43 = vunpack.c.0.s8 %v231_v8  ;;  %v249_v32 = vld [vmem:[#allocation8 + $0xd0] sm:$0xff] }
  0x41   :  { %v887_v44 = vpack.c.bf16 %v727_v37, %v719_v36  ;;  %v720_v45 = vcvt.s32.f32 %v464_v38  ;;  %v728_v46 = vcvt.s32.f32 %v472_v39  ;;  %v327_v47 = vunpack.c.1.s8 %v231_v8 }
  0x42   :  { %931 = vmatpush.bf16.msra.mxu0 %v823_v40  ;;  %v824_v48 = vpack.c.bf16 %v600_v42, %v592_v41  ;;  %v575_v49 = vcvt.s32.f32 %v319_v43  ;;  %v447_v50 = vunpack.c.0.s8 %v263_v17  ;;  %v455_v51 = vunpack.c.1.s8 %v263_v17  ;;  %v281_v41 = vld [vmem:[#allocation8 + $0x1d0] sm:$0xff] }
  0x43   :  { %945 = vmatpush.bf16.msra.mxu1 %v887_v44  ;;  %v888_v53 = vpack.c.bf16 %v728_v46, %v720_v45  ;;  %v583_v54 = vcvt.s32.f32 %v327_v47  ;;  %v320_v55 = vunpack.c.0.s8 %v232_v22  ;;  %v328_v56 = vunpack.c.1.s8 %v232_v22  ;;  %v250_v46 = vld [vmem:[#allocation8 + $0xd8] sm:$0xff] }
  0x44   :  { %959 = vmatpush.bf16.msra.mxu2 %v824_v48  ;;  %v703_v57 = vcvt.s32.f32 %v447_v50  ;;  %v711_v58 = vcvt.s32.f32 %v455_v51  ;;  %v448_v59 = vunpack.c.0.s8 %v264_v27  ;;  %v456_v60 = vunpack.c.1.s8 %v264_v27  ;;  %v282_v51 = vld [vmem:[#allocation8 + $0x1d8] sm:$0xff] }
  0x45   :  { %973 = vmatpush.bf16.msra.mxu3 %v888_v53  ;;  %v815_v62 = vpack.c.bf16 %v583_v54, %v575_v49  ;;  %v576_v63 = vcvt.s32.f32 %v320_v55  ;;  %v584_v0 = vcvt.s32.f32 %v328_v56  ;;  %v303_v1 = vunpack.c.2.s8 %v223_v52 }
  0x46   :  { %v879_v3 = vpack.c.bf16 %v711_v58, %v703_v57  ;;  %v704_v4 = vcvt.s32.f32 %v448_v59  ;;  %v712_v5 = vcvt.s32.f32 %v456_v60  ;;  %v311_v6 = vunpack.c.3.s8 %v223_v52 }
  0x47   :  { %932 = vmatpush.bf16.msra.mxu0 %v815_v62  ;;  %v816_v8 = vpack.c.bf16 %v584_v0, %v576_v63  ;;  %v559_v9 = vcvt.s32.f32 %v303_v1  ;;  %v431_v10 = vunpack.c.2.s8 %v255_v61  ;;  %v439_v11 = vunpack.c.3.s8 %v255_v61 }
  0x48   :  { %946 = vmatpush.bf16.msra.mxu1 %v879_v3  ;;  %v880_v12 = vpack.c.bf16 %v712_v5, %v704_v4  ;;  %v567_v13 = vcvt.s32.f32 %v311_v6  ;;  %v304_v14 = vunpack.c.2.s8 %v224_v2  ;;  %v312_v15 = vunpack.c.3.s8 %v224_v2 }
  0x49   :  { %960 = vmatpush.bf16.msra.mxu2 %v816_v8  ;;  %v687_v16 = vcvt.s32.f32 %v431_v10  ;;  %v695_v17 = vcvt.s32.f32 %v439_v11  ;;  %v432_v18 = vunpack.c.2.s8 %v256_v7  ;;  %v440_v19 = vunpack.c.3.s8 %v256_v7 }
  0x4a   :  { %974 = vmatpush.bf16.msra.mxu3 %v880_v12  ;;  %v807_v20 = vpack.c.bf16 %v567_v13, %v559_v9  ;;  %v560_v21 = vcvt.s32.f32 %v304_v14  ;;  %v568_v22 = vcvt.s32.f32 %v312_v15  ;;  %v287_v23 = vunpack.c.0.s8 %v223_v52  ;;  %v4035_v12 = vld [vmem:[#allocation8 + $0x90] sm:$0xff] }
  0x4b   :  { %v871_v24 = vpack.c.bf16 %v695_v17, %v687_v16  ;;  %v688_v25 = vcvt.s32.f32 %v432_v18  ;;  %v696_v26 = vcvt.s32.f32 %v440_v19  ;;  %v295_v27 = vunpack.c.1.s8 %v223_v52 }
  0x4c   :  { %933 = vmatpush.bf16.msra.mxu0 %v807_v20  ;;  %v808_v28 = vpack.c.bf16 %v568_v22, %v560_v21  ;;  %v543_v29 = vcvt.s32.f32 %v287_v23  ;;  %v415_v30 = vunpack.c.0.s8 %v255_v61  ;;  %v423_v31 = vunpack.c.1.s8 %v255_v61  ;;  %v4037_v21 = vld [vmem:[#allocation8 + $0x190] sm:$0xff] }
  0x4d   :  { %947 = vmatpush.bf16.msra.mxu1 %v871_v24  ;;  %v872_v33 = vpack.c.bf16 %v696_v26, %v688_v25  ;;  %v551_v34 = vcvt.s32.f32 %v295_v27  ;;  %v288_v35 = vunpack.c.0.s8 %v224_v2  ;;  %v296_v36 = vunpack.c.1.s8 %v224_v2  ;;  %v4040_v26 = vld [vmem:[#allocation8 + $0x98] sm:$0xff] }
  0x4e   :  { %961 = vmatpush.bf16.msra.mxu2 %v808_v28  ;;  %v671_v37 = vcvt.s32.f32 %v415_v30  ;;  %v679_v38 = vcvt.s32.f32 %v423_v31  ;;  %v416_v39 = vunpack.c.0.s8 %v256_v7  ;;  %v424_v40 = vunpack.c.1.s8 %v256_v7  ;;  %v4043_v31 = vld [vmem:[#allocation8 + $0x198] sm:$0xff] }
  0x4f   :  { %975 = vmatpush.bf16.msra.mxu3 %v872_v33  ;;  %v799_v42 = vpack.c.bf16 %v551_v34, %v543_v29  ;;  %v544_v43 = vcvt.s32.f32 %v288_v35  ;;  %v552_v44 = vcvt.s32.f32 %v296_v36  ;;  %v401_v45 = vunpack.c.2.s8 %v249_v32  ;;  %v173_v36 = vld [vmem:[#allocation5] sm:$0x3] }
  0x50   :  { %v863_v47 = vpack.c.bf16 %v679_v38, %v671_v37  ;;  %v672_v48 = vcvt.s32.f32 %v416_v39  ;;  %v680_v49 = vcvt.s32.f32 %v424_v40  ;;  %v409_v50 = vunpack.c.3.s8 %v249_v32 }
  0x51   :  { %934 = vmatpush.bf16.msra.mxu0 %v799_v42  ;;  %v800_v52 = vpack.c.bf16 %v552_v44, %v544_v43  ;;  %v657_v53 = vcvt.s32.f32 %v401_v45  ;;  %v529_v54 = vunpack.c.2.s8 %v281_v41  ;;  %v537_v55 = vunpack.c.3.s8 %v281_v41 }
  0x52   :  { %948 = vmatpush.bf16.msra.mxu1 %v863_v47  ;;  %v864_v56 = vpack.c.bf16 %v680_v49, %v672_v48  ;;  %v665_v57 = vcvt.s32.f32 %v409_v50  ;;  %v402_v58 = vunpack.c.2.s8 %v250_v46  ;;  %v410_v59 = vunpack.c.3.s8 %v250_v46  ;;  %v169_v49 = vld [vmem:[#allocation2] sm:$0xff]  ;;  %v171_v50 = vld [vmem:[#allocation2 + $0x10] sm:$0xff] }
  0x53   :  { %962 = vmatpush.bf16.msra.mxu2 %v800_v52  ;;  %v785_v60 = vcvt.s32.f32 %v529_v54  ;;  %v793_v61 = vcvt.s32.f32 %v537_v55  ;;  %v530_v62 = vunpack.c.2.s8 %v282_v51  ;;  %v538_v63 = vunpack.c.3.s8 %v282_v51 }
  0x54   :  { %976 = vmatpush.bf16.msra.mxu3 %v864_v56  ;;  %v857_v0 = vpack.c.bf16 %v665_v57, %v657_v53  ;;  %v658_v1 = vcvt.s32.f32 %v402_v58  ;;  %v666_v2 = vcvt.s32.f32 %v410_v59  ;;  %v385_v3 = vunpack.c.0.s8 %v249_v32  ;;  %v170_v57 = vld [vmem:[#allocation2 + $0x8] sm:$0xff] }
  0x55   :  { %v921_v4 = vpack.c.bf16 %v793_v61, %v785_v60  ;;  %v786_v5 = vcvt.s32.f32 %v530_v62  ;;  %v794_v6 = vcvt.s32.f32 %v538_v63  ;;  %v393_v7 = vunpack.c.1.s8 %v249_v32  ;;  %v172_v62 = vld [vmem:[#allocation2 + $0x18] sm:$0xff] }
  0x56   :  { %983 = vmatpush.bf16.msrb.mxu0 %v857_v0  ;;  %v858_v8 = vpack.c.bf16 %v666_v2, %v658_v1  ;;  %v641_v9 = vcvt.s32.f32 %v385_v3  ;;  %v513_v10 = vunpack.c.0.s8 %v281_v41  ;;  %v521_v11 = vunpack.c.1.s8 %v281_v41  ;;  %v183_v41 = vld [vmem:[#allocation7] sm:$0x3] }
  0x57   :  { %997 = vmatpush.bf16.msrb.mxu1 %v921_v4  ;;  %v922_v13 = vpack.c.bf16 %v794_v6, %v786_v5  ;;  %v649_v14 = vcvt.s32.f32 %v393_v7  ;;  %v386_v15 = vunpack.c.0.s8 %v250_v46  ;;  %v394_v16 = vunpack.c.1.s8 %v250_v46 }
  0x58   :  { %1011 = vmatpush.bf16.msrb.mxu2 %v858_v8  ;;  %v769_v17 = vcvt.s32.f32 %v513_v10  ;;  %v777_v18 = vcvt.s32.f32 %v521_v11  ;;  %v514_v19 = vunpack.c.0.s8 %v282_v51  ;;  %v522_v20 = vunpack.c.1.s8 %v282_v51 }
  0x59   :  { %1025 = vmatpush.bf16.msrb.mxu3 %v922_v13  ;;  %v849_v22 = vpack.c.bf16 %v649_v14, %v641_v9  ;;  %v642_v23 = vcvt.s32.f32 %v386_v15  ;;  %v650_v24 = vcvt.s32.f32 %v394_v16  ;;  %v369_v25 = vunpack.c.2.s8 %v4035_v12 }
  0x5a   :  { %v913_v27 = vpack.c.bf16 %v777_v18, %v769_v17  ;;  %v770_v28 = vcvt.s32.f32 %v514_v19  ;;  %v778_v29 = vcvt.s32.f32 %v522_v20  ;;  %v377_v30 = vunpack.c.3.s8 %v4035_v12  ;;  %v4083_v17 = vld [vmem:[#allocation8 + $0x50] sm:$0xff] }
  0x5b   :  { %984 = vmatpush.bf16.msrb.mxu0 %v849_v22  ;;  %v850_v32 = vpack.c.bf16 %v650_v24, %v642_v23  ;;  %v625_v33 = vcvt.s32.f32 %v369_v25  ;;  %v497_v34 = vunpack.c.2.s8 %v4037_v21  ;;  %v505_v35 = vunpack.c.3.s8 %v4037_v21  ;;  %v4088_v23 = vld [vmem:[#allocation8 + $0x150] sm:$0xff] }
  0x5c   :  { %998 = vmatpush.bf16.msrb.mxu1 %v913_v27  ;;  %v914_v37 = vpack.c.bf16 %v778_v29, %v770_v28  ;;  %v633_v38 = vcvt.s32.f32 %v377_v30  ;;  %v370_v39 = vunpack.c.2.s8 %v4040_v26  ;;  %v378_v40 = vunpack.c.3.s8 %v4040_v26 }
  0x5d   :  { %1012 = vmatpush.bf16.msrb.mxu2 %v850_v32  ;;  %v753_v42 = vcvt.s32.f32 %v497_v34  ;;  %v761_v43 = vcvt.s32.f32 %v505_v35  ;;  %v498_v44 = vunpack.c.2.s8 %v4043_v31  ;;  %v506_v45 = vunpack.c.3.s8 %v4043_v31 }
  0x5e   :  { %1026 = vmatpush.bf16.msrb.mxu3 %v914_v37  ;;  %v841_v46 = vpack.c.bf16 %v633_v38, %v625_v33  ;;  %v626_v47 = vcvt.s32.f32 %v370_v39  ;;  %v634_v48 = vcvt.s32.f32 %v378_v40  ;;  %v175_v51 = vperm.slane %v173_v36, 0  ;;  %v4099_v38 = vld [vmem:[#allocation8 + $0x58] sm:$0xff] }
  0x5f   :  { %v905_v52 = vpack.c.bf16 %v761_v43, %v753_v42  ;;  %v754_v53 = vcvt.s32.f32 %v498_v44  ;;  %v762_v54 = vcvt.s32.f32 %v506_v45  ;;  %v4051_v55 = vperm.slane %v183_v41, 0  ;;  %v4102_v42 = vld [vmem:[#allocation8 + $0x158] sm:$0xff] }
  0x60   :  { %985 = vmatpush.bf16.msrb.mxu0 %v841_v46  ;;  %v842_v56 = vpack.c.bf16 %v634_v48, %v626_v47  ;;  %v176_v58 = vperm.slane %v173_v36, 1  ;;  %v4053_v60 = vsub.f32 %v169_v49, %v175_v51  ;;  %v4055_v61 = vsub.f32 %v171_v50, %v175_v51 }
  0x61   :  { %999 = vmatpush.bf16.msrb.mxu1 %v905_v52  ;;  %v906_v59 = vpack.c.bf16 %v762_v54, %v754_v53  ;;  %3668 = vrcp.f32 %v4051_v55  ;;  %vm194_vm0 = vweird.f32 %v4051_v55  ;;  %v198_v63 = vand.u32 2147483647, %v4051_v55 }
  0x62   :  { %1013 = vmatpush.bf16.msrb.mxu2 %v842_v56  ;;  %v200_v0 = vand.u32 2147483648, %v4051_v55  ;;  %v4061_v1 = vperm.slane %v183_v41, 1  ;;  %v4063_v2 = vsub.f32 %v170_v57, %v176_v58  ;;  %v353_v3 = vunpack.c.0.s8 %v4035_v12 }
  0x63   :  { %1027 = vmatpush.bf16.msrb.mxu3 %v906_v59  ;;  %v361_v4 = vunpack.c.1.s8 %v4035_v12  ;;  %v481_v5 = vunpack.c.0.s8 %v4037_v21  ;;  %v4070_v7 = vsub.f32 %v172_v62, %v176_v58  ;;  %v489_v13 = vunpack.c.1.s8 %v4037_v21  ;;  %v251_v62 = vld [vmem:[#allocation8 + $0xe0] sm:$0xff] }
  0x64   :  { %v4068_v6 = vor.u32 1.1754944e-38, %v200_v0  ;;  %3670 = vrcp.f32 %v4061_v1  ;;  %v213_v8 = vand.u32 2147483647, %v4061_v1  ;;  %v215_v9 = vand.u32 2147483648, %v4061_v1 }
  0x65   :  { %v609_v10 = vcvt.s32.f32 %v353_v3  ;;  %v617_v11 = vcvt.s32.f32 %v361_v4  ;;  %vm4076_vm1 = vcmp.eq.f32.partialorder %v198_v63, 8.507059e+37  ;;  %vm209_vm2 = vweird.f32 %v4061_v1 }
  0x66   :  { %v737_v12 = vcvt.s32.f32 %v481_v5  ;;  %v354_v15 = vunpack.c.0.s8 %v4040_v26  ;;  %v362_v16 = vunpack.c.1.s8 %v4040_v26  ;;  %v4085_v19 = vor.u32 1.1754944e-38, %v215_v9 }
  0x67   :  { %v3669_v18 = vpop.eup %3668  ;;  %v833_v20 = vpack.c.bf16 %v617_v11, %v609_v10  ;;  %v745_v22 = vcvt.s32.f32 %v489_v13  ;;  %v482_v21 = vunpack.c.0.s8 %v4043_v31  ;;  %vm4091_vm4 = vcmp.eq.f32.partialorder %v213_v8, 8.507059e+37 }
  0x68   :  { %v190_v24 = vmul.f32 %v3669_v18, %v4051_v55  ;;  %vm195_vm3 = vweird.f32 %v3669_v18  ;;  %v610_v25 = vcvt.s32.f32 %v354_v15  ;;  %v618_v27 = vcvt.s32.f32 %v362_v16 }
  0x69   :  { %986 = vmatpush.bf16.msrb.mxu0 %v833_v20  ;;  %v897_v26 = vpack.c.bf16 %v745_v22, %v737_v12  ;;  %v490_v29 = vunpack.c.1.s8 %v4043_v31  ;;  %v738_v30 = vcvt.s32.f32 %v482_v21  ;;  %v337_v32 = vunpack.c.2.s8 %v4083_v17  ;;  %vm4108_vm6 = vmor %vm194_vm0, %vm195_vm3 }
  0x6a   :  { %v3671_v33 = vpop.eup %3670  ;;  %v191_v34 = vsub.f32 1.0, %v190_v24  ;;  %v834_v35 = vpack.c.bf16 %v618_v27, %v610_v25  ;;  %v345_v36 = vunpack.c.3.s8 %v4083_v17  ;;  %v465_v37 = vunpack.c.2.s8 %v4088_v23  ;;  %v257_v25 = vld [vmem:[#allocation8 + $0x110] sm:$0xff] }
  0x6b   :  { %v205_v39 = vmul.f32 %v3671_v33, %v4061_v1  ;;  %vm210_vm5 = vweird.f32 %v3671_v33  ;;  %1000 = vmatpush.bf16.msrb.mxu1 %v897_v26  ;;  %v746_v40 = vcvt.s32.f32 %v490_v29  ;;  %v593_v41 = vcvt.s32.f32 %v337_v32  ;;  %v226_v26 = vld [vmem:[#allocation8 + $0x18] sm:$0xff] }
  0x6c   :  { %v192_v31 = vmul.f32 %v3669_v18, %v191_v34  ;;  %1014 = vmatpush.bf16.msrb.mxu2 %v834_v35  ;;  %v601_v43 = vcvt.s32.f32 %v345_v36  ;;  %v473_v44 = vunpack.c.3.s8 %v4088_v23  ;;  %v721_v45 = vcvt.s32.f32 %v465_v37  ;;  %vm4121_vm7 = vmor %vm209_vm2, %vm210_vm5  ;;  %v258_v36 = vld [vmem:[#allocation8 + $0x118] sm:$0xff] }
  0x6d   :  { %v206_v47 = vsub.f32 1.0, %v205_v39  ;;  %v898_v48 = vpack.c.bf16 %v746_v40, %v738_v30  ;;  %v338_v49 = vunpack.c.2.s8 %v4099_v38  ;;  %v346_v50 = vunpack.c.3.s8 %v4099_v38 }
  0x6e   :  { %v193_v51 = vadd.f32 %v3669_v18, %v192_v31  ;;  %v825_v52 = vpack.c.bf16 %v601_v43, %v593_v41  ;;  %v729_v53 = vcvt.s32.f32 %v473_v44  ;;  %v466_v54 = vunpack.c.2.s8 %v4102_v42 }
  0x6f   :  { %v207_v56 = vmul.f32 %v3671_v33, %v206_v47  ;;  %1028 = vmatpush.bf16.msrb.mxu3 %v898_v48  ;;  %v594_v57 = vcvt.s32.f32 %v338_v49  ;;  %v602_v58 = vcvt.s32.f32 %v346_v50  ;;  %v474_v55 = vunpack.c.3.s8 %v4102_v42 }
  0x70   :  { %v197_v59 = vsel %vm4108_vm6, %v3669_v18, %v193_v51  ;;  %987 = vmatpush.bf16.msrb.mxu0 %v825_v52  ;;  %v889_v63 = vpack.c.bf16 %v729_v53, %v721_v45  ;;  %v722_v0 = vcvt.s32.f32 %v466_v54  ;;  %v321_v3 = vunpack.c.0.s8 %v4083_v17 }
  0x71   :  { %v202_v4 = vsel %vm4076_vm1, %v4068_v6, %v197_v59  ;;  %v208_v5 = vadd.f32 %v3671_v33, %v207_v56  ;;  %v826_v8 = vpack.c.bf16 %v602_v58, %v594_v57  ;;  %v730_v9 = vcvt.s32.f32 %v474_v55 }
  0x72   :  { %v203_v10 = vmul.f32 %v202_v4, %v4053_v60  ;;  %v219_v1 = vmul.f32 %v202_v4, %v4055_v61  ;;  %1001 = vmatpush.bf16.msrb.mxu1 %v889_v63  ;;  %v329_v11 = vunpack.c.1.s8 %v4083_v17  ;;  %v577_v13 = vcvt.s32.f32 %v321_v3  ;;  %v225_v17 = vld [vmem:[#allocation8 + $0x10] sm:$0xff] }
  0x73   :  { %v212_v12 = vsel %vm4121_vm7, %v3671_v33, %v208_v5  ;;  %1015 = vmatpush.bf16.msrb.mxu2 %v826_v8  ;;  %v890_v15 = vpack.c.bf16 %v730_v9, %v722_v0  ;;  %v449_v16 = vunpack.c.0.s8 %v4088_v23  ;;  %v457_v6 = vunpack.c.1.s8 %v4088_v23 }
  0x74   :  { %v4136_v14 = vpack.c.bf16 %v219_v1, %v203_v10  ;;  %v217_v60 = vsel %vm4091_vm4, %v4085_v19, %v212_v12  ;;  %v585_v61 = vcvt.s32.f32 %v329_v11  ;;  %v322_v18 = vunpack.c.0.s8 %v4099_v38  ;;  %v283_v1 = vld [vmem:[#allocation8 + $0x1e0] sm:$0xff] }
  0x75   :  { %v218_v20 = vmul.f32 %v217_v60, %v4063_v2  ;;  %v220_v22 = vmul.f32 %v217_v60, %v4070_v7  ;;  %1029 = vmatpush.bf16.msrb.mxu3 %v890_v15  ;;  %v705_v21 = vcvt.s32.f32 %v449_v16  ;;  %v713_v24 = vcvt.s32.f32 %v457_v6  ;;  %v252_v16 = vld [vmem:[#allocation8 + $0xe8] sm:$0xff] }
  0x76   :  { %963 = vmatmul.bf16.vlgmr.msra.gmra.mxu2 %v4136_v14  ;;  %935 = vmatmul.bf16.vlgmr.msra.gmra.mxu0 %v4136_v14  ;;  %v817_v23 = vpack.c.bf16 %v585_v61, %v577_v13  ;;  %v330_v27 = vunpack.c.1.s8 %v4099_v38  ;;  %v578_v19 = vcvt.s32.f32 %v322_v18  ;;  %v450_v28 = vunpack.c.0.s8 %v4102_v42 }
  0x77   :  { %v4148_v29 = vpack.c.bf16 %v220_v22, %v218_v20  ;;  %v881_v2 = vpack.c.bf16 %v713_v24, %v705_v21  ;;  %v458_v7 = vunpack.c.1.s8 %v4102_v42  ;;  %v305_v30 = vunpack.c.2.s8 %v225_v17 }
  0x78   :  { %988 = vmatpush.bf16.msrb.mxu0 %v817_v23  ;;  %v586_v32 = vcvt.s32.f32 %v330_v27  ;;  %v706_v33 = vcvt.s32.f32 %v450_v28  ;;  %v313_v34 = vunpack.c.3.s8 %v225_v17  ;;  %v433_v35 = vunpack.c.2.s8 %v257_v25 }
  0x79   :  { %977 = vmatmul.bf16.vlgmr.msra.gmra.mxu3 %v4148_v29  ;;  %949 = vmatmul.bf16.vlgmr.msra.gmra.mxu1 %v4148_v29  ;;  %v714_v37 = vcvt.s32.f32 %v458_v7  ;;  %v561_v38 = vcvt.s32.f32 %v305_v30  ;;  %v441_v39 = vunpack.c.3.s8 %v257_v25  ;;  %v306_v40 = vunpack.c.2.s8 %v226_v26 }
  0x7a   :  { %1002 = vmatpush.bf16.msrb.mxu1 %v881_v2  ;;  %v818_v41 = vpack.c.bf16 %v586_v32, %v578_v19  ;;  %v569_v31 = vcvt.s32.f32 %v313_v34  ;;  %v689_v43 = vcvt.s32.f32 %v433_v35  ;;  %v314_v42 = vunpack.c.3.s8 %v226_v26 }
  0x7b   :  { %v882_v44 = vpack.c.bf16 %v714_v37, %v706_v33  ;;  %v697_v45 = vcvt.s32.f32 %v441_v39  ;;  %v562_v46 = vcvt.s32.f32 %v306_v40  ;;  %v434_v47 = vunpack.c.2.s8 %v258_v36 }
  0x7c   :  { %1016 = vmatpush.bf16.msrb.mxu2 %v818_v41  ;;  %v809_v48 = vpack.c.bf16 %v569_v31, %v561_v38  ;;  %v570_v49 = vcvt.s32.f32 %v314_v42  ;;  %v442_v50 = vunpack.c.3.s8 %v258_v36  ;;  %v289_v51 = vunpack.c.0.s8 %v225_v17 }
  0x7d   :  { %1030 = vmatpush.bf16.msrb.mxu3 %v882_v44  ;;  %v873_v52 = vpack.c.bf16 %v697_v45, %v689_v43  ;;  %v690_v53 = vcvt.s32.f32 %v434_v47  ;;  %v297_v54 = vunpack.c.1.s8 %v225_v17  ;;  %v417_v56 = vunpack.c.0.s8 %v257_v25  ;;  %v284_v17 = vld [vmem:[#allocation8 + $0x1e8] sm:$0xff]  ;;  %v243_v43 = vld [vmem:[#allocation8 + $0xa0] sm:$0xff] }
  0x7e   :  { %989 = vmatpush.bf16.msrb.mxu0 %v809_v48  ;;  %v810_v57 = vpack.c.bf16 %v570_v49, %v562_v46  ;;  %v698_v58 = vcvt.s32.f32 %v442_v50  ;;  %v545_v55 = vcvt.s32.f32 %v289_v51  ;;  %v425_v59 = vunpack.c.1.s8 %v257_v25  ;;  %v275_v51 = vld [vmem:[#allocation8 + $0x1a0] sm:$0xff] }
  0x7f   :  { %1003 = vmatpush.bf16.msrb.mxu1 %v873_v52  ;;  %v553_v63 = vcvt.s32.f32 %v297_v54  ;;  %v673_v0 = vcvt.s32.f32 %v417_v56  ;;  %v290_v3 = vunpack.c.0.s8 %v226_v26  ;;  %v298_v4 = vunpack.c.1.s8 %v226_v26 }
  0x80   :  { %1017 = vmatpush.bf16.msrb.mxu2 %v810_v57  ;;  %v874_v5 = vpack.c.bf16 %v698_v58, %v690_v53  ;;  %v681_v8 = vcvt.s32.f32 %v425_v59  ;;  %v418_v9 = vunpack.c.0.s8 %v258_v36  ;;  %v426_v10 = vunpack.c.1.s8 %v258_v36  ;;  %v244_v57 = vld [vmem:[#allocation8 + $0xa8] sm:$0xff] }
  0x81   :  { %v801_v11 = vpack.c.bf16 %v553_v63, %v545_v55  ;;  %v546_v13 = vcvt.s32.f32 %v290_v3  ;;  %v554_v12 = vcvt.s32.f32 %v298_v4  ;;  %v403_v15 = vunpack.c.2.s8 %v251_v62  ;;  %v276_v63 = vld [vmem:[#allocation8 + $0x1a8] sm:$0xff] }
  0x82   :  { %1031 = vmatpush.bf16.msrb.mxu3 %v874_v5  ;;  %v865_v6 = vpack.c.bf16 %v681_v8, %v673_v0  ;;  %v674_v60 = vcvt.s32.f32 %v418_v9  ;;  %v682_v61 = vcvt.s32.f32 %v426_v10  ;;  %v411_v18 = vunpack.c.3.s8 %v251_v62 }
  0x83   :  { %990 = vmatpush.bf16.msrb.mxu0 %v801_v11  ;;  %v802_v20 = vpack.c.bf16 %v554_v12, %v546_v13  ;;  %v659_v22 = vcvt.s32.f32 %v403_v15  ;;  %v531_v21 = vunpack.c.2.s8 %v283_v1  ;;  %v539_v24 = vunpack.c.3.s8 %v283_v1 }
  0x84   :  { %1004 = vmatpush.bf16.msrb.mxu1 %v865_v6  ;;  %v866_v25 = vpack.c.bf16 %v682_v61, %v674_v60  ;;  %v667_v23 = vcvt.s32.f32 %v411_v18  ;;  %v404_v27 = vunpack.c.2.s8 %v252_v16  ;;  %v412_v19 = vunpack.c.3.s8 %v252_v16 }
  0x85   :  { %1018 = vmatpush.bf16.msrb.mxu2 %v802_v20  ;;  %v787_v28 = vcvt.s32.f32 %v531_v21  ;;  %v795_v26 = vcvt.s32.f32 %v539_v24  ;;  %v532_v2 = vunpack.c.2.s8 %v284_v17  ;;  %v540_v7 = vunpack.c.3.s8 %v284_v17 }
  0x86   :  { %1032 = vmatpush.bf16.msrb.mxu3 %v866_v25  ;;  %v859_v30 = vpack.c.bf16 %v667_v23, %v659_v22  ;;  %v660_v32 = vcvt.s32.f32 %v404_v27  ;;  %v668_v33 = vcvt.s32.f32 %v412_v19  ;;  %991 = vmatmul.bf16.vlgmr.msrb.gmra.mxu0 %v4136_v14  ;;  %v387_v34 = vunpack.c.0.s8 %v251_v62  ;;  %v235_v27 = vld [vmem:[#allocation8 + $0x60] sm:$0xff] }
  0x87   :  { %v923_v35 = vpack.c.bf16 %v795_v26, %v787_v28  ;;  %v788_v36 = vcvt.s32.f32 %v532_v2  ;;  %v796_v37 = vcvt.s32.f32 %v540_v7  ;;  %v395_v38 = vunpack.c.1.s8 %v251_v62 }
  0x88   :  { %1039 = vmatpush.bf16.msra.mxu0 %v859_v30  ;;  %v860_v39 = vpack.c.bf16 %v668_v33, %v660_v32  ;;  %1019 = vmatmul.bf16.vlgmr.msrb.gmra.mxu2 %v4136_v14  ;;  %v643_v40 = vcvt.s32.f32 %v387_v34  ;;  %v515_v41 = vunpack.c.0.s8 %v283_v1  ;;  %v523_v31 = vunpack.c.1.s8 %v283_v1  ;;  %v267_v34 = vld [vmem:[#allocation8 + $0x160] sm:$0xff] }
  0x89   :  { %1053 = vmatpush.bf16.msra.mxu1 %v923_v35  ;;  %v924_v42 = vpack.c.bf16 %v796_v37, %v788_v36  ;;  %1033 = vmatmul.bf16.vlgmr.msrb.gmra.mxu3 %v4148_v29  ;;  %v651_v44 = vcvt.s32.f32 %v395_v38  ;;  %v388_v45 = vunpack.c.0.s8 %v252_v16  ;;  %v396_v46 = vunpack.c.1.s8 %v252_v16 }
  0x8a   :  { %1067 = vmatpush.bf16.msra.mxu2 %v860_v39  ;;  %1005 = vmatmul.bf16.vlgmr.msrb.gmra.mxu1 %v4148_v29  ;;  %v771_v47 = vcvt.s32.f32 %v515_v41  ;;  %v779_v48 = vcvt.s32.f32 %v523_v31  ;;  %v516_v49 = vunpack.c.0.s8 %v284_v17  ;;  %v524_v50 = vunpack.c.1.s8 %v284_v17  ;;  %v236_v39 = vld [vmem:[#allocation8 + $0x68] sm:$0xff] }
  0x8b   :  { %1081 = vmatpush.bf16.msra.mxu3 %v924_v42  ;;  %v851_v52 = vpack.c.bf16 %v651_v44, %v643_v40  ;;  %v644_v53 = vcvt.s32.f32 %v388_v45  ;;  %v652_v54 = vcvt.s32.f32 %v396_v46  ;;  %v371_v56 = vunpack.c.2.s8 %v243_v43  ;;  %v268_v42 = vld [vmem:[#allocation8 + $0x168] sm:$0xff] }
  0x8c   :  { %v915_v58 = vpack.c.bf16 %v779_v48, %v771_v47  ;;  %v772_v55 = vcvt.s32.f32 %v516_v49  ;;  %v780_v59 = vcvt.s32.f32 %v524_v50  ;;  %v379_v62 = vunpack.c.3.s8 %v243_v43 }
  0x8d   :  { %1040 = vmatpush.bf16.msra.mxu0 %v851_v52  ;;  %v852_v0 = vpack.c.bf16 %v652_v54, %v644_v53  ;;  %v627_v3 = vcvt.s32.f32 %v371_v56  ;;  %v499_v4 = vunpack.c.2.s8 %v275_v51  ;;  %v507_v5 = vunpack.c.3.s8 %v275_v51 }
  0x8e   :  { %1054 = vmatpush.bf16.msra.mxu1 %v915_v58  ;;  %v916_v8 = vpack.c.bf16 %v780_v59, %v772_v55  ;;  %v635_v9 = vcvt.s32.f32 %v379_v62  ;;  %v372_v10 = vunpack.c.2.s8 %v244_v57  ;;  %v380_v1 = vunpack.c.3.s8 %v244_v57 }
  0x8f   :  { %1068 = vmatpush.bf16.msra.mxu2 %v852_v0  ;;  %v755_v11 = vcvt.s32.f32 %v499_v4  ;;  %v763_v13 = vcvt.s32.f32 %v507_v5  ;;  %v500_v12 = vunpack.c.2.s8 %v276_v63  ;;  %v508_v15 = vunpack.c.3.s8 %v276_v63 }
  0x90   :  { %1082 = vmatpush.bf16.msra.mxu3 %v916_v8  ;;  %v843_v16 = vpack.c.bf16 %v635_v9, %v627_v3  ;;  %v628_v6 = vcvt.s32.f32 %v372_v10  ;;  %v636_v60 = vcvt.s32.f32 %v380_v1  ;;  %v355_v61 = vunpack.c.0.s8 %v243_v43  ;;  %v227_v10 = vld [vmem:[#allocation8 + $0x20] sm:$0xff] }
  0x91   :  { %v907_v18 = vpack.c.bf16 %v763_v13, %v755_v11  ;;  %v756_v17 = vcvt.s32.f32 %v500_v12  ;;  %v764_v20 = vcvt.s32.f32 %v508_v15  ;;  %v363_v22 = vunpack.c.1.s8 %v243_v43 }
  0x92   :  { %1041 = vmatpush.bf16.msra.mxu0 %v843_v16  ;;  %v844_v21 = vpack.c.bf16 %v636_v60, %v628_v6  ;;  %v611_v24 = vcvt.s32.f32 %v355_v61  ;;  %v483_v25 = vunpack.c.0.s8 %v275_v51  ;;  %v491_v23 = vunpack.c.1.s8 %v275_v51  ;;  %v259_v61 = vld [vmem:[#allocation8 + $0x120] sm:$0xff] }
  0x93   :  { %1055 = vmatpush.bf16.msra.mxu1 %v907_v18  ;;  %v908_v19 = vpack.c.bf16 %v764_v20, %v756_v17  ;;  %v619_v28 = vcvt.s32.f32 %v363_v22  ;;  %v356_v26 = vunpack.c.0.s8 %v244_v57  ;;  %v364_v2 = vunpack.c.1.s8 %v244_v57 }
  0x94   :  { %1069 = vmatpush.bf16.msra.mxu2 %v844_v21  ;;  %v739_v7 = vcvt.s32.f32 %v483_v25  ;;  %v747_v30 = vcvt.s32.f32 %v491_v23  ;;  %v484_v32 = vunpack.c.0.s8 %v276_v63  ;;  %v492_v33 = vunpack.c.1.s8 %v276_v63  ;;  %v228_v21 = vld [vmem:[#allocation8 + $0x28] sm:$0xff] }
  0x95   :  { %1083 = vmatpush.bf16.msra.mxu3 %v908_v19  ;;  %v835_v35 = vpack.c.bf16 %v619_v28, %v611_v24  ;;  %v612_v36 = vcvt.s32.f32 %v356_v26  ;;  %v620_v37 = vcvt.s32.f32 %v364_v2  ;;  %v339_v38 = vunpack.c.2.s8 %v235_v27  ;;  %v260_v19 = vld [vmem:[#allocation8 + $0x128] sm:$0xff] }
  0x96   :  { %v899_v40 = vpack.c.bf16 %v747_v30, %v739_v7  ;;  %v740_v41 = vcvt.s32.f32 %v484_v32  ;;  %v748_v31 = vcvt.s32.f32 %v492_v33  ;;  %v347_v43 = vunpack.c.3.s8 %v235_v27 }
  0x97   :  { %1042 = vmatpush.bf16.msra.mxu0 %v835_v35  ;;  %v836_v44 = vpack.c.bf16 %v620_v37, %v612_v36  ;;  %v595_v45 = vcvt.s32.f32 %v339_v38  ;;  %v467_v46 = vunpack.c.2.s8 %v267_v34  ;;  %v475_v47 = vunpack.c.3.s8 %v267_v34 }
  0x98   :  { %1056 = vmatpush.bf16.msra.mxu1 %v899_v40  ;;  %v900_v48 = vpack.c.bf16 %v748_v31, %v740_v41  ;;  %v603_v49 = vcvt.s32.f32 %v347_v43  ;;  %v340_v50 = vunpack.c.2.s8 %v236_v39  ;;  %v348_v51 = vunpack.c.3.s8 %v236_v39 }
  0x99   :  { %1070 = vmatpush.bf16.msra.mxu2 %v836_v44  ;;  %v723_v52 = vcvt.s32.f32 %v467_v46  ;;  %v731_v53 = vcvt.s32.f32 %v475_v47  ;;  %v468_v54 = vunpack.c.2.s8 %v268_v42  ;;  %v476_v56 = vunpack.c.3.s8 %v268_v42 }
  0x9a   :  { %1084 = vmatpush.bf16.msra.mxu3 %v900_v48  ;;  %v827_v57 = vpack.c.bf16 %v603_v49, %v595_v45  ;;  %v596_v58 = vcvt.s32.f32 %v340_v50  ;;  %v604_v55 = vcvt.s32.f32 %v348_v51  ;;  %v323_v59 = vunpack.c.0.s8 %v235_v27  ;;  %v253_v50 = vld [vmem:[#allocation8 + $0xf0] sm:$0xff] }
  0x9b   :  { %v891_v62 = vpack.c.bf16 %v731_v53, %v723_v52  ;;  %v724_v63 = vcvt.s32.f32 %v468_v54  ;;  %v732_v0 = vcvt.s32.f32 %v476_v56  ;;  %v331_v3 = vunpack.c.1.s8 %v235_v27 }
  0x9c   :  { %1043 = vmatpush.bf16.msra.mxu0 %v827_v57  ;;  %v828_v4 = vpack.c.bf16 %v604_v55, %v596_v58  ;;  %v579_v5 = vcvt.s32.f32 %v323_v59  ;;  %v451_v8 = vunpack.c.0.s8 %v267_v34  ;;  %v459_v9 = vunpack.c.1.s8 %v267_v34  ;;  %v285_v59 = vld [vmem:[#allocation8 + $0x1f0] sm:$0xff] }
  0x9d   :  { %1057 = vmatpush.bf16.msra.mxu1 %v891_v62  ;;  %v892_v1 = vpack.c.bf16 %v732_v0, %v724_v63  ;;  %v587_v11 = vcvt.s32.f32 %v331_v3  ;;  %v324_v13 = vunpack.c.0.s8 %v236_v39  ;;  %v332_v12 = vunpack.c.1.s8 %v236_v39 }
  0x9e   :  { %1071 = vmatpush.bf16.msra.mxu2 %v828_v4  ;;  %v707_v15 = vcvt.s32.f32 %v451_v8  ;;  %v715_v16 = vcvt.s32.f32 %v459_v9  ;;  %v452_v6 = vunpack.c.0.s8 %v268_v42  ;;  %v460_v60 = vunpack.c.1.s8 %v268_v42  ;;  %v254_v4 = vld [vmem:[#allocation8 + $0xf8] sm:$0xff] }
  0x9f   :  { %1085 = vmatpush.bf16.msra.mxu3 %v892_v1  ;;  %v819_v18 = vpack.c.bf16 %v587_v11, %v579_v5  ;;  %v580_v17 = vcvt.s32.f32 %v324_v13  ;;  %v588_v20 = vcvt.s32.f32 %v332_v12  ;;  %v307_v22 = vunpack.c.2.s8 %v227_v10  ;;  %v286_v1 = vld [vmem:[#allocation8 + $0x1f8] sm:$0xff] }
  0xa0   :  { %v883_v24 = vpack.c.bf16 %v715_v16, %v707_v15  ;;  %v708_v25 = vcvt.s32.f32 %v452_v6  ;;  %v716_v23 = vcvt.s32.f32 %v460_v60  ;;  %v315_v27 = vunpack.c.3.s8 %v227_v10 }
  0xa1   :  { %1044 = vmatpush.bf16.msra.mxu0 %v819_v18  ;;  %v820_v28 = vpack.c.bf16 %v588_v20, %v580_v17  ;;  %v563_v26 = vcvt.s32.f32 %v307_v22  ;;  %v435_v2 = vunpack.c.2.s8 %v259_v61  ;;  %v443_v7 = vunpack.c.3.s8 %v259_v61 }
  0xa2   :  { %1058 = vmatpush.bf16.msra.mxu1 %v883_v24  ;;  %v884_v30 = vpack.c.bf16 %v716_v23, %v708_v25  ;;  %v571_v32 = vcvt.s32.f32 %v315_v27  ;;  %v308_v33 = vunpack.c.2.s8 %v228_v21  ;;  %v316_v34 = vunpack.c.3.s8 %v228_v21 }
  0xa3   :  { %1072 = vmatpush.bf16.msra.mxu2 %v820_v28  ;;  %v691_v35 = vcvt.s32.f32 %v435_v2  ;;  %v699_v36 = vcvt.s32.f32 %v443_v7  ;;  %v436_v37 = vunpack.c.2.s8 %v260_v19  ;;  %v444_v38 = vunpack.c.3.s8 %v260_v19 }
  0xa4   :  { %1086 = vmatpush.bf16.msra.mxu3 %v884_v30  ;;  %v811_v39 = vpack.c.bf16 %v571_v32, %v563_v26  ;;  %v564_v40 = vcvt.s32.f32 %v308_v33  ;;  %v572_v41 = vcvt.s32.f32 %v316_v34  ;;  %v291_v31 = vunpack.c.0.s8 %v227_v10  ;;  %v245_v33 = vld [vmem:[#allocation8 + $0xb0] sm:$0xff] }
  0xa5   :  { %v875_v43 = vpack.c.bf16 %v699_v36, %v691_v35  ;;  %v692_v42 = vcvt.s32.f32 %v436_v37  ;;  %v700_v44 = vcvt.s32.f32 %v444_v38  ;;  %v299_v45 = vunpack.c.1.s8 %v227_v10 }
  0xa6   :  { %1045 = vmatpush.bf16.msra.mxu0 %v811_v39  ;;  %v812_v46 = vpack.c.bf16 %v572_v41, %v564_v40  ;;  %v547_v47 = vcvt.s32.f32 %v291_v31  ;;  %v419_v48 = vunpack.c.0.s8 %v259_v61  ;;  %v427_v49 = vunpack.c.1.s8 %v259_v61  ;;  %v277_v31 = vld [vmem:[#allocation8 + $0x1b0] sm:$0xff] }
  0xa7   :  { %1059 = vmatpush.bf16.msra.mxu1 %v875_v43  ;;  %v876_v51 = vpack.c.bf16 %v700_v44, %v692_v42  ;;  %v555_v52 = vcvt.s32.f32 %v299_v45  ;;  %v292_v53 = vunpack.c.0.s8 %v228_v21  ;;  %v300_v54 = vunpack.c.1.s8 %v228_v21 }
  0xa8   :  { %1073 = vmatpush.bf16.msra.mxu2 %v812_v46  ;;  %v675_v56 = vcvt.s32.f32 %v419_v48  ;;  %v683_v57 = vcvt.s32.f32 %v427_v49  ;;  %v420_v58 = vunpack.c.0.s8 %v260_v19  ;;  %v428_v55 = vunpack.c.1.s8 %v260_v19  ;;  %v246_v46 = vld [vmem:[#allocation8 + $0xb8] sm:$0xff] }
  0xa9   :  { %1087 = vmatpush.bf16.msra.mxu3 %v876_v51  ;;  %v803_v62 = vpack.c.bf16 %v555_v52, %v547_v47  ;;  %v548_v63 = vcvt.s32.f32 %v292_v53  ;;  %v556_v0 = vcvt.s32.f32 %v300_v54  ;;  %v405_v3 = vunpack.c.2.s8 %v253_v50  ;;  %v278_v51 = vld [vmem:[#allocation8 + $0x1b8] sm:$0xff] }
  0xaa   :  { %v867_v5 = vpack.c.bf16 %v683_v57, %v675_v56  ;;  %v676_v8 = vcvt.s32.f32 %v420_v58  ;;  %v684_v9 = vcvt.s32.f32 %v428_v55  ;;  %v413_v10 = vunpack.c.3.s8 %v253_v50 }
  0xab   :  { %1046 = vmatpush.bf16.msra.mxu0 %v803_v62  ;;  %v804_v11 = vpack.c.bf16 %v556_v0, %v548_v63  ;;  %v661_v13 = vcvt.s32.f32 %v405_v3  ;;  %v533_v12 = vunpack.c.2.s8 %v285_v59  ;;  %v541_v15 = vunpack.c.3.s8 %v285_v59 }
  0xac   :  { %1060 = vmatpush.bf16.msra.mxu1 %v867_v5  ;;  %v868_v16 = vpack.c.bf16 %v684_v9, %v676_v8  ;;  %v669_v6 = vcvt.s32.f32 %v413_v10  ;;  %v406_v60 = vunpack.c.2.s8 %v254_v4  ;;  %v414_v61 = vunpack.c.3.s8 %v254_v4 }
  0xad   :  { %1074 = vmatpush.bf16.msra.mxu2 %v804_v11  ;;  %v789_v18 = vcvt.s32.f32 %v533_v12  ;;  %v797_v17 = vcvt.s32.f32 %v541_v15  ;;  %v534_v20 = vunpack.c.2.s8 %v286_v1  ;;  %v542_v22 = vunpack.c.3.s8 %v286_v1 }
  0xae   :  { %1088 = vmatpush.bf16.msra.mxu3 %v868_v16  ;;  %v861_v21 = vpack.c.bf16 %v669_v6, %v661_v13  ;;  %v662_v24 = vcvt.s32.f32 %v406_v60  ;;  %v670_v25 = vcvt.s32.f32 %v414_v61  ;;  %1047 = vmatmul.bf16.vlgmr.msra.gmra.mxu0 %v4136_v14  ;;  %v389_v23 = vunpack.c.0.s8 %v253_v50  ;;  %v237_v60 = vld [vmem:[#allocation8 + $0x70] sm:$0xff] }
  0xaf   :  { %v925_v27 = vpack.c.bf16 %v797_v17, %v789_v18  ;;  %v790_v19 = vcvt.s32.f32 %v534_v20  ;;  %v798_v28 = vcvt.s32.f32 %v542_v22  ;;  %1061 = vmatmul.bf16.vlgmr.msra.gmra.mxu1 %v4148_v29  ;;  %v397_v26 = vunpack.c.1.s8 %v253_v50 }
  0xb0   :  { %1095 = vmatpush.bf16.msrb.mxu0 %v861_v21  ;;  %v862_v2 = vpack.c.bf16 %v670_v25, %v662_v24  ;;  %1075 = vmatmul.bf16.vlgmr.msra.gmra.mxu2 %v4136_v14  ;;  %v645_v7 = vcvt.s32.f32 %v389_v23  ;;  %v517_v30 = vunpack.c.0.s8 %v285_v59  ;;  %v525_v32 = vunpack.c.1.s8 %v285_v59  ;;  %v269_v23 = vld [vmem:[#allocation8 + $0x170] sm:$0xff] }
  0xb1   :  { %1109 = vmatpush.bf16.msrb.mxu1 %v925_v27  ;;  %v926_v34 = vpack.c.bf16 %v798_v28, %v790_v19  ;;  %1089 = vmatmul.bf16.vlgmr.msra.gmra.mxu3 %v4148_v29  ;;  %v653_v35 = vcvt.s32.f32 %v397_v26  ;;  %v390_v36 = vunpack.c.0.s8 %v254_v4  ;;  %v398_v37 = vunpack.c.1.s8 %v254_v4 }
  0xb2   :  { %1123 = vmatpush.bf16.msrb.mxu2 %v862_v2  ;;  %v773_v38 = vcvt.s32.f32 %v517_v30  ;;  %v781_v39 = vcvt.s32.f32 %v525_v32  ;;  %v518_v40 = vunpack.c.0.s8 %v286_v1  ;;  %v526_v41 = vunpack.c.1.s8 %v286_v1  ;;  %v238_v2 = vld [vmem:[#allocation8 + $0x78] sm:$0xff] }
  0xb3   :  { %1137 = vmatpush.bf16.msrb.mxu3 %v926_v34  ;;  %v853_v43 = vpack.c.bf16 %v653_v35, %v645_v7  ;;  %v646_v42 = vcvt.s32.f32 %v390_v36  ;;  %v654_v44 = vcvt.s32.f32 %v398_v37  ;;  %v373_v45 = vunpack.c.2.s8 %v245_v33  ;;  %v270_v34 = vld [vmem:[#allocation8 + $0x178] sm:$0xff] }
  0xb4   :  { %v917_v47 = vpack.c.bf16 %v781_v39, %v773_v38  ;;  %v774_v48 = vcvt.s32.f32 %v518_v40  ;;  %v782_v49 = vcvt.s32.f32 %v526_v41  ;;  %v381_v50 = vunpack.c.3.s8 %v245_v33 }
  0xb5   :  { %1096 = vmatpush.bf16.msrb.mxu0 %v853_v43  ;;  %v854_v52 = vpack.c.bf16 %v654_v44, %v646_v42  ;;  %v629_v53 = vcvt.s32.f32 %v373_v45  ;;  %v501_v54 = vunpack.c.2.s8 %v277_v31  ;;  %v509_v56 = vunpack.c.3.s8 %v277_v31 }
  0xb6   :  { %1110 = vmatpush.bf16.msrb.mxu1 %v917_v47  ;;  %v918_v57 = vpack.c.bf16 %v782_v49, %v774_v48  ;;  %v637_v58 = vcvt.s32.f32 %v381_v50  ;;  %v374_v55 = vunpack.c.2.s8 %v246_v46  ;;  %v382_v59 = vunpack.c.3.s8 %v246_v46 }
  0xb7   :  { %1124 = vmatpush.bf16.msrb.mxu2 %v854_v52  ;;  %v757_v62 = vcvt.s32.f32 %v501_v54  ;;  %v765_v63 = vcvt.s32.f32 %v509_v56  ;;  %v502_v0 = vunpack.c.2.s8 %v278_v51  ;;  %v510_v3 = vunpack.c.3.s8 %v278_v51 }
  0xb8   :  { %1138 = vmatpush.bf16.msrb.mxu3 %v918_v57  ;;  %v845_v4 = vpack.c.bf16 %v637_v58, %v629_v53  ;;  %v630_v5 = vcvt.s32.f32 %v374_v55  ;;  %v638_v8 = vcvt.s32.f32 %v382_v59  ;;  %v357_v9 = vunpack.c.0.s8 %v245_v33  ;;  %v229_v55 = vld [vmem:[#allocation8 + $0x30] sm:$0xff] }
  0xb9   :  { %v909_v10 = vpack.c.bf16 %v765_v63, %v757_v62  ;;  %v758_v1 = vcvt.s32.f32 %v502_v0  ;;  %v766_v11 = vcvt.s32.f32 %v510_v3  ;;  %v365_v13 = vunpack.c.1.s8 %v245_v33 }
  0xba   :  { %1097 = vmatpush.bf16.msrb.mxu0 %v845_v4  ;;  %v846_v12 = vpack.c.bf16 %v638_v8, %v630_v5  ;;  %v613_v15 = vcvt.s32.f32 %v357_v9  ;;  %v485_v16 = vunpack.c.0.s8 %v277_v31  ;;  %v493_v6 = vunpack.c.1.s8 %v277_v31  ;;  %v261_v9 = vld [vmem:[#allocation8 + $0x130] sm:$0xff] }
  0xbb   :  { %1111 = vmatpush.bf16.msrb.mxu1 %v909_v10  ;;  %v910_v61 = vpack.c.bf16 %v766_v11, %v758_v1  ;;  %v621_v18 = vcvt.s32.f32 %v365_v13  ;;  %v358_v17 = vunpack.c.0.s8 %v246_v46  ;;  %v366_v20 = vunpack.c.1.s8 %v246_v46 }
  0xbc   :  { %1125 = vmatpush.bf16.msrb.mxu2 %v846_v12  ;;  %v741_v22 = vcvt.s32.f32 %v485_v16  ;;  %v749_v21 = vcvt.s32.f32 %v493_v6  ;;  %v486_v24 = vunpack.c.0.s8 %v278_v51  ;;  %v494_v25 = vunpack.c.1.s8 %v278_v51  ;;  %v230_v12 = vld [vmem:[#allocation8 + $0x38] sm:$0xff] }
  0xbd   :  { %1139 = vmatpush.bf16.msrb.mxu3 %v910_v61  ;;  %v837_v27 = vpack.c.bf16 %v621_v18, %v613_v15  ;;  %v614_v19 = vcvt.s32.f32 %v358_v17  ;;  %v622_v28 = vcvt.s32.f32 %v366_v20  ;;  %v341_v26 = vunpack.c.2.s8 %v237_v60  ;;  %v262_v61 = vld [vmem:[#allocation8 + $0x138] sm:$0xff] }
  0xbe   :  { %v901_v7 = vpack.c.bf16 %v749_v21, %v741_v22  ;;  %v742_v30 = vcvt.s32.f32 %v486_v24  ;;  %v750_v32 = vcvt.s32.f32 %v494_v25  ;;  %v349_v33 = vunpack.c.3.s8 %v237_v60 }
  0xbf   :  { %1098 = vmatpush.bf16.msrb.mxu0 %v837_v27  ;;  %v838_v35 = vpack.c.bf16 %v622_v28, %v614_v19  ;;  %v597_v36 = vcvt.s32.f32 %v341_v26  ;;  %v469_v37 = vunpack.c.2.s8 %v269_v23  ;;  %v477_v38 = vunpack.c.3.s8 %v269_v23 }
  0xc0   :  { %1112 = vmatpush.bf16.msrb.mxu1 %v901_v7  ;;  %v902_v39 = vpack.c.bf16 %v750_v32, %v742_v30  ;;  %v605_v40 = vcvt.s32.f32 %v349_v33  ;;  %v342_v41 = vunpack.c.2.s8 %v238_v2  ;;  %v350_v31 = vunpack.c.3.s8 %v238_v2 }
  0xc1   :  { %1126 = vmatpush.bf16.msrb.mxu2 %v838_v35  ;;  %v725_v43 = vcvt.s32.f32 %v469_v37  ;;  %v733_v42 = vcvt.s32.f32 %v477_v38  ;;  %v470_v44 = vunpack.c.2.s8 %v270_v34  ;;  %v478_v45 = vunpack.c.3.s8 %v270_v34 }
  0xc2   :  { %1140 = vmatpush.bf16.msrb.mxu3 %v902_v39  ;;  %v829_v46 = vpack.c.bf16 %v605_v40, %v597_v36  ;;  %v598_v47 = vcvt.s32.f32 %v342_v41  ;;  %v606_v48 = vcvt.s32.f32 %v350_v31  ;;  %v325_v49 = vunpack.c.0.s8 %v237_v60  ;;  %v1247_v41 = vld [vmem:[#allocation13 + $0x60] sm:$0xff] }
  0xc3   :  { %v893_v50 = vpack.c.bf16 %v733_v42, %v725_v43  ;;  %v726_v51 = vcvt.s32.f32 %v470_v44  ;;  %v734_v52 = vcvt.s32.f32 %v478_v45  ;;  %v333_v53 = vunpack.c.1.s8 %v237_v60 }
  0xc4   :  { %1099 = vmatpush.bf16.msrb.mxu0 %v829_v46  ;;  %v830_v54 = vpack.c.bf16 %v606_v48, %v598_v47  ;;  %v581_v56 = vcvt.s32.f32 %v325_v49  ;;  %v453_v57 = vunpack.c.0.s8 %v269_v23  ;;  %v461_v58 = vunpack.c.1.s8 %v269_v23 }
  0xc5   :  { %1113 = vmatpush.bf16.msrb.mxu1 %v893_v50  ;;  %v894_v59 = vpack.c.bf16 %v734_v52, %v726_v51  ;;  %v589_v62 = vcvt.s32.f32 %v333_v53  ;;  %v326_v63 = vunpack.c.0.s8 %v238_v2  ;;  %v334_v0 = vunpack.c.1.s8 %v238_v2  ;;  %v1263_v53 = vld [vmem:[#allocation13 + $0xe0] sm:$0xff] }
  0xc6   :  { %1127 = vmatpush.bf16.msrb.mxu2 %v830_v54  ;;  %v709_v3 = vcvt.s32.f32 %v453_v57  ;;  %v717_v4 = vcvt.s32.f32 %v461_v58  ;;  %v454_v5 = vunpack.c.0.s8 %v270_v34  ;;  %v462_v8 = vunpack.c.1.s8 %v270_v34 }
  0xc7   :  { %1141 = vmatpush.bf16.msrb.mxu3 %v894_v59  ;;  %v821_v10 = vpack.c.bf16 %v589_v62, %v581_v56  ;;  %v582_v1 = vcvt.s32.f32 %v326_v63  ;;  %v590_v11 = vcvt.s32.f32 %v334_v0  ;;  %v309_v13 = vunpack.c.2.s8 %v229_v55 }
  0xc8   :  { %v885_v15 = vpack.c.bf16 %v717_v4, %v709_v3  ;;  %v710_v16 = vcvt.s32.f32 %v454_v5  ;;  %v718_v6 = vcvt.s32.f32 %v462_v8  ;;  %v317_v60 = vunpack.c.3.s8 %v229_v55 }
  0xc9   :  { %1100 = vmatpush.bf16.msrb.mxu0 %v821_v10  ;;  %v822_v18 = vpack.c.bf16 %v590_v11, %v582_v1  ;;  %v565_v17 = vcvt.s32.f32 %v309_v13  ;;  %v437_v20 = vunpack.c.2.s8 %v261_v9  ;;  %v445_v22 = vunpack.c.3.s8 %v261_v9 }
  0xca   :  { %1114 = vmatpush.bf16.msrb.mxu1 %v885_v15  ;;  %v886_v21 = vpack.c.bf16 %v718_v6, %v710_v16  ;;  %v573_v24 = vcvt.s32.f32 %v317_v60  ;;  %v310_v25 = vunpack.c.2.s8 %v230_v12  ;;  %v318_v23 = vunpack.c.3.s8 %v230_v12  ;;  %v1259_v6 = vld [vmem:[#allocation13 + $0xc0] sm:$0xff] }
  0xcb   :  { %1128 = vmatpush.bf16.msrb.mxu2 %v822_v18  ;;  %v693_v27 = vcvt.s32.f32 %v437_v20  ;;  %v701_v19 = vcvt.s32.f32 %v445_v22  ;;  %v438_v28 = vunpack.c.2.s8 %v262_v61  ;;  %v446_v26 = vunpack.c.3.s8 %v262_v61  ;;  %v1239_v20 = vld [vmem:[#allocation13 + $0x20] sm:$0xff] }
  0xcc   :  { %1142 = vmatpush.bf16.msrb.mxu3 %v886_v21  ;;  %v813_v2 = vpack.c.bf16 %v573_v24, %v565_v17  ;;  %v566_v7 = vcvt.s32.f32 %v310_v25  ;;  %v574_v30 = vcvt.s32.f32 %v318_v23  ;;  %v293_v32 = vunpack.c.0.s8 %v229_v55 }
  0xcd   :  { %v877_v33 = vpack.c.bf16 %v701_v19, %v693_v27  ;;  %v694_v34 = vcvt.s32.f32 %v438_v28  ;;  %v702_v35 = vcvt.s32.f32 %v446_v26  ;;  %v301_v36 = vunpack.c.1.s8 %v229_v55  ;;  %v1243_v55 = vld [vmem:[#allocation13 + $0x40] sm:$0xff] }
  0xce   :  { %1101 = vmatpush.bf16.msrb.mxu0 %v813_v2  ;;  %v814_v37 = vpack.c.bf16 %v574_v30, %v566_v7  ;;  %v549_v38 = vcvt.s32.f32 %v293_v32  ;;  %v421_v39 = vunpack.c.0.s8 %v261_v9  ;;  %v429_v40 = vunpack.c.1.s8 %v261_v9 }
  0xcf   :  { %1115 = vmatpush.bf16.msrb.mxu1 %v877_v33  ;;  %v878_v31 = vpack.c.bf16 %v702_v35, %v694_v34  ;;  %v557_v43 = vcvt.s32.f32 %v301_v36  ;;  %v294_v42 = vunpack.c.0.s8 %v230_v12  ;;  %v302_v44 = vunpack.c.1.s8 %v230_v12  ;;  %v1255_v34 = vld [vmem:[#allocation13 + $0xa0] sm:$0xff] }
  0xd0   :  { %1129 = vmatpush.bf16.msrb.mxu2 %v814_v37  ;;  %v677_v45 = vcvt.s32.f32 %v421_v39  ;;  %v685_v46 = vcvt.s32.f32 %v429_v40  ;;  %v422_v47 = vunpack.c.0.s8 %v262_v61  ;;  %v430_v48 = vunpack.c.1.s8 %v262_v61 }
  0xd1   :  { %1143 = vmatpush.bf16.msrb.mxu3 %v878_v31  ;;  %v805_v49 = vpack.c.bf16 %v557_v43, %v549_v38  ;;  %v550_v50 = vcvt.s32.f32 %v294_v42  ;;  %v558_v51 = vcvt.s32.f32 %v302_v44  ;;  %v1419_v52 = vunpack.c.2.s8 %v1247_v41 }
  0xd2   :  { %v869_v54 = vpack.c.bf16 %v685_v46, %v677_v45  ;;  %v678_v56 = vcvt.s32.f32 %v422_v47  ;;  %v686_v57 = vcvt.s32.f32 %v430_v48  ;;  %v1423_v58 = vunpack.c.3.s8 %v1247_v41  ;;  %v4165_v45 = vld [vmem:[#allocation10] sm:$0xff]  ;;  %v4167_v48 = vld [vmem:[#allocation11] sm:$0xff] }
  0xd3   :  { %1102 = vmatpush.bf16.msrb.mxu0 %v805_v49  ;;  %v806_v59 = vpack.c.bf16 %v558_v51, %v550_v50  ;;  %v1931_v62 = vcvt.s32.f32 %v1419_v52  ;;  %v1411_v63 = vunpack.c.0.s8 %v1247_v41  ;;  %v1415_v0 = vunpack.c.1.s8 %v1247_v41  ;;  %v1235_v41 = vld [vmem:[#allocation13] sm:$0xff] }
  0xd4   :  { %1116 = vmatpush.bf16.msrb.mxu1 %v869_v54  ;;  %v870_v3 = vpack.c.bf16 %v686_v57, %v678_v56  ;;  %v1935_v4 = vcvt.s32.f32 %v1423_v58  ;;  %v1483_v5 = vunpack.c.2.s8 %v1263_v53  ;;  %v1487_v8 = vunpack.c.3.s8 %v1263_v53 }
  0xd5   :  { %1130 = vmatpush.bf16.msrb.mxu2 %v806_v59  ;;  %v1923_v9 = vcvt.s32.f32 %v1411_v63  ;;  %v1927_v10 = vcvt.s32.f32 %v1415_v0  ;;  %v1403_v1 = vunpack.c.2.s8 %v1243_v55  ;;  %v1407_v11 = vunpack.c.3.s8 %v1243_v55 }
  0xd6   :  { %1144 = vmatpush.bf16.msrb.mxu3 %v870_v3  ;;  %1103 = vmatmul.bf16.vlgmr.msrb.gmra.mxu0 %v4136_v14  ;;  %v2415_v13 = vpack.c.bf16 %v1935_v4, %v1931_v62  ;;  %v1995_v12 = vcvt.s32.f32 %v1483_v5  ;;  %v1999_v15 = vcvt.s32.f32 %v1487_v8  ;;  %v1475_v16 = vunpack.c.0.s8 %v1263_v53  ;;  %v1279_v3 = vld [vmem:[#allocation13 + $0x160] sm:$0xff] }
  0xd7   :  { %1117 = vmatmul.bf16.vlgmr.msrb.gmra.mxu1 %v4148_v29  ;;  %v2411_v60 = vpack.c.bf16 %v1927_v10, %v1923_v9  ;;  %v1915_v61 = vcvt.s32.f32 %v1403_v1  ;;  %v1919_v18 = vcvt.s32.f32 %v1407_v11  ;;  %v1479_v17 = vunpack.c.1.s8 %v1263_v53  ;;  %v1311_v5 = vld [vmem:[#allocation13 + $0x260] sm:$0xff] }
  0xd8   :  { %1131 = vmatmul.bf16.vlgmr.msrb.gmra.mxu2 %v4136_v14  ;;  %2651 = vmatpush.bf16.msra.mxu0 %v2415_v13  ;;  %v2447_v22 = vpack.c.bf16 %v1999_v15, %v1995_v12  ;;  %v1987_v21 = vcvt.s32.f32 %v1475_v16  ;;  %v1395_v24 = vunpack.c.0.s8 %v1243_v55  ;;  %v1399_v25 = vunpack.c.1.s8 %v1243_v55  ;;  %v1251_v11 = vld [vmem:[#allocation13 + $0x80] sm:$0xff] }
  0xd9   :  { %1145 = vmatmul.bf16.vlgmr.msrb.gmra.mxu3 %v4148_v29  ;;  %v1991_v23 = vcvt.s32.f32 %v1479_v17  ;;  %v1467_v27 = vunpack.c.2.s8 %v1259_v6  ;;  %v1471_v19 = vunpack.c.3.s8 %v1259_v6  ;;  %v2407_v28 = vpack.c.bf16 %v1919_v18, %v1915_v61 }
  0xda   :  { %2665 = vmatpush.bf16.msra.mxu1 %v2447_v22  ;;  %v1387_v26 = vunpack.c.2.s8 %v1239_v20  ;;  %v1391_v2 = vunpack.c.3.s8 %v1239_v20  ;;  %v1459_v33 = vunpack.c.0.s8 %v1259_v6  ;;  %v1907_v14 = vcvt.s32.f32 %v1395_v24 }
  0xdb   :  { %v2443_v7 = vpack.c.bf16 %v1991_v23, %v1987_v21  ;;  %v1979_v30 = vcvt.s32.f32 %v1467_v27  ;;  %v1983_v32 = vcvt.s32.f32 %v1471_v19  ;;  %v1911_v35 = vcvt.s32.f32 %v1399_v25 }
  0xdc   :  { %2652 = vmatpush.bf16.msra.mxu0 %v2411_v60  ;;  %v1899_v36 = vcvt.s32.f32 %v1387_v26  ;;  %v1463_v37 = vunpack.c.1.s8 %v1259_v6  ;;  %v1903_v39 = vcvt.s32.f32 %v1391_v2  ;;  %v1379_v29 = vunpack.c.0.s8 %v1239_v20 }
  0xdd   :  { %v2439_v38 = vpack.c.bf16 %v1983_v32, %v1979_v30  ;;  %v1383_v40 = vunpack.c.1.s8 %v1239_v20  ;;  %v1971_v31 = vcvt.s32.f32 %v1459_v33  ;;  %v1451_v42 = vunpack.c.2.s8 %v1255_v34 }
  0xde   :  { %2666 = vmatpush.bf16.msra.mxu1 %v2443_v7  ;;  %v1975_v43 = vcvt.s32.f32 %v1463_v37  ;;  %v1455_v44 = vunpack.c.3.s8 %v1255_v34  ;;  %v1891_v46 = vcvt.s32.f32 %v1379_v29  ;;  %v2403_v49 = vpack.c.bf16 %v1911_v35, %v1907_v14  ;;  %v1295_v35 = vld [vmem:[#allocation13 + $0x1e0] sm:$0xff] }
  0xdf   :  { %v1895_v47 = vcvt.s32.f32 %v1383_v40  ;;  %v1963_v50 = vcvt.s32.f32 %v1451_v42  ;;  %v1371_v52 = vunpack.c.2.s8 %v1235_v41  ;;  %v2399_v53 = vpack.c.bf16 %v1903_v39, %v1899_v36 }
  0xe0   :  { %2653 = vmatpush.bf16.msra.mxu0 %v2407_v28  ;;  %v1967_v51 = vcvt.s32.f32 %v1455_v44  ;;  %v1153_v54 = vperm.slane %v4165_v45, 0  ;;  %v1375_v56 = vunpack.c.3.s8 %v1235_v41  ;;  %v2435_v57 = vpack.c.bf16 %v1975_v43, %v1971_v31  ;;  %v1327_v31 = vld [vmem:[#allocation13 + $0x2e0] sm:$0xff] }
  0xe1   :  { %v2395_v58 = vpack.c.bf16 %v1895_v47, %v1891_v46  ;;  %v1187_v59 = vperm.slane %v4167_v48, 0  ;;  %v4171_v62 = vcvt.s32.f32 %v1371_v52  ;;  %v1443_v63 = vunpack.c.0.s8 %v1255_v34  ;;  %v4192_v52 = vld [vmem:[#allocation13 + $0x240] sm:$0xff] }
  0xe2   :  { %2667 = vmatpush.bf16.msra.mxu1 %v2439_v38  ;;  %v2431_v55 = vpack.c.bf16 %v1967_v51, %v1963_v50  ;;  %v1447_v0 = vunpack.c.1.s8 %v1255_v34  ;;  %v1363_v4 = vunpack.c.0.s8 %v1235_v41  ;;  %v1547_v8 = vunpack.c.2.s8 %v1279_v3  ;;  %v1275_v38 = vld [vmem:[#allocation13 + $0x140] sm:$0xff] }
  0xe3   :  { %v1551_v9 = vunpack.c.3.s8 %v1279_v3  ;;  %v1367_v10 = vunpack.c.1.s8 %v1235_v41  ;;  %v1675_v1 = vunpack.c.2.s8 %v1311_v5  ;;  %v1887_v13 = vcvt.s32.f32 %v1375_v56 }
  0xe4   :  { %2654 = vmatpush.bf16.msra.mxu0 %v2403_v49  ;;  %v1955_v12 = vcvt.s32.f32 %v1443_v63  ;;  %v1959_v15 = vcvt.s32.f32 %v1447_v0  ;;  %v4173_v16 = vcvt.s32.f32 %v1363_v4  ;;  %v2059_v6 = vcvt.s32.f32 %v1547_v8 }
  0xe5   :  { %v2063_v60 = vcvt.s32.f32 %v1551_v9  ;;  %v4175_v61 = vcvt.s32.f32 %v1367_v10  ;;  %v1679_v18 = vunpack.c.3.s8 %v1311_v5  ;;  %v1154_v17 = vperm.slane %v4165_v45, 1 }
  0xe6   :  { %2668 = vmatpush.bf16.msra.mxu1 %v2435_v57  ;;  %v4178_v20 = vcvt.s32.f32 %v1675_v1  ;;  %v1435_v22 = vunpack.c.2.s8 %v1251_v11  ;;  %v1439_v21 = vunpack.c.3.s8 %v1251_v11  ;;  %v1188_v24 = vperm.slane %v4167_v48, 1 }
  0xe7   :  { %v2479_v25 = vpack.c.bf16 %v2063_v60, %v2059_v6  ;;  %v4181_v23 = vcvt.s32.f32 %v1679_v18  ;;  %v1539_v27 = vunpack.c.0.s8 %v1279_v3  ;;  %v2391_v19 = vpack.c.bf16 %v1887_v13, %v4171_v62  ;;  %v4199_v13 = vld [vmem:[#allocation13 + $0x1c0] sm:$0xff] }
  0xe8   :  { %2655 = vmatpush.bf16.msra.mxu0 %v2399_v53  ;;  %v1947_v28 = vcvt.s32.f32 %v1435_v22  ;;  %v1951_v26 = vcvt.s32.f32 %v1439_v21  ;;  %v1543_v2 = vunpack.c.1.s8 %v1279_v3  ;;  %v2427_v7 = vpack.c.bf16 %v1959_v15, %v1955_v12 }
  0xe9   :  { %2679 = vmatpush.bf16.msra.mxu2 %v2479_v25  ;;  %v2387_v30 = vpack.c.bf16 %v4175_v61, %v4173_v16  ;;  %v2543_v32 = vpack.c.bf16 %v4181_v23, %v4178_v20  ;;  %v2051_v33 = vcvt.s32.f32 %v1539_v27  ;;  %v1667_v36 = vunpack.c.0.s8 %v1311_v5 }
  0xea   :  { %2669 = vmatpush.bf16.msra.mxu1 %v2431_v55  ;;  %v2423_v34 = vpack.c.bf16 %v1951_v26, %v1947_v28  ;;  %v2055_v14 = vcvt.s32.f32 %v1543_v2  ;;  %v1671_v37 = vunpack.c.1.s8 %v1311_v5  ;;  %v1611_v39 = vunpack.c.2.s8 %v1295_v35 }
  0xeb   :  { %v1615_v29 = vunpack.c.3.s8 %v1295_v35  ;;  %v1427_v40 = vunpack.c.0.s8 %v1251_v11  ;;  %v1431_v41 = vunpack.c.1.s8 %v1251_v11  ;;  %v4188_v42 = vcvt.s32.f32 %v1667_v36 }
  0xec   :  { %2656 = vmatpush.bf16.msra.mxu0 %v2395_v58  ;;  %v2475_v43 = vpack.c.bf16 %v2055_v14, %v2051_v33  ;;  %v4190_v44 = vcvt.s32.f32 %v1671_v37  ;;  %v1531_v46 = vunpack.c.2.s8 %v1275_v38  ;;  %v2123_v47 = vcvt.s32.f32 %v1611_v39  ;;  %v4204_v33 = vld [vmem:[#allocation13 + $0x120] sm:$0xff] }
  0xed   :  { %v2127_v49 = vcvt.s32.f32 %v1615_v29  ;;  %v1939_v50 = vcvt.s32.f32 %v1427_v40  ;;  %v1943_v51 = vcvt.s32.f32 %v1431_v41  ;;  %v1535_v56 = vunpack.c.3.s8 %v1275_v38 }
  0xee   :  { %2670 = vmatpush.bf16.msra.mxu1 %v2427_v7  ;;  %2680 = vmatpush.bf16.msra.mxu2 %v2475_v43  ;;  %v2539_v53 = vpack.c.bf16 %v4190_v44, %v4188_v42  ;;  %v2043_v57 = vcvt.s32.f32 %v1531_v46  ;;  %v1739_v58 = vunpack.c.2.s8 %v1327_v31  ;;  %v1743_v63 = vunpack.c.3.s8 %v1327_v31 }
  0xef   :  { %v2511_v55 = vpack.c.bf16 %v2127_v49, %v2123_v47  ;;  %v2419_v62 = vpack.c.bf16 %v1943_v51, %v1939_v50  ;;  %v1603_v0 = vunpack.c.0.s8 %v1295_v35  ;;  %v2047_v3 = vcvt.s32.f32 %v1535_v56  ;;  %v4220_v56 = vld [vmem:[#allocation13 + $0x220] sm:$0xff] }
  0xf0   :  { %2657 = vmatpush.bf16.msra.mxu0 %v2391_v19  ;;  %v2251_v4 = vcvt.s32.f32 %v1739_v58  ;;  %v1607_v5 = vunpack.c.1.s8 %v1295_v35  ;;  %v1659_v8 = vunpack.c.2.s8 %v4192_v52  ;;  %v2255_v9 = vcvt.s32.f32 %v1743_v63  ;;  %v4206_v35 = vld [vmem:[#allocation13 + $0x2c0] sm:$0xff] }
  0xf1   :  { %2693 = vmatpush.bf16.msra.mxu3 %v2511_v55  ;;  %v2115_v10 = vcvt.s32.f32 %v1603_v0  ;;  %v1663_v1 = vunpack.c.3.s8 %v4192_v52  ;;  %v1155_v11 = vperm.slane %v4165_v45, 2  ;;  %v2471_v15 = vpack.c.bf16 %v2047_v3, %v2043_v57 }
  0xf2   :  { %2671 = vmatpush.bf16.msra.mxu1 %v2423_v34  ;;  %v2119_v16 = vcvt.s32.f32 %v1607_v5  ;;  %v2171_v6 = vcvt.s32.f32 %v1659_v8  ;;  %v1189_v60 = vperm.slane %v4167_v48, 2  ;;  %v2575_v61 = vpack.c.bf16 %v2255_v9, %v2251_v4 }
  0xf3   :  { %v936_v12 = vpop.f32.mrf.mxu0  ;;  %v2175_v18 = vcvt.s32.f32 %v1663_v1  ;;  %v1523_v20 = vunpack.c.0.s8 %v1275_v38  ;;  %v1527_v22 = vunpack.c.1.s8 %v1275_v38  ;;  %2681 = vmatpush.bf16.msra.mxu2 %v2471_v15  ;;  %v1731_v25 = vunpack.c.0.s8 %v1327_v31 }
  0xf4   :  { %2658 = vmatpush.bf16.msra.mxu0 %v2387_v30  ;;  %v2507_v21 = vpack.c.bf16 %v2119_v16, %v2115_v10  ;;  %v1735_v23 = vunpack.c.1.s8 %v1327_v31  ;;  %v1595_v27 = vunpack.c.2.s8 %v4199_v13  ;;  %v1599_v7 = vunpack.c.3.s8 %v4199_v13 }
  0xf5   :  { %v2535_v28 = vpack.c.bf16 %v2175_v18, %v2171_v6  ;;  %v2035_v26 = vcvt.s32.f32 %v1523_v20  ;;  %v2039_v2 = vcvt.s32.f32 %v1527_v22  ;;  %v2243_v34 = vcvt.s32.f32 %v1731_v25  ;;  %v4232_v25 = vld [vmem:[#allocation13 + $0x1a0] sm:$0xff] }
  0xf6   :  { %v950_v19 = vpop.f32.mrf.mxu1  ;;  %2672 = vmatpush.bf16.msra.mxu1 %v2419_v62  ;;  %2694 = vmatpush.bf16.msra.mxu3 %v2507_v21  ;;  %v2107_v14 = vcvt.s32.f32 %v1595_v27  ;;  %v2111_v37 = vcvt.s32.f32 %v1599_v7  ;;  %v1651_v38 = vunpack.c.0.s8 %v4192_v52  ;;  %v1655_v39 = vunpack.c.1.s8 %v4192_v52 }
  0xf7   :  { %v951_v30 = vadd.f32 %v950_v19, %v936_v12  ;;  %v2467_v36 = vpack.c.bf16 %v2039_v2, %v2035_v26  ;;  %v1515_v31 = vunpack.c.2.s8 %v4204_v33  ;;  %v1519_v43 = vunpack.c.3.s8 %v4204_v33 }
  0xf8   :  { %2707 = vmatpush.bf16.msrb.mxu0 %v2543_v32  ;;  %v2247_v32 = vcvt.s32.f32 %v1735_v23  ;;  %v2503_v42 = vpack.c.bf16 %v2111_v37, %v2107_v14  ;;  %v2163_v44 = vcvt.s32.f32 %v1651_v38  ;;  %v2167_v46 = vcvt.s32.f32 %v1655_v39 }
  0xf9   :  { %v1169_v29 = vmul.f32 %v1153_v54, %v951_v30  ;;  %v964_v40 = vpop.f32.mrf.mxu2  ;;  %2682 = vmatpush.bf16.msra.mxu2 %v2467_v36  ;;  %v1723_v47 = vunpack.c.2.s8 %v4206_v35  ;;  %v2027_v51 = vcvt.s32.f32 %v1515_v31  ;;  %v2031_v52 = vcvt.s32.f32 %v1519_v43 }
  0xfa   :  { %2721 = vmatpush.bf16.msrb.mxu1 %v2575_v61  ;;  %v2571_v41 = vpack.c.bf16 %v2247_v32, %v2243_v34  ;;  %2695 = vmatpush.bf16.msra.mxu3 %v2503_v42  ;;  %v2531_v58 = vpack.c.bf16 %v2167_v46, %v2163_v44  ;;  %v1156_v62 = vperm.slane %v4165_v45, 3  ;;  %v1190_v63 = vperm.slane %v4167_v48, 3 }
  0xfb   :  { %v4217_v49 = vadd.f32 %v1187_v59, %v1169_v29  ;;  %v938_v50 = vpop.f32.mrf.mxu0  ;;  %v2235_v55 = vcvt.s32.f32 %v1723_v47  ;;  %v2463_v4 = vpack.c.bf16 %v2031_v52, %v2027_v51  ;;  %v1587_v9 = vunpack.c.0.s8 %v4199_v13 }
  0xfc   :  { %2708 = vmatpush.bf16.msrb.mxu0 %v2539_v53  ;;  %v1727_v53 = vunpack.c.3.s8 %v4206_v35  ;;  %v978_v57 = vpop.f32.mrf.mxu3  ;;  %v1591_v10 = vunpack.c.1.s8 %v4199_v13  ;;  %v1643_v1 = vunpack.c.2.s8 %v4220_v56  ;;  %v1647_v12 = vunpack.c.3.s8 %v4220_v56 }
  0xfd   :  { %v1219_v0 = vmax.f32 %v4217_v49, 0.0  ;;  %v979_v3 = vadd.f32 %v978_v57, %v964_v40  ;;  %2683 = vmatpush.bf16.msra.mxu2 %v2463_v4  ;;  %v1507_v61 = vunpack.c.0.s8 %v4204_v33  ;;  %v2099_v18 = vcvt.s32.f32 %v1587_v9  ;;  %v4249_v40 = vld [vmem:[#allocation13 + $0x100] sm:$0xff] }
  0xfe   :  { %2722 = vmatpush.bf16.msrb.mxu1 %v2571_v41  ;;  %v2239_v5 = vcvt.s32.f32 %v1727_v53  ;;  %v952_v8 = vpop.f32.mrf.mxu1  ;;  %v2103_v20 = vcvt.s32.f32 %v1591_v10  ;;  %v2155_v22 = vcvt.s32.f32 %v1643_v1  ;;  %v2159_v21 = vcvt.s32.f32 %v1647_v12 }
  0xff   :  { %v1170_v15 = vmul.f32 %v1154_v17, %v979_v3  ;;  %v953_v16 = vadd.f32 %v952_v8, %v938_v50  ;;  %v1511_v27 = vunpack.c.1.s8 %v4204_v33  ;;  %v2019_v19 = vcvt.s32.f32 %v1507_v61 }
 0x100   :  { %2709 = vmatpush.bf16.msrb.mxu0 %v2535_v28  ;;  %v2567_v6 = vpack.c.bf16 %v2239_v5, %v2235_v55  ;;  %v2499_v26 = vpack.c.bf16 %v2103_v20, %v2099_v18  ;;  %v2527_v2 = vpack.c.bf16 %v2159_v21, %v2155_v22  ;;  %v1715_v7 = vunpack.c.0.s8 %v4206_v35  ;;  %v4265_v5 = vld [vmem:[#allocation13 + $0x200] sm:$0xff] }
 0x101   :  { %v4236_v13 = vadd.f32 %v1188_v24, %v1170_v15  ;;  %v1177_v23 = vmul.f32 %v1153_v54, %v953_v16  ;;  %v966_v28 = vpop.f32.mrf.mxu2  ;;  %v1719_v30 = vunpack.c.1.s8 %v4206_v35  ;;  %v2023_v36 = vcvt.s32.f32 %v1511_v27 }
 0x102   :  { %2723 = vmatpush.bf16.msrb.mxu1 %v2567_v6  ;;  %v1579_v54 = vunpack.c.2.s8 %v4232_v25  ;;  %2696 = vmatpush.bf16.msra.mxu3 %v2499_v26  ;;  %v2227_v33 = vcvt.s32.f32 %v1715_v7  ;;  %v1583_v39 = vunpack.c.3.s8 %v4232_v25  ;;  %v1635_v29 = vunpack.c.0.s8 %v4220_v56 }
 0x103   :  { %v1220_v34 = vmax.f32 %v4236_v13, 0.0  ;;  %v1211_v32 = vadd.f32 %v1187_v59, %v1177_v23  ;;  %v992_v14 = vpop.f32.mrf.mxu0  ;;  %v2231_v38 = vcvt.s32.f32 %v1719_v30  ;;  %v2459_v31 = vpack.c.bf16 %v2023_v36, %v2019_v19  ;;  %v4251_v59 = vld [vmem:[#allocation13 + $0x2a0] sm:$0xff] }
 0x104   :  { %2710 = vmatpush.bf16.msrb.mxu0 %v2531_v58  ;;  %v980_v37 = vpop.f32.mrf.mxu3  ;;  %v2091_v43 = vcvt.s32.f32 %v1579_v54  ;;  %v2095_v44 = vcvt.s32.f32 %v1583_v39  ;;  %v1639_v46 = vunpack.c.1.s8 %v4220_v56  ;;  %v2147_v47 = vcvt.s32.f32 %v1635_v29  ;;  %v4281_v30 = vld [vmem:[#allocation13 + $0x180] sm:$0xff] }
 0x105   :  { %v1227_v35 = vmax.f32 %v1211_v32, 0.0  ;;  %v981_v41 = vadd.f32 %v980_v37, %v966_v28  ;;  %v2563_v42 = vpack.c.bf16 %v2231_v38, %v2227_v33  ;;  %2684 = vmatpush.bf16.msra.mxu2 %v2459_v31  ;;  %v1499_v52 = vunpack.c.2.s8 %v4249_v40 }
 0x106   :  { %v1503_v53 = vunpack.c.3.s8 %v4249_v40  ;;  %v2495_v58 = vpack.c.bf16 %v2095_v44, %v2091_v43  ;;  %v2151_v55 = vcvt.s32.f32 %v1639_v46  ;;  %v1707_v3 = vunpack.c.2.s8 %v4251_v59  ;;  %v1343_v46 = vld [vmem:[#allocation13 + $0x360] sm:$0xff] }
 0x107   :  { %v1178_v49 = vmul.f32 %v1154_v17, %v981_v41  ;;  %v1006_v50 = vpop.f32.mrf.mxu1  ;;  %v4256_v51 = vpack.c.bf16 %v1227_v35, %v1219_v0  ;;  %2724 = vmatpush.bf16.msrb.mxu1 %v2563_v42  ;;  %v2011_v17 = vcvt.s32.f32 %v1499_v52  ;;  %v1711_v0 = vunpack.c.3.s8 %v4251_v59 }
 0x108   :  { %2711 = vmatpush.bf16.msrb.mxu0 %v2527_v2  ;;  %v1007_v57 = vadd.f32 %v1006_v50, %v992_v14  ;;  %v2015_v4 = vcvt.s32.f32 %v1503_v53  ;;  %2697 = vmatpush.bf16.msra.mxu3 %v2495_v58  ;;  %v2523_v9 = vpack.c.bf16 %v2151_v55, %v2147_v47  ;;  %v2219_v10 = vcvt.s32.f32 %v1707_v3  ;;  %v1248_v53 = vld [vmem:[#allocation13 + $0x68] sm:$0xff] }
 0x109   :  { %v1212_v56 = vadd.f32 %v1188_v24, %v1178_v49  ;;  %2659 = vmatmul.bf16.vlgmr.msra.gmra.mxu0 %v4256_v51  ;;  %v1571_v1 = vunpack.c.0.s8 %v4232_v25  ;;  %v2223_v24 = vcvt.s32.f32 %v1711_v0  ;;  %v1575_v6 = vunpack.c.1.s8 %v4232_v25 }
 0x10a   :  { %v1171_v8 = vmul.f32 %v1155_v11, %v1007_v57  ;;  %v2455_v16 = vpack.c.bf16 %v2015_v4, %v2011_v17  ;;  %v1627_v22 = vunpack.c.2.s8 %v4265_v5  ;;  %v1631_v21 = vunpack.c.3.s8 %v4265_v5 }
 0x10b   :  { %v1228_v12 = vmax.f32 %v1212_v56, 0.0  ;;  %v1020_v15 = vpop.f32.mrf.mxu2  ;;  %v2083_v20 = vcvt.s32.f32 %v1571_v1  ;;  %v994_v27 = vpop.f32.mrf.mxu0  ;;  %v2559_v19 = vpack.c.bf16 %v2223_v24, %v2219_v10  ;;  %v2087_v28 = vcvt.s32.f32 %v1575_v6 }
 0x10c   :  { %v4273_v61 = vadd.f32 %v1189_v60, %v1171_v8  ;;  %v1034_v18 = vpop.f32.mrf.mxu3  ;;  %2712 = vmatpush.bf16.msrb.mxu0 %v2523_v9  ;;  %2685 = vmatpush.bf16.msra.mxu2 %v2455_v16  ;;  %v2139_v26 = vcvt.s32.f32 %v1627_v22  ;;  %v2143_v2 = vcvt.s32.f32 %v1631_v21  ;;  %v1491_v7 = vunpack.c.0.s8 %v4249_v40  ;;  %v1315_v8 = vld [vmem:[#allocation13 + $0x280] sm:$0xff] }
 0x10d   :  { %v4277_v13 = vpack.c.bf16 %v1228_v12, %v1220_v34  ;;  %v1035_v23 = vadd.f32 %v1034_v18, %v1020_v15  ;;  %v2491_v14 = vpack.c.bf16 %v2087_v28, %v2083_v20  ;;  %v1495_v36 = vunpack.c.1.s8 %v4249_v40  ;;  %2725 = vmatpush.bf16.msrb.mxu1 %v2559_v19 }
 0x10e   :  { %v1221_v25 = vmax.f32 %v4273_v61, 0.0  ;;  %v1699_v54 = vunpack.c.0.s8 %v4251_v59  ;;  %v2519_v33 = vpack.c.bf16 %v2143_v2, %v2139_v26  ;;  %v2003_v38 = vcvt.s32.f32 %v1491_v7 }
 0x10f   :  { %2673 = vmatmul.bf16.vlgmr.msra.gmra.mxu1 %v4277_v13  ;;  %v1172_v32 = vmul.f32 %v1156_v62, %v1035_v23  ;;  %v1008_v34 = vpop.f32.mrf.mxu1  ;;  %v1703_v39 = vunpack.c.1.s8 %v4251_v59  ;;  %2698 = vmatpush.bf16.msra.mxu3 %v2491_v14  ;;  %v2007_v35 = vcvt.s32.f32 %v1495_v36  ;;  %v1563_v31 = vunpack.c.2.s8 %v4281_v30  ;;  %v1359_v36 = vld [vmem:[#allocation13 + $0x3e0] sm:$0xff] }
 0x110   :  { %v1009_v37 = vadd.f32 %v1008_v34, %v994_v27  ;;  %v2211_v41 = vcvt.s32.f32 %v1699_v54  ;;  %2713 = vmatpush.bf16.msrb.mxu0 %v2519_v33  ;;  %v1567_v42 = vunpack.c.3.s8 %v4281_v30  ;;  %v1619_v44 = vunpack.c.0.s8 %v4265_v5 }
 0x111   :  { %v4291_v29 = vadd.f32 %v1190_v63, %v1172_v32  ;;  %v2215_v43 = vcvt.s32.f32 %v1703_v39  ;;  %v2451_v49 = vpack.c.bf16 %v2007_v35, %v2003_v38  ;;  %v2075_v50 = vcvt.s32.f32 %v1563_v31  ;;  %v1264_v39 = vld [vmem:[#allocation13 + $0xe8] sm:$0xff]  ;;  %v1339_v31 = vld [vmem:[#allocation13 + $0x340] sm:$0xff] }
 0x112   :  { %v1179_v40 = vmul.f32 %v1155_v11, %v1009_v37  ;;  %v1623_v52 = vunpack.c.1.s8 %v4265_v5  ;;  %v2079_v55 = vcvt.s32.f32 %v1567_v42  ;;  %v2131_v3 = vcvt.s32.f32 %v1619_v44 }
 0x113   :  { %v1222_v59 = vmax.f32 %v4291_v29, 0.0  ;;  %v1022_v47 = vpop.f32.mrf.mxu2  ;;  %v2555_v11 = vpack.c.bf16 %v2215_v43, %v2211_v41  ;;  %2686 = vmatpush.bf16.msra.mxu2 %v2451_v49  ;;  %v1803_v4 = vunpack.c.2.s8 %v1343_v46  ;;  %v1807_v0 = vunpack.c.3.s8 %v1343_v46 }
 0x114   :  { %v1213_v57 = vadd.f32 %v1189_v60, %v1179_v40  ;;  %v1036_v58 = vpop.f32.mrf.mxu3  ;;  %v2135_v17 = vcvt.s32.f32 %v1623_v52  ;;  %v2487_v10 = vpack.c.bf16 %v2079_v55, %v2075_v50  ;;  %v1420_v1 = vunpack.c.2.s8 %v1248_v53 }
 0x115   :  { %v1037_v56 = vadd.f32 %v1036_v58, %v1022_v47  ;;  %2726 = vmatpush.bf16.msrb.mxu1 %v2555_v11  ;;  %v1424_v12 = vunpack.c.3.s8 %v1248_v53  ;;  %v2315_v60 = vcvt.s32.f32 %v1803_v4  ;;  %v2319_v16 = vcvt.s32.f32 %v1807_v0 }
 0x116   :  { %v1229_v9 = vmax.f32 %v1213_v57, 0.0  ;;  %v2515_v15 = vpack.c.bf16 %v2135_v17, %v2131_v3  ;;  %2699 = vmatpush.bf16.msra.mxu3 %v2487_v10  ;;  %v1932_v6 = vcvt.s32.f32 %v1420_v1  ;;  %v1691_v18 = vunpack.c.2.s8 %v1315_v8 }
 0x117   :  { %v1180_v5 = vmul.f32 %v1156_v62, %v1037_v56  ;;  %v1936_v61 = vcvt.s32.f32 %v1424_v12  ;;  %v2607_v22 = vpack.c.bf16 %v2319_v16, %v2315_v60  ;;  %v1695_v21 = vunpack.c.3.s8 %v1315_v8 }
 0x118   :  { %v4304_v24 = vpack.c.bf16 %v1229_v9, %v1221_v25  ;;  %2714 = vmatpush.bf16.msrb.mxu0 %v2515_v15  ;;  %v1555_v23 = vunpack.c.0.s8 %v4281_v30  ;;  %v2203_v27 = vcvt.s32.f32 %v1691_v18  ;;  %v1559_v19 = vunpack.c.1.s8 %v4281_v30 }
 0x119   :  { %v1214_v20 = vadd.f32 %v1190_v63, %v1180_v5  ;;  %v2416_v62 = vpack.c.bf16 %v1936_v61, %v1932_v6  ;;  %v1795_v28 = vunpack.c.0.s8 %v1343_v46  ;;  %2735 = vmatpush.bf16.msrb.mxu2 %v2607_v22  ;;  %v2207_v26 = vcvt.s32.f32 %v1695_v21  ;;  %v1355_v22 = vld [vmem:[#allocation13 + $0x3c0] sm:$0xff] }
 0x11a   :  { %2687 = vmatmul.bf16.vlgmr.msra.gmra.mxu2 %v4304_v24  ;;  %v2067_v2 = vcvt.s32.f32 %v1555_v23  ;;  %v1799_v7 = vunpack.c.1.s8 %v1343_v46  ;;  %v2071_v32 = vcvt.s32.f32 %v1559_v19  ;;  %v1412_v34 = vunpack.c.0.s8 %v1248_v53  ;;  %v1244_v46 = vld [vmem:[#allocation13 + $0x48] sm:$0xff] }
 0x11b   :  { %v1230_v25 = vmax.f32 %v1214_v20, 0.0  ;;  %v2307_v63 = vcvt.s32.f32 %v1795_v28  ;;  %v1416_v14 = vunpack.c.1.s8 %v1248_v53  ;;  %v2551_v37 = vpack.c.bf16 %v2207_v26, %v2203_v27  ;;  %v1260_v19 = vld [vmem:[#allocation13 + $0xc8] sm:$0xff] }
 0x11c   :  { %2763 = vmatpush.bf16.msra.mxu0 %v2416_v62  ;;  %v2311_v33 = vcvt.s32.f32 %v1799_v7  ;;  %v1683_v38 = vunpack.c.0.s8 %v1315_v8  ;;  %v2483_v29 = vpack.c.bf16 %v2071_v32, %v2067_v2  ;;  %v1924_v30 = vcvt.s32.f32 %v1412_v34 }
 0x11d   :  { %v4311_v54 = vpack.c.bf16 %v1230_v25, %v1222_v59  ;;  %v1928_v35 = vcvt.s32.f32 %v1416_v14  ;;  %v1687_v41 = vunpack.c.1.s8 %v1315_v8  ;;  %2727 = vmatpush.bf16.msrb.mxu1 %v2551_v37  ;;  %v1867_v42 = vunpack.c.2.s8 %v1359_v36  ;;  %v4316_v14 = vld [vmem:[#allocation13 + $0x320] sm:$0xff] }
 0x11e   :  { %v2603_v40 = vpack.c.bf16 %v2311_v33, %v2307_v63  ;;  %v2195_v43 = vcvt.s32.f32 %v1683_v38  ;;  %v1871_v44 = vunpack.c.3.s8 %v1359_v36  ;;  %2700 = vmatpush.bf16.msra.mxu3 %v2483_v29  ;;  %v1484_v59 = vunpack.c.2.s8 %v1264_v39 }
 0x11f   :  { %v2412_v47 = vpack.c.bf16 %v1928_v35, %v1924_v30  ;;  %v2199_v49 = vcvt.s32.f32 %v1687_v41  ;;  %v1488_v50 = vunpack.c.3.s8 %v1264_v39  ;;  %v2379_v52 = vcvt.s32.f32 %v1867_v42 }
 0x120   :  { %2736 = vmatpush.bf16.msrb.mxu2 %v2603_v40  ;;  %v2383_v53 = vcvt.s32.f32 %v1871_v44  ;;  %v1787_v57 = vunpack.c.2.s8 %v1339_v31  ;;  %v1791_v58 = vunpack.c.3.s8 %v1339_v31  ;;  %v1996_v55 = vcvt.s32.f32 %v1484_v59 }
 0x121   :  { %2764 = vmatpush.bf16.msra.mxu0 %v2412_v47  ;;  %v2547_v11 = vpack.c.bf16 %v2199_v49, %v2195_v43  ;;  %v2000_v3 = vcvt.s32.f32 %v1488_v50  ;;  %v1404_v56 = vunpack.c.2.s8 %v1244_v46  ;;  %2701 = vmatmul.bf16.vlgmr.msra.gmra.mxu3 %v4311_v54  ;;  %v1408_v8 = vunpack.c.3.s8 %v1244_v46 }
 0x122   :  { %v2639_v17 = vpack.c.bf16 %v2383_v53, %v2379_v52  ;;  %v2299_v4 = vcvt.s32.f32 %v1787_v57  ;;  %v2303_v0 = vcvt.s32.f32 %v1791_v58  ;;  %v1157_v1 = vperm.slane %v4165_v45, 4 }
 0x123   :  { %2728 = vmatpush.bf16.msrb.mxu1 %v2547_v11  ;;  %v2448_v9 = vpack.c.bf16 %v2000_v3, %v1996_v55  ;;  %v1916_v10 = vcvt.s32.f32 %v1404_v56  ;;  %v1191_v12 = vperm.slane %v4167_v48, 4  ;;  %v1920_v15 = vcvt.s32.f32 %v1408_v8 }
 0x124   :  { %2749 = vmatpush.bf16.msrb.mxu3 %v2639_v17  ;;  %v2599_v5 = vpack.c.bf16 %v2303_v0, %v2299_v4  ;;  %v1859_v60 = vunpack.c.0.s8 %v1359_v36  ;;  %v1863_v16 = vunpack.c.1.s8 %v1359_v36  ;;  %v1476_v6 = vunpack.c.0.s8 %v1264_v39 }
 0x125   :  { %v1480_v61 = vunpack.c.1.s8 %v1264_v39  ;;  %v1779_v18 = vunpack.c.0.s8 %v1339_v31  ;;  %v1783_v20 = vunpack.c.1.s8 %v1339_v31  ;;  %v2408_v21 = vpack.c.bf16 %v1920_v15, %v1916_v10  ;;  %v1240_v31 = vld [vmem:[#allocation13 + $0x28] sm:$0xff] }
 0x126   :  { %2737 = vmatpush.bf16.msrb.mxu2 %v2599_v5  ;;  %v2371_v23 = vcvt.s32.f32 %v1859_v60  ;;  %v2375_v62 = vcvt.s32.f32 %v1863_v16  ;;  %v1396_v27 = vunpack.c.0.s8 %v1244_v46  ;;  %v1988_v28 = vcvt.s32.f32 %v1476_v6  ;;  %v4328_v60 = vld [vmem:[#allocation13 + $0x3a0] sm:$0xff] }
 0x127   :  { %2777 = vmatpush.bf16.msra.mxu1 %v2448_v9  ;;  %v1992_v25 = vcvt.s32.f32 %v1480_v61  ;;  %v2291_v26 = vcvt.s32.f32 %v1779_v18  ;;  %v2295_v2 = vcvt.s32.f32 %v1783_v20  ;;  %2765 = vmatpush.bf16.msra.mxu0 %v2408_v21  ;;  %v1400_v32 = vunpack.c.1.s8 %v1244_v46 }
 0x128   :  { %v2635_v7 = vpack.c.bf16 %v2375_v62, %v2371_v23  ;;  %v1908_v63 = vcvt.s32.f32 %v1396_v27  ;;  %v1851_v34 = vunpack.c.2.s8 %v1355_v22  ;;  %v1855_v33 = vunpack.c.3.s8 %v1355_v22 }
 0x129   :  { %v2444_v36 = vpack.c.bf16 %v1992_v25, %v1988_v28  ;;  %v2595_v37 = vpack.c.bf16 %v2295_v2, %v2291_v26  ;;  %v1468_v38 = vunpack.c.2.s8 %v1260_v19  ;;  %v1912_v29 = vcvt.s32.f32 %v1400_v32  ;;  %v1256_v32 = vld [vmem:[#allocation13 + $0xa8] sm:$0xff] }
 0x12a   :  { %2750 = vmatpush.bf16.msrb.mxu3 %v2635_v7  ;;  %v2363_v30 = vcvt.s32.f32 %v1851_v34  ;;  %v1472_v35 = vunpack.c.3.s8 %v1260_v19  ;;  %v1158_v41 = vperm.slane %v4165_v45, 5  ;;  %v2367_v43 = vcvt.s32.f32 %v1855_v33  ;;  %v1331_v33 = vld [vmem:[#allocation13 + $0x300] sm:$0xff] }
 0x12b   :  { %v1048_v39 = vpop.f32.mrf.mxu0  ;;  %2778 = vmatpush.bf16.msra.mxu1 %v2444_v36  ;;  %2738 = vmatpush.bf16.msrb.mxu2 %v2595_v37  ;;  %v1980_v42 = vcvt.s32.f32 %v1468_v38  ;;  %v1192_v44 = vperm.slane %v4167_v48, 5  ;;  %v1771_v46 = vunpack.c.2.s8 %v4316_v14  ;;  %v2404_v49 = vpack.c.bf16 %v1912_v29, %v1908_v63 }
 0x12c   :  { %v1062_v40 = vpop.f32.mrf.mxu1  ;;  %v1984_v59 = vcvt.s32.f32 %v1472_v35  ;;  %v1775_v50 = vunpack.c.3.s8 %v4316_v14  ;;  %v2631_v52 = vpack.c.bf16 %v2367_v43, %v2363_v30  ;;  %v1388_v57 = vunpack.c.2.s8 %v1240_v31  ;;  %v1236_v43 = vld [vmem:[#allocation13 + $0x8] sm:$0xff] }
 0x12d   :  { %v1063_v47 = vadd.f32 %v1062_v40, %v1048_v39  ;;  %v2283_v53 = vcvt.s32.f32 %v1771_v46  ;;  %v1392_v58 = vunpack.c.3.s8 %v1240_v31  ;;  %2766 = vmatpush.bf16.msra.mxu0 %v2404_v49  ;;  %v1843_v56 = vunpack.c.0.s8 %v1355_v22 }
 0x12e   :  { %v2440_v55 = vpack.c.bf16 %v1984_v59, %v1980_v42  ;;  %v2287_v3 = vcvt.s32.f32 %v1775_v50  ;;  %2751 = vmatpush.bf16.msrb.mxu3 %v2631_v52  ;;  %v1900_v17 = vcvt.s32.f32 %v1388_v57  ;;  %v1847_v0 = vunpack.c.1.s8 %v1355_v22 }
 0x12f   :  { %v1173_v11 = vmul.f32 %v1157_v1, %v1063_v47  ;;  %v1904_v4 = vcvt.s32.f32 %v1392_v58  ;;  %v1460_v8 = vunpack.c.0.s8 %v1260_v19  ;;  %v2355_v5 = vcvt.s32.f32 %v1843_v56 }
 0x130   :  { %2779 = vmatpush.bf16.msra.mxu1 %v2440_v55  ;;  %v2591_v10 = vpack.c.bf16 %v2287_v3, %v2283_v53  ;;  %v1464_v15 = vunpack.c.1.s8 %v1260_v19  ;;  %v2359_v6 = vcvt.s32.f32 %v1847_v0  ;;  %v1763_v18 = vunpack.c.0.s8 %v4316_v14 }
 0x131   :  { %v4326_v9 = vadd.f32 %v1191_v12, %v1173_v11  ;;  %v2400_v16 = vpack.c.bf16 %v1904_v4, %v1900_v17  ;;  %v1972_v61 = vcvt.s32.f32 %v1460_v8  ;;  %v1767_v62 = vunpack.c.1.s8 %v4316_v14 }
 0x132   :  { %2739 = vmatpush.bf16.msrb.mxu2 %v2591_v10  ;;  %v1976_v23 = vcvt.s32.f32 %v1464_v15  ;;  %v1380_v27 = vunpack.c.0.s8 %v1240_v31  ;;  %v2627_v19 = vpack.c.bf16 %v2359_v6, %v2355_v5  ;;  %v2275_v26 = vcvt.s32.f32 %v1763_v18 }
 0x133   :  { %v1223_v20 = vmax.f32 %v4326_v9, 0.0  ;;  %v1076_v21 = vpop.f32.mrf.mxu2  ;;  %v1050_v22 = vpop.f32.mrf.mxu0  ;;  %2767 = vmatpush.bf16.msra.mxu0 %v2400_v16  ;;  %v1384_v2 = vunpack.c.1.s8 %v1240_v31  ;;  %v1835_v7 = vunpack.c.2.s8 %v4328_v60  ;;  %v2279_v37 = vcvt.s32.f32 %v1767_v62 }
 0x134   :  { %v1090_v28 = vpop.f32.mrf.mxu3  ;;  %v1064_v25 = vpop.f32.mrf.mxu1  ;;  %v2436_v36 = vpack.c.bf16 %v1976_v23, %v1972_v61  ;;  %2752 = vmatpush.bf16.msrb.mxu3 %v2627_v19  ;;  %v1892_v38 = vcvt.s32.f32 %v1380_v27  ;;  %v1839_v14 = vunpack.c.3.s8 %v4328_v60  ;;  %v1452_v40 = vunpack.c.2.s8 %v1256_v32 }
 0x135   :  { %v1091_v63 = vadd.f32 %v1090_v28, %v1076_v21  ;;  %v1065_v34 = vadd.f32 %v1064_v25, %v1050_v22  ;;  %v1896_v39 = vcvt.s32.f32 %v1384_v2  ;;  %v2347_v29 = vcvt.s32.f32 %v1835_v7  ;;  %v1312_v2 = vld [vmem:[#allocation13 + $0x268] sm:$0xff] }
 0x136   :  { %2780 = vmatpush.bf16.msra.mxu1 %v2436_v36  ;;  %v2587_v31 = vpack.c.bf16 %v2279_v37, %v2275_v26  ;;  %v2351_v46 = vcvt.s32.f32 %v1839_v14  ;;  %v1456_v47 = vunpack.c.3.s8 %v1256_v32  ;;  %v1755_v49 = vunpack.c.2.s8 %v1331_v33 }
 0x137   :  { %v1174_v30 = vmul.f32 %v1158_v41, %v1091_v63  ;;  %v1181_v35 = vmul.f32 %v1157_v1, %v1065_v34  ;;  %v2396_v42 = vpack.c.bf16 %v1896_v39, %v1892_v38  ;;  %v1964_v52 = vcvt.s32.f32 %v1452_v40 }
 0x138   :  { %2740 = vmatpush.bf16.msrb.mxu2 %v2587_v31  ;;  %v1759_v53 = vunpack.c.3.s8 %v1331_v33  ;;  %v2623_v1 = vpack.c.bf16 %v2351_v46, %v2347_v29  ;;  %v1968_v57 = vcvt.s32.f32 %v1456_v47  ;;  %v2267_v58 = vcvt.s32.f32 %v1755_v49 }
 0x139   :  { %v4341_v59 = vadd.f32 %v1192_v44, %v1174_v30  ;;  %v1215_v50 = vadd.f32 %v1191_v12, %v1181_v35  ;;  %2768 = vmatpush.bf16.msra.mxu0 %v2396_v42  ;;  %v1372_v11 = vunpack.c.2.s8 %v1236_v43  ;;  %v1376_v4 = vunpack.c.3.s8 %v1236_v43  ;;  %v1252_v30 = vld [vmem:[#allocation13 + $0x88] sm:$0xff] }
 0x13a   :  { %v2271_v17 = vcvt.s32.f32 %v1759_v53  ;;  %2753 = vmatpush.bf16.msrb.mxu3 %v2623_v1  ;;  %v2432_v0 = vpack.c.bf16 %v1968_v57, %v1964_v52  ;;  %v1827_v12 = vunpack.c.0.s8 %v4328_v60  ;;  %v1831_v10 = vunpack.c.1.s8 %v4328_v60  ;;  %v1280_v60 = vld [vmem:[#allocation13 + $0x168] sm:$0xff] }
 0x13b   :  { %v1224_v55 = vmax.f32 %v4341_v59, 0.0  ;;  %v1231_v3 = vmax.f32 %v1215_v50, 0.0  ;;  %v1078_v56 = vpop.f32.mrf.mxu2  ;;  %v1884_v9 = vcvt.s32.f32 %v1372_v11  ;;  %v1888_v6 = vcvt.s32.f32 %v1376_v4 }
 0x13c   :  { %v1092_v8 = vpop.f32.mrf.mxu3  ;;  %v2583_v16 = vpack.c.bf16 %v2271_v17, %v2267_v58  ;;  %2781 = vmatpush.bf16.msra.mxu1 %v2432_v0  ;;  %v2339_v61 = vcvt.s32.f32 %v1827_v12  ;;  %v2343_v18 = vcvt.s32.f32 %v1831_v10  ;;  %v1444_v21 = vunpack.c.0.s8 %v1256_v32 }
 0x13d   :  { %v4348_v5 = vpack.c.bf16 %v1231_v3, %v1223_v20  ;;  %v1093_v15 = vadd.f32 %v1092_v8, %v1078_v56  ;;  %v1448_v22 = vunpack.c.1.s8 %v1256_v32  ;;  %v2392_v62 = vpack.c.bf16 %v1888_v6, %v1884_v9  ;;  %v4358_v8 = vld [vmem:[#allocation13 + $0x1e8] sm:$0xff] }
 0x13e   :  { %2741 = vmatpush.bf16.msrb.mxu2 %v2583_v16  ;;  %v1747_v27 = vunpack.c.0.s8 %v1331_v33  ;;  %v1751_v28 = vunpack.c.1.s8 %v1331_v33  ;;  %v2619_v20 = vpack.c.bf16 %v2343_v18, %v2339_v61  ;;  %v1956_v25 = vcvt.s32.f32 %v1444_v21  ;;  %v1328_v16 = vld [vmem:[#allocation13 + $0x2e8] sm:$0xff] }
 0x13f   :  { %v1182_v23 = vmul.f32 %v1158_v41, %v1093_v15  ;;  %2715 = vmatmul.bf16.vlgmr.msrb.gmra.mxu0 %v4348_v5  ;;  %v1960_v19 = vcvt.s32.f32 %v1448_v22  ;;  %v1364_v26 = vunpack.c.0.s8 %v1236_v43  ;;  %v1368_v45 = vunpack.c.1.s8 %v1236_v43  ;;  %v1347_v41 = vld [vmem:[#allocation13 + $0x380] sm:$0xff]  ;;  %v1276_v22 = vld [vmem:[#allocation13 + $0x148] sm:$0xff] }
 0x140   :  { %2769 = vmatpush.bf16.msra.mxu0 %v2392_v62  ;;  %v2259_v32 = vcvt.s32.f32 %v1747_v27  ;;  %v2263_v63 = vcvt.s32.f32 %v1751_v28  ;;  %2754 = vmatpush.bf16.msrb.mxu3 %v2619_v20  ;;  %v1548_v37 = vunpack.c.2.s8 %v1280_v60  ;;  %v1552_v33 = vunpack.c.3.s8 %v1280_v60 }
 0x141   :  { %v1216_v7 = vadd.f32 %v1192_v44, %v1182_v23  ;;  %v2428_v34 = vpack.c.bf16 %v1960_v19, %v1956_v25  ;;  %v1876_v36 = vcvt.s32.f32 %v1364_v26  ;;  %v1880_v14 = vcvt.s32.f32 %v1368_v45  ;;  %v1308_v26 = vld [vmem:[#allocation13 + $0x248] sm:$0xff] }
 0x142   :  { %v2579_v39 = vpack.c.bf16 %v2263_v63, %v2259_v32  ;;  %v1676_v29 = vunpack.c.2.s8 %v1312_v2  ;;  %v2060_v35 = vcvt.s32.f32 %v1548_v37  ;;  %v2064_v31 = vcvt.s32.f32 %v1552_v33 }
 0x143   :  { %v1232_v38 = vmax.f32 %v1216_v7, 0.0  ;;  %2782 = vmatpush.bf16.msra.mxu1 %v2428_v34  ;;  %v1680_v48 = vunpack.c.3.s8 %v1312_v2  ;;  %v1819_v44 = vunpack.c.2.s8 %v1347_v41  ;;  %v2388_v43 = vpack.c.bf16 %v1880_v14, %v1876_v36 }
 0x144   :  { %2742 = vmatpush.bf16.msrb.mxu2 %v2579_v39  ;;  %v2188_v42 = vcvt.s32.f32 %v1676_v29  ;;  %v1823_v46 = vunpack.c.3.s8 %v1347_v41  ;;  %v2480_v47 = vpack.c.bf16 %v2064_v31, %v2060_v35  ;;  %v1436_v50 = vunpack.c.2.s8 %v1252_v30  ;;  %v4366_v31 = vld [vmem:[#allocation11] sm:$0xff] }
 0x145   :  { %v4355_v40 = vpack.c.bf16 %v1232_v38, %v1224_v55  ;;  %v2192_v49 = vcvt.s32.f32 %v1680_v48  ;;  %v2331_v59 = vcvt.s32.f32 %v1819_v44  ;;  %2770 = vmatpush.bf16.msra.mxu0 %v2388_v43  ;;  %v1440_v53 = vunpack.c.3.s8 %v1252_v30 }
 0x146   :  { %v2335_v52 = vcvt.s32.f32 %v1823_v46  ;;  %v1540_v1 = vunpack.c.0.s8 %v1280_v60  ;;  %v1544_v57 = vunpack.c.1.s8 %v1280_v60  ;;  %v1948_v11 = vcvt.s32.f32 %v1436_v50 }
 0x147   :  { %2729 = vmatmul.bf16.vlgmr.msrb.gmra.mxu1 %v4355_v40  ;;  %v2544_v58 = vpack.c.bf16 %v2192_v49, %v2188_v42  ;;  %v1668_v55 = vunpack.c.0.s8 %v1312_v2  ;;  %v1672_v3 = vunpack.c.1.s8 %v1312_v2  ;;  %v1952_v17 = vcvt.s32.f32 %v1440_v53 }
 0x148   :  { %2791 = vmatpush.bf16.msra.mxu2 %v2480_v47  ;;  %v2615_v56 = vpack.c.bf16 %v2335_v52, %v2331_v59  ;;  %v2052_v4 = vcvt.s32.f32 %v1540_v1  ;;  %v2056_v0 = vcvt.s32.f32 %v1544_v57  ;;  %v1811_v10 = vunpack.c.0.s8 %v1347_v41 }
 0x149   :  { %2819 = vmatpush.bf16.msrb.mxu0 %v2544_v58  ;;  %v2180_v9 = vcvt.s32.f32 %v1668_v55  ;;  %v2184_v12 = vcvt.s32.f32 %v1672_v3  ;;  %v1815_v15 = vunpack.c.1.s8 %v1347_v41  ;;  %v2424_v6 = vpack.c.bf16 %v1952_v17, %v1948_v11  ;;  %v4371_v55 = vld [vmem:[#allocation13 + $0x1c8] sm:$0xff] }
 0x14a   :  { %2755 = vmatpush.bf16.msrb.mxu3 %v2615_v56  ;;  %v2476_v61 = vpack.c.bf16 %v2056_v0, %v2052_v4  ;;  %v1428_v18 = vunpack.c.0.s8 %v1252_v30  ;;  %v1432_v21 = vunpack.c.1.s8 %v1252_v30  ;;  %v2323_v62 = vcvt.s32.f32 %v1811_v10  ;;  %v4363_v30 = vld [vmem:[#allocation10] sm:$0xff]  ;;  %v1324_v10 = vld [vmem:[#allocation13 + $0x2c8] sm:$0xff] }
 0x14b   :  { %v2540_v23 = vpack.c.bf16 %v2184_v12, %v2180_v9  ;;  %v2327_v27 = vcvt.s32.f32 %v1815_v15  ;;  %v1612_v28 = vunpack.c.2.s8 %v4358_v8  ;;  %2783 = vmatpush.bf16.msra.mxu1 %v2424_v6  ;;  %v1616_v25 = vunpack.c.3.s8 %v4358_v8 }
 0x14c   :  { %2792 = vmatpush.bf16.msra.mxu2 %v2476_v61  ;;  %v1940_v60 = vcvt.s32.f32 %v1428_v18  ;;  %v1944_v20 = vcvt.s32.f32 %v1432_v21  ;;  %v1740_v19 = vunpack.c.2.s8 %v1328_v16  ;;  %v1744_v32 = vunpack.c.3.s8 %v1328_v16 }
 0x14d   :  { %2820 = vmatpush.bf16.msrb.mxu0 %v2540_v23  ;;  %v2611_v2 = vpack.c.bf16 %v2327_v27, %v2323_v62  ;;  %v2124_v7 = vcvt.s32.f32 %v1612_v28  ;;  %v1532_v63 = vunpack.c.2.s8 %v1276_v22  ;;  %v2128_v41 = vcvt.s32.f32 %v1616_v25  ;;  %v4378_v62 = vld [vmem:[#allocation13 + $0x128] sm:$0xff] }
 0x14e   :  { %v2420_v45 = vpack.c.bf16 %v1944_v20, %v1940_v60  ;;  %v2252_v34 = vcvt.s32.f32 %v1740_v19  ;;  %v1536_v36 = vunpack.c.3.s8 %v1276_v22  ;;  %v2256_v37 = vcvt.s32.f32 %v1744_v32  ;;  %v1304_v25 = vld [vmem:[#allocation13 + $0x228] sm:$0xff] }
 0x14f   :  { %2771 = vmatmul.bf16.vlgmr.msra.gmra.mxu0 %v4256_v51  ;;  %2756 = vmatpush.bf16.msrb.mxu3 %v2611_v2  ;;  %v2044_v33 = vcvt.s32.f32 %v1532_v63  ;;  %v1660_v38 = vunpack.c.2.s8 %v1308_v26  ;;  %v1664_v39 = vunpack.c.3.s8 %v1308_v26  ;;  %v2512_v14 = vpack.c.bf16 %v2128_v41, %v2124_v7 }
 0x150   :  { %2784 = vmatpush.bf16.msra.mxu1 %v2420_v45  ;;  %v2048_v29 = vcvt.s32.f32 %v1536_v36  ;;  %v1159_v35 = vperm.slane %v4363_v30, 6  ;;  %v1193_v48 = vperm.slane %v4366_v31, 6  ;;  %v2576_v44 = vpack.c.bf16 %v2256_v37, %v2252_v34 }
 0x151   :  { %v2172_v43 = vcvt.s32.f32 %v1660_v38  ;;  %v2176_v42 = vcvt.s32.f32 %v1664_v39  ;;  %v1604_v46 = vunpack.c.0.s8 %v4358_v8  ;;  %v1608_v59 = vunpack.c.1.s8 %v4358_v8 }
 0x152   :  { %v2472_v47 = vpack.c.bf16 %v2048_v29, %v2044_v33  ;;  %v1732_v50 = vunpack.c.0.s8 %v1328_v16  ;;  %v1736_v52 = vunpack.c.1.s8 %v1328_v16  ;;  %v1524_v58 = vunpack.c.0.s8 %v1276_v22 }
 0x153   :  { %2805 = vmatpush.bf16.msra.mxu3 %v2512_v14  ;;  %v1104_v49 = vpop.f32.mrf.mxu0  ;;  %v2536_v53 = vpack.c.bf16 %v2176_v42, %v2172_v43  ;;  %v2116_v57 = vcvt.s32.f32 %v1604_v46  ;;  %v1528_v11 = vunpack.c.1.s8 %v1276_v22  ;;  %v2120_v56 = vcvt.s32.f32 %v1608_v59 }
 0x154   :  { %2833 = vmatpush.bf16.msrb.mxu1 %v2576_v44  ;;  %v1118_v1 = vpop.f32.mrf.mxu1  ;;  %2793 = vmatpush.bf16.msra.mxu2 %v2472_v47  ;;  %v2244_v17 = vcvt.s32.f32 %v1732_v50  ;;  %v2248_v4 = vcvt.s32.f32 %v1736_v52  ;;  %v2036_v0 = vcvt.s32.f32 %v1524_v58  ;;  %v1652_v12 = vunpack.c.0.s8 %v1308_v26 }
 0x155   :  { %v1119_v3 = vadd.f32 %v1118_v1, %v1104_v49  ;;  %2821 = vmatpush.bf16.msrb.mxu0 %v2536_v53  ;;  %v2040_v9 = vcvt.s32.f32 %v1528_v11  ;;  %v1656_v8 = vunpack.c.1.s8 %v1308_v26  ;;  %v2508_v16 = vpack.c.bf16 %v2120_v56, %v2116_v57 }
 0x156   :  { %v2572_v6 = vpack.c.bf16 %v2248_v4, %v2244_v17  ;;  %v1596_v61 = vunpack.c.2.s8 %v4371_v55  ;;  %v2164_v21 = vcvt.s32.f32 %v1652_v12  ;;  %v1600_v23 = vunpack.c.3.s8 %v4371_v55 }
 0x157   :  { %v1175_v15 = vmul.f32 %v1159_v35, %v1119_v3  ;;  %2785 = vmatmul.bf16.vlgmr.msra.gmra.mxu1 %v4277_v13  ;;  %v2468_v18 = vpack.c.bf16 %v2040_v9, %v2036_v0  ;;  %v2168_v22 = vcvt.s32.f32 %v1656_v8  ;;  %2806 = vmatpush.bf16.msra.mxu3 %v2508_v16  ;;  %v1724_v60 = vunpack.c.2.s8 %v1324_v10 }
 0x158   :  { %2834 = vmatpush.bf16.msrb.mxu1 %v2572_v6  ;;  %v2108_v28 = vcvt.s32.f32 %v1596_v61  ;;  %v1728_v20 = vunpack.c.3.s8 %v1324_v10  ;;  %v2112_v26 = vcvt.s32.f32 %v1600_v23  ;;  %v1160_v2 = vperm.slane %v4363_v30, 7 }
 0x159   :  { %v4382_v27 = vadd.f32 %v1193_v48, %v1175_v15  ;;  %2794 = vmatpush.bf16.msra.mxu2 %v2468_v18  ;;  %v2532_v19 = vpack.c.bf16 %v2168_v22, %v2164_v21  ;;  %v1194_v7 = vperm.slane %v4366_v31, 7  ;;  %v2236_v63 = vcvt.s32.f32 %v1724_v60  ;;  %v1288_v15 = vld [vmem:[#allocation13 + $0x1a8] sm:$0xff] }
 0x15a   :  { %v2240_v45 = vcvt.s32.f32 %v1728_v20  ;;  %v1516_v34 = vunpack.c.2.s8 %v4378_v62  ;;  %v2504_v37 = vpack.c.bf16 %v2112_v26, %v2108_v28  ;;  %v1520_v38 = vunpack.c.3.s8 %v4378_v62  ;;  %v1320_v18 = vld [vmem:[#allocation13 + $0x2a8] sm:$0xff] }
 0x15b   :  { %v1225_v32 = vmax.f32 %v4382_v27, 0.0  ;;  %v1132_v41 = vpop.f32.mrf.mxu2  ;;  %v1106_v36 = vpop.f32.mrf.mxu0  ;;  %2822 = vmatpush.bf16.msrb.mxu0 %v2532_v19  ;;  %v1644_v39 = vunpack.c.2.s8 %v1304_v25  ;;  %v1648_v14 = vunpack.c.3.s8 %v1304_v25  ;;  %v1588_v50 = vunpack.c.0.s8 %v4371_v55  ;;  %v1268_v60 = vld [vmem:[#allocation13 + $0x108] sm:$0xff] }
 0x15c   :  { %v1146_v33 = vpop.f32.mrf.mxu3  ;;  %v1120_v29 = vpop.f32.mrf.mxu1  ;;  %v2568_v44 = vpack.c.bf16 %v2240_v45, %v2236_v63  ;;  %v2028_v42 = vcvt.s32.f32 %v1516_v34  ;;  %2807 = vmatpush.bf16.msra.mxu3 %v2504_v37  ;;  %v2032_v47 = vcvt.s32.f32 %v1520_v38  ;;  %v1592_v1 = vunpack.c.1.s8 %v4371_v55 }
 0x15d   :  { %v1147_v43 = vadd.f32 %v1146_v33, %v1132_v41  ;;  %v1121_v46 = vadd.f32 %v1120_v29, %v1106_v36  ;;  %v2156_v49 = vcvt.s32.f32 %v1644_v39  ;;  %v2160_v59 = vcvt.s32.f32 %v1648_v14 }
 0x15e   :  { %2835 = vmatpush.bf16.msrb.mxu1 %v2568_v44  ;;  %v1716_v57 = vunpack.c.0.s8 %v1324_v10  ;;  %v2464_v58 = vpack.c.bf16 %v2032_v47, %v2028_v42  ;;  %v2100_v3 = vcvt.s32.f32 %v1588_v50  ;;  %v1720_v56 = vunpack.c.1.s8 %v1324_v10 }
 0x15f   :  { %v1176_v52 = vmul.f32 %v1160_v2, %v1147_v43  ;;  %v1183_v53 = vmul.f32 %v1159_v35, %v1121_v46  ;;  %v2528_v11 = vpack.c.bf16 %v2160_v59, %v2156_v49  ;;  %v2104_v0 = vcvt.s32.f32 %v1592_v1 }
 0x160   :  { %v2228_v9 = vcvt.s32.f32 %v1716_v57  ;;  %2795 = vmatpush.bf16.msra.mxu2 %v2464_v58  ;;  %v2232_v12 = vcvt.s32.f32 %v1720_v56  ;;  %v1508_v35 = vunpack.c.0.s8 %v4378_v62  ;;  %v1512_v55 = vunpack.c.1.s8 %v4378_v62 }
 0x161   :  { %v4397_v17 = vadd.f32 %v1194_v7, %v1176_v52  ;;  %v1217_v4 = vadd.f32 %v1193_v48, %v1183_v53  ;;  %2823 = vmatpush.bf16.msrb.mxu0 %v2528_v11  ;;  %v1636_v8 = vunpack.c.0.s8 %v1304_v25  ;;  %v2500_v6 = vpack.c.bf16 %v2104_v0, %v2100_v3  ;;  %v1344_v3 = vld [vmem:[#allocation13 + $0x368] sm:$0xff] }
 0x162   :  { %v1640_v61 = vunpack.c.1.s8 %v1304_v25  ;;  %v2564_v22 = vpack.c.bf16 %v2232_v12, %v2228_v9  ;;  %v2020_v48 = vcvt.s32.f32 %v1508_v35  ;;  %v2024_v23 = vcvt.s32.f32 %v1512_v55  ;;  %v1300_v25 = vld [vmem:[#allocation13 + $0x208] sm:$0xff]  ;;  %v1249_v35 = vld [vmem:[#allocation13 + $0x70] sm:$0xff] }
 0x163   :  { %v1226_v10 = vmax.f32 %v4397_v17, 0.0  ;;  %v1233_v16 = vmax.f32 %v1217_v4, 0.0  ;;  %v1134_v21 = vpop.f32.mrf.mxu2  ;;  %v2148_v27 = vcvt.s32.f32 %v1636_v8  ;;  %2808 = vmatpush.bf16.msra.mxu3 %v2500_v6  ;;  %v1580_v62 = vunpack.c.2.s8 %v1288_v15  ;;  %v1284_v6 = vld [vmem:[#allocation13 + $0x188] sm:$0xff] }
 0x164   :  { %v1148_v28 = vpop.f32.mrf.mxu3  ;;  %v2152_v19 = vcvt.s32.f32 %v1640_v61  ;;  %v1584_v26 = vunpack.c.3.s8 %v1288_v15  ;;  %2836 = vmatpush.bf16.msrb.mxu1 %v2564_v22  ;;  %v2460_v63 = vpack.c.bf16 %v2024_v23, %v2020_v48  ;;  %v1708_v45 = vunpack.c.2.s8 %v1320_v18  ;;  %v1316_v48 = vld [vmem:[#allocation13 + $0x288] sm:$0xff] }
 0x165   :  { %v4404_v20 = vpack.c.bf16 %v1233_v16, %v1225_v32  ;;  %v1712_v41 = vunpack.c.3.s8 %v1320_v18  ;;  %v1149_v34 = vadd.f32 %v1148_v28, %v1134_v21  ;;  %v2092_v37 = vcvt.s32.f32 %v1580_v62 }
 0x166   :  { %v2524_v36 = vpack.c.bf16 %v2152_v19, %v2148_v27  ;;  %v2096_v33 = vcvt.s32.f32 %v1584_v26  ;;  %v1500_v38 = vunpack.c.2.s8 %v1268_v60  ;;  %2796 = vmatpush.bf16.msra.mxu2 %v2460_v63  ;;  %v2220_v39 = vcvt.s32.f32 %v1708_v45 }
 0x167   :  { %2743 = vmatmul.bf16.vlgmr.msrb.gmra.mxu2 %v4404_v20  ;;  %v2224_v32 = vcvt.s32.f32 %v1712_v41  ;;  %v1184_v14 = vmul.f32 %v1160_v2, %v1149_v34  ;;  %v1504_v29 = vunpack.c.3.s8 %v1268_v60  ;;  %v1628_v42 = vunpack.c.2.s8 %v1300_v25 }
 0x168   :  { %2824 = vmatpush.bf16.msrb.mxu0 %v2524_v36  ;;  %v2496_v44 = vpack.c.bf16 %v2096_v33, %v2092_v37  ;;  %v2012_v43 = vcvt.s32.f32 %v1500_v38  ;;  %v1632_v46 = vunpack.c.3.s8 %v1300_v25  ;;  %v1572_v50 = vunpack.c.0.s8 %v1288_v15 }
 0x169   :  { %v2560_v47 = vpack.c.bf16 %v2224_v32, %v2220_v39  ;;  %v1218_v49 = vadd.f32 %v1194_v7, %v1184_v14  ;;  %v2016_v59 = vcvt.s32.f32 %v1504_v29  ;;  %v2140_v52 = vcvt.s32.f32 %v1628_v42 }
 0x16a   :  { %2809 = vmatpush.bf16.msra.mxu3 %v2496_v44  ;;  %v2144_v53 = vcvt.s32.f32 %v1632_v46  ;;  %v1576_v1 = vunpack.c.1.s8 %v1288_v15  ;;  %v1700_v57 = vunpack.c.0.s8 %v1320_v18  ;;  %v2084_v58 = vcvt.s32.f32 %v1572_v50  ;;  %v1360_v50 = vld [vmem:[#allocation13 + $0x3e8] sm:$0xff] }
 0x16b   :  { %2837 = vmatpush.bf16.msrb.mxu1 %v2560_v47  ;;  %v1234_v30 = vmax.f32 %v1218_v49, 0.0  ;;  %v2456_v2 = vpack.c.bf16 %v2016_v59, %v2012_v43  ;;  %v1704_v11 = vunpack.c.1.s8 %v1320_v18  ;;  %v1492_v0 = vunpack.c.0.s8 %v1268_v60 }
 0x16c   :  { %v2520_v56 = vpack.c.bf16 %v2144_v53, %v2140_v52  ;;  %v2088_v17 = vcvt.s32.f32 %v1576_v1  ;;  %v2212_v4 = vcvt.s32.f32 %v1700_v57  ;;  %v1496_v7 = vunpack.c.1.s8 %v1268_v60 }
 0x16d   :  { %v4411_v9 = vpack.c.bf16 %v1234_v30, %v1226_v10  ;;  %2797 = vmatpush.bf16.msra.mxu2 %v2456_v2  ;;  %v2216_v31 = vcvt.s32.f32 %v1704_v11  ;;  %v1620_v12 = vunpack.c.0.s8 %v1300_v25  ;;  %v2004_v8 = vcvt.s32.f32 %v1492_v0  ;;  %v1265_v30 = vld [vmem:[#allocation13 + $0xf0] sm:$0xff] }
 0x16e   :  { %2825 = vmatpush.bf16.msrb.mxu0 %v2520_v56  ;;  %v2492_v55 = vpack.c.bf16 %v2088_v17, %v2084_v58  ;;  %v1624_v15 = vunpack.c.1.s8 %v1300_v25  ;;  %v1804_v16 = vunpack.c.2.s8 %v1344_v3  ;;  %v2008_v18 = vcvt.s32.f32 %v1496_v7  ;;  %v1340_v56 = vld [vmem:[#allocation13 + $0x348] sm:$0xff]  ;;  %v1245_v7 = vld [vmem:[#allocation13 + $0x50] sm:$0xff] }
 0x16f   :  { %v2556_v61 = vpack.c.bf16 %v2216_v31, %v2212_v4  ;;  %v2132_v21 = vcvt.s32.f32 %v1620_v12  ;;  %v1808_v22 = vunpack.c.3.s8 %v1344_v3  ;;  %2757 = vmatmul.bf16.vlgmr.msrb.gmra.mxu3 %v4411_v9  ;;  %v1421_v27 = vunpack.c.2.s8 %v1249_v35 }
 0x170   :  { %2810 = vmatpush.bf16.msra.mxu3 %v2492_v55  ;;  %v2136_v10 = vcvt.s32.f32 %v1624_v15  ;;  %v2316_v23 = vcvt.s32.f32 %v1804_v16  ;;  %v1425_v28 = vunpack.c.3.s8 %v1249_v35  ;;  %v2452_v60 = vpack.c.bf16 %v2008_v18, %v2004_v8 }
 0x171   :  { %2838 = vmatpush.bf16.msrb.mxu1 %v2556_v61  ;;  %v2320_v19 = vcvt.s32.f32 %v1808_v22  ;;  %v1564_v62 = vunpack.c.2.s8 %v1284_v6  ;;  %v1568_v26 = vunpack.c.3.s8 %v1284_v6  ;;  %v1933_v45 = vcvt.s32.f32 %v1421_v27 }
 0x172   :  { %v2516_v63 = vpack.c.bf16 %v2136_v10, %v2132_v21  ;;  %v1937_v41 = vcvt.s32.f32 %v1425_v28  ;;  %v1692_v34 = vunpack.c.2.s8 %v1316_v48  ;;  %2798 = vmatpush.bf16.msra.mxu2 %v2452_v60  ;;  %v1696_v33 = vunpack.c.3.s8 %v1316_v48 }
 0x173   :  { %v2608_v25 = vpack.c.bf16 %v2320_v19, %v2316_v23  ;;  %v2076_v36 = vcvt.s32.f32 %v1564_v62  ;;  %v2080_v37 = vcvt.s32.f32 %v1568_v26  ;;  %v1796_v32 = vunpack.c.0.s8 %v1344_v3 }
 0x174   :  { %2826 = vmatpush.bf16.msrb.mxu0 %v2516_v63  ;;  %v2417_v38 = vpack.c.bf16 %v1937_v41, %v1933_v45  ;;  %v2204_v39 = vcvt.s32.f32 %v1692_v34  ;;  %v1800_v14 = vunpack.c.1.s8 %v1344_v3  ;;  %v2208_v44 = vcvt.s32.f32 %v1696_v33 }
 0x175   :  { %v2488_v29 = vpack.c.bf16 %v2080_v37, %v2076_v36  ;;  %v1413_v43 = vunpack.c.0.s8 %v1249_v35  ;;  %v1417_v42 = vunpack.c.1.s8 %v1249_v35  ;;  %v2308_v46 = vcvt.s32.f32 %v1796_v32 }
 0x176   :  { %2847 = vmatpush.bf16.msrb.mxu2 %v2608_v25  ;;  %v2312_v47 = vcvt.s32.f32 %v1800_v14  ;;  %v1556_v49 = vunpack.c.0.s8 %v1284_v6  ;;  %v1560_v59 = vunpack.c.1.s8 %v1284_v6  ;;  %v2552_v52 = vpack.c.bf16 %v2208_v44, %v2204_v39  ;;  %v1261_v44 = vld [vmem:[#allocation13 + $0xd0] sm:$0xff] }
 0x177   :  { %2799 = vmatmul.bf16.vlgmr.msra.gmra.mxu2 %v4304_v24  ;;  %2811 = vmatpush.bf16.msra.mxu3 %v2488_v29  ;;  %v1925_v53 = vcvt.s32.f32 %v1413_v43  ;;  %v1929_v1 = vcvt.s32.f32 %v1417_v42  ;;  %v1684_v57 = vunpack.c.0.s8 %v1316_v48  ;;  %v1688_v3 = vunpack.c.1.s8 %v1316_v48 }
 0x178   :  { %2875 = vmatpush.bf16.msra.mxu0 %v2417_v38  ;;  %v2604_v2 = vpack.c.bf16 %v2312_v47, %v2308_v46  ;;  %v2068_v58 = vcvt.s32.f32 %v1556_v49  ;;  %v2072_v11 = vcvt.s32.f32 %v1560_v59  ;;  %2839 = vmatpush.bf16.msrb.mxu1 %v2552_v52  ;;  %v1868_v0 = vunpack.c.2.s8 %v1360_v50  ;;  %v1356_v38 = vld [vmem:[#allocation13 + $0x3c8] sm:$0xff] }
 0x179   :  { %2827 = vmatmul.bf16.vlgmr.msrb.gmra.mxu0 %v4348_v5  ;;  %v2413_v17 = vpack.c.bf16 %v1929_v1, %v1925_v53  ;;  %v2196_v4 = vcvt.s32.f32 %v1684_v57  ;;  %v1872_v31 = vunpack.c.3.s8 %v1360_v50  ;;  %v2200_v35 = vcvt.s32.f32 %v1688_v3  ;;  %v1336_v49 = vld [vmem:[#allocation13 + $0x328] sm:$0xff]  ;;  %v1241_v1 = vld [vmem:[#allocation13 + $0x30] sm:$0xff] }
 0x17a   :  { %2848 = vmatpush.bf16.msrb.mxu2 %v2604_v2  ;;  %v2484_v12 = vpack.c.bf16 %v2072_v11, %v2068_v58  ;;  %v1485_v55 = vunpack.c.2.s8 %v1265_v30  ;;  %v1489_v8 = vunpack.c.3.s8 %v1265_v30  ;;  %v2380_v15 = vcvt.s32.f32 %v1868_v0 }
 0x17b   :  { %v2384_v16 = vcvt.s32.f32 %v1872_v31  ;;  %v1788_v6 = vunpack.c.2.s8 %v1340_v56  ;;  %v1792_v61 = vunpack.c.3.s8 %v1340_v56  ;;  %v2548_v18 = vpack.c.bf16 %v2200_v35, %v2196_v4 }
 0x17c   :  { %2876 = vmatpush.bf16.msra.mxu0 %v2413_v17  ;;  %2812 = vmatpush.bf16.msra.mxu3 %v2484_v12  ;;  %v1997_v21 = vcvt.s32.f32 %v1485_v55  ;;  %v2001_v22 = vcvt.s32.f32 %v1489_v8  ;;  %v1405_v48 = vunpack.c.2.s8 %v1245_v7  ;;  %v1409_v28 = vunpack.c.3.s8 %v1245_v7 }
 0x17d   :  { %v2640_v10 = vpack.c.bf16 %v2384_v16, %v2380_v15  ;;  %v2300_v23 = vcvt.s32.f32 %v1788_v6  ;;  %v2304_v27 = vcvt.s32.f32 %v1792_v61  ;;  %2840 = vmatpush.bf16.msrb.mxu1 %v2548_v18  ;;  %v1860_v62 = vunpack.c.0.s8 %v1360_v50 }
 0x17e   :  { %v2449_v60 = vpack.c.bf16 %v2001_v22, %v1997_v21  ;;  %v1917_v19 = vcvt.s32.f32 %v1405_v48  ;;  %v1864_v26 = vunpack.c.1.s8 %v1360_v50  ;;  %v1921_v45 = vcvt.s32.f32 %v1409_v28 }
 0x17f   :  { %v2600_v63 = vpack.c.bf16 %v2304_v27, %v2300_v23  ;;  %v1477_v41 = vunpack.c.0.s8 %v1265_v30  ;;  %v1481_v34 = vunpack.c.1.s8 %v1265_v30  ;;  %v2372_v25 = vcvt.s32.f32 %v1860_v62  ;;  %2813 = vmatmul.bf16.vlgmr.msra.gmra.mxu3 %v4311_v54 }
 0x180   :  { %2861 = vmatpush.bf16.msrb.mxu3 %v2640_v10  ;;  %v2376_v36 = vcvt.s32.f32 %v1864_v26  ;;  %v1780_v37 = vunpack.c.0.s8 %v1340_v56  ;;  %v1784_v33 = vunpack.c.1.s8 %v1340_v56  ;;  %v2409_v39 = vpack.c.bf16 %v1921_v45, %v1917_v19  ;;  %2841 = vmatmul.bf16.vlgmr.msrb.gmra.mxu1 %v4355_v40  ;;  %v1257_v45 = vld [vmem:[#allocation13 + $0xb0] sm:$0xff] }
 0x181   :  { %2889 = vmatpush.bf16.msra.mxu1 %v2449_v60  ;;  %2849 = vmatpush.bf16.msrb.mxu2 %v2600_v63  ;;  %v1989_v32 = vcvt.s32.f32 %v1477_v41  ;;  %v1993_v14 = vcvt.s32.f32 %v1481_v34  ;;  %v1397_v29 = vunpack.c.0.s8 %v1245_v7  ;;  %v1401_v47 = vunpack.c.1.s8 %v1245_v7  ;;  %v1352_v60 = vld [vmem:[#allocation13 + $0x3a8] sm:$0xff] }
 0x182   :  { %v2636_v43 = vpack.c.bf16 %v2376_v36, %v2372_v25  ;;  %v2292_v42 = vcvt.s32.f32 %v1780_v37  ;;  %v2296_v46 = vcvt.s32.f32 %v1784_v33  ;;  %2877 = vmatpush.bf16.msra.mxu0 %v2409_v39  ;;  %v1852_v52 = vunpack.c.2.s8 %v1356_v38  ;;  %v1332_v37 = vld [vmem:[#allocation13 + $0x308] sm:$0xff] }
 0x183   :  { %v2445_v59 = vpack.c.bf16 %v1993_v14, %v1989_v32  ;;  %v1909_v50 = vcvt.s32.f32 %v1397_v29  ;;  %v1856_v53 = vunpack.c.3.s8 %v1356_v38  ;;  %v1913_v30 = vcvt.s32.f32 %v1401_v47  ;;  %v1237_v14 = vld [vmem:[#allocation13 + $0x10] sm:$0xff] }
 0x184   :  { %2862 = vmatpush.bf16.msrb.mxu3 %v2636_v43  ;;  %v2596_v57 = vpack.c.bf16 %v2296_v46, %v2292_v42  ;;  %v1469_v2 = vunpack.c.2.s8 %v1261_v44  ;;  %v1473_v58 = vunpack.c.3.s8 %v1261_v44  ;;  %v2364_v11 = vcvt.s32.f32 %v1852_v52 }
 0x185   :  { %2890 = vmatpush.bf16.msra.mxu1 %v2445_v59  ;;  %v2368_v3 = vcvt.s32.f32 %v1856_v53  ;;  %v1772_v56 = vunpack.c.2.s8 %v1336_v49  ;;  %v1776_v17 = vunpack.c.3.s8 %v1336_v49  ;;  %v2405_v4 = vpack.c.bf16 %v1913_v30, %v1909_v50 }
 0x186   :  { %2850 = vmatpush.bf16.msrb.mxu2 %v2596_v57  ;;  %v1981_v0 = vcvt.s32.f32 %v1469_v2  ;;  %v1985_v31 = vcvt.s32.f32 %v1473_v58  ;;  %v1389_v7 = vunpack.c.2.s8 %v1241_v1  ;;  %v1393_v8 = vunpack.c.3.s8 %v1241_v1 }
 0x187   :  { %v2632_v12 = vpack.c.bf16 %v2368_v3, %v2364_v11  ;;  %v2284_v35 = vcvt.s32.f32 %v1772_v56  ;;  %v2288_v55 = vcvt.s32.f32 %v1776_v17  ;;  %2878 = vmatpush.bf16.msra.mxu0 %v2405_v4  ;;  %v1844_v6 = vunpack.c.0.s8 %v1356_v38 }
 0x188   :  { %v2441_v15 = vpack.c.bf16 %v1985_v31, %v1981_v0  ;;  %v1901_v16 = vcvt.s32.f32 %v1389_v7  ;;  %v1848_v61 = vunpack.c.1.s8 %v1356_v38  ;;  %v1905_v21 = vcvt.s32.f32 %v1393_v8 }
 0x189   :  { %2863 = vmatpush.bf16.msrb.mxu3 %v2632_v12  ;;  %v2592_v18 = vpack.c.bf16 %v2288_v55, %v2284_v35  ;;  %v1461_v22 = vunpack.c.0.s8 %v1261_v44  ;;  %v1465_v48 = vunpack.c.1.s8 %v1261_v44  ;;  %v2356_v10 = vcvt.s32.f32 %v1844_v6 }
 0x18a   :  { %2891 = vmatpush.bf16.msra.mxu1 %v2441_v15  ;;  %v2360_v23 = vcvt.s32.f32 %v1848_v61  ;;  %v1764_v27 = vunpack.c.0.s8 %v1336_v49  ;;  %v1768_v28 = vunpack.c.1.s8 %v1336_v49  ;;  %v2401_v19 = vpack.c.bf16 %v1905_v21, %v1901_v16  ;;  %v1281_v15 = vld [vmem:[#allocation13 + $0x170] sm:$0xff] }
 0x18b   :  { %2851 = vmatpush.bf16.msrb.mxu2 %v2592_v18  ;;  %v1973_v62 = vcvt.s32.f32 %v1461_v22  ;;  %v1977_v26 = vcvt.s32.f32 %v1465_v48  ;;  %v1381_v63 = vunpack.c.0.s8 %v1241_v1  ;;  %v1385_v36 = vunpack.c.1.s8 %v1241_v1  ;;  %v1313_v21 = vld [vmem:[#allocation13 + $0x270] sm:$0xff] }
 0x18c   :  { %v2628_v41 = vpack.c.bf16 %v2360_v23, %v2356_v10  ;;  %v2276_v34 = vcvt.s32.f32 %v1764_v27  ;;  %v2280_v25 = vcvt.s32.f32 %v1768_v28  ;;  %2879 = vmatpush.bf16.msra.mxu0 %v2401_v19  ;;  %v1836_v39 = vunpack.c.2.s8 %v1352_v60  ;;  %v1348_v27 = vld [vmem:[#allocation13 + $0x388] sm:$0xff] }
 0x18d   :  { %v2437_v33 = vpack.c.bf16 %v1977_v26, %v1973_v62  ;;  %v1893_v38 = vcvt.s32.f32 %v1381_v63  ;;  %v1840_v32 = vunpack.c.3.s8 %v1352_v60  ;;  %v1897_v44 = vcvt.s32.f32 %v1385_v36  ;;  %v1253_v26 = vld [vmem:[#allocation13 + $0x90] sm:$0xff] }
 0x18e   :  { %2864 = vmatpush.bf16.msrb.mxu3 %v2628_v41  ;;  %v2588_v29 = vpack.c.bf16 %v2280_v25, %v2276_v34  ;;  %v1453_v43 = vunpack.c.2.s8 %v1257_v45  ;;  %v1457_v42 = vunpack.c.3.s8 %v1257_v45  ;;  %v2348_v46 = vcvt.s32.f32 %v1836_v39 }
 0x18f   :  { %2892 = vmatpush.bf16.msra.mxu1 %v2437_v33  ;;  %v2352_v47 = vcvt.s32.f32 %v1840_v32  ;;  %v1756_v49 = vunpack.c.2.s8 %v1332_v37  ;;  %v1760_v59 = vunpack.c.3.s8 %v1332_v37  ;;  %v2397_v50 = vpack.c.bf16 %v1897_v44, %v1893_v38 }
 0x190   :  { %2852 = vmatpush.bf16.msrb.mxu2 %v2588_v29  ;;  %v1965_v52 = vcvt.s32.f32 %v1453_v43  ;;  %v1969_v53 = vcvt.s32.f32 %v1457_v42  ;;  %v1373_v1 = vunpack.c.2.s8 %v1237_v14  ;;  %v1377_v58 = vunpack.c.3.s8 %v1237_v14 }
 0x191   :  { %v2624_v57 = vpack.c.bf16 %v2352_v47, %v2348_v46  ;;  %v2268_v30 = vcvt.s32.f32 %v1756_v49  ;;  %v2272_v2 = vcvt.s32.f32 %v1760_v59  ;;  %2880 = vmatpush.bf16.msra.mxu0 %v2397_v50  ;;  %v1828_v56 = vunpack.c.0.s8 %v1352_v60 }
 0x192   :  { %v2433_v11 = vpack.c.bf16 %v1969_v53, %v1965_v52  ;;  %v1885_v3 = vcvt.s32.f32 %v1373_v1  ;;  %v1832_v17 = vunpack.c.1.s8 %v1352_v60  ;;  %v1889_v0 = vcvt.s32.f32 %v1377_v58 }
 0x193   :  { %2865 = vmatpush.bf16.msrb.mxu3 %v2624_v57  ;;  %v2584_v4 = vpack.c.bf16 %v2272_v2, %v2268_v30  ;;  %v1445_v31 = vunpack.c.0.s8 %v1257_v45  ;;  %v1449_v7 = vunpack.c.1.s8 %v1257_v45  ;;  %v2340_v12 = vcvt.s32.f32 %v1828_v56 }
 0x194   :  { %2893 = vmatpush.bf16.msra.mxu1 %v2433_v11  ;;  %v2344_v35 = vcvt.s32.f32 %v1832_v17  ;;  %v1748_v55 = vunpack.c.0.s8 %v1332_v37  ;;  %v1752_v8 = vunpack.c.1.s8 %v1332_v37  ;;  %v2393_v16 = vpack.c.bf16 %v1889_v0, %v1885_v3  ;;  %v1297_v11 = vld [vmem:[#allocation13 + $0x1f0] sm:$0xff] }
 0x195   :  { %2853 = vmatpush.bf16.msrb.mxu2 %v2584_v4  ;;  %v1957_v6 = vcvt.s32.f32 %v1445_v31  ;;  %v1961_v61 = vcvt.s32.f32 %v1449_v7  ;;  %v1365_v18 = vunpack.c.0.s8 %v1237_v14  ;;  %v1369_v23 = vunpack.c.1.s8 %v1237_v14  ;;  %v1329_v0 = vld [vmem:[#allocation13 + $0x2f0] sm:$0xff] }
 0x196   :  { %v2620_v22 = vpack.c.bf16 %v2344_v35, %v2340_v12  ;;  %v2260_v48 = vcvt.s32.f32 %v1748_v55  ;;  %v2264_v10 = vcvt.s32.f32 %v1752_v8  ;;  %2881 = vmatpush.bf16.msra.mxu0 %v2393_v16  ;;  %v1549_v19 = vunpack.c.2.s8 %v1281_v15  ;;  %v1277_v55 = vld [vmem:[#allocation13 + $0x150] sm:$0xff] }
 0x197   :  { %v2429_v28 = vpack.c.bf16 %v1961_v61, %v1957_v6  ;;  %v1877_v60 = vcvt.s32.f32 %v1365_v18  ;;  %v1553_v62 = vunpack.c.3.s8 %v1281_v15  ;;  %v1881_v45 = vcvt.s32.f32 %v1369_v23  ;;  %v1309_v61 = vld [vmem:[#allocation13 + $0x250] sm:$0xff] }
 0x198   :  { %2866 = vmatpush.bf16.msrb.mxu3 %v2620_v22  ;;  %v2580_v63 = vpack.c.bf16 %v2264_v10, %v2260_v48  ;;  %v1677_v41 = vunpack.c.2.s8 %v1313_v21  ;;  %v1681_v34 = vunpack.c.3.s8 %v1313_v21  ;;  %v2061_v25 = vcvt.s32.f32 %v1549_v19 }
 0x199   :  { %2894 = vmatpush.bf16.msra.mxu1 %v2429_v28  ;;  %v2065_v36 = vcvt.s32.f32 %v1553_v62  ;;  %v1820_v37 = vunpack.c.2.s8 %v1348_v27  ;;  %v1824_v33 = vunpack.c.3.s8 %v1348_v27  ;;  %v2389_v38 = vpack.c.bf16 %v1881_v45, %v1877_v60 }
 0x19a   :  { %2854 = vmatpush.bf16.msrb.mxu2 %v2580_v63  ;;  %v2189_v39 = vcvt.s32.f32 %v1677_v41  ;;  %v2193_v32 = vcvt.s32.f32 %v1681_v34  ;;  %v1437_v14 = vunpack.c.2.s8 %v1253_v26  ;;  %v1441_v42 = vunpack.c.3.s8 %v1253_v26 }
 0x19b   :  { %v2481_v29 = vpack.c.bf16 %v2065_v36, %v2061_v25  ;;  %v2332_v44 = vcvt.s32.f32 %v1820_v37  ;;  %v2336_v43 = vcvt.s32.f32 %v1824_v33  ;;  %2882 = vmatpush.bf16.msra.mxu0 %v2389_v38  ;;  %v1541_v49 = vunpack.c.0.s8 %v1281_v15 }
 0x19c   :  { %v2545_v46 = vpack.c.bf16 %v2193_v32, %v2189_v39  ;;  %v1949_v47 = vcvt.s32.f32 %v1437_v14  ;;  %v1545_v59 = vunpack.c.1.s8 %v1281_v15  ;;  %v1953_v52 = vcvt.s32.f32 %v1441_v42 }
 0x19d   :  { %v2616_v50 = vpack.c.bf16 %v2336_v43, %v2332_v44  ;;  %v1669_v53 = vunpack.c.0.s8 %v1313_v21  ;;  %v1673_v1 = vunpack.c.1.s8 %v1313_v21  ;;  %2855 = vmatmul.bf16.vlgmr.msrb.gmra.mxu2 %v4404_v20  ;;  %v2053_v57 = vcvt.s32.f32 %v1541_v49 }
 0x19e   :  { %2903 = vmatpush.bf16.msra.mxu2 %v2481_v29  ;;  %v2057_v30 = vcvt.s32.f32 %v1545_v59  ;;  %v1812_v2 = vunpack.c.0.s8 %v1348_v27  ;;  %v1816_v58 = vunpack.c.1.s8 %v1348_v27  ;;  %v2425_v3 = vpack.c.bf16 %v1953_v52, %v1949_v47  ;;  %2883 = vmatmul.bf16.vlgmr.msra.gmra.mxu0 %v4256_v51  ;;  %v1325_v52 = vld [vmem:[#allocation13 + $0x2d0] sm:$0xff] }
 0x19f   :  { %2931 = vmatpush.bf16.msrb.mxu0 %v2545_v46  ;;  %2867 = vmatpush.bf16.msrb.mxu3 %v2616_v50  ;;  %v2181_v56 = vcvt.s32.f32 %v1669_v53  ;;  %v2185_v17 = vcvt.s32.f32 %v1673_v1  ;;  %v1429_v4 = vunpack.c.0.s8 %v1253_v26  ;;  %v1433_v35 = vunpack.c.1.s8 %v1253_v26  ;;  %v1293_v46 = vld [vmem:[#allocation13 + $0x1d0] sm:$0xff] }
 0x1a0   :  { %v2477_v31 = vpack.c.bf16 %v2057_v30, %v2053_v57  ;;  %v2324_v7 = vcvt.s32.f32 %v1812_v2  ;;  %v2328_v12 = vcvt.s32.f32 %v1816_v58  ;;  %2895 = vmatpush.bf16.msra.mxu1 %v2425_v3  ;;  %v1613_v16 = vunpack.c.2.s8 %v1297_v11  ;;  %v1273_v2 = vld [vmem:[#allocation13 + $0x130] sm:$0xff] }
 0x1a1   :  { %v2541_v8 = vpack.c.bf16 %v2185_v17, %v2181_v56  ;;  %v1941_v15 = vcvt.s32.f32 %v1429_v4  ;;  %v1617_v6 = vunpack.c.3.s8 %v1297_v11  ;;  %v1945_v21 = vcvt.s32.f32 %v1433_v35  ;;  %v1305_v17 = vld [vmem:[#allocation13 + $0x230] sm:$0xff] }
 0x1a2   :  { %2904 = vmatpush.bf16.msra.mxu2 %v2477_v31  ;;  %v2612_v18 = vpack.c.bf16 %v2328_v12, %v2324_v7  ;;  %v1741_v22 = vunpack.c.2.s8 %v1329_v0  ;;  %v1745_v48 = vunpack.c.3.s8 %v1329_v0  ;;  %v2125_v10 = vcvt.s32.f32 %v1613_v16 }
 0x1a3   :  { %2932 = vmatpush.bf16.msrb.mxu0 %v2541_v8  ;;  %v2129_v23 = vcvt.s32.f32 %v1617_v6  ;;  %v1533_v27 = vunpack.c.2.s8 %v1277_v55  ;;  %v1537_v28 = vunpack.c.3.s8 %v1277_v55  ;;  %v2421_v60 = vpack.c.bf16 %v1945_v21, %v1941_v15 }
 0x1a4   :  { %2868 = vmatpush.bf16.msrb.mxu3 %v2612_v18  ;;  %v2253_v19 = vcvt.s32.f32 %v1741_v22  ;;  %v2257_v62 = vcvt.s32.f32 %v1745_v48  ;;  %v1661_v26 = vunpack.c.2.s8 %v1309_v61  ;;  %v1665_v34 = vunpack.c.3.s8 %v1309_v61 }
 0x1a5   :  { %v2513_v63 = vpack.c.bf16 %v2129_v23, %v2125_v10  ;;  %v2045_v45 = vcvt.s32.f32 %v1533_v27  ;;  %v2049_v41 = vcvt.s32.f32 %v1537_v28  ;;  %2896 = vmatpush.bf16.msra.mxu1 %v2421_v60  ;;  %v1605_v37 = vunpack.c.0.s8 %v1297_v11 }
 0x1a6   :  { %v2577_v25 = vpack.c.bf16 %v2257_v62, %v2253_v19  ;;  %v2173_v36 = vcvt.s32.f32 %v1661_v26  ;;  %v1609_v33 = vunpack.c.1.s8 %v1297_v11  ;;  %v2177_v39 = vcvt.s32.f32 %v1665_v34 }
 0x1a7   :  { %v2473_v38 = vpack.c.bf16 %v2049_v41, %v2045_v45  ;;  %v1733_v32 = vunpack.c.0.s8 %v1329_v0  ;;  %v1737_v14 = vunpack.c.1.s8 %v1329_v0  ;;  %2869 = vmatmul.bf16.vlgmr.msrb.gmra.mxu3 %v4411_v9  ;;  %v2117_v29 = vcvt.s32.f32 %v1605_v37 }
 0x1a8   :  { %2917 = vmatpush.bf16.msra.mxu3 %v2513_v63  ;;  %v2121_v44 = vcvt.s32.f32 %v1609_v33  ;;  %v1525_v43 = vunpack.c.0.s8 %v1277_v55  ;;  %v1529_v42 = vunpack.c.1.s8 %v1277_v55  ;;  %2897 = vmatmul.bf16.vlgmr.msra.gmra.mxu1 %v4277_v13  ;;  %v2537_v47 = vpack.c.bf16 %v2177_v39, %v2173_v36  ;;  %v1321_v39 = vld [vmem:[#allocation13 + $0x2b0] sm:$0xff] }
 0x1a9   :  { %2945 = vmatpush.bf16.msrb.mxu1 %v2577_v25  ;;  %2905 = vmatpush.bf16.msra.mxu2 %v2473_v38  ;;  %v2245_v49 = vcvt.s32.f32 %v1733_v32  ;;  %v2249_v59 = vcvt.s32.f32 %v1737_v14  ;;  %v1653_v50 = vunpack.c.0.s8 %v1309_v61  ;;  %v1657_v30 = vunpack.c.1.s8 %v1309_v61  ;;  %v1289_v25 = vld [vmem:[#allocation13 + $0x1b0] sm:$0xff] }
 0x1aa   :  { %v2509_v53 = vpack.c.bf16 %v2121_v44, %v2117_v29  ;;  %v2037_v1 = vcvt.s32.f32 %v1525_v43  ;;  %v2041_v57 = vcvt.s32.f32 %v1529_v42  ;;  %2933 = vmatpush.bf16.msrb.mxu0 %v2537_v47  ;;  %v1597_v3 = vunpack.c.2.s8 %v1293_v46  ;;  %v1269_v43 = vld [vmem:[#allocation13 + $0x110] sm:$0xff] }
 0x1ab   :  { %v2573_v58 = vpack.c.bf16 %v2249_v59, %v2245_v49  ;;  %v2165_v11 = vcvt.s32.f32 %v1653_v50  ;;  %v1601_v56 = vunpack.c.3.s8 %v1293_v46  ;;  %v2169_v0 = vcvt.s32.f32 %v1657_v30 }
 0x1ac   :  { %2918 = vmatpush.bf16.msra.mxu3 %v2509_v53  ;;  %v2469_v4 = vpack.c.bf16 %v2041_v57, %v2037_v1  ;;  %v1725_v31 = vunpack.c.2.s8 %v1325_v52  ;;  %v1729_v7 = vunpack.c.3.s8 %v1325_v52  ;;  %v2109_v12 = vcvt.s32.f32 %v1597_v3  ;;  %v1301_v1 = vld [vmem:[#allocation13 + $0x210] sm:$0xff] }
 0x1ad   :  { %2946 = vmatpush.bf16.msrb.mxu1 %v2573_v58  ;;  %v2113_v35 = vcvt.s32.f32 %v1601_v56  ;;  %v1517_v55 = vunpack.c.2.s8 %v1273_v2  ;;  %v1521_v8 = vunpack.c.3.s8 %v1273_v2  ;;  %v2533_v15 = vpack.c.bf16 %v2169_v0, %v2165_v11 }
 0x1ae   :  { %2906 = vmatpush.bf16.msra.mxu2 %v2469_v4  ;;  %v2237_v16 = vcvt.s32.f32 %v1725_v31  ;;  %v2241_v6 = vcvt.s32.f32 %v1729_v7  ;;  %v1645_v61 = vunpack.c.2.s8 %v1305_v17  ;;  %v1649_v48 = vunpack.c.3.s8 %v1305_v17 }
 0x1af   :  { %v2505_v18 = vpack.c.bf16 %v2113_v35, %v2109_v12  ;;  %v2029_v21 = vcvt.s32.f32 %v1517_v55  ;;  %v2033_v22 = vcvt.s32.f32 %v1521_v8  ;;  %2934 = vmatpush.bf16.msrb.mxu0 %v2533_v15  ;;  %v1589_v27 = vunpack.c.0.s8 %v1293_v46 }
 0x1b0   :  { %v2569_v10 = vpack.c.bf16 %v2241_v6, %v2237_v16  ;;  %v2157_v23 = vcvt.s32.f32 %v1645_v61  ;;  %v1593_v28 = vunpack.c.1.s8 %v1293_v46  ;;  %v2161_v19 = vcvt.s32.f32 %v1649_v48  ;;  %v1345_v48 = vld [vmem:[#allocation13 + $0x370] sm:$0xff] }
 0x1b1   :  { %2919 = vmatpush.bf16.msra.mxu3 %v2505_v18  ;;  %v2465_v60 = vpack.c.bf16 %v2033_v22, %v2029_v21  ;;  %v1717_v62 = vunpack.c.0.s8 %v1325_v52  ;;  %v1721_v26 = vunpack.c.1.s8 %v1325_v52  ;;  %v2101_v63 = vcvt.s32.f32 %v1589_v27 }
 0x1b2   :  { %2947 = vmatpush.bf16.msrb.mxu1 %v2569_v10  ;;  %v2105_v45 = vcvt.s32.f32 %v1593_v28  ;;  %v1509_v41 = vunpack.c.0.s8 %v1273_v2  ;;  %v1513_v34 = vunpack.c.1.s8 %v1273_v2  ;;  %v2529_v36 = vpack.c.bf16 %v2161_v19, %v2157_v23 }
 0x1b3   :  { %2907 = vmatpush.bf16.msra.mxu2 %v2465_v60  ;;  %v2229_v37 = vcvt.s32.f32 %v1717_v62  ;;  %v2233_v33 = vcvt.s32.f32 %v1721_v26  ;;  %v1637_v38 = vunpack.c.0.s8 %v1305_v17  ;;  %v1641_v44 = vunpack.c.1.s8 %v1305_v17  ;;  %v1250_v60 = vld [vmem:[#allocation13 + $0x78] sm:$0xff] }
 0x1b4   :  { %v2501_v32 = vpack.c.bf16 %v2105_v45, %v2101_v63  ;;  %v2021_v14 = vcvt.s32.f32 %v1509_v41  ;;  %v2025_v29 = vcvt.s32.f32 %v1513_v34  ;;  %2935 = vmatpush.bf16.msrb.mxu0 %v2529_v36  ;;  %v1581_v47 = vunpack.c.2.s8 %v1289_v25  ;;  %v1285_v45 = vld [vmem:[#allocation13 + $0x190] sm:$0xff] }
 0x1b5   :  { %v2565_v42 = vpack.c.bf16 %v2233_v33, %v2229_v37  ;;  %v2149_v46 = vcvt.s32.f32 %v1637_v38  ;;  %v1585_v49 = vunpack.c.3.s8 %v1289_v25  ;;  %v2153_v50 = vcvt.s32.f32 %v1641_v44 }
 0x1b6   :  { %2920 = vmatpush.bf16.msra.mxu3 %v2501_v32  ;;  %v2461_v59 = vpack.c.bf16 %v2025_v29, %v2021_v14  ;;  %v1709_v52 = vunpack.c.2.s8 %v1321_v39  ;;  %v1713_v53 = vunpack.c.3.s8 %v1321_v39  ;;  %v2093_v57 = vcvt.s32.f32 %v1581_v47  ;;  %v1317_v32 = vld [vmem:[#allocation13 + $0x290] sm:$0xff] }
 0x1b7   :  { %2948 = vmatpush.bf16.msrb.mxu1 %v2565_v42  ;;  %v2097_v30 = vcvt.s32.f32 %v1585_v49  ;;  %v1501_v2 = vunpack.c.2.s8 %v1269_v43  ;;  %v2525_v58 = vpack.c.bf16 %v2153_v50, %v2149_v46  ;;  %v1505_v56 = vunpack.c.3.s8 %v1269_v43 }
 0x1b8   :  { %2908 = vmatpush.bf16.msra.mxu2 %v2461_v59  ;;  %v2221_v11 = vcvt.s32.f32 %v1709_v52  ;;  %v2225_v3 = vcvt.s32.f32 %v1713_v53  ;;  %v1629_v0 = vunpack.c.2.s8 %v1301_v1  ;;  %v1633_v31 = vunpack.c.3.s8 %v1301_v1 }
 0x1b9   :  { %v2497_v17 = vpack.c.bf16 %v2097_v30, %v2093_v57  ;;  %v2013_v4 = vcvt.s32.f32 %v1501_v2  ;;  %2936 = vmatpush.bf16.msrb.mxu0 %v2525_v58  ;;  %v2017_v12 = vcvt.s32.f32 %v1505_v56  ;;  %v1573_v35 = vunpack.c.0.s8 %v1289_v25 }
 0x1ba   :  { %v2561_v7 = vpack.c.bf16 %v2225_v3, %v2221_v11  ;;  %v1577_v55 = vunpack.c.1.s8 %v1289_v25  ;;  %v2141_v8 = vcvt.s32.f32 %v1629_v0  ;;  %v2145_v15 = vcvt.s32.f32 %v1633_v31  ;;  %v1361_v31 = vld [vmem:[#allocation13 + $0x3f0] sm:$0xff] }
 0x1bb   :  { %2921 = vmatpush.bf16.msra.mxu3 %v2497_v17  ;;  %v1701_v16 = vunpack.c.0.s8 %v1321_v39  ;;  %v1705_v6 = vunpack.c.1.s8 %v1321_v39  ;;  %v2457_v61 = vpack.c.bf16 %v2017_v12, %v2013_v4  ;;  %v2085_v18 = vcvt.s32.f32 %v1573_v35 }
 0x1bc   :  { %2949 = vmatpush.bf16.msrb.mxu1 %v2561_v7  ;;  %v2089_v21 = vcvt.s32.f32 %v1577_v55  ;;  %v1493_v22 = vunpack.c.0.s8 %v1269_v43  ;;  %v2521_v10 = vpack.c.bf16 %v2145_v15, %v2141_v8  ;;  %v1497_v28 = vunpack.c.1.s8 %v1269_v43  ;;  %v1266_v8 = vld [vmem:[#allocation13 + $0xf8] sm:$0xff] }
 0x1bd   :  { %v2213_v23 = vcvt.s32.f32 %v1701_v16  ;;  %v2217_v27 = vcvt.s32.f32 %v1705_v6  ;;  %2909 = vmatpush.bf16.msra.mxu2 %v2457_v61  ;;  %v1621_v26 = vunpack.c.0.s8 %v1301_v1  ;;  %v1625_v63 = vunpack.c.1.s8 %v1301_v1 }
 0x1be   :  { %v2493_v19 = vpack.c.bf16 %v2089_v21, %v2085_v18  ;;  %v2005_v62 = vcvt.s32.f32 %v1493_v22  ;;  %2937 = vmatpush.bf16.msrb.mxu0 %v2521_v10  ;;  %v2009_v34 = vcvt.s32.f32 %v1497_v28  ;;  %v1805_v25 = vunpack.c.2.s8 %v1345_v48  ;;  %v1341_v10 = vld [vmem:[#allocation13 + $0x350] sm:$0xff] }
 0x1bf   :  { %v2557_v41 = vpack.c.bf16 %v2217_v27, %v2213_v23  ;;  %v1809_v36 = vunpack.c.3.s8 %v1345_v48  ;;  %v2133_v37 = vcvt.s32.f32 %v1621_v26  ;;  %v2137_v33 = vcvt.s32.f32 %v1625_v63 }
 0x1c0   :  { %2922 = vmatpush.bf16.msra.mxu3 %v2493_v19  ;;  %v1422_v38 = vunpack.c.2.s8 %v1250_v60  ;;  %v1426_v39 = vunpack.c.3.s8 %v1250_v60  ;;  %v2453_v14 = vpack.c.bf16 %v2009_v34, %v2005_v62  ;;  %v2317_v29 = vcvt.s32.f32 %v1805_v25  ;;  %v1246_v19 = vld [vmem:[#allocation13 + $0x58] sm:$0xff] }
 0x1c1   :  { %2950 = vmatpush.bf16.msrb.mxu1 %v2557_v41  ;;  %v2321_v44 = vcvt.s32.f32 %v1809_v36  ;;  %v1565_v43 = vunpack.c.2.s8 %v1285_v45  ;;  %v2517_v42 = vpack.c.bf16 %v2137_v33, %v2133_v37  ;;  %v1569_v49 = vunpack.c.3.s8 %v1285_v45 }
 0x1c2   :  { %v1934_v46 = vcvt.s32.f32 %v1422_v38  ;;  %v1938_v47 = vcvt.s32.f32 %v1426_v39  ;;  %2910 = vmatpush.bf16.msra.mxu2 %v2453_v14  ;;  %v1693_v52 = vunpack.c.2.s8 %v1317_v32  ;;  %v1697_v53 = vunpack.c.3.s8 %v1317_v32 }
 0x1c3   :  { %v2609_v59 = vpack.c.bf16 %v2321_v44, %v2317_v29  ;;  %v2077_v50 = vcvt.s32.f32 %v1565_v43  ;;  %2938 = vmatpush.bf16.msrb.mxu0 %v2517_v42  ;;  %v2081_v57 = vcvt.s32.f32 %v1569_v49  ;;  %v1797_v30 = vunpack.c.0.s8 %v1345_v48 }
 0x1c4   :  { %v2418_v1 = vpack.c.bf16 %v1938_v47, %v1934_v46  ;;  %v2205_v2 = vcvt.s32.f32 %v1693_v52  ;;  %v2209_v58 = vcvt.s32.f32 %v1697_v53  ;;  %v1801_v11 = vunpack.c.1.s8 %v1345_v48  ;;  %v1357_v53 = vld [vmem:[#allocation13 + $0x3d0] sm:$0xff] }
 0x1c5   :  { %v1414_v3 = vunpack.c.0.s8 %v1250_v60  ;;  %v2489_v56 = vpack.c.bf16 %v2081_v57, %v2077_v50  ;;  %2911 = vmatmul.bf16.vlgmr.msra.gmra.mxu2 %v4304_v24  ;;  %v2309_v17 = vcvt.s32.f32 %v1797_v30  ;;  %v1418_v4 = vunpack.c.1.s8 %v1250_v60 }
 0x1c6   :  { %2959 = vmatpush.bf16.msrb.mxu2 %v2609_v59  ;;  %v1557_v0 = vunpack.c.0.s8 %v1285_v45  ;;  %v2553_v7 = vpack.c.bf16 %v2209_v58, %v2205_v2  ;;  %2939 = vmatmul.bf16.vlgmr.msrb.gmra.mxu0 %v4348_v5  ;;  %v2313_v12 = vcvt.s32.f32 %v1801_v11  ;;  %v1561_v55 = vunpack.c.1.s8 %v1285_v45  ;;  %v1262_v58 = vld [vmem:[#allocation13 + $0xd8] sm:$0xff] }
 0x1c7   :  { %2987 = vmatpush.bf16.msra.mxu0 %v2418_v1  ;;  %v1926_v35 = vcvt.s32.f32 %v1414_v3  ;;  %2923 = vmatpush.bf16.msra.mxu3 %v2489_v56  ;;  %v1930_v15 = vcvt.s32.f32 %v1418_v4  ;;  %v1685_v6 = vunpack.c.0.s8 %v1317_v32  ;;  %v1689_v61 = vunpack.c.1.s8 %v1317_v32  ;;  %v2660_v4 = vpop.f32.mrf.mxu0 }
 0x1c8   :  { %v2069_v16 = vcvt.s32.f32 %v1557_v0  ;;  %2951 = vmatpush.bf16.msrb.mxu1 %v2553_v7  ;;  %v2605_v18 = vpack.c.bf16 %v2313_v12, %v2309_v17  ;;  %v2073_v21 = vcvt.s32.f32 %v1561_v55  ;;  %v1869_v22 = vunpack.c.2.s8 %v1361_v31  ;;  %v2674_v0 = vpop.f32.mrf.mxu1  ;;  %v1337_v55 = vld [vmem:[#allocation13 + $0x330] sm:$0xff] }
 0x1c9   :  { %v1873_v48 = vunpack.c.3.s8 %v1361_v31  ;;  %v2414_v23 = vpack.c.bf16 %v1930_v15, %v1926_v35  ;;  %v2197_v27 = vcvt.s32.f32 %v1685_v6  ;;  %v2201_v28 = vcvt.s32.f32 %v1689_v61  ;;  %v1242_v61 = vld [vmem:[#allocation13 + $0x38] sm:$0xff] }
 0x1ca   :  { %v1486_v60 = vunpack.c.2.s8 %v1266_v8  ;;  %2960 = vmatpush.bf16.msrb.mxu2 %v2605_v18  ;;  %v2485_v62 = vpack.c.bf16 %v2073_v21, %v2069_v16  ;;  %v2381_v26 = vcvt.s32.f32 %v1869_v22  ;;  %v1490_v45 = vunpack.c.3.s8 %v1266_v8 }
 0x1cb   :  { %v2385_v63 = vcvt.s32.f32 %v1873_v48  ;;  %2988 = vmatpush.bf16.msra.mxu0 %v2414_v23  ;;  %v2549_v41 = vpack.c.bf16 %v2201_v28, %v2197_v27  ;;  %v1789_v25 = vunpack.c.2.s8 %v1341_v10  ;;  %v1793_v36 = vunpack.c.3.s8 %v1341_v10 }
 0x1cc   :  { %v1998_v34 = vcvt.s32.f32 %v1486_v60  ;;  %2924 = vmatpush.bf16.msra.mxu3 %v2485_v62  ;;  %v2002_v33 = vcvt.s32.f32 %v1490_v45  ;;  %v1406_v38 = vunpack.c.2.s8 %v1246_v19  ;;  %v1410_v39 = vunpack.c.3.s8 %v1246_v19 }
 0x1cd   :  { %v2641_v37 = vpack.c.bf16 %v2385_v63, %v2381_v26  ;;  %2952 = vmatpush.bf16.msrb.mxu1 %v2549_v41  ;;  %v2301_v32 = vcvt.s32.f32 %v1789_v25  ;;  %v2305_v14 = vcvt.s32.f32 %v1793_v36  ;;  %v1861_v29 = vunpack.c.0.s8 %v1361_v31 }
 0x1ce   :  { %v1865_v44 = vunpack.c.1.s8 %v1361_v31  ;;  %v2450_v43 = vpack.c.bf16 %v2002_v33, %v1998_v34  ;;  %v1918_v42 = vcvt.s32.f32 %v1406_v38  ;;  %v1922_v46 = vcvt.s32.f32 %v1410_v39 }
 0x1cf   :  { %v1478_v47 = vunpack.c.0.s8 %v1266_v8  ;;  %2925 = vmatmul.bf16.vlgmr.msra.gmra.mxu3 %v4311_v54  ;;  %v2601_v49 = vpack.c.bf16 %v2305_v14, %v2301_v32  ;;  %v2373_v59 = vcvt.s32.f32 %v1861_v29  ;;  %v1482_v52 = vunpack.c.1.s8 %v1266_v8 }
 0x1d0   :  { %2973 = vmatpush.bf16.msrb.mxu3 %v2641_v37  ;;  %v2377_v50 = vcvt.s32.f32 %v1865_v44  ;;  %v2410_v1 = vpack.c.bf16 %v1922_v46, %v1918_v42  ;;  %v1781_v30 = vunpack.c.0.s8 %v1341_v10  ;;  %v1785_v2 = vunpack.c.1.s8 %v1341_v10  ;;  %2953 = vmatmul.bf16.vlgmr.msrb.gmra.mxu1 %v4355_v40  ;;  %v1353_v42 = vld [vmem:[#allocation13 + $0x3b0] sm:$0xff] }
 0x1d1   :  { %3001 = vmatpush.bf16.msra.mxu1 %v2450_v43  ;;  %v1990_v57 = vcvt.s32.f32 %v1478_v47  ;;  %2961 = vmatpush.bf16.msrb.mxu2 %v2601_v49  ;;  %v1994_v3 = vcvt.s32.f32 %v1482_v52  ;;  %v1398_v56 = vunpack.c.0.s8 %v1246_v19  ;;  %v1402_v17 = vunpack.c.1.s8 %v1246_v19 }
 0x1d2   :  { %v2637_v11 = vpack.c.bf16 %v2377_v50, %v2373_v59  ;;  %2989 = vmatpush.bf16.msra.mxu0 %v2410_v1  ;;  %v2293_v31 = vcvt.s32.f32 %v1781_v30  ;;  %v2297_v7 = vcvt.s32.f32 %v1785_v2  ;;  %v1853_v12 = vunpack.c.2.s8 %v1357_v53  ;;  %v1258_v50 = vld [vmem:[#allocation13 + $0xb8] sm:$0xff]  ;;  %v2676_v1 = vpop.f32.mrf.mxu1 }
 0x1d3   :  { %v1857_v35 = vunpack.c.3.s8 %v1357_v53  ;;  %v2446_v8 = vpack.c.bf16 %v1994_v3, %v1990_v57  ;;  %v1910_v15 = vcvt.s32.f32 %v1398_v56  ;;  %v1914_v16 = vcvt.s32.f32 %v1402_v17 }
 0x1d4   :  { %2974 = vmatpush.bf16.msrb.mxu3 %v2637_v11  ;;  %v1470_v6 = vunpack.c.2.s8 %v1262_v58  ;;  %v2597_v18 = vpack.c.bf16 %v2297_v7, %v2293_v31  ;;  %v2365_v21 = vcvt.s32.f32 %v1853_v12  ;;  %v1474_v48 = vunpack.c.3.s8 %v1262_v58  ;;  %v1333_v11 = vld [vmem:[#allocation13 + $0x310] sm:$0xff] }
 0x1d5   :  { %v2369_v22 = vcvt.s32.f32 %v1857_v35  ;;  %3002 = vmatpush.bf16.msra.mxu1 %v2446_v8  ;;  %v2406_v10 = vpack.c.bf16 %v1914_v16, %v1910_v15  ;;  %v1773_v27 = vunpack.c.2.s8 %v1337_v55  ;;  %v1777_v19 = vunpack.c.3.s8 %v1337_v55 }
 0x1d6   :  { %v1982_v23 = vcvt.s32.f32 %v1470_v6  ;;  %2962 = vmatpush.bf16.msrb.mxu2 %v2597_v18  ;;  %v1986_v60 = vcvt.s32.f32 %v1474_v48  ;;  %v1390_v62 = vunpack.c.2.s8 %v1242_v61  ;;  %v1394_v63 = vunpack.c.3.s8 %v1242_v61 }
 0x1d7   :  { %v2633_v28 = vpack.c.bf16 %v2369_v22, %v2365_v21  ;;  %2990 = vmatpush.bf16.msra.mxu0 %v2406_v10  ;;  %v2285_v26 = vcvt.s32.f32 %v1773_v27  ;;  %v1845_v45 = vunpack.c.0.s8 %v1357_v53  ;;  %v1849_v41 = vunpack.c.1.s8 %v1357_v53  ;;  %v2662_v53 = vpop.f32.mrf.mxu0 }
 0x1d8   :  { %v2442_v34 = vpack.c.bf16 %v1986_v60, %v1982_v23  ;;  %v2289_v25 = vcvt.s32.f32 %v1777_v19  ;;  %v1902_v36 = vcvt.s32.f32 %v1390_v62  ;;  %v1462_v37 = vunpack.c.0.s8 %v1262_v58 }
 0x1d9   :  { %2975 = vmatpush.bf16.msrb.mxu3 %v2633_v28  ;;  %v1906_v33 = vcvt.s32.f32 %v1394_v63  ;;  %v2357_v38 = vcvt.s32.f32 %v1845_v45  ;;  %v2361_v39 = vcvt.s32.f32 %v1849_v41  ;;  %v1466_v32 = vunpack.c.1.s8 %v1262_v58  ;;  %v2688_v45 = vpop.f32.mrf.mxu2 }
 0x1da   :  { %3003 = vmatpush.bf16.msra.mxu1 %v2442_v34  ;;  %v2593_v14 = vpack.c.bf16 %v2289_v25, %v2285_v26  ;;  %v1974_v29 = vcvt.s32.f32 %v1462_v37  ;;  %v1765_v44 = vunpack.c.0.s8 %v1337_v55  ;;  %v1769_v43 = vunpack.c.1.s8 %v1337_v55  ;;  %v1238_v55 = vld [vmem:[#allocation13 + $0x18] sm:$0xff] }
 0x1db   :  { %v2402_v46 = vpack.c.bf16 %v1906_v33, %v1902_v36  ;;  %v2629_v47 = vpack.c.bf16 %v2361_v39, %v2357_v38  ;;  %v1978_v49 = vcvt.s32.f32 %v1466_v32  ;;  %v1382_v59 = vunpack.c.0.s8 %v1242_v61  ;;  %v1282_v37 = vld [vmem:[#allocation13 + $0x178] sm:$0xff] }
 0x1dc   :  { %v2675_v52 = vadd.f32 %v2674_v0, %v2660_v4  ;;  %2963 = vmatpush.bf16.msrb.mxu2 %v2593_v14  ;;  %v2277_v57 = vcvt.s32.f32 %v1765_v44  ;;  %v2281_v30 = vcvt.s32.f32 %v1769_v43  ;;  %v1386_v2 = vunpack.c.1.s8 %v1242_v61  ;;  %v1314_v14 = vld [vmem:[#allocation13 + $0x278] sm:$0xff] }
 0x1dd   :  { %2991 = vmatpush.bf16.msra.mxu0 %v2402_v46  ;;  %2976 = vmatpush.bf16.msrb.mxu3 %v2629_v47  ;;  %v2438_v58 = vpack.c.bf16 %v1978_v49, %v1974_v29  ;;  %v1894_v3 = vcvt.s32.f32 %v1382_v59  ;;  %v1837_v56 = vunpack.c.2.s8 %v1353_v42  ;;  %v1841_v17 = vunpack.c.3.s8 %v1353_v42  ;;  %v1349_v46 = vld [vmem:[#allocation13 + $0x390] sm:$0xff] }
 0x1de   :  { %v2589_v31 = vpack.c.bf16 %v2281_v30, %v2277_v57  ;;  %v1898_v7 = vcvt.s32.f32 %v1386_v2  ;;  %v1454_v12 = vunpack.c.2.s8 %v1258_v50  ;;  %v1458_v35 = vunpack.c.3.s8 %v1258_v50  ;;  %v1254_v2 = vld [vmem:[#allocation13 + $0x98] sm:$0xff] }
 0x1df   :  { %v4426_v8 = vadd.f32 %v2676_v1, %v2662_v53  ;;  %3004 = vmatpush.bf16.msra.mxu1 %v2438_v58  ;;  %v2349_v4 = vcvt.s32.f32 %v1837_v56  ;;  %v2353_v0 = vcvt.s32.f32 %v1841_v17  ;;  %v1757_v15 = vunpack.c.2.s8 %v1333_v11 }
 0x1e0   :  { %2964 = vmatpush.bf16.msrb.mxu2 %v2589_v31  ;;  %v2398_v16 = vpack.c.bf16 %v1898_v7, %v1894_v3  ;;  %v1966_v6 = vcvt.s32.f32 %v1454_v12  ;;  %v1970_v61 = vcvt.s32.f32 %v1458_v35  ;;  %v1761_v18 = vunpack.c.3.s8 %v1333_v11 }
 0x1e1   :  { %v2625_v21 = vpack.c.bf16 %v2353_v0, %v2349_v4  ;;  %v2269_v22 = vcvt.s32.f32 %v1757_v15  ;;  %v1374_v48 = vunpack.c.2.s8 %v1238_v55  ;;  %v1378_v10 = vunpack.c.3.s8 %v1238_v55 }
 0x1e2   :  { %2992 = vmatpush.bf16.msra.mxu0 %v2398_v16  ;;  %v2434_v23 = vpack.c.bf16 %v1970_v61, %v1966_v6  ;;  %v2273_v27 = vcvt.s32.f32 %v1761_v18  ;;  %v1829_v28 = vunpack.c.0.s8 %v1353_v42  ;;  %v1833_v60 = vunpack.c.1.s8 %v1353_v42 }
 0x1e3   :  { %2977 = vmatpush.bf16.msrb.mxu3 %v2625_v21  ;;  %v1886_v19 = vcvt.s32.f32 %v1374_v48  ;;  %v1890_v62 = vcvt.s32.f32 %v1378_v10  ;;  %v1446_v26 = vunpack.c.0.s8 %v1258_v50  ;;  %v1450_v63 = vunpack.c.1.s8 %v1258_v50 }
 0x1e4   :  { %3005 = vmatpush.bf16.msra.mxu1 %v2434_v23  ;;  %v2585_v41 = vpack.c.bf16 %v2273_v27, %v2269_v22  ;;  %v2341_v34 = vcvt.s32.f32 %v1829_v28  ;;  %v2345_v25 = vcvt.s32.f32 %v1833_v60  ;;  %v1749_v36 = vunpack.c.0.s8 %v1333_v11  ;;  %v1298_v28 = vld [vmem:[#allocation13 + $0x1f8] sm:$0xff] }
 0x1e5   :  { %v2394_v33 = vpack.c.bf16 %v1890_v62, %v1886_v19  ;;  %v1958_v38 = vcvt.s32.f32 %v1446_v26  ;;  %v1962_v39 = vcvt.s32.f32 %v1450_v63  ;;  %v1753_v32 = vunpack.c.1.s8 %v1333_v11  ;;  %v1330_v63 = vld [vmem:[#allocation13 + $0x2f8] sm:$0xff] }
 0x1e6   :  { %2965 = vmatpush.bf16.msrb.mxu2 %v2585_v41  ;;  %v2621_v29 = vpack.c.bf16 %v2345_v25, %v2341_v34  ;;  %v2261_v44 = vcvt.s32.f32 %v1749_v36  ;;  %v1366_v43 = vunpack.c.0.s8 %v1238_v55  ;;  %v1370_v42 = vunpack.c.1.s8 %v1238_v55 }
 0x1e7   :  { %v4428_v47 = vadd.f32 %v2688_v45, %v2675_v52  ;;  %2993 = vmatpush.bf16.msra.mxu0 %v2394_v33  ;;  %v2430_v49 = vpack.c.bf16 %v1962_v39, %v1958_v38  ;;  %v2265_v59 = vcvt.s32.f32 %v1753_v32  ;;  %v1550_v50 = vunpack.c.2.s8 %v1282_v37  ;;  %v1278_v39 = vld [vmem:[#allocation13 + $0x158] sm:$0xff] }
 0x1e8   :  { %2978 = vmatpush.bf16.msrb.mxu3 %v2621_v29  ;;  %v1878_v53 = vcvt.s32.f32 %v1366_v43  ;;  %v1882_v1 = vcvt.s32.f32 %v1370_v42  ;;  %v1554_v57 = vunpack.c.3.s8 %v1282_v37  ;;  %v1678_v30 = vunpack.c.2.s8 %v1314_v14  ;;  %v1310_v43 = vld [vmem:[#allocation13 + $0x258] sm:$0xff]  ;;  %v2702_v42 = vpop.f32.mrf.mxu3 }
 0x1e9   :  { %3006 = vmatpush.bf16.msra.mxu1 %v2430_v49  ;;  %v2581_v11 = vpack.c.bf16 %v2265_v59, %v2261_v44  ;;  %v2062_v58 = vcvt.s32.f32 %v1550_v50  ;;  %v1682_v3 = vunpack.c.3.s8 %v1314_v14  ;;  %v1821_v56 = vunpack.c.2.s8 %v1349_v46 }
 0x1ea   :  { %v2390_v17 = vpack.c.bf16 %v1882_v1, %v1878_v53  ;;  %v2066_v31 = vcvt.s32.f32 %v1554_v57  ;;  %v2190_v7 = vcvt.s32.f32 %v1678_v30  ;;  %v1825_v52 = vunpack.c.3.s8 %v1349_v46 }
 0x1eb   :  { %2966 = vmatpush.bf16.msrb.mxu2 %v2581_v11  ;;  %v2194_v12 = vcvt.s32.f32 %v1682_v3  ;;  %v2333_v35 = vcvt.s32.f32 %v1821_v56  ;;  %v1438_v55 = vunpack.c.2.s8 %v1254_v2  ;;  %v1442_v4 = vunpack.c.3.s8 %v1254_v2 }
 0x1ec   :  { %2994 = vmatpush.bf16.msra.mxu0 %v2390_v17  ;;  %v2482_v0 = vpack.c.bf16 %v2066_v31, %v2062_v58  ;;  %v2337_v15 = vcvt.s32.f32 %v1825_v52  ;;  %v1542_v16 = vunpack.c.0.s8 %v1282_v37  ;;  %v1546_v6 = vunpack.c.1.s8 %v1282_v37 }
 0x1ed   :  { %v2546_v61 = vpack.c.bf16 %v2194_v12, %v2190_v7  ;;  %v1950_v18 = vcvt.s32.f32 %v1438_v55  ;;  %v1954_v21 = vcvt.s32.f32 %v1442_v4  ;;  %v1670_v22 = vunpack.c.0.s8 %v1314_v14 }
 0x1ee   :  { %v2617_v48 = vpack.c.bf16 %v2337_v15, %v2333_v35  ;;  %v2054_v10 = vcvt.s32.f32 %v1542_v16  ;;  %v2058_v23 = vcvt.s32.f32 %v1546_v6  ;;  %v1674_v27 = vunpack.c.1.s8 %v1314_v14  ;;  %2967 = vmatmul.bf16.vlgmr.msrb.gmra.mxu2 %v4404_v20  ;;  %v4436_v16 = vld [vmem:[#allocation13 + $0x1d8] sm:$0xff] }
 0x1ef   :  { %3015 = vmatpush.bf16.msra.mxu2 %v2482_v0  ;;  %v2426_v60 = vpack.c.bf16 %v1954_v21, %v1950_v18  ;;  %v2182_v19 = vcvt.s32.f32 %v1670_v22  ;;  %v1813_v62 = vunpack.c.0.s8 %v1349_v46  ;;  %v1817_v26 = vunpack.c.1.s8 %v1349_v46  ;;  %2995 = vmatmul.bf16.vlgmr.msra.gmra.mxu0 %v4256_v51 }
 0x1f0   :  { %3043 = vmatpush.bf16.msrb.mxu0 %v2546_v61  ;;  %2979 = vmatpush.bf16.msrb.mxu3 %v2617_v48  ;;  %v2478_v45 = vpack.c.bf16 %v2058_v23, %v2054_v10  ;;  %v2186_v41 = vcvt.s32.f32 %v1674_v27  ;;  %v1430_v34 = vunpack.c.0.s8 %v1254_v2  ;;  %v1434_v25 = vunpack.c.1.s8 %v1254_v2  ;;  %v1326_v23 = vld [vmem:[#allocation13 + $0x2d8] sm:$0xff]  ;;  %v2690_v27 = vpop.f32.mrf.mxu2 }
 0x1f1   :  { %3007 = vmatpush.bf16.msra.mxu1 %v2426_v60  ;;  %v2325_v36 = vcvt.s32.f32 %v1813_v62  ;;  %v2329_v37 = vcvt.s32.f32 %v1817_v26  ;;  %v1614_v33 = vunpack.c.2.s8 %v1298_v28  ;;  %v1618_v38 = vunpack.c.3.s8 %v1298_v28  ;;  %v1274_v26 = vld [vmem:[#allocation13 + $0x138] sm:$0xff] }
 0x1f2   :  { %v2542_v32 = vpack.c.bf16 %v2186_v41, %v2182_v19  ;;  %v1942_v14 = vcvt.s32.f32 %v1430_v34  ;;  %v1946_v29 = vcvt.s32.f32 %v1434_v25  ;;  %v1742_v44 = vunpack.c.2.s8 %v1330_v63  ;;  %v2704_v25 = vpop.f32.mrf.mxu3 }
 0x1f3   :  { %3016 = vmatpush.bf16.msra.mxu2 %v2478_v45  ;;  %v2613_v46 = vpack.c.bf16 %v2329_v37, %v2325_v36  ;;  %v2126_v49 = vcvt.s32.f32 %v1614_v33  ;;  %v2130_v51 = vcvt.s32.f32 %v1618_v38  ;;  %v1746_v59 = vunpack.c.3.s8 %v1330_v63 }
 0x1f4   :  { %3044 = vmatpush.bf16.msrb.mxu0 %v2542_v32  ;;  %v2422_v50 = vpack.c.bf16 %v1946_v29, %v1942_v14  ;;  %v2254_v53 = vcvt.s32.f32 %v1742_v44  ;;  %v1534_v1 = vunpack.c.2.s8 %v1278_v39  ;;  %v1538_v57 = vunpack.c.3.s8 %v1278_v39  ;;  %v2716_v32 = vpop.f32.mrf.mxu0 }
 0x1f5   :  { %2980 = vmatpush.bf16.msrb.mxu3 %v2613_v46  ;;  %v2514_v30 = vpack.c.bf16 %v2130_v51, %v2126_v49  ;;  %v2258_v2 = vcvt.s32.f32 %v1746_v59  ;;  %v1662_v11 = vunpack.c.2.s8 %v1310_v43  ;;  %v1666_v58 = vunpack.c.3.s8 %v1310_v43 }
 0x1f6   :  { %v4433_v3 = vadd.f32 %v2702_v42, %v4428_v47  ;;  %3008 = vmatpush.bf16.msra.mxu1 %v2422_v50  ;;  %v2046_v56 = vcvt.s32.f32 %v1534_v1  ;;  %v2050_v17 = vcvt.s32.f32 %v1538_v57  ;;  %v1606_v31 = vunpack.c.0.s8 %v1298_v28  ;;  %v4444_v50 = vpop.f32.mrf.mxu1 }
 0x1f7   :  { %v2578_v7 = vpack.c.bf16 %v2258_v2, %v2254_v53  ;;  %v2174_v52 = vcvt.s32.f32 %v1662_v11  ;;  %v2178_v12 = vcvt.s32.f32 %v1666_v58  ;;  %v1610_v35 = vunpack.c.1.s8 %v1298_v28 }
 0x1f8   :  { %2981 = vmatmul.bf16.vlgmr.msrb.gmra.mxu3 %v4411_v9  ;;  %v2474_v55 = vpack.c.bf16 %v2050_v17, %v2046_v56  ;;  %v2118_v4 = vcvt.s32.f32 %v1606_v31  ;;  %v1734_v0 = vunpack.c.0.s8 %v1330_v63  ;;  %v1738_v15 = vunpack.c.1.s8 %v1330_v63 }
 0x1f9   :  { %3029 = vmatpush.bf16.msra.mxu3 %v2514_v30  ;;  %v2538_v47 = vpack.c.bf16 %v2178_v12, %v2174_v52  ;;  %v2122_v6 = vcvt.s32.f32 %v1610_v35  ;;  %v1526_v61 = vunpack.c.0.s8 %v1278_v39  ;;  %v1530_v18 = vunpack.c.1.s8 %v1278_v39  ;;  %3009 = vmatmul.bf16.vlgmr.msra.gmra.mxu1 %v4277_v13  ;;  %v1306_v13 = vld [vmem:[#allocation13 + $0x238] sm:$0xff] }
 0x1fa   :  { %3057 = vmatpush.bf16.msrb.mxu1 %v2578_v7  ;;  %3017 = vmatpush.bf16.msra.mxu2 %v2474_v55  ;;  %v2246_v21 = vcvt.s32.f32 %v1734_v0  ;;  %v2250_v22 = vcvt.s32.f32 %v1738_v15  ;;  %v1654_v48 = vunpack.c.0.s8 %v1310_v43  ;;  %v1658_v10 = vunpack.c.1.s8 %v1310_v43  ;;  %v1290_v35 = vld [vmem:[#allocation13 + $0x1b8] sm:$0xff] }
 0x1fb   :  { %3045 = vmatpush.bf16.msrb.mxu0 %v2538_v47  ;;  %v2510_v28 = vpack.c.bf16 %v2122_v6, %v2118_v4  ;;  %v2038_v60 = vcvt.s32.f32 %v1526_v61  ;;  %v2042_v19 = vcvt.s32.f32 %v1530_v18  ;;  %v1598_v62 = vunpack.c.2.s8 %v4436_v16  ;;  %v1322_v47 = vld [vmem:[#allocation13 + $0x2b8] sm:$0xff] }
 0x1fc   :  { %v2574_v63 = vpack.c.bf16 %v2250_v22, %v2246_v21  ;;  %v2166_v45 = vcvt.s32.f32 %v1654_v48  ;;  %v2170_v41 = vcvt.s32.f32 %v1658_v10  ;;  %v1602_v34 = vunpack.c.3.s8 %v4436_v16 }
 0x1fd   :  { %3030 = vmatpush.bf16.msra.mxu3 %v2510_v28  ;;  %v2470_v36 = vpack.c.bf16 %v2042_v19, %v2038_v60  ;;  %v2110_v37 = vcvt.s32.f32 %v1598_v62  ;;  %v1726_v33 = vunpack.c.2.s8 %v1326_v23  ;;  %v1730_v38 = vunpack.c.3.s8 %v1326_v23 }
 0x1fe   :  { %v2691_v39 = vadd.f32 %v2690_v27, %v4426_v8  ;;  %3058 = vmatpush.bf16.msrb.mxu1 %v2574_v63  ;;  %v2534_v14 = vpack.c.bf16 %v2170_v41, %v2166_v45  ;;  %v2114_v29 = vcvt.s32.f32 %v1602_v34  ;;  %v1518_v44 = vunpack.c.2.s8 %v1274_v26  ;;  %v4448_v27 = vpop.f32.mrf.mxu2  ;;  %v4453_v45 = vpop.f32.mrf.mxu0 }
 0x1ff   :  { %3018 = vmatpush.bf16.msra.mxu2 %v2470_v36  ;;  %v2238_v43 = vcvt.s32.f32 %v1726_v33  ;;  %v2242_v42 = vcvt.s32.f32 %v1730_v38  ;;  %v1522_v46 = vunpack.c.3.s8 %v1274_v26  ;;  %v1646_v49 = vunpack.c.2.s8 %v1306_v13 }
 0x200   :  { %v4442_v51 = vadd.f32 %v2704_v25, %v2691_v39  ;;  %3046 = vmatpush.bf16.msrb.mxu0 %v2534_v14  ;;  %v2506_v59 = vpack.c.bf16 %v2114_v29, %v2110_v37  ;;  %v2030_v53 = vcvt.s32.f32 %v1518_v44  ;;  %v1650_v1 = vunpack.c.3.s8 %v1306_v13  ;;  %v4455_v14 = vpop.f32.mrf.mxu1 }
 0x201   :  { %v2570_v57 = vpack.c.bf16 %v2242_v42, %v2238_v43  ;;  %v2034_v8 = vcvt.s32.f32 %v1522_v46  ;;  %v2158_v30 = vcvt.s32.f32 %v1646_v49  ;;  %v1590_v2 = vunpack.c.0.s8 %v4436_v16  ;;  %v4457_v46 = vpop.f32.mrf.mxu3 }
 0x202   :  { %3031 = vmatpush.bf16.msra.mxu3 %v2506_v59  ;;  %v2162_v11 = vcvt.s32.f32 %v1650_v1  ;;  %v1594_v58 = vunpack.c.1.s8 %v4436_v16  ;;  %v1718_v56 = vunpack.c.0.s8 %v1326_v23  ;;  %v1722_v17 = vunpack.c.1.s8 %v1326_v23  ;;  %v1270_v23 = vld [vmem:[#allocation13 + $0x118] sm:$0xff] }
 0x203   :  { %3059 = vmatpush.bf16.msrb.mxu1 %v2570_v57  ;;  %v2466_v31 = vpack.c.bf16 %v2034_v8, %v2030_v53  ;;  %v2102_v7 = vcvt.s32.f32 %v1590_v2  ;;  %v1510_v52 = vunpack.c.0.s8 %v1274_v26  ;;  %v1514_v12 = vunpack.c.1.s8 %v1274_v26  ;;  %v1302_v26 = vld [vmem:[#allocation13 + $0x218] sm:$0xff] }
 0x204   :  { %v2530_v55 = vpack.c.bf16 %v2162_v11, %v2158_v30  ;;  %v2106_v4 = vcvt.s32.f32 %v1594_v58  ;;  %v2230_v0 = vcvt.s32.f32 %v1718_v56  ;;  %v2234_v15 = vcvt.s32.f32 %v1722_v17  ;;  %v1346_v11 = vld [vmem:[#allocation13 + $0x378] sm:$0xff] }
 0x205   :  { %3019 = vmatpush.bf16.msra.mxu2 %v2466_v31  ;;  %v2022_v6 = vcvt.s32.f32 %v1510_v52  ;;  %v2026_v61 = vcvt.s32.f32 %v1514_v12  ;;  %v1638_v18 = vunpack.c.0.s8 %v1306_v13  ;;  %v1642_v21 = vunpack.c.1.s8 %v1306_v13 }
 0x206   :  { %3047 = vmatpush.bf16.msrb.mxu0 %v2530_v55  ;;  %v2502_v16 = vpack.c.bf16 %v2106_v4, %v2102_v7  ;;  %v2566_v22 = vpack.c.bf16 %v2234_v15, %v2230_v0  ;;  %v1582_v48 = vunpack.c.2.s8 %v1290_v35  ;;  %v1586_v10 = vunpack.c.3.s8 %v1290_v35  ;;  %v1286_v7 = vld [vmem:[#allocation13 + $0x198] sm:$0xff]  ;;  %v4459_v52 = vpop.f32.mrf.mxu2 }
 0x207   :  { %v2462_v28 = vpack.c.bf16 %v2026_v61, %v2022_v6  ;;  %v2150_v60 = vcvt.s32.f32 %v1638_v18  ;;  %v2154_v19 = vcvt.s32.f32 %v1642_v21  ;;  %v1710_v62 = vunpack.c.2.s8 %v1322_v47 }
 0x208   :  { %v4451_v63 = vadd.f32 %v2716_v32, %v4433_v3  ;;  %3032 = vmatpush.bf16.msra.mxu3 %v2502_v16  ;;  %3060 = vmatpush.bf16.msrb.mxu1 %v2566_v22  ;;  %v2094_v41 = vcvt.s32.f32 %v1582_v48  ;;  %v2098_v34 = vcvt.s32.f32 %v1586_v10  ;;  %v1714_v13 = vunpack.c.3.s8 %v1322_v47  ;;  %v4461_v48 = vpop.f32.mrf.mxu0 }
 0x209   :  { %3020 = vmatpush.bf16.msra.mxu2 %v2462_v28  ;;  %v2526_v25 = vpack.c.bf16 %v2154_v19, %v2150_v60  ;;  %v2222_v36 = vcvt.s32.f32 %v1710_v62  ;;  %v1502_v37 = vunpack.c.2.s8 %v1270_v23  ;;  %v1506_v33 = vunpack.c.3.s8 %v1270_v23  ;;  %v3623_v19 = vld [vmem:[#allocation16 + $0x38] sm:$0xff] }
 0x20a   :  { %v2498_v38 = vpack.c.bf16 %v2098_v34, %v2094_v41  ;;  %v2226_v39 = vcvt.s32.f32 %v1714_v13  ;;  %v1630_v29 = vunpack.c.2.s8 %v1302_v26  ;;  %v1634_v44 = vunpack.c.3.s8 %v1302_v26  ;;  %v4463_v13 = vpop.f32.mrf.mxu3 }
 0x20b   :  { %3048 = vmatpush.bf16.msrb.mxu0 %v2526_v25  ;;  %v2014_v3 = vcvt.s32.f32 %v1502_v37  ;;  %v2018_v32 = vcvt.s32.f32 %v1506_v33  ;;  %v1574_v43 = vunpack.c.0.s8 %v1290_v35  ;;  %v1578_v42 = vunpack.c.1.s8 %v1290_v35  ;;  %v4469_v33 = vpop.f32.mrf.mxu1 }
 0x20c   :  { %3033 = vmatpush.bf16.msra.mxu3 %v2498_v38  ;;  %v2562_v49 = vpack.c.bf16 %v2226_v39, %v2222_v36  ;;  %v2142_v59 = vcvt.s32.f32 %v1630_v29  ;;  %v2146_v53 = vcvt.s32.f32 %v1634_v44  ;;  %v1702_v1 = vunpack.c.0.s8 %v1322_v47 }
 0x20d   :  { %v2458_v57 = vpack.c.bf16 %v2018_v32, %v2014_v3  ;;  %v2086_v8 = vcvt.s32.f32 %v1574_v43  ;;  %v2090_v30 = vcvt.s32.f32 %v1578_v42  ;;  %v1706_v2 = vunpack.c.1.s8 %v1322_v47  ;;  %v1318_v47 = vld [vmem:[#allocation13 + $0x298] sm:$0xff] }
 0x20e   :  { %3061 = vmatpush.bf16.msrb.mxu1 %v2562_v49  ;;  %v2522_v58 = vpack.c.bf16 %v2146_v53, %v2142_v59  ;;  %v2214_v56 = vcvt.s32.f32 %v1702_v1  ;;  %v1494_v17 = vunpack.c.0.s8 %v1270_v23  ;;  %v1498_v31 = vunpack.c.1.s8 %v1270_v23  ;;  %v1362_v32 = vld [vmem:[#allocation13 + $0x3f8] sm:$0xff] }
 0x20f   :  { %3021 = vmatpush.bf16.msra.mxu2 %v2458_v57  ;;  %v2494_v12 = vpack.c.bf16 %v2090_v30, %v2086_v8  ;;  %v2218_v35 = vcvt.s32.f32 %v1706_v2  ;;  %v1622_v55 = vunpack.c.0.s8 %v1302_v26  ;;  %v1626_v4 = vunpack.c.1.s8 %v1302_v26  ;;  %v1342_v53 = vld [vmem:[#allocation13 + $0x358] sm:$0xff] }
 0x210   :  { %3049 = vmatpush.bf16.msrb.mxu0 %v2522_v58  ;;  %v2006_v0 = vcvt.s32.f32 %v1494_v17  ;;  %v2010_v15 = vcvt.s32.f32 %v1498_v31  ;;  %v1806_v6 = vunpack.c.2.s8 %v1346_v11  ;;  %v1810_v61 = vunpack.c.3.s8 %v1346_v11 }
 0x211   :  { %3034 = vmatpush.bf16.msra.mxu3 %v2494_v12  ;;  %v2558_v18 = vpack.c.bf16 %v2218_v35, %v2214_v56  ;;  %v2134_v21 = vcvt.s32.f32 %v1622_v55  ;;  %v2138_v16 = vcvt.s32.f32 %v1626_v4  ;;  %v1566_v22 = vunpack.c.2.s8 %v1286_v7 }
 0x212   :  { %v2454_v10 = vpack.c.bf16 %v2010_v15, %v2006_v0  ;;  %v2318_v23 = vcvt.s32.f32 %v1806_v6  ;;  %v2322_v28 = vcvt.s32.f32 %v1810_v61  ;;  %v1570_v60 = vunpack.c.3.s8 %v1286_v7  ;;  %v1358_v0 = vld [vmem:[#allocation13 + $0x3d8] sm:$0xff]  ;;  %v3621_v15 = vld [vmem:[#allocation16 + $0x28] sm:$0xff] }
 0x213   :  { %3062 = vmatpush.bf16.msrb.mxu1 %v2558_v18  ;;  %v2518_v62 = vpack.c.bf16 %v2138_v16, %v2134_v21  ;;  %v2078_v26 = vcvt.s32.f32 %v1566_v22  ;;  %v1694_v41 = vunpack.c.2.s8 %v1318_v47  ;;  %v1698_v34 = vunpack.c.3.s8 %v1318_v47  ;;  %v4479_v18 = vpop.f32.mrf.mxu3  ;;  %v4481_v21 = vpop.f32.mrf.mxu0 }
 0x214   :  { %v4467_v25 = vadd.f32 %v4444_v50, %v4451_v63  ;;  %3022 = vmatpush.bf16.msra.mxu2 %v2454_v10  ;;  %v2610_v36 = vpack.c.bf16 %v2322_v28, %v2318_v23  ;;  %v2082_v37 = vcvt.s32.f32 %v1570_v60  ;;  %v1798_v38 = vunpack.c.0.s8 %v1346_v11  ;;  %v3622_v50 = vld [vmem:[#allocation16 + $0x30] sm:$0xff]  ;;  %v4471_v63 = vpop.f32.mrf.mxu2 }
 0x215   :  { %3050 = vmatpush.bf16.msrb.mxu0 %v2518_v62  ;;  %v2206_v39 = vcvt.s32.f32 %v1694_v41  ;;  %v2210_v29 = vcvt.s32.f32 %v1698_v34  ;;  %v1802_v44 = vunpack.c.1.s8 %v1346_v11  ;;  %v1558_v3 = vunpack.c.0.s8 %v1286_v7  ;;  %v1338_v10 = vld [vmem:[#allocation13 + $0x338] sm:$0xff] }
 0x216   :  { %v2490_v43 = vpack.c.bf16 %v2082_v37, %v2078_v26  ;;  %v2310_v42 = vcvt.s32.f32 %v1798_v38  ;;  %v1562_v49 = vunpack.c.1.s8 %v1286_v7  ;;  %v1686_v59 = vunpack.c.0.s8 %v1318_v47  ;;  %v3631_v62 = vld [vmem:[#allocation16 + $0x78] sm:$0xff]  ;;  %v4483_v26 = vpop.f32.mrf.mxu1  ;;  %v3620_v38 = vld [vmem:[#allocation16 + $0x20] sm:$0xff] }
 0x217   :  { %v2554_v1 = vpack.c.bf16 %v2210_v29, %v2206_v39  ;;  %3023 = vmatmul.bf16.vlgmr.msra.gmra.mxu2 %v4304_v24  ;;  %v2314_v57 = vcvt.s32.f32 %v1802_v44  ;;  %v2070_v8 = vcvt.s32.f32 %v1558_v3  ;;  %v1690_v30 = vunpack.c.1.s8 %v1318_v47 }
 0x218   :  { %3071 = vmatpush.bf16.msrb.mxu2 %v2610_v36  ;;  %3035 = vmatpush.bf16.msra.mxu3 %v2490_v43  ;;  %v2074_v2 = vcvt.s32.f32 %v1562_v49  ;;  %v2198_v11 = vcvt.s32.f32 %v1686_v59  ;;  %v1870_v58 = vunpack.c.2.s8 %v1362_v32  ;;  %v1874_v56 = vunpack.c.3.s8 %v1362_v32 }
 0x219   :  { %3407 = vmatpush.bf16.msra.mxu0 %v3623_v19  ;;  %3063 = vmatpush.bf16.msrb.mxu1 %v2554_v1  ;;  %v2606_v17 = vpack.c.bf16 %v2314_v57, %v2310_v42  ;;  %v2202_v31 = vcvt.s32.f32 %v1690_v30  ;;  %v1790_v7 = vunpack.c.2.s8 %v1342_v53  ;;  %v1794_v12 = vunpack.c.3.s8 %v1342_v53  ;;  %v4496_v1 = vld [vmem:[#allocation14] sm:$0xf]  ;;  %v1354_v57 = vld [vmem:[#allocation13 + $0x3b8] sm:$0xff] }
 0x21a   :  { %3051 = vmatmul.bf16.vlgmr.msrb.gmra.mxu0 %v4348_v5  ;;  %v4477_v35 = vadd.f32 %v4453_v45, %v4442_v51  ;;  %v2486_v24 = vpack.c.bf16 %v2074_v2, %v2070_v8  ;;  %v2382_v55 = vcvt.s32.f32 %v1870_v58  ;;  %v2386_v4 = vcvt.s32.f32 %v1874_v56  ;;  %v3630_v8 = vld [vmem:[#allocation16 + $0x70] sm:$0xff]  ;;  %v3619_v56 = vld [vmem:[#allocation16 + $0x18] sm:$0xff] }
 0x21b   :  { %v2550_v5 = vpack.c.bf16 %v2202_v31, %v2198_v11  ;;  %v2302_v6 = vcvt.s32.f32 %v1790_v7  ;;  %v2306_v61 = vcvt.s32.f32 %v1794_v12  ;;  %v1862_v47 = vunpack.c.0.s8 %v1362_v32  ;;  %v1334_v58 = vld [vmem:[#allocation13 + $0x318] sm:$0xff] }
 0x21c   :  { %3072 = vmatpush.bf16.msrb.mxu2 %v2606_v17  ;;  %3036 = vmatpush.bf16.msra.mxu3 %v2486_v24  ;;  %v2642_v16 = vpack.c.bf16 %v2386_v4, %v2382_v55  ;;  %v1866_v22 = vunpack.c.1.s8 %v1362_v32  ;;  %v1782_v51 = vunpack.c.0.s8 %v1342_v53  ;;  %v1786_v45 = vunpack.c.1.s8 %v1342_v53  ;;  %v4487_v39 = vpop.f32.mrf.mxu2  ;;  %v4502_v24 = vpop.f32.mrf.mxu3 }
 0x21d   :  { %3408 = vmatpush.bf16.msra.mxu0 %v3622_v50  ;;  %3064 = vmatpush.bf16.msrb.mxu1 %v2550_v5  ;;  %v2602_v23 = vpack.c.bf16 %v2306_v61, %v2302_v6  ;;  %v2374_v28 = vcvt.s32.f32 %v1862_v47  ;;  %v1854_v60 = vunpack.c.2.s8 %v1358_v0  ;;  %v1858_v19 = vunpack.c.3.s8 %v1358_v0  ;;  %v3629_v47 = vld [vmem:[#allocation16 + $0x68] sm:$0xff] }
 0x21e   :  { %v2378_v41 = vcvt.s32.f32 %v1866_v22  ;;  %v2294_v34 = vcvt.s32.f32 %v1782_v51  ;;  %v2298_v36 = vcvt.s32.f32 %v1786_v45  ;;  %v2745_v37 = vadd.f32 %v4448_v27, %v4467_v25  ;;  %v4494_v27 = vld [vmem:[%s4536_s7] sm:$0xf]  ;;  %v3618_v45 = vld [vmem:[#allocation16 + $0x10] sm:$0xff] }
 0x21f   :  { %3037 = vmatmul.bf16.vlgmr.msra.gmra.mxu3 %v4311_v54  ;;  %v2366_v29 = vcvt.s32.f32 %v1854_v60  ;;  %v2370_v44 = vcvt.s32.f32 %v1858_v19  ;;  %v1774_v3 = vunpack.c.2.s8 %v1338_v10  ;;  %v1778_v32 = vunpack.c.3.s8 %v1338_v10  ;;  %v1350_v19 = vld [vmem:[#allocation13 + $0x398] sm:$0xff] }
 0x220   :  { %3085 = vmatpush.bf16.msrb.mxu3 %v2642_v16  ;;  %3073 = vmatpush.bf16.msrb.mxu2 %v2602_v23  ;;  %v2638_v43 = vpack.c.bf16 %v2378_v41, %v2374_v28  ;;  %v2598_v42 = vpack.c.bf16 %v2298_v36, %v2294_v34  ;;  %v1846_v49 = vunpack.c.0.s8 %v1358_v0  ;;  %v1850_v59 = vunpack.c.1.s8 %v1358_v0  ;;  %v2828_v16 = vpop.f32.mrf.mxu0  ;;  %v2842_v41 = vpop.f32.mrf.mxu1 }
 0x221   :  { %3409 = vmatpush.bf16.msra.mxu0 %v3621_v15  ;;  %3065 = vmatmul.bf16.vlgmr.msrb.gmra.mxu1 %v4355_v40  ;;  %v2634_v25 = vpack.c.bf16 %v2370_v44, %v2366_v29  ;;  %v2286_v53 = vcvt.s32.f32 %v1774_v3  ;;  %v2290_v50 = vcvt.s32.f32 %v1778_v32  ;;  %v1766_v54 = vunpack.c.0.s8 %v1338_v10  ;;  %v3628_v32 = vld [vmem:[#allocation16 + $0x60] sm:$0xff] }
 0x222   :  { %3421 = vmatpush.bf16.msra.mxu1 %v3631_v62  ;;  %v2358_v40 = vcvt.s32.f32 %v1846_v49  ;;  %v2362_v30 = vcvt.s32.f32 %v1850_v59  ;;  %v1770_v2 = vunpack.c.1.s8 %v1338_v10  ;;  %v2759_v11 = vadd.f32 %v4457_v46, %v2745_v37 }
 0x223   :  { %v2733_v17 = vadd.f32 %v4455_v14, %v4477_v35  ;;  %v2594_v31 = vpack.c.bf16 %v2290_v50, %v2286_v53  ;;  %v2278_v7 = vcvt.s32.f32 %v1766_v54  ;;  %v3101_v12 = vperm.slane %v4494_v27, 0 }
 0x224   :  { %3086 = vmatpush.bf16.msrb.mxu3 %v2638_v43  ;;  %3074 = vmatpush.bf16.msrb.mxu2 %v2598_v42  ;;  %v2282_v55 = vcvt.s32.f32 %v1770_v2  ;;  %v3119_v4 = vperm.slane %v4496_v1, 0  ;;  %v1838_v0 = vunpack.c.2.s8 %v1354_v57  ;;  %v1842_v15 = vunpack.c.3.s8 %v1354_v57 }
 0x225   :  { %3410 = vmatpush.bf16.msra.mxu0 %v3620_v38  ;;  %v2630_v5 = vpack.c.bf16 %v2362_v30, %v2358_v40  ;;  %v3109_v46 = vmul.f32 %v3101_v12, %v2759_v11  ;;  %v1758_v6 = vunpack.c.2.s8 %v1334_v58  ;;  %v1762_v61 = vunpack.c.3.s8 %v1334_v58  ;;  %v2856_v38 = vpop.f32.mrf.mxu2  ;;  %v3627_v40 = vld [vmem:[#allocation16 + $0x58] sm:$0xff] }
 0x226   :  { %3422 = vmatpush.bf16.msra.mxu1 %v3630_v8  ;;  %v2350_v14 = vcvt.s32.f32 %v1838_v0  ;;  %v2354_v35 = vcvt.s32.f32 %v1842_v15  ;;  %v2747_v22 = vadd.f32 %v4459_v52, %v2733_v17  ;;  %v1830_v51 = vunpack.c.0.s8 %v1354_v57 }
 0x227   :  { %v2590_v10 = vpack.c.bf16 %v2282_v55, %v2278_v7  ;;  %v2270_v23 = vcvt.s32.f32 %v1758_v6  ;;  %v2274_v28 = vcvt.s32.f32 %v1762_v61  ;;  %v1834_v60 = vunpack.c.1.s8 %v1354_v57 }
 0x228   :  { %3087 = vmatpush.bf16.msrb.mxu3 %v2634_v25  ;;  %3075 = vmatpush.bf16.msrb.mxu2 %v2594_v31  ;;  %v2787_v62 = vadd.f32 %v4469_v33, %v4461_v48  ;;  %v3127_v34 = vadd.f32 %v3119_v4, %v3109_v46  ;;  %v1750_v36 = vunpack.c.0.s8 %v1334_v58  ;;  %v1754_v37 = vunpack.c.1.s8 %v1334_v58  ;;  %v3617_v33 = vld [vmem:[#allocation16 + $0x8] sm:$0xff]  ;;  %v2844_v0 = vpop.f32.mrf.mxu1 }
 0x229   :  { %3411 = vmatpush.bf16.msra.mxu0 %v3619_v56  ;;  %v2789_v52 = vadd.f32 %v4483_v26, %v4481_v21  ;;  %v2342_v29 = vcvt.s32.f32 %v1830_v51  ;;  %v2346_v44 = vcvt.s32.f32 %v1834_v60  ;;  %v2761_v3 = vadd.f32 %v4463_v13, %v2747_v22  ;;  %v3616_v56 = vld [vmem:[#allocation16] sm:$0xff]  ;;  %v3625_v51 = vld [vmem:[#allocation16 + $0x48] sm:$0xff] }
 0x22a   :  { %3423 = vmatpush.bf16.msra.mxu1 %v3629_v47  ;;  %v2626_v43 = vpack.c.bf16 %v2354_v35, %v2350_v14  ;;  %v2586_v42 = vpack.c.bf16 %v2274_v28, %v2270_v23  ;;  %v1822_v49 = vunpack.c.2.s8 %v1350_v19  ;;  %v1826_v48 = vunpack.c.3.s8 %v1350_v19  ;;  %v2870_v21 = vpop.f32.mrf.mxu3 }
 0x22b   :  { %v2262_v59 = vcvt.s32.f32 %v1750_v36  ;;  %v2266_v25 = vcvt.s32.f32 %v1754_v37  ;;  %v3113_v53 = vmul.f32 %v3101_v12, %v2761_v3  ;;  %v2801_v50 = vadd.f32 %v4471_v63, %v2787_v62  ;;  %v2830_v12 = vpop.f32.mrf.mxu0  ;;  %v3639_v37 = vld [vmem:[#allocation16 + $0xb8] sm:$0xff] }
 0x22c   :  { %3088 = vmatpush.bf16.msrb.mxu3 %v2630_v5  ;;  %3076 = vmatpush.bf16.msrb.mxu2 %v2590_v10  ;;  %v3135_v26 = vmax.f32 %v3127_v34, 0.0  ;;  %v2622_v54 = vpack.c.bf16 %v2346_v44, %v2342_v29  ;;  %v2803_v8 = vadd.f32 %v4487_v39, %v2789_v52  ;;  %v2334_v30 = vcvt.s32.f32 %v1822_v49  ;;  %v3626_v39 = vld [vmem:[#allocation16 + $0x50] sm:$0xff]  ;;  %v3636_v29 = vld [vmem:[#allocation16 + $0xa0] sm:$0xff] }
 0x22d   :  { %3412 = vmatpush.bf16.msra.mxu0 %v3618_v45  ;;  %v3131_v57 = vadd.f32 %v3119_v4, %v3113_v53  ;;  %v2815_v13 = vadd.f32 %v4479_v18, %v2801_v50  ;;  %v2338_v2 = vcvt.s32.f32 %v1826_v48  ;;  %v1814_v11 = vunpack.c.0.s8 %v1350_v19  ;;  %v2858_v6 = vpop.f32.mrf.mxu2 }
 0x22e   :  { %3424 = vmatpush.bf16.msra.mxu1 %v3628_v32  ;;  %v1818_v58 = vunpack.c.1.s8 %v1350_v19  ;;  %v2582_v17 = vpack.c.bf16 %v2266_v25, %v2262_v59  ;;  %v2817_v7 = vadd.f32 %v4502_v24, %v2803_v8  ;;  %v3102_v47 = vperm.slane %v4494_v27, 1  ;;  %v3624_v19 = vld [vmem:[#allocation16 + $0x40] sm:$0xff]  ;;  %v3635_v32 = vld [vmem:[#allocation16 + $0x98] sm:$0xff]  ;;  %v3633_v59 = vld [vmem:[#allocation16 + $0x88] sm:$0xff] }
 0x22f   :  { %v3139_v63 = vmax.f32 %v3131_v57, 0.0  ;;  %v2829_v31 = vadd.f32 %v2828_v16, %v2815_v13  ;;  %v2618_v15 = vpack.c.bf16 %v2338_v2, %v2334_v30  ;;  %v2326_v5 = vcvt.s32.f32 %v1814_v11 }
 0x230   :  { %3089 = vmatpush.bf16.msrb.mxu3 %v2626_v43  ;;  %3077 = vmatpush.bf16.msrb.mxu2 %v2586_v42  ;;  %v2831_v18 = vadd.f32 %v2830_v12, %v2817_v7  ;;  %v2330_v46 = vcvt.s32.f32 %v1818_v58  ;;  %v3120_v35 = vperm.slane %v4496_v1, 1  ;;  %v2898_v44 = vpop.f32.mrf.mxu1  ;;  %v3634_v42 = vld [vmem:[#allocation16 + $0x90] sm:$0xff] }
 0x231   :  { %3413 = vmatpush.bf16.msra.mxu0 %v3617_v33  ;;  %v3143_v55 = vpack.c.bf16 %v3139_v63, %v3135_v26  ;;  %v2843_v4 = vadd.f32 %v2842_v41, %v2829_v31  ;;  %v3103_v31 = vperm.slane %v4494_v27, 2 }
 0x232   :  { %3425 = vmatpush.bf16.msra.mxu1 %v3627_v40  ;;  %v2845_v16 = vadd.f32 %v2844_v0, %v2831_v18  ;;  %v2872_v14 = vpop.f32.mrf.mxu3  ;;  %v2614_v45 = vpack.c.bf16 %v2330_v46, %v2326_v5 }
 0x233   :  { %v2857_v61 = vadd.f32 %v2856_v38, %v2843_v4  ;;  %v3638_v38 = vld [vmem:[#allocation16 + $0xb0] sm:$0xff]  ;;  %v2884_v52 = vpop.f32.mrf.mxu0  ;;  %v3121_v4 = vperm.slane %v4496_v1, 2 }
 0x234   :  { %3090 = vmatpush.bf16.msrb.mxu3 %v2622_v54  ;;  %3078 = vmatpush.bf16.msrb.mxu2 %v2582_v17  ;;  %v2859_v22 = vadd.f32 %v2858_v6, %v2845_v16  ;;  %v2899_v33 = vadd.f32 %v2898_v44, %v2884_v52 }
 0x235   :  { %3414 = vmatpush.bf16.msra.mxu0 %v3616_v56  ;;  %v2871_v24 = vadd.f32 %v2870_v21, %v2857_v61  ;;  %v3632_v21 = vld [vmem:[#allocation16 + $0x80] sm:$0xff] }
 0x236   :  { %3426 = vmatpush.bf16.msra.mxu1 %v3626_v39  ;;  %v2873_v23 = vadd.f32 %v2872_v14, %v2859_v22  ;;  %v3647_v14 = vld [vmem:[#allocation16 + $0xf8] sm:$0xff]  ;;  %v3644_v22 = vld [vmem:[#allocation16 + $0xe0] sm:$0xff] }
 0x237   :  { %3079 = vmatmul.bf16.vlgmr.msrb.gmra.mxu2 %v4404_v20  ;;  %v3110_v10 = vmul.f32 %v3102_v47, %v2871_v24  ;;  %v3637_v20 = vld [vmem:[#allocation16 + $0xa8] sm:$0xff]  ;;  %v3646_v24 = vld [vmem:[#allocation16 + $0xf0] sm:$0xff] }
 0x238   :  { %3415 = vmatmul.bf16.vlgmr.msra.gmra.mxu0 %v3143_v55  ;;  %3091 = vmatpush.bf16.msrb.mxu3 %v2618_v15  ;;  %v3114_v60 = vmul.f32 %v3102_v47, %v2873_v23  ;;  %v2900_v49 = vpop.f32.mrf.mxu1 }
 0x239   :  { %v3128_v28 = vadd.f32 %v3120_v35, %v3110_v10  ;;  %3435 = vmatpush.bf16.msra.mxu2 %v3639_v37  ;;  %v3642_v10 = vld [vmem:[#allocation16 + $0xd0] sm:$0xff] }
 0x23a   :  { %3427 = vmatpush.bf16.msra.mxu1 %v3625_v51  ;;  %v3132_v62 = vadd.f32 %v3120_v35, %v3114_v60  ;;  %v3645_v35 = vld [vmem:[#allocation16 + $0xe8] sm:$0xff]  ;;  %v3643_v51 = vld [vmem:[#allocation16 + $0xd8] sm:$0xff] }
 0x23b   :  { %v3136_v41 = vmax.f32 %v3128_v28, 0.0  ;;  %v2886_v43 = vpop.f32.mrf.mxu0  ;;  %v3641_v60 = vld [vmem:[#allocation16 + $0xc8] sm:$0xff] }
 0x23c   :  { %3092 = vmatpush.bf16.msrb.mxu3 %v2614_v45  ;;  %v3140_v34 = vmax.f32 %v3132_v62, 0.0  ;;  %v2901_v54 = vadd.f32 %v2900_v49, %v2886_v43 }
 0x23d   :  { %3436 = vmatpush.bf16.msra.mxu2 %v3638_v38 }
 0x23e   :  { %3428 = vmatpush.bf16.msra.mxu1 %v3624_v19  ;;  %v3144_v36 = vpack.c.bf16 %v3140_v34, %v3136_v41  ;;  %v3640_v41 = vld [vmem:[#allocation16 + $0xc0] sm:$0xff] }
 0x23f   :  { %3093 = vmatmul.bf16.vlgmr.msrb.gmra.mxu3 %v4411_v9 }
 0x240   :  { %3449 = vmatpush.bf16.msra.mxu3 %v3647_v14 }
 0x241   :  { %3429 = vmatmul.bf16.vlgmr.msra.gmra.mxu1 %v3144_v36  ;;  %3437 = vmatpush.bf16.msra.mxu2 %v3637_v20 }
 0x243   :  { %v2940_v53 = vpop.f32.mrf.mxu0 }
 0x244   :  { %3450 = vmatpush.bf16.msra.mxu3 %v3646_v24 }
 0x245   :  { %3438 = vmatpush.bf16.msra.mxu2 %v3636_v29 }
 0x248   :  { %v2912_v3 = vpop.f32.mrf.mxu2  ;;  %3451 = vmatpush.bf16.msra.mxu3 %v3645_v35 }
 0x249   :  { %3439 = vmatpush.bf16.msra.mxu2 %v3635_v32  ;;  %v2913_v25 = vadd.f32 %v2912_v3, %v2899_v33 }
 0x24b   :  { %v2942_v11 = vpop.f32.mrf.mxu0 }
 0x24c   :  { %3452 = vmatpush.bf16.msra.mxu3 %v3644_v22 }
 0x24d   :  { %3440 = vmatpush.bf16.msra.mxu2 %v3634_v42  ;;  %v2954_v57 = vpop.f32.mrf.mxu1 }
 0x250   :  { %v2914_v48 = vpop.f32.mrf.mxu2  ;;  %3453 = vmatpush.bf16.msra.mxu3 %v3643_v51 }
 0x251   :  { %3441 = vmatpush.bf16.msra.mxu2 %v3633_v59  ;;  %v2915_v40 = vadd.f32 %v2914_v48, %v2901_v54 }
 0x252   :  { %v2926_v9 = vpop.f32.mrf.mxu3 }
 0x253   :  { %v2927_v50 = vadd.f32 %v2926_v9, %v2913_v25 }
 0x254   :  { %3454 = vmatpush.bf16.msra.mxu3 %v3642_v10 }
 0x255   :  { %v2941_v8 = vadd.f32 %v2940_v53, %v2927_v50  ;;  %3442 = vmatpush.bf16.msra.mxu2 %v3632_v21  ;;  %v2956_v7 = vpop.f32.mrf.mxu1  ;;  %v3104_v50 = vperm.slane %v4494_v27, 3  ;;  %v3667_v27 = vld [vmem:[%s4539_s10] ss:$0 sm:$0xff]  ;;  %s3943_s10 = smov 128  }
 0x257   :  { %v2955_v2 = vadd.f32 %v2954_v57, %v2941_v8 }
 0x258   :  { %3455 = vmatpush.bf16.msra.mxu3 %v3641_v60 }
 0x25a   :  { %v2928_v26 = vpop.f32.mrf.mxu3 }
 0x25b   :  { %v2929_v30 = vadd.f32 %v2928_v26, %v2915_v40 }
 0x25c   :  { %3456 = vmatpush.bf16.msra.mxu3 %v3640_v41 }
 0x25d   :  { %v2943_v56 = vadd.f32 %v2942_v11, %v2929_v30 }
 0x25f   :  { %v2957_v55 = vadd.f32 %v2956_v7, %v2943_v56 }
 0x26c   :  { %v2996_v45 = vpop.f32.mrf.mxu0 }
 0x271   :  { %v2968_v13 = vpop.f32.mrf.mxu2 }
 0x272   :  { %v2969_v17 = vadd.f32 %v2968_v13, %v2955_v2  ;;  %v3122_v13 = vperm.slane %v4496_v1, 3 }
 0x274   :  { %v2998_v19 = vpop.f32.mrf.mxu0 }
 0x276   :  { %v3010_v23 = vpop.f32.mrf.mxu1 }
 0x277   :  { %v3011_v37 = vadd.f32 %v3010_v23, %v2996_v45 }
 0x279   :  { %v2970_v12 = vpop.f32.mrf.mxu2 }
 0x27a   :  { %v2971_v39 = vadd.f32 %v2970_v12, %v2957_v55 }
 0x27b   :  { %v2982_v58 = vpop.f32.mrf.mxu3 }
 0x27c   :  { %v2983_v63 = vadd.f32 %v2982_v58, %v2969_v17 }
 0x27e   :  { %v3111_v18 = vmul.f32 %v3103_v31, %v2983_v63  ;;  %v3012_v34 = vpop.f32.mrf.mxu1 }
 0x27f   :  { %v3013_v44 = vadd.f32 %v3012_v34, %v2998_v19 }
 0x280   :  { %v3129_v5 = vadd.f32 %v3121_v4, %v3111_v18 }
 0x282   :  { %v3137_v61 = vmax.f32 %v3129_v5, 0.0 }
 0x283   :  { %v2984_v0 = vpop.f32.mrf.mxu3 }
 0x284   :  { %v2985_v15 = vadd.f32 %v2984_v0, %v2971_v39 }
 0x286   :  { %v3115_v46 = vmul.f32 %v3103_v31, %v2985_v15 }
 0x288   :  { %v3133_v6 = vadd.f32 %v3121_v4, %v3115_v46 }
 0x28a   :  { %v3141_v47 = vmax.f32 %v3133_v6, 0.0 }
 0x28c   :  { %v3145_v16 = vpack.c.bf16 %v3141_v47, %v3137_v61 }
 0x28e   :  { %3443 = vmatmul.bf16.vlgmr.msra.gmra.mxu2 %v3145_v16 }
 0x297   :  { %v3052_v20 = vpop.f32.mrf.mxu0 }
 0x29a   :  { %v3024_v28 = vpop.f32.mrf.mxu2 }
 0x29b   :  { %v3025_v38 = vadd.f32 %v3024_v28, %v3011_v37 }
 0x29e   :  { %v3066_v3 = vpop.f32.mrf.mxu1 }
 0x29f   :  { %v3054_v48 = vpop.f32.mrf.mxu0 }
 0x2a2   :  { %v3038_v62 = vpop.f32.mrf.mxu3  ;;  %v3026_v36 = vpop.f32.mrf.mxu2 }
 0x2a3   :  { %v3039_v52 = vadd.f32 %v3038_v62, %v3025_v38  ;;  %v3027_v9 = vadd.f32 %v3026_v36, %v3013_v44 }
 0x2a5   :  { %v3053_v43 = vadd.f32 %v3052_v20, %v3039_v52 }
 0x2a6   :  { %v3068_v21 = vpop.f32.mrf.mxu1 }
 0x2a7   :  { %v3067_v49 = vadd.f32 %v3066_v3, %v3053_v43 }
 0x2aa   :  { %v3040_v29 = vpop.f32.mrf.mxu3 }
 0x2ab   :  { %v3041_v42 = vadd.f32 %v3040_v29, %v3027_v9 }
 0x2ad   :  { %v3055_v59 = vadd.f32 %v3054_v48, %v3041_v42 }
 0x2af   :  { %v3069_v54 = vadd.f32 %v3068_v21, %v3055_v59 }
 0x2b5   :  { %v3416_v31 = vpop.f32.mrf.mxu0 }
 0x2b6   :  { %v3417_v55 = vadd.f32 %v3667_v27, %v3416_v31 }
 0x2ba   :  { %v3080_v32 = vpop.f32.mrf.mxu2 }
 0x2bb   :  { %v3081_v25 = vadd.f32 %v3080_v32, %v3067_v49 }
 0x2bd   :  { %v3418_v4 = vpop.f32.mrf.mxu0 }
 0x2be   :  { %v3430_v7 = vpop.f32.mrf.mxu1  ;;  %v3419_v5 = vadd.f32 %v3667_v27, %v3418_v4 }
 0x2bf   :  { %v3431_v18 = vadd.f32 %v3430_v7, %v3417_v55 }
 0x2c2   :  { %v3094_v33 = vpop.f32.mrf.mxu3  ;;  %v3082_v26 = vpop.f32.mrf.mxu2 }
 0x2c3   :  { %v3095_v53 = vadd.f32 %v3094_v33, %v3081_v25  ;;  %v3083_v8 = vadd.f32 %v3082_v26, %v3069_v54 }
 0x2c5   :  { %v3112_v57 = vmul.f32 %v3104_v50, %v3095_v53 }
 0x2c6   :  { %v3432_v15 = vpop.f32.mrf.mxu1 }
 0x2c7   :  { %v3130_v2 = vadd.f32 %v3122_v13, %v3112_v57  ;;  %v3433_v6 = vadd.f32 %v3432_v15, %v3419_v5 }
 0x2c9   :  { %v3138_v56 = vmax.f32 %v3130_v2, 0.0 }
 0x2ca   :  { %v3096_v40 = vpop.f32.mrf.mxu3 }
 0x2cb   :  { %v3097_v30 = vadd.f32 %v3096_v40, %v3083_v8 }
 0x2cd   :  { %v3116_v11 = vmul.f32 %v3104_v50, %v3097_v30 }
 0x2cf   :  { %v3134_v58 = vadd.f32 %v3122_v13, %v3116_v11 }
 0x2d1   :  { %v3142_v17 = vmax.f32 %v3134_v58, 0.0 }
 0x2d3   :  { %v3146_v63 = vpack.c.bf16 %v3142_v17, %v3138_v56 }
 0x2d5   :  { %3457 = vmatmul.bf16.vlgmr.msra.gmra.mxu3 %v3146_v63 }
 0x311   :  { %v3444_v12 = vpop.f32.mrf.mxu2 }
 0x312   :  { %v3445_v1 = vadd.f32 %v3444_v12, %v3431_v18 }
 0x319   :  { %v3446_v46 = vpop.f32.mrf.mxu2 }
 0x31a   :  { %v3447_v61 = vadd.f32 %v3446_v46, %v3433_v6 }
 0x358   :  { %v3458_v39 = vpop.f32.mrf.mxu3 }
 0x359   :  { %v3459_v0 = vadd.f32 %v3458_v39, %v3445_v1 }
 0x35b   :  { %3463 = vst [vmem:[#allocation17] sm:$0xff] %v3459_v0 }
 0x360   :  { %v3460_v47 = vpop.f32.mrf.mxu3 }
 0x361   :  { %v3461_v16 = vadd.f32 %v3460_v47, %v3447_v61 }
 0x363   :  { %3464 = vst [vmem:[#allocation17 + $0x8] sm:$0xff] %v3461_v16 }
 0x364   :  { %3477 = dma.vmem_to_hbm [thread:$0]  %s3470_s23, 256, %s3472_s8, [#allocation4], %s3943_s10, %s3943_s10, %s3944_s26  }
 0x365   :  { %3924 = dma.done.wait [#allocation4], 256  }
 0x366   :  { %3925 = vsyncadd [#allocation4], 4294967040 }
 0x367   :  { %3482 = vsyncpa [#allocation3], 1 }
 0x368   :  { %3483 = vsyncpa [#allocation6], 1 }
 0x369   :  { %3484 = vsyncpa [#allocation9], 1 }
 0x36a   :  { %3485 = vsyncpa [#allocation12], 1 }
 0x36b   :  { %3486 = vsyncpa [#allocation15], 1 }
 0x36c   :  { %3487 = vsyncpa [#allocation4], 1 }

</bundles_post_ra>
